<compile_context>
chip_gen: v7x
topology: tpu7x:2x2x1
jax: 0.10.0
libtpu: 0.0.40
codegen_flags: <defaults>
</compile_context>

<pallas_src>
import functools

import jax
import jax.numpy as jnp
from jax.experimental import pallas as pl
from jax.experimental.pallas import tpu as pltpu


# --------------------------------------------------------------------------
# Kernel 1: fused localization conv stack (per image)
# --------------------------------------------------------------------------

def _shift_matrix(n, delta, dtype):
    """S[i, y] = 1 iff i == y + delta, so A @ S shifts lanes by `delta`
    (shifting in zeros == the conv's zero padding along H)."""
    r = jax.lax.broadcasted_iota(jnp.int32, (n, n), 0)
    c = jax.lax.broadcasted_iota(jnp.int32, (n, n), 1)
    return jnp.where(r == c + delta, 1.0, 0.0).astype(dtype)


def _pool_matrices(n, dtype):
    """E0[y, o] = 1 iff y == 2o ; E1[y, o] = 1 iff y == 2o+1 (lane subsample)."""
    r = jax.lax.broadcasted_iota(jnp.int32, (n, n // 2), 0)
    c = jax.lax.broadcasted_iota(jnp.int32, (n, n // 2), 1)
    e0 = jnp.where(r == 2 * c, 1.0, 0.0).astype(dtype)
    e1 = jnp.where(r == 2 * c + 1, 1.0, 0.0).astype(dtype)
    return e0, e1


def _conv_pool_relu(a, g_ref, b_ref, k, pad):
    """a: (Cin*Win, Hin) bf16,  g_ref: (k, 2*Cout*Wout, Cin*Win) bf16,
    b_ref: (Cout*Wout, 1) f32.  Returns ReLU(MaxPool2(conv(a)+b)) laid out as
    (Cout*Wout, Hin//2) f32 (rows = (cout, wout), lanes = hout)."""
    h = a.shape[-1]
    half = g_ref.shape[1] // 2
    acc = None
    for dy in range(k):                               # height taps, unrolled
        shift = _shift_matrix(h, dy - pad, a.dtype)
        sh = jnp.dot(a, shift, preferred_element_type=jnp.float32).astype(a.dtype)
        t = jnp.dot(g_ref[dy], sh, preferred_element_type=jnp.float32)
        acc = t if acc is None else acc + t
    # width-phase max (pool over W pairs) + per-channel bias
    px = jnp.maximum(acc[:half, :], acc[half:, :]) + b_ref[...]
    # height pool: even/odd lane selection matmuls, max, then ReLU
    e0, e1 = _pool_matrices(h, px.dtype)
    p0 = jnp.dot(px, e0, preferred_element_type=jnp.float32)
    p1 = jnp.dot(px, e1, preferred_element_type=jnp.float32)
    return jnp.maximum(jnp.maximum(p0, p1), 0.0)


def loc_kernel(a_ref, g1_ref, b1_ref, g2_ref, b2_ref, o_ref, *, k1, p1, k2, p2):
    pooled1 = _conv_pool_relu(a_ref[...], g1_ref, b1_ref, k1, p1)
    pooled2 = _conv_pool_relu(pooled1.astype(jnp.bfloat16), g2_ref, b2_ref, k2, p2)
    o_ref[...] = pooled2


def _build_conv_matrix(w_oihw, w_in, pad):
    """Banded width-tap matrix G[dy, (j, cout, wo), (cin, xin)] =
    w[cout, cin, dy, dx] where xin == 2*wo + j + dx - pad (0 otherwise).
    j in {0,1} is the width phase of the following MaxPool2d(2,2)."""
    cout, cin, k, _ = w_oihw.shape
    w_out = w_in // 2
    j = jnp.arange(2).reshape(2, 1, 1, 1)
    wo = jnp.arange(w_out).reshape(1, w_out, 1, 1)
    dx = jnp.arange(k).reshape(1, 1, k, 1)
    xi = jnp.arange(w_in).reshape(1, 1, 1, w_in)
    sel = (xi == 2 * wo + j + dx - pad).astype(jnp.float32)     # (2, Wout, k, Win)
    g = jnp.einsum("ocdx,jwxi->djowci", w_oihw.astype(jnp.float32), sel)
    return g.reshape(k, 2 * cout * w_out, cin * w_in)


def localization_features(x_nchw, params):
    """Returns xs (B, 32*H/4*W/4) f32 in the PyTorch NCHW-flatten order."""
    B, C, H, W = x_nchw.shape
    w1, w2 = params["conv1_w"], params["conv2_w"]
    c1, k1 = w1.shape[0], w1.shape[2]
    c2, k2 = w2.shape[0], w2.shape[2]
    p1, p2 = k1 // 2, k2 // 2
    w1o, w2o, h2o = W // 2, W // 4, H // 4

    a1 = jnp.transpose(x_nchw, (0, 1, 3, 2)).reshape(B, C * W, H).astype(jnp.bfloat16)
    g1 = _build_conv_matrix(w1, W, p1).astype(jnp.bfloat16)      # (k1, 2*c1*w1o, C*W)
    g2 = _build_conv_matrix(w2, w1o, p2).astype(jnp.bfloat16)    # (k2, 2*c2*w2o, c1*w1o)
    b1 = jnp.repeat(params["conv1_b"], w1o).reshape(c1 * w1o, 1).astype(jnp.float32)
    b2 = jnp.repeat(params["conv2_b"], w2o).reshape(c2 * w2o, 1).astype(jnp.float32)

    kern = functools.partial(loc_kernel, k1=k1, p1=p1, k2=k2, p2=p2)
    pooled = pl.pallas_call(
        kern,
        out_shape=jax.ShapeDtypeStruct((B, c2 * w2o, h2o), jnp.float32),
        grid=(B,),
        in_specs=[
            pl.BlockSpec((None, C * W, H), lambda b: (b, 0, 0)),
            pl.BlockSpec(g1.shape, lambda b: (0, 0, 0)),
            pl.BlockSpec(b1.shape, lambda b: (0, 0)),
            pl.BlockSpec(g2.shape, lambda b: (0, 0, 0)),
            pl.BlockSpec(b2.shape, lambda b: (0, 0)),
        ],
        out_specs=pl.BlockSpec((None, c2 * w2o, h2o), lambda b: (b, 0, 0)),
        compiler_params=pltpu.CompilerParams(dimension_semantics=("parallel",)),
    )(a1, g1, b1, g2, b2)

    # rows are (cout, wo), lanes are ho  ->  NCHW (c, h, w) flatten order
    xs = jnp.transpose(pooled.reshape(B, c2, w2o, h2o), (0, 1, 3, 2))
    return xs.reshape(B, c2 * h2o * w2o)


# --------------------------------------------------------------------------
# Kernel 2: fc_loc (Linear + ReLU + Linear fused)
# --------------------------------------------------------------------------

def fc_loc_kernel(x_ref, w1_ref, b1_ref, w2_ref, b2_ref, o_ref):
    h = jnp.dot(x_ref[...], w1_ref[...], preferred_element_type=jnp.float32) + b1_ref[...]
    h = jnp.maximum(h, 0.0)
    o_ref[...] = jnp.dot(h, w2_ref[...], preferred_element_type=jnp.float32) + b2_ref[...]


def fc_loc(x, w1, b1, w2, b2):
    B = x.shape[0]
    args = (x, w1, b1, w2, b2)
    in_specs = [pl.BlockSpec(a.shape, lambda i: (0, 0)) for a in args]
    return pl.pallas_call(
        fc_loc_kernel,
        out_shape=jax.ShapeDtypeStruct((B, w2.shape[1]), jnp.float32),
        grid=(1,),
        in_specs=in_specs,
        out_specs=pl.BlockSpec((B, w2.shape[1]), lambda i: (0, 0)),
    )(*args)


# --------------------------------------------------------------------------
# Kernel 3: affine_grid + bilinear grid_sample (separable, align_corners=False,
# zeros padding).  Rt carries the y weights, Ct the x weights; one MXU matmul
# over H, then a sublane-aligned Ct-weighted reduce per channel.
# --------------------------------------------------------------------------

def grid_sample_kernel(theta_ref, img_ref, o_ref, *, H, W, Wp, C):
    b = pl.program_id(0)
    HW = H * W

    t00 = theta_ref[b, 0]; t01 = theta_ref[b, 1]; t02 = theta_ref[b, 2]
    t10 = theta_ref[b, 3]; t11 = theta_ref[b, 4]; t12 = theta_ref[b, 5]

    # target-grid coordinates generated in-kernel (p = h*W + w, row-major)
    p = jax.lax.broadcasted_iota(jnp.int32, (1, HW), 1).astype(jnp.float32)
    hh = jnp.floor((p + 0.5) * (1.0 / W))
    ww = p - W * hh
    xt = (2.0 * ww + 1.0) / W - 1.0           # affine_grid base grid (x)
    yt = (2.0 * hh + 1.0) / H - 1.0           # affine_grid base grid (y)

    sx = t00 * xt + t01 * yt + t02
    sy = t10 * xt + t11 * yt + t12
    ix = ((sx + 1.0) * W - 1.0) * 0.5         # align_corners=False unnormalize
    iy = ((sy + 1.0) * H - 1.0) * 0.5

    # closed-form separable bilinear weights; OOB rows/cols get weight 0 (or
    # hit the zero-padded image rows), which reproduces zeros padding.
    ry = jax.lax.broadcasted_iota(jnp.int32, (H, HW), 0).astype(jnp.float32)
    Rt = jnp.maximum(1.0 - jnp.abs(ry - iy), 0.0)            # (H, HW)
    cx = jax.lax.broadcasted_iota(jnp.int32, (Wp, HW), 0).astype(jnp.float32)
    Ct = jnp.maximum(1.0 - jnp.abs(cx - ix), 0.0)            # (Wp, HW)

    M = jnp.dot(img_ref[...], Rt, preferred_element_type=jnp.float32)  # (C*Wp, HW)
    rows = []
    for c in range(C):                                       # C = 3, unrolled
        mc = M[c * Wp:(c + 1) * Wp, :]                       # aligned (Wp mult of 8)
        rows.append(jnp.sum(mc * Ct, axis=0, keepdims=True))
    o_ref[...] = jnp.concatenate(rows, axis=0)               # (C, HW) lane-dense


def grid_sample_affine(x_nchw, theta):
    B, C, H, W = x_nchw.shape
    Wp = ((W + 7) // 8) * 8                                  # sublane-aligned channel stride
    img = jnp.transpose(x_nchw, (0, 1, 3, 2)).astype(jnp.float32)      # (B, C, W, H)
    img = jnp.pad(img, ((0, 0), (0, 0), (0, Wp - W), (0, 0))).reshape(B, C * Wp, H)
    theta_flat = theta.reshape(B, 6).astype(jnp.float32)
    HW = H * W

    kern = functools.partial(grid_sample_kernel, H=H, W=W, Wp=Wp, C=C)
    out = pl.pallas_call(
        kern,
        out_shape=jax.ShapeDtypeStruct((B, C, HW), jnp.float32),
        grid=(B,),
        in_specs=[
            pl.BlockSpec(memory_space=pltpu.MemorySpace.SMEM),          # theta (B, 6)
            pl.BlockSpec((None, C * Wp, H), lambda b: (b, 0, 0)),       # image
        ],
        out_specs=pl.BlockSpec((None, C, HW), lambda b: (b, 0, 0)),
        compiler_params=pltpu.CompilerParams(dimension_semantics=("parallel",)),
    )(theta_flat, img)
    return out.reshape(B, C, H, W)


# --------------------------------------------------------------------------
# Model forward
# --------------------------------------------------------------------------

def compute_theta(x_nchw, params):
    xs = localization_features(x_nchw, params)               # (B, 3200) f32
    return fc_loc(
        xs.astype(jnp.bfloat16),
        params["fc1_w"].T.astype(jnp.bfloat16),
        params["fc1_b"].reshape(1, -1).astype(jnp.float32),
        params["fc2_w"].T.astype(jnp.float32),
        params["fc2_b"].reshape(1, -1).astype(jnp.float32),
    )                                                        # (B, 6)


def stnet2_forward(x_nchw, params):
    x_nchw = x_nchw.astype(jnp.float32)
    theta = compute_theta(x_nchw, params)
    return grid_sample_affine(x_nchw, theta)


def init_params(key):
    k1, k2, k3, k4, k5, k6 = jax.random.split(key, 6)
    return {
        "conv1_w": 0.10 * jax.random.normal(k1, (32, 3, 3, 3), jnp.float32),
        "conv1_b": 0.10 * jax.random.normal(k2, (32,), jnp.float32),
        "conv2_w": 0.05 * jax.random.normal(k3, (32, 32, 5, 5), jnp.float32),
        "conv2_b": 0.05 * jax.random.normal(k4, (32,), jnp.float32),
        "fc1_w": 0.01 * jax.random.normal(k5, (32, 32 * 20 * 5), jnp.float32),
        "fc1_b": 0.01 * jax.random.normal(k6, (32,), jnp.float32),
        # STNet_2.__init__ zeroes the last linear and sets identity-affine bias.
        "fc2_w": jnp.zeros((6, 32), jnp.float32),
        "fc2_b": jnp.array([1.0, 0.0, 0.0, 0.0, 1.0, 0.0], jnp.float32),
    }


# --------------------------------------------------------------------------
# Pure-JAX (XLA) reference used only for the self-test
# --------------------------------------------------------------------------

def ref_theta(x, params):
    def conv(z, w, b, pad):
        y = jax.lax.conv_general_dilated(
            z, w, window_strides=(1, 1), padding=((pad, pad), (pad, pad)),
            dimension_numbers=("NCHW", "OIHW", "NCHW"))
        return y + b.reshape(1, -1, 1, 1)

    def pool(z):
        return jax.lax.reduce_window(z, -jnp.inf, jax.lax.max,
                                     (1, 1, 2, 2), (1, 1, 2, 2), "VALID")

    y = jax.nn.relu(pool(conv(x, params["conv1_w"], params["conv1_b"], 1)))
    y = jax.nn.relu(pool(conv(y, params["conv2_w"], params["conv2_b"], 2)))
    xs = y.reshape(x.shape[0], -1)
    h = jax.nn.relu(xs @ params["fc1_w"].T + params["fc1_b"])
    return h @ params["fc2_w"].T + params["fc2_b"]


def ref_grid_sample(x, theta):
    B, C, H, W = x.shape
    theta = theta.reshape(B, 2, 3)
    xs_t = 2.0 * (jnp.arange(W, dtype=jnp.float32) + 0.5) / W - 1.0
    ys_t = 2.0 * (jnp.arange(H, dtype=jnp.float32) + 0.5) / H - 1.0
    gx, gy = jnp.meshgrid(xs_t, ys_t)                        # (H, W)
    base = jnp.stack([gx.ravel(), gy.ravel(), jnp.ones(H * W, jnp.float32)], axis=0)
    src = jnp.einsum("bij,jp->bip", theta, base)             # (B, 2, HW)
    ix = ((src[:, 0] + 1.0) * W - 1.0) * 0.5
    iy = ((src[:, 1] + 1.0) * H - 1.0) * 0.5
    x0 = jnp.floor(ix)
    y0 = jnp.floor(iy)
    img = x.reshape(B, C, H * W)
    out = jnp.zeros((B, C, H * W), jnp.float32)
    for dy in (0, 1):
        for dx in (0, 1):
            xx = x0 + dx
            yy = y0 + dy
            w = (jnp.maximum(1.0 - jnp.abs(ix - xx), 0.0) *
                 jnp.maximum(1.0 - jnp.abs(iy - yy), 0.0))
            valid = (xx >= 0) & (xx < W) & (yy >= 0) & (yy < H)
            xi = jnp.clip(xx, 0, W - 1).astype(jnp.int32)
            yi = jnp.clip(yy, 0, H - 1).astype(jnp.int32)
            flat = yi * W + xi
            vals = jnp.take_along_axis(img, flat[:, None, :], axis=2)
            out = out + jnp.where(valid, w, 0.0)[:, None, :] * vals
    return out.reshape(B, C, H, W)


# --------------------------------------------------------------------------

if __name__ == "__main__":
    key = jax.random.PRNGKey(0)
    pk, xk, tk, fk1, fk2 = jax.random.split(key, 5)
    params = init_params(pk)

    # fc_loc expects 32*20*5 features after two /2 pools -> input is (B, 3, 80, 20)
    x = jax.random.normal(xk, (2, 3, 80, 20), jnp.float32)

    fwd = jax.jit(lambda xx: stnet2_forward(xx, params))
    out = jax.block_until_ready(fwd(x))
    assert out.shape == x.shape, (out.shape, x.shape)
    assert bool(jnp.all(jnp.isfinite(out)))
    # fc2 is zero-initialized with identity bias -> theta is exactly identity,
    # so the sampled output must reproduce the input (f32 path, tight check).
    err_id = float(jnp.max(jnp.abs(out - x)))
    assert err_id < 1e-3, err_id

    # Localization-branch numerics vs pure-JAX f32 reference (random fc2 so the
    # conv/fc path is actually exercised; kernel conv path runs in bf16).
    params2 = dict(params)
    params2["fc2_w"] = 0.05 * jax.random.normal(fk1, (6, 32), jnp.float32)
    params2["fc2_b"] = params["fc2_b"] + 0.1 * jax.random.normal(fk2, (6,), jnp.float32)
    theta_k = jax.block_until_ready(jax.jit(lambda xx: compute_theta(xx, params2))(x))
    theta_r = jax.jit(lambda xx: ref_theta(xx, params2))(x)
    err_t = float(jnp.max(jnp.abs(theta_k - theta_r)))
    assert err_t < 3e-2, err_t

    # grid_sample vs reference for a non-trivial theta (exercises OOB zeros).
    ident = jnp.array([[1.0, 0.0, 0.0, 0.0, 1.0, 0.0]], jnp.float32)
    theta_test = jnp.tile(ident, (2, 1)) + 0.1 * jax.random.normal(tk, (2, 6), jnp.float32)
    gs_k = jax.block_until_ready(jax.jit(grid_sample_affine)(x, theta_test))
    gs_r = ref_grid_sample(x, theta_test)
    err_g = float(jnp.max(jnp.abs(gs_k - gs_r)))
    assert err_g < 1e-3, err_g

    print("KERNEL_OK")
</pallas_src>

<mosaic_0001>
module attributes {stable_mosaic.version = 11 : i64} {
  func.func @loc_kernel(%arg0: i32, %arg1: memref<1x60x80xbf16, #tpu.memory_space<vmem>>, %arg2: memref<3x640x60xbf16, #tpu.memory_space<vmem>>, %arg3: memref<320x1xf32, #tpu.memory_space<vmem>>, %arg4: memref<5x320x320xbf16, #tpu.memory_space<vmem>>, %arg5: memref<160x1xf32, #tpu.memory_space<vmem>>, %arg6: memref<1x160x20xf32, #tpu.memory_space<vmem>>) attributes {dimension_semantics = [#tpu.dimension_semantics<parallel>], iteration_bounds = array<i64: 2>, scalar_prefetch = 0 : i64, scratch_operands = 0 : i64, tpu.core_type = #tpu.core_type<tc>, window_params = [{transform_indices = @transform_0, window_bounds = array<i64: 1, 60, 80>}, {pipeline_mode = #tpu.pipeline_mode<synchronous>, transform_indices = @transform_1, window_bounds = array<i64: 3, 640, 60>}, {pipeline_mode = #tpu.pipeline_mode<synchronous>, transform_indices = @transform_2, window_bounds = array<i64: 320, 1>}, {pipeline_mode = #tpu.pipeline_mode<synchronous>, transform_indices = @transform_3, window_bounds = array<i64: 5, 320, 320>}, {pipeline_mode = #tpu.pipeline_mode<synchronous>, transform_indices = @transform_4, window_bounds = array<i64: 160, 1>}, {transform_indices = @transform_5, window_bounds = array<i64: 1, 160, 20>}]} {
    %c0 = arith.constant 0 : index
    %c0_0 = arith.constant 0 : index
    %c0_1 = arith.constant 0 : index
    %0 = vector.load %arg1[%c0, %c0_0, %c0_1] : memref<1x60x80xbf16, #tpu.memory_space<vmem>>, vector<1x60x80xbf16>
    %1 = vector.shape_cast %0 : vector<1x60x80xbf16> to vector<60x80xbf16>
    %2 = tpu.iota {dimensions = array<i32: 0>} : vector<80x80xi32>
    %3 = tpu.iota {dimensions = array<i32: 1>} : vector<80x80xi32>
    %c-1_i32 = arith.constant -1 : i32
    %4 = vector.broadcast %c-1_i32 : i32 to vector<80x80xi32>
    %5 = arith.addi %3, %4 : vector<80x80xi32>
    %6 = arith.cmpi eq, %2, %5 : vector<80x80xi32>
    %cst = arith.constant 1.000000e+00 : f32
    %cst_2 = arith.constant 0.000000e+00 : f32
    %7 = vector.broadcast %cst : f32 to vector<80x80xf32>
    %8 = vector.broadcast %cst_2 : f32 to vector<80x80xf32>
    %9 = arith.select %6, %7, %8 : vector<80x80xi1>, vector<80x80xf32>
    %10 = arith.truncf %9 : vector<80x80xf32> to vector<80x80xbf16>
    %cst_3 = arith.constant dense<0.000000e+00> : vector<60x80xf32>
    %11 = tpu.matmul %1, %10, %cst_3 {dimension_numbers = #tpu.dot_dimension_numbers<[1], [0], [0], [1], [0, 0, 1, 1], [], []>} : vector<60x80xbf16>, vector<80x80xbf16>, vector<60x80xf32> -> vector<60x80xf32>
    %12 = arith.truncf %11 : vector<60x80xf32> to vector<60x80xbf16>
    %c0_4 = arith.constant 0 : index
    %c0_5 = arith.constant 0 : index
    %c0_6 = arith.constant 0 : index
    %13 = vector.load %arg2[%c0_4, %c0_5, %c0_6] : memref<3x640x60xbf16, #tpu.memory_space<vmem>>, vector<1x640x60xbf16>
    %14 = vector.shape_cast %13 : vector<1x640x60xbf16> to vector<640x60xbf16>
    %cst_7 = arith.constant dense<0.000000e+00> : vector<640x80xf32>
    %15 = tpu.matmul %14, %12, %cst_7 {dimension_numbers = #tpu.dot_dimension_numbers<[1], [0], [0], [1], [0, 0, 1, 1], [], []>} : vector<640x60xbf16>, vector<60x80xbf16>, vector<640x80xf32> -> vector<640x80xf32>
    %16 = tpu.iota {dimensions = array<i32: 0>} : vector<80x80xi32>
    %17 = tpu.iota {dimensions = array<i32: 1>} : vector<80x80xi32>
    %c0_i32 = arith.constant 0 : i32
    %18 = vector.broadcast %c0_i32 : i32 to vector<80x80xi32>
    %19 = arith.addi %17, %18 : vector<80x80xi32>
    %20 = arith.cmpi eq, %16, %19 : vector<80x80xi32>
    %cst_8 = arith.constant 1.000000e+00 : f32
    %cst_9 = arith.constant 0.000000e+00 : f32
    %21 = vector.broadcast %cst_8 : f32 to vector<80x80xf32>
    %22 = vector.broadcast %cst_9 : f32 to vector<80x80xf32>
    %23 = arith.select %20, %21, %22 : vector<80x80xi1>, vector<80x80xf32>
    %24 = arith.truncf %23 : vector<80x80xf32> to vector<80x80xbf16>
    %cst_10 = arith.constant dense<0.000000e+00> : vector<60x80xf32>
    %25 = tpu.matmul %1, %24, %cst_10 {dimension_numbers = #tpu.dot_dimension_numbers<[1], [0], [0], [1], [0, 0, 1, 1], [], []>} : vector<60x80xbf16>, vector<80x80xbf16>, vector<60x80xf32> -> vector<60x80xf32>
    %26 = arith.truncf %25 : vector<60x80xf32> to vector<60x80xbf16>
    %c1 = arith.constant 1 : index
    %c0_11 = arith.constant 0 : index
    %c0_12 = arith.constant 0 : index
    %27 = vector.load %arg2[%c1, %c0_11, %c0_12] : memref<3x640x60xbf16, #tpu.memory_space<vmem>>, vector<1x640x60xbf16>
    %28 = vector.shape_cast %27 : vector<1x640x60xbf16> to vector<640x60xbf16>
    %cst_13 = arith.constant dense<0.000000e+00> : vector<640x80xf32>
    %29 = tpu.matmul %28, %26, %cst_13 {dimension_numbers = #tpu.dot_dimension_numbers<[1], [0], [0], [1], [0, 0, 1, 1], [], []>} : vector<640x60xbf16>, vector<60x80xbf16>, vector<640x80xf32> -> vector<640x80xf32>
    %30 = arith.addf %15, %29 : vector<640x80xf32>
    %31 = tpu.iota {dimensions = array<i32: 0>} : vector<80x80xi32>
    %32 = tpu.iota {dimensions = array<i32: 1>} : vector<80x80xi32>
    %c1_i32 = arith.constant 1 : i32
    %33 = vector.broadcast %c1_i32 : i32 to vector<80x80xi32>
    %34 = arith.addi %32, %33 : vector<80x80xi32>
    %35 = arith.cmpi eq, %31, %34 : vector<80x80xi32>
    %cst_14 = arith.constant 1.000000e+00 : f32
    %cst_15 = arith.constant 0.000000e+00 : f32
    %36 = vector.broadcast %cst_14 : f32 to vector<80x80xf32>
    %37 = vector.broadcast %cst_15 : f32 to vector<80x80xf32>
    %38 = arith.select %35, %36, %37 : vector<80x80xi1>, vector<80x80xf32>
    %39 = arith.truncf %38 : vector<80x80xf32> to vector<80x80xbf16>
    %cst_16 = arith.constant dense<0.000000e+00> : vector<60x80xf32>
    %40 = tpu.matmul %1, %39, %cst_16 {dimension_numbers = #tpu.dot_dimension_numbers<[1], [0], [0], [1], [0, 0, 1, 1], [], []>} : vector<60x80xbf16>, vector<80x80xbf16>, vector<60x80xf32> -> vector<60x80xf32>
    %41 = arith.truncf %40 : vector<60x80xf32> to vector<60x80xbf16>
    %c2 = arith.constant 2 : index
    %c0_17 = arith.constant 0 : index
    %c0_18 = arith.constant 0 : index
    %42 = vector.load %arg2[%c2, %c0_17, %c0_18] : memref<3x640x60xbf16, #tpu.memory_space<vmem>>, vector<1x640x60xbf16>
    %43 = vector.shape_cast %42 : vector<1x640x60xbf16> to vector<640x60xbf16>
    %cst_19 = arith.constant dense<0.000000e+00> : vector<640x80xf32>
    %44 = tpu.matmul %43, %41, %cst_19 {dimension_numbers = #tpu.dot_dimension_numbers<[1], [0], [0], [1], [0, 0, 1, 1], [], []>} : vector<640x60xbf16>, vector<60x80xbf16>, vector<640x80xf32> -> vector<640x80xf32>
    %45 = arith.addf %30, %44 : vector<640x80xf32>
    %46 = vector.extract_strided_slice %45 {offsets = [0, 0], sizes = [320, 80], strides = [1, 1]} : vector<640x80xf32> to vector<320x80xf32>
    %47 = vector.extract_strided_slice %45 {offsets = [320, 0], sizes = [320, 80], strides = [1, 1]} : vector<640x80xf32> to vector<320x80xf32>
    %48 = arith.maximumf %46, %47 : vector<320x80xf32>
    %c0_20 = arith.constant 0 : index
    %c0_21 = arith.constant 0 : index
    %49 = vector.load %arg3[%c0_20, %c0_21] : memref<320x1xf32, #tpu.memory_space<vmem>>, vector<320x1xf32>
    %50 = vector.broadcast %49 : vector<320x1xf32> to vector<320x80xf32>
    %51 = arith.addf %48, %50 : vector<320x80xf32>
    %52 = tpu.iota {dimensions = array<i32: 0>} : vector<80x40xi32>
    %53 = tpu.iota {dimensions = array<i32: 1>} : vector<80x40xi32>
    %c2_i32 = arith.constant 2 : i32
    %54 = vector.broadcast %c2_i32 : i32 to vector<80x40xi32>
    %55 = arith.muli %54, %53 : vector<80x40xi32>
    %56 = arith.cmpi eq, %52, %55 : vector<80x40xi32>
    %cst_22 = arith.constant 1.000000e+00 : f32
    %cst_23 = arith.constant 0.000000e+00 : f32
    %57 = vector.broadcast %cst_22 : f32 to vector<80x40xf32>
    %58 = vector.broadcast %cst_23 : f32 to vector<80x40xf32>
    %59 = arith.select %56, %57, %58 : vector<80x40xi1>, vector<80x40xf32>
    %c2_i32_24 = arith.constant 2 : i32
    %60 = vector.broadcast %c2_i32_24 : i32 to vector<80x40xi32>
    %61 = arith.muli %60, %53 : vector<80x40xi32>
    %c1_i32_25 = arith.constant 1 : i32
    %62 = vector.broadcast %c1_i32_25 : i32 to vector<80x40xi32>
    %63 = arith.addi %61, %62 : vector<80x40xi32>
    %64 = arith.cmpi eq, %52, %63 : vector<80x40xi32>
    %cst_26 = arith.constant 1.000000e+00 : f32
    %cst_27 = arith.constant 0.000000e+00 : f32
    %65 = vector.broadcast %cst_26 : f32 to vector<80x40xf32>
    %66 = vector.broadcast %cst_27 : f32 to vector<80x40xf32>
    %67 = arith.select %64, %65, %66 : vector<80x40xi1>, vector<80x40xf32>
    %cst_28 = arith.constant dense<0.000000e+00> : vector<320x40xf32>
    %68 = tpu.matmul %51, %59, %cst_28 {dimension_numbers = #tpu.dot_dimension_numbers<[1], [0], [0], [1], [0, 0, 1, 1], [], []>} : vector<320x80xf32>, vector<80x40xf32>, vector<320x40xf32> -> vector<320x40xf32>
    %cst_29 = arith.constant dense<0.000000e+00> : vector<320x40xf32>
    %69 = tpu.matmul %51, %67, %cst_29 {dimension_numbers = #tpu.dot_dimension_numbers<[1], [0], [0], [1], [0, 0, 1, 1], [], []>} : vector<320x80xf32>, vector<80x40xf32>, vector<320x40xf32> -> vector<320x40xf32>
    %70 = arith.maximumf %68, %69 : vector<320x40xf32>
    %cst_30 = arith.constant 0.000000e+00 : f32
    %71 = vector.broadcast %cst_30 : f32 to vector<320x40xf32>
    %72 = arith.maximumf %70, %71 : vector<320x40xf32>
    %73 = arith.truncf %72 : vector<320x40xf32> to vector<320x40xbf16>
    %74 = tpu.iota {dimensions = array<i32: 0>} : vector<40x40xi32>
    %75 = tpu.iota {dimensions = array<i32: 1>} : vector<40x40xi32>
    %c-2_i32 = arith.constant -2 : i32
    %76 = vector.broadcast %c-2_i32 : i32 to vector<40x40xi32>
    %77 = arith.addi %75, %76 : vector<40x40xi32>
    %78 = arith.cmpi eq, %74, %77 : vector<40x40xi32>
    %cst_31 = arith.constant 1.000000e+00 : f32
    %cst_32 = arith.constant 0.000000e+00 : f32
    %79 = vector.broadcast %cst_31 : f32 to vector<40x40xf32>
    %80 = vector.broadcast %cst_32 : f32 to vector<40x40xf32>
    %81 = arith.select %78, %79, %80 : vector<40x40xi1>, vector<40x40xf32>
    %82 = arith.truncf %81 : vector<40x40xf32> to vector<40x40xbf16>
    %cst_33 = arith.constant dense<0.000000e+00> : vector<320x40xf32>
    %83 = tpu.matmul %73, %82, %cst_33 {dimension_numbers = #tpu.dot_dimension_numbers<[1], [0], [0], [1], [0, 0, 1, 1], [], []>} : vector<320x40xbf16>, vector<40x40xbf16>, vector<320x40xf32> -> vector<320x40xf32>
    %84 = arith.truncf %83 : vector<320x40xf32> to vector<320x40xbf16>
    %c0_34 = arith.constant 0 : index
    %c0_35 = arith.constant 0 : index
    %c0_36 = arith.constant 0 : index
    %85 = vector.load %arg4[%c0_34, %c0_35, %c0_36] : memref<5x320x320xbf16, #tpu.memory_space<vmem>>, vector<1x320x320xbf16>
    %86 = vector.shape_cast %85 : vector<1x320x320xbf16> to vector<320x320xbf16>
    %cst_37 = arith.constant dense<0.000000e+00> : vector<320x40xf32>
    %87 = tpu.matmul %86, %84, %cst_37 {dimension_numbers = #tpu.dot_dimension_numbers<[1], [0], [0], [1], [0, 0, 1, 1], [], []>} : vector<320x320xbf16>, vector<320x40xbf16>, vector<320x40xf32> -> vector<320x40xf32>
    %88 = tpu.iota {dimensions = array<i32: 0>} : vector<40x40xi32>
    %89 = tpu.iota {dimensions = array<i32: 1>} : vector<40x40xi32>
    %c-1_i32_38 = arith.constant -1 : i32
    %90 = vector.broadcast %c-1_i32_38 : i32 to vector<40x40xi32>
    %91 = arith.addi %89, %90 : vector<40x40xi32>
    %92 = arith.cmpi eq, %88, %91 : vector<40x40xi32>
    %cst_39 = arith.constant 1.000000e+00 : f32
    %cst_40 = arith.constant 0.000000e+00 : f32
    %93 = vector.broadcast %cst_39 : f32 to vector<40x40xf32>
    %94 = vector.broadcast %cst_40 : f32 to vector<40x40xf32>
    %95 = arith.select %92, %93, %94 : vector<40x40xi1>, vector<40x40xf32>
    %96 = arith.truncf %95 : vector<40x40xf32> to vector<40x40xbf16>
    %cst_41 = arith.constant dense<0.000000e+00> : vector<320x40xf32>
    %97 = tpu.matmul %73, %96, %cst_41 {dimension_numbers = #tpu.dot_dimension_numbers<[1], [0], [0], [1], [0, 0, 1, 1], [], []>} : vector<320x40xbf16>, vector<40x40xbf16>, vector<320x40xf32> -> vector<320x40xf32>
    %98 = arith.truncf %97 : vector<320x40xf32> to vector<320x40xbf16>
    %c1_42 = arith.constant 1 : index
    %c0_43 = arith.constant 0 : index
    %c0_44 = arith.constant 0 : index
    %99 = vector.load %arg4[%c1_42, %c0_43, %c0_44] : memref<5x320x320xbf16, #tpu.memory_space<vmem>>, vector<1x320x320xbf16>
    %100 = vector.shape_cast %99 : vector<1x320x320xbf16> to vector<320x320xbf16>
    %cst_45 = arith.constant dense<0.000000e+00> : vector<320x40xf32>
    %101 = tpu.matmul %100, %98, %cst_45 {dimension_numbers = #tpu.dot_dimension_numbers<[1], [0], [0], [1], [0, 0, 1, 1], [], []>} : vector<320x320xbf16>, vector<320x40xbf16>, vector<320x40xf32> -> vector<320x40xf32>
    %102 = arith.addf %87, %101 : vector<320x40xf32>
    %103 = tpu.iota {dimensions = array<i32: 0>} : vector<40x40xi32>
    %104 = tpu.iota {dimensions = array<i32: 1>} : vector<40x40xi32>
    %c0_i32_46 = arith.constant 0 : i32
    %105 = vector.broadcast %c0_i32_46 : i32 to vector<40x40xi32>
    %106 = arith.addi %104, %105 : vector<40x40xi32>
    %107 = arith.cmpi eq, %103, %106 : vector<40x40xi32>
    %cst_47 = arith.constant 1.000000e+00 : f32
    %cst_48 = arith.constant 0.000000e+00 : f32
    %108 = vector.broadcast %cst_47 : f32 to vector<40x40xf32>
    %109 = vector.broadcast %cst_48 : f32 to vector<40x40xf32>
    %110 = arith.select %107, %108, %109 : vector<40x40xi1>, vector<40x40xf32>
    %111 = arith.truncf %110 : vector<40x40xf32> to vector<40x40xbf16>
    %cst_49 = arith.constant dense<0.000000e+00> : vector<320x40xf32>
    %112 = tpu.matmul %73, %111, %cst_49 {dimension_numbers = #tpu.dot_dimension_numbers<[1], [0], [0], [1], [0, 0, 1, 1], [], []>} : vector<320x40xbf16>, vector<40x40xbf16>, vector<320x40xf32> -> vector<320x40xf32>
    %113 = arith.truncf %112 : vector<320x40xf32> to vector<320x40xbf16>
    %c2_50 = arith.constant 2 : index
    %c0_51 = arith.constant 0 : index
    %c0_52 = arith.constant 0 : index
    %114 = vector.load %arg4[%c2_50, %c0_51, %c0_52] : memref<5x320x320xbf16, #tpu.memory_space<vmem>>, vector<1x320x320xbf16>
    %115 = vector.shape_cast %114 : vector<1x320x320xbf16> to vector<320x320xbf16>
    %cst_53 = arith.constant dense<0.000000e+00> : vector<320x40xf32>
    %116 = tpu.matmul %115, %113, %cst_53 {dimension_numbers = #tpu.dot_dimension_numbers<[1], [0], [0], [1], [0, 0, 1, 1], [], []>} : vector<320x320xbf16>, vector<320x40xbf16>, vector<320x40xf32> -> vector<320x40xf32>
    %117 = arith.addf %102, %116 : vector<320x40xf32>
    %118 = tpu.iota {dimensions = array<i32: 0>} : vector<40x40xi32>
    %119 = tpu.iota {dimensions = array<i32: 1>} : vector<40x40xi32>
    %c1_i32_54 = arith.constant 1 : i32
    %120 = vector.broadcast %c1_i32_54 : i32 to vector<40x40xi32>
    %121 = arith.addi %119, %120 : vector<40x40xi32>
    %122 = arith.cmpi eq, %118, %121 : vector<40x40xi32>
    %cst_55 = arith.constant 1.000000e+00 : f32
    %cst_56 = arith.constant 0.000000e+00 : f32
    %123 = vector.broadcast %cst_55 : f32 to vector<40x40xf32>
    %124 = vector.broadcast %cst_56 : f32 to vector<40x40xf32>
    %125 = arith.select %122, %123, %124 : vector<40x40xi1>, vector<40x40xf32>
    %126 = arith.truncf %125 : vector<40x40xf32> to vector<40x40xbf16>
    %cst_57 = arith.constant dense<0.000000e+00> : vector<320x40xf32>
    %127 = tpu.matmul %73, %126, %cst_57 {dimension_numbers = #tpu.dot_dimension_numbers<[1], [0], [0], [1], [0, 0, 1, 1], [], []>} : vector<320x40xbf16>, vector<40x40xbf16>, vector<320x40xf32> -> vector<320x40xf32>
    %128 = arith.truncf %127 : vector<320x40xf32> to vector<320x40xbf16>
    %c3 = arith.constant 3 : index
    %c0_58 = arith.constant 0 : index
    %c0_59 = arith.constant 0 : index
    %129 = vector.load %arg4[%c3, %c0_58, %c0_59] : memref<5x320x320xbf16, #tpu.memory_space<vmem>>, vector<1x320x320xbf16>
    %130 = vector.shape_cast %129 : vector<1x320x320xbf16> to vector<320x320xbf16>
    %cst_60 = arith.constant dense<0.000000e+00> : vector<320x40xf32>
    %131 = tpu.matmul %130, %128, %cst_60 {dimension_numbers = #tpu.dot_dimension_numbers<[1], [0], [0], [1], [0, 0, 1, 1], [], []>} : vector<320x320xbf16>, vector<320x40xbf16>, vector<320x40xf32> -> vector<320x40xf32>
    %132 = arith.addf %117, %131 : vector<320x40xf32>
    %133 = tpu.iota {dimensions = array<i32: 0>} : vector<40x40xi32>
    %134 = tpu.iota {dimensions = array<i32: 1>} : vector<40x40xi32>
    %c2_i32_61 = arith.constant 2 : i32
    %135 = vector.broadcast %c2_i32_61 : i32 to vector<40x40xi32>
    %136 = arith.addi %134, %135 : vector<40x40xi32>
    %137 = arith.cmpi eq, %133, %136 : vector<40x40xi32>
    %cst_62 = arith.constant 1.000000e+00 : f32
    %cst_63 = arith.constant 0.000000e+00 : f32
    %138 = vector.broadcast %cst_62 : f32 to vector<40x40xf32>
    %139 = vector.broadcast %cst_63 : f32 to vector<40x40xf32>
    %140 = arith.select %137, %138, %139 : vector<40x40xi1>, vector<40x40xf32>
    %141 = arith.truncf %140 : vector<40x40xf32> to vector<40x40xbf16>
    %cst_64 = arith.constant dense<0.000000e+00> : vector<320x40xf32>
    %142 = tpu.matmul %73, %141, %cst_64 {dimension_numbers = #tpu.dot_dimension_numbers<[1], [0], [0], [1], [0, 0, 1, 1], [], []>} : vector<320x40xbf16>, vector<40x40xbf16>, vector<320x40xf32> -> vector<320x40xf32>
    %143 = arith.truncf %142 : vector<320x40xf32> to vector<320x40xbf16>
    %c4 = arith.constant 4 : index
    %c0_65 = arith.constant 0 : index
    %c0_66 = arith.constant 0 : index
    %144 = vector.load %arg4[%c4, %c0_65, %c0_66] : memref<5x320x320xbf16, #tpu.memory_space<vmem>>, vector<1x320x320xbf16>
    %145 = vector.shape_cast %144 : vector<1x320x320xbf16> to vector<320x320xbf16>
    %cst_67 = arith.constant dense<0.000000e+00> : vector<320x40xf32>
    %146 = tpu.matmul %145, %143, %cst_67 {dimension_numbers = #tpu.dot_dimension_numbers<[1], [0], [0], [1], [0, 0, 1, 1], [], []>} : vector<320x320xbf16>, vector<320x40xbf16>, vector<320x40xf32> -> vector<320x40xf32>
    %147 = arith.addf %132, %146 : vector<320x40xf32>
    %148 = vector.extract_strided_slice %147 {offsets = [0, 0], sizes = [160, 40], strides = [1, 1]} : vector<320x40xf32> to vector<160x40xf32>
    %149 = vector.extract_strided_slice %147 {offsets = [160, 0], sizes = [160, 40], strides = [1, 1]} : vector<320x40xf32> to vector<160x40xf32>
    %150 = arith.maximumf %148, %149 : vector<160x40xf32>
    %c0_68 = arith.constant 0 : index
    %c0_69 = arith.constant 0 : index
    %151 = vector.load %arg5[%c0_68, %c0_69] : memref<160x1xf32, #tpu.memory_space<vmem>>, vector<160x1xf32>
    %152 = vector.broadcast %151 : vector<160x1xf32> to vector<160x40xf32>
    %153 = arith.addf %150, %152 : vector<160x40xf32>
    %154 = tpu.iota {dimensions = array<i32: 0>} : vector<40x20xi32>
    %155 = tpu.iota {dimensions = array<i32: 1>} : vector<40x20xi32>
    %c2_i32_70 = arith.constant 2 : i32
    %156 = vector.broadcast %c2_i32_70 : i32 to vector<40x20xi32>
    %157 = arith.muli %156, %155 : vector<40x20xi32>
    %158 = arith.cmpi eq, %154, %157 : vector<40x20xi32>
    %cst_71 = arith.constant 1.000000e+00 : f32
    %cst_72 = arith.constant 0.000000e+00 : f32
    %159 = vector.broadcast %cst_71 : f32 to vector<40x20xf32>
    %160 = vector.broadcast %cst_72 : f32 to vector<40x20xf32>
    %161 = arith.select %158, %159, %160 : vector<40x20xi1>, vector<40x20xf32>
    %c2_i32_73 = arith.constant 2 : i32
    %162 = vector.broadcast %c2_i32_73 : i32 to vector<40x20xi32>
    %163 = arith.muli %162, %155 : vector<40x20xi32>
    %c1_i32_74 = arith.constant 1 : i32
    %164 = vector.broadcast %c1_i32_74 : i32 to vector<40x20xi32>
    %165 = arith.addi %163, %164 : vector<40x20xi32>
    %166 = arith.cmpi eq, %154, %165 : vector<40x20xi32>
    %cst_75 = arith.constant 1.000000e+00 : f32
    %cst_76 = arith.constant 0.000000e+00 : f32
    %167 = vector.broadcast %cst_75 : f32 to vector<40x20xf32>
    %168 = vector.broadcast %cst_76 : f32 to vector<40x20xf32>
    %169 = arith.select %166, %167, %168 : vector<40x20xi1>, vector<40x20xf32>
    %cst_77 = arith.constant dense<0.000000e+00> : vector<160x20xf32>
    %170 = tpu.matmul %153, %161, %cst_77 {dimension_numbers = #tpu.dot_dimension_numbers<[1], [0], [0], [1], [0, 0, 1, 1], [], []>} : vector<160x40xf32>, vector<40x20xf32>, vector<160x20xf32> -> vector<160x20xf32>
    %cst_78 = arith.constant dense<0.000000e+00> : vector<160x20xf32>
    %171 = tpu.matmul %153, %169, %cst_78 {dimension_numbers = #tpu.dot_dimension_numbers<[1], [0], [0], [1], [0, 0, 1, 1], [], []>} : vector<160x40xf32>, vector<40x20xf32>, vector<160x20xf32> -> vector<160x20xf32>
    %172 = arith.maximumf %170, %171 : vector<160x20xf32>
    %cst_79 = arith.constant 0.000000e+00 : f32
    %173 = vector.broadcast %cst_79 : f32 to vector<160x20xf32>
    %174 = arith.maximumf %172, %173 : vector<160x20xf32>
    %c0_80 = arith.constant 0 : index
    %c0_81 = arith.constant 0 : index
    %c0_82 = arith.constant 0 : index
    %175 = vector.load %arg6[%c0_80, %c0_81, %c0_82] : memref<1x160x20xf32, #tpu.memory_space<vmem>>, vector<1x160x20xf32>
    %176 = vector.shape_cast %175 : vector<1x160x20xf32> to vector<160x20xf32>
    %177 = vector.shape_cast %174 : vector<160x20xf32> to vector<1x160x20xf32>
    tpu.vector_store %arg6[%c0_80, %c0_81, %c0_82], %177 {strides = array<i32>} : memref<1x160x20xf32, #tpu.memory_space<vmem>>, vector<1x160x20xf32>,
    return
  }
  func.func @transform_0(%arg0: i32) -> (i32, i32, i32) {
    %c0_i32 = arith.constant 0 : i32
    %c0_i32_0 = arith.constant 0 : i32
    %c0_i32_1 = arith.constant 0 : i32
    return %arg0, %c0_i32, %c0_i32_0 : i32, i32, i32
  }
  func.func @transform_1(%arg0: i32) -> (i32, i32, i32) {
    %c0_i32 = arith.constant 0 : i32
    %c0_i32_0 = arith.constant 0 : i32
    %c0_i32_1 = arith.constant 0 : i32
    %c0_i32_2 = arith.constant 0 : i32
    return %c0_i32, %c0_i32_0, %c0_i32_1 : i32, i32, i32
  }
  func.func @transform_2(%arg0: i32) -> (i32, i32) {
    %c0_i32 = arith.constant 0 : i32
    %c0_i32_0 = arith.constant 0 : i32
    %c0_i32_1 = arith.constant 0 : i32
    return %c0_i32, %c0_i32_0 : i32, i32
  }
  func.func @transform_3(%arg0: i32) -> (i32, i32, i32) {
    %c0_i32 = arith.constant 0 : i32
    %c0_i32_0 = arith.constant 0 : i32
    %c0_i32_1 = arith.constant 0 : i32
    %c0_i32_2 = arith.constant 0 : i32
    return %c0_i32, %c0_i32_0, %c0_i32_1 : i32, i32, i32
  }
  func.func @transform_4(%arg0: i32) -> (i32, i32) {
    %c0_i32 = arith.constant 0 : i32
    %c0_i32_0 = arith.constant 0 : i32
    %c0_i32_1 = arith.constant 0 : i32
    return %c0_i32, %c0_i32_0 : i32, i32
  }
  func.func @transform_5(%arg0: i32) -> (i32, i32, i32) {
    %c0_i32 = arith.constant 0 : i32
    %c0_i32_0 = arith.constant 0 : i32
    %c0_i32_1 = arith.constant 0 : i32
    return %arg0, %c0_i32, %c0_i32_0 : i32, i32, i32
  }
}

module attributes {stable_mosaic.version = 11 : i64} {
  func.func @fc_loc_kernel(%arg0: i32, %arg1: memref<2x3200xbf16, #tpu.memory_space<vmem>>, %arg2: memref<3200x32xbf16, #tpu.memory_space<vmem>>, %arg3: memref<1x32xf32, #tpu.memory_space<vmem>>, %arg4: memref<32x6xf32, #tpu.memory_space<vmem>>, %arg5: memref<1x6xf32, #tpu.memory_space<vmem>>, %arg6: memref<2x6xf32, #tpu.memory_space<vmem>>) attributes {dimension_semantics = [#tpu.dimension_semantics<arbitrary>], iteration_bounds = array<i64: 1>, scalar_prefetch = 0 : i64, scratch_operands = 0 : i64, tpu.core_type = #tpu.core_type<tc>, window_params = [{pipeline_mode = #tpu.pipeline_mode<synchronous>, transform_indices = @transform_0, window_bounds = array<i64: 2, 3200>}, {pipeline_mode = #tpu.pipeline_mode<synchronous>, transform_indices = @transform_1, window_bounds = array<i64: 3200, 32>}, {pipeline_mode = #tpu.pipeline_mode<synchronous>, transform_indices = @transform_2, window_bounds = array<i64: 1, 32>}, {pipeline_mode = #tpu.pipeline_mode<synchronous>, transform_indices = @transform_3, window_bounds = array<i64: 32, 6>}, {pipeline_mode = #tpu.pipeline_mode<synchronous>, transform_indices = @transform_4, window_bounds = array<i64: 1, 6>}, {pipeline_mode = #tpu.pipeline_mode<synchronous>, transform_indices = @transform_5, window_bounds = array<i64: 2, 6>}]} {
    %c0 = arith.constant 0 : index
    %c0_0 = arith.constant 0 : index
    %0 = vector.load %arg1[%c0, %c0_0] : memref<2x3200xbf16, #tpu.memory_space<vmem>>, vector<2x3200xbf16>
    %c0_1 = arith.constant 0 : index
    %c0_2 = arith.constant 0 : index
    %1 = vector.load %arg2[%c0_1, %c0_2] : memref<3200x32xbf16, #tpu.memory_space<vmem>>, vector<3200x32xbf16>
    %cst = arith.constant dense<0.000000e+00> : vector<2x32xf32>
    %2 = tpu.matmul %0, %1, %cst {dimension_numbers = #tpu.dot_dimension_numbers<[1], [0], [0], [1], [0, 0, 1, 1], [], []>} : vector<2x3200xbf16>, vector<3200x32xbf16>, vector<2x32xf32> -> vector<2x32xf32>
    %c0_3 = arith.constant 0 : index
    %c0_4 = arith.constant 0 : index
    %3 = vector.load %arg3[%c0_3, %c0_4] : memref<1x32xf32, #tpu.memory_space<vmem>>, vector<1x32xf32>
    %4 = vector.broadcast %3 : vector<1x32xf32> to vector<2x32xf32>
    %5 = arith.addf %2, %4 : vector<2x32xf32>
    %cst_5 = arith.constant 0.000000e+00 : f32
    %6 = vector.broadcast %cst_5 : f32 to vector<2x32xf32>
    %7 = arith.maximumf %5, %6 : vector<2x32xf32>
    %c0_6 = arith.constant 0 : index
    %c0_7 = arith.constant 0 : index
    %8 = vector.load %arg4[%c0_6, %c0_7] : memref<32x6xf32, #tpu.memory_space<vmem>>, vector<32x6xf32>
    %cst_8 = arith.constant dense<0.000000e+00> : vector<2x6xf32>
    %9 = tpu.matmul %7, %8, %cst_8 {dimension_numbers = #tpu.dot_dimension_numbers<[1], [0], [0], [1], [0, 0, 1, 1], [], []>} : vector<2x32xf32>, vector<32x6xf32>, vector<2x6xf32> -> vector<2x6xf32>
    %c0_9 = arith.constant 0 : index
    %c0_10 = arith.constant 0 : index
    %10 = vector.load %arg5[%c0_9, %c0_10] : memref<1x6xf32, #tpu.memory_space<vmem>>, vector<1x6xf32>
    %11 = vector.broadcast %10 : vector<1x6xf32> to vector<2x6xf32>
    %12 = arith.addf %9, %11 : vector<2x6xf32>
    %c0_11 = arith.constant 0 : index
    %c0_12 = arith.constant 0 : index
    %13 = vector.load %arg6[%c0_11, %c0_12] : memref<2x6xf32, #tpu.memory_space<vmem>>, vector<2x6xf32>
    tpu.vector_store %arg6[%c0_11, %c0_12], %12 {strides = array<i32>} : memref<2x6xf32, #tpu.memory_space<vmem>>, vector<2x6xf32>,
    return
  }
  func.func @transform_0(%arg0: i32) -> (i32, i32) {
    %c0_i32 = arith.constant 0 : i32
    %c0_i32_0 = arith.constant 0 : i32
    %c0_i32_1 = arith.constant 0 : i32
    return %c0_i32, %c0_i32_0 : i32, i32
  }
  func.func @transform_1(%arg0: i32) -> (i32, i32) {
    %c0_i32 = arith.constant 0 : i32
    %c0_i32_0 = arith.constant 0 : i32
    %c0_i32_1 = arith.constant 0 : i32
    return %c0_i32, %c0_i32_0 : i32, i32
  }
  func.func @transform_2(%arg0: i32) -> (i32, i32) {
    %c0_i32 = arith.constant 0 : i32
    %c0_i32_0 = arith.constant 0 : i32
    %c0_i32_1 = arith.constant 0 : i32
    return %c0_i32, %c0_i32_0 : i32, i32
  }
  func.func @transform_3(%arg0: i32) -> (i32, i32) {
    %c0_i32 = arith.constant 0 : i32
    %c0_i32_0 = arith.constant 0 : i32
    %c0_i32_1 = arith.constant 0 : i32
    return %c0_i32, %c0_i32_0 : i32, i32
  }
  func.func @transform_4(%arg0: i32) -> (i32, i32) {
    %c0_i32 = arith.constant 0 : i32
    %c0_i32_0 = arith.constant 0 : i32
    %c0_i32_1 = arith.constant 0 : i32
    return %c0_i32, %c0_i32_0 : i32, i32
  }
  func.func @transform_5(%arg0: i32) -> (i32, i32) {
    %c0_i32 = arith.constant 0 : i32
    %c0_i32_0 = arith.constant 0 : i32
    %c0_i32_1 = arith.constant 0 : i32
    return %c0_i32, %c0_i32_0 : i32, i32
  }
}

module attributes {stable_mosaic.version = 11 : i64} {
  func.func @grid_sample_kernel(%arg0: i32, %arg1: memref<2x6xf32, #tpu.memory_space<smem>>, %arg2: memref<1x72x80xf32, #tpu.memory_space<vmem>>, %arg3: memref<1x3x1600xf32, #tpu.memory_space<vmem>>) attributes {dimension_semantics = [#tpu.dimension_semantics<parallel>], iteration_bounds = array<i64: 2>, scalar_prefetch = 0 : i64, scratch_operands = 0 : i64, tpu.core_type = #tpu.core_type<tc>, window_params = [{transform_indices = @transform_0, window_bounds = array<i64: 2, 6>}, {transform_indices = @transform_1, window_bounds = array<i64: 1, 72, 80>}, {transform_indices = @transform_2, window_bounds = array<i64: 1, 3, 1600>}]} {
    %0 = arith.index_cast %arg0 : i32 to index
    %c0 = arith.constant 0 : index
    %1 = memref.load %arg1[%0, %c0] : memref<2x6xf32, #tpu.memory_space<smem>>
    %2 = arith.index_cast %arg0 : i32 to index
    %c1 = arith.constant 1 : index
    %3 = memref.load %arg1[%2, %c1] : memref<2x6xf32, #tpu.memory_space<smem>>
    %4 = arith.index_cast %arg0 : i32 to index
    %c2 = arith.constant 2 : index
    %5 = memref.load %arg1[%4, %c2] : memref<2x6xf32, #tpu.memory_space<smem>>
    %6 = arith.index_cast %arg0 : i32 to index
    %c3 = arith.constant 3 : index
    %7 = memref.load %arg1[%6, %c3] : memref<2x6xf32, #tpu.memory_space<smem>>
    %8 = arith.index_cast %arg0 : i32 to index
    %c4 = arith.constant 4 : index
    %9 = memref.load %arg1[%8, %c4] : memref<2x6xf32, #tpu.memory_space<smem>>
    %10 = arith.index_cast %arg0 : i32 to index
    %c5 = arith.constant 5 : index
    %11 = memref.load %arg1[%10, %c5] : memref<2x6xf32, #tpu.memory_space<smem>>
    %12 = tpu.iota {dimensions = array<i32: 1>} : vector<1x1600xi32>
    %13 = arith.sitofp %12 : vector<1x1600xi32> to vector<1x1600xf32>
    %cst = arith.constant 5.000000e-01 : f32
    %14 = vector.broadcast %cst : f32 to vector<1x1600xf32>
    %15 = arith.addf %13, %14 : vector<1x1600xf32>
    %cst_0 = arith.constant 5.000000e-02 : f32
    %16 = vector.broadcast %cst_0 : f32 to vector<1x1600xf32>
    %17 = arith.mulf %15, %16 : vector<1x1600xf32>
    %18 = math.floor %17 : vector<1x1600xf32>
    %cst_1 = arith.constant 2.000000e+01 : f32
    %19 = vector.broadcast %cst_1 : f32 to vector<1x1600xf32>
    %20 = arith.mulf %19, %18 : vector<1x1600xf32>
    %21 = arith.subf %13, %20 : vector<1x1600xf32>
    %cst_2 = arith.constant 2.000000e+00 : f32
    %22 = vector.broadcast %cst_2 : f32 to vector<1x1600xf32>
    %23 = arith.mulf %22, %21 : vector<1x1600xf32>
    %cst_3 = arith.constant 1.000000e+00 : f32
    %24 = vector.broadcast %cst_3 : f32 to vector<1x1600xf32>
    %25 = arith.addf %23, %24 : vector<1x1600xf32>
    %cst_4 = arith.constant 2.000000e+01 : f32
    %26 = vector.broadcast %cst_4 : f32 to vector<1x1600xf32>
    %27 = arith.divf %25, %26 : vector<1x1600xf32>
    %cst_5 = arith.constant 1.000000e+00 : f32
    %28 = vector.broadcast %cst_5 : f32 to vector<1x1600xf32>
    %29 = arith.subf %27, %28 : vector<1x1600xf32>
    %cst_6 = arith.constant 2.000000e+00 : f32
    %30 = vector.broadcast %cst_6 : f32 to vector<1x1600xf32>
    %31 = arith.mulf %30, %18 : vector<1x1600xf32>
    %cst_7 = arith.constant 1.000000e+00 : f32
    %32 = vector.broadcast %cst_7 : f32 to vector<1x1600xf32>
    %33 = arith.addf %31, %32 : vector<1x1600xf32>
    %cst_8 = arith.constant 8.000000e+01 : f32
    %34 = vector.broadcast %cst_8 : f32 to vector<1x1600xf32>
    %35 = arith.divf %33, %34 : vector<1x1600xf32>
    %cst_9 = arith.constant 1.000000e+00 : f32
    %36 = vector.broadcast %cst_9 : f32 to vector<1x1600xf32>
    %37 = arith.subf %35, %36 : vector<1x1600xf32>
    %38 = vector.broadcast %1 : f32 to vector<1x1600xf32>
    %39 = arith.mulf %38, %29 : vector<1x1600xf32>
    %40 = vector.broadcast %3 : f32 to vector<1x1600xf32>
    %41 = arith.mulf %40, %37 : vector<1x1600xf32>
    %42 = arith.addf %39, %41 : vector<1x1600xf32>
    %43 = vector.broadcast %5 : f32 to vector<1x1600xf32>
    %44 = arith.addf %42, %43 : vector<1x1600xf32>
    %45 = vector.broadcast %7 : f32 to vector<1x1600xf32>
    %46 = arith.mulf %45, %29 : vector<1x1600xf32>
    %47 = vector.broadcast %9 : f32 to vector<1x1600xf32>
    %48 = arith.mulf %47, %37 : vector<1x1600xf32>
    %49 = arith.addf %46, %48 : vector<1x1600xf32>
    %50 = vector.broadcast %11 : f32 to vector<1x1600xf32>
    %51 = arith.addf %49, %50 : vector<1x1600xf32>
    %cst_10 = arith.constant 1.000000e+00 : f32
    %52 = vector.broadcast %cst_10 : f32 to vector<1x1600xf32>
    %53 = arith.addf %44, %52 : vector<1x1600xf32>
    %cst_11 = arith.constant 2.000000e+01 : f32
    %54 = vector.broadcast %cst_11 : f32 to vector<1x1600xf32>
    %55 = arith.mulf %53, %54 : vector<1x1600xf32>
    %cst_12 = arith.constant 1.000000e+00 : f32
    %56 = vector.broadcast %cst_12 : f32 to vector<1x1600xf32>
    %57 = arith.subf %55, %56 : vector<1x1600xf32>
    %cst_13 = arith.constant 5.000000e-01 : f32
    %58 = vector.broadcast %cst_13 : f32 to vector<1x1600xf32>
    %59 = arith.mulf %57, %58 : vector<1x1600xf32>
    %cst_14 = arith.constant 1.000000e+00 : f32
    %60 = vector.broadcast %cst_14 : f32 to vector<1x1600xf32>
    %61 = arith.addf %51, %60 : vector<1x1600xf32>
    %cst_15 = arith.constant 8.000000e+01 : f32
    %62 = vector.broadcast %cst_15 : f32 to vector<1x1600xf32>
    %63 = arith.mulf %61, %62 : vector<1x1600xf32>
    %cst_16 = arith.constant 1.000000e+00 : f32
    %64 = vector.broadcast %cst_16 : f32 to vector<1x1600xf32>
    %65 = arith.subf %63, %64 : vector<1x1600xf32>
    %cst_17 = arith.constant 5.000000e-01 : f32
    %66 = vector.broadcast %cst_17 : f32 to vector<1x1600xf32>
    %67 = arith.mulf %65, %66 : vector<1x1600xf32>
    %68 = tpu.iota {dimensions = array<i32: 0>} : vector<80x1600xi32>
    %69 = arith.sitofp %68 : vector<80x1600xi32> to vector<80x1600xf32>
    %70 = vector.broadcast %67 : vector<1x1600xf32> to vector<80x1600xf32>
    %71 = arith.subf %69, %70 : vector<80x1600xf32>
    %72 = math.absf %71 : vector<80x1600xf32>
    %cst_18 = arith.constant 1.000000e+00 : f32
    %73 = vector.broadcast %cst_18 : f32 to vector<80x1600xf32>
    %74 = arith.subf %73, %72 : vector<80x1600xf32>
    %cst_19 = arith.constant 0.000000e+00 : f32
    %75 = vector.broadcast %cst_19 : f32 to vector<80x1600xf32>
    %76 = arith.maximumf %74, %75 : vector<80x1600xf32>
    %77 = tpu.iota {dimensions = array<i32: 0>} : vector<24x1600xi32>
    %78 = arith.sitofp %77 : vector<24x1600xi32> to vector<24x1600xf32>
    %79 = vector.broadcast %59 : vector<1x1600xf32> to vector<24x1600xf32>
    %80 = arith.subf %78, %79 : vector<24x1600xf32>
    %81 = math.absf %80 : vector<24x1600xf32>
    %cst_20 = arith.constant 1.000000e+00 : f32
    %82 = vector.broadcast %cst_20 : f32 to vector<24x1600xf32>
    %83 = arith.subf %82, %81 : vector<24x1600xf32>
    %cst_21 = arith.constant 0.000000e+00 : f32
    %84 = vector.broadcast %cst_21 : f32 to vector<24x1600xf32>
    %85 = arith.maximumf %83, %84 : vector<24x1600xf32>
    %c0_22 = arith.constant 0 : index
    %c0_23 = arith.constant 0 : index
    %c0_24 = arith.constant 0 : index
    %86 = vector.load %arg2[%c0_22, %c0_23, %c0_24] : memref<1x72x80xf32, #tpu.memory_space<vmem>>, vector<1x72x80xf32>
    %87 = vector.shape_cast %86 : vector<1x72x80xf32> to vector<72x80xf32>
    %cst_25 = arith.constant dense<0.000000e+00> : vector<72x1600xf32>
    %88 = tpu.matmul %87, %76, %cst_25 {dimension_numbers = #tpu.dot_dimension_numbers<[1], [0], [0], [1], [0, 0, 1, 1], [], []>} : vector<72x80xf32>, vector<80x1600xf32>, vector<72x1600xf32> -> vector<72x1600xf32>
    %89 = vector.extract_strided_slice %88 {offsets = [0, 0], sizes = [24, 1600], strides = [1, 1]} : vector<72x1600xf32> to vector<24x1600xf32>
    %90 = arith.mulf %89, %85 : vector<24x1600xf32>
    %cst_26 = arith.constant dense<0.000000e+00> : vector<1600xf32>
    %91 = vector.multi_reduction <add>, %90, %cst_26 [0] : vector<24x1600xf32> to vector<1600xf32>
    %92 = vector.shape_cast %91 : vector<1600xf32> to vector<1x1600xf32>
    %93 = vector.extract_strided_slice %88 {offsets = [24, 0], sizes = [24, 1600], strides = [1, 1]} : vector<72x1600xf32> to vector<24x1600xf32>
    %94 = arith.mulf %93, %85 : vector<24x1600xf32>
    %cst_27 = arith.constant dense<0.000000e+00> : vector<1600xf32>
    %95 = vector.multi_reduction <add>, %94, %cst_27 [0] : vector<24x1600xf32> to vector<1600xf32>
    %96 = vector.shape_cast %95 : vector<1600xf32> to vector<1x1600xf32>
    %97 = vector.extract_strided_slice %88 {offsets = [48, 0], sizes = [24, 1600], strides = [1, 1]} : vector<72x1600xf32> to vector<24x1600xf32>
    %98 = arith.mulf %97, %85 : vector<24x1600xf32>
    %cst_28 = arith.constant dense<0.000000e+00> : vector<1600xf32>
    %99 = vector.multi_reduction <add>, %98, %cst_28 [0] : vector<24x1600xf32> to vector<1600xf32>
    %100 = vector.shape_cast %99 : vector<1600xf32> to vector<1x1600xf32>
    %101 = tpu.concatenate %92, %96, %100 in 0 : vector<1x1600xf32>, vector<1x1600xf32>, vector<1x1600xf32> -> vector<3x1600xf32>
    %c0_29 = arith.constant 0 : index
    %c0_30 = arith.constant 0 : index
    %c0_31 = arith.constant 0 : index
    %102 = vector.load %arg3[%c0_29, %c0_30, %c0_31] : memref<1x3x1600xf32, #tpu.memory_space<vmem>>, vector<1x3x1600xf32>
    %103 = vector.shape_cast %102 : vector<1x3x1600xf32> to vector<3x1600xf32>
    %104 = vector.shape_cast %101 : vector<3x1600xf32> to vector<1x3x1600xf32>
    tpu.vector_store %arg3[%c0_29, %c0_30, %c0_31], %104 {strides = array<i32>} : memref<1x3x1600xf32, #tpu.memory_space<vmem>>, vector<1x3x1600xf32>,
    return
  }
  func.func @transform_0(%arg0: i32) -> (i32, i32) {
    %c0_i32 = arith.constant 0 : i32
    %c0_i32_0 = arith.constant 0 : i32
    %c0_i32_1 = arith.constant 0 : i32
    return %c0_i32, %c0_i32_0 : i32, i32
  }
  func.func @transform_1(%arg0: i32) -> (i32, i32, i32) {
    %c0_i32 = arith.constant 0 : i32
    %c0_i32_0 = arith.constant 0 : i32
    %c0_i32_1 = arith.constant 0 : i32
    return %arg0, %c0_i32, %c0_i32_0 : i32, i32, i32
  }
  func.func @transform_2(%arg0: i32) -> (i32, i32, i32) {
    %c0_i32 = arith.constant 0 : i32
    %c0_i32_0 = arith.constant 0 : i32
    %c0_i32_1 = arith.constant 0 : i32
    return %arg0, %c0_i32, %c0_i32_0 : i32, i32, i32
  }
}

</mosaic_0001>

<bundles_post_ra>
// kernel: _lambda_.4
= control target key start
LH: loop header
LB: loop body
LE: loop exit
PB: predicated region body
PF: predicated region fallthrough
CT: control target
= control target key end

     0   :  { %v3160_v21 = vmov 1966171168   ;;  %v440_v23 = vlaneseq  ;;  %vm3162_vm0 = vmmov 0   ;;  %vm2354_vm1 = vcmask 261120   ;;  %s3863_s1 = inlined_call_operand.vmem [shape: bf16[3200,32], index: 1, kind: input, shape index: {}]   ;;  %s3864_s0 = inlined_call_operand.vmem [shape: bf16[2,3200], index: 0, kind: input, shape index: {}]   ;;  %s3865_s2 = inlined_call_operand.vmem [shape: f32[1,32], index: 2, kind: input, shape index: {}]   ;;  %s3866_s3 = inlined_call_operand.vmem [shape: f32[32,6], index: 3, kind: input, shape index: {}]   ;;  %s3867_s4 = inlined_call_operand.vmem [shape: f32[1,6], index: 4, kind: input, shape index: {}]   ;;  %s3868_s5 = inlined_call_operand.vmem [shape: f32[2,6], index: 5, kind: output, shape index: {}]  }
   0x1   :  { %v2957_v0 = vld [vmem:[%s3863_s1 + $0x40] sm:$0xff]   ;;  %v2961_v4 = vld [vmem:[%s3863_s1 + $0x48] sm:$0xff]   ;;  %v2965_v8 = vld [vmem:[%s3863_s1 + $0x50] sm:$0xff]   ;;  %v438_v22 = vunpack.c.l.s4 %v3160_v21  ;;  %vm2428_vm2 = vcmask 41984  }
   0x2   :  { %v2958_v1 = vld [vmem:[%s3863_s1] sm:$0xff]   ;;  %2638 = vmatprep.subr.bf16.mxu0 %v2957_v0  ;;  %v2962_v5 = vld [vmem:[%s3863_s1 + $0x8] sm:$0xff]   ;;  %v2966_v9 = vld [vmem:[%s3863_s1 + $0x10] sm:$0xff]   ;;  %v441_v29 = vshrl.u32 %v440_v23, 7 }
   0x3   :  { %v2959_v2 = vld [vmem:[%s3863_s1 + $0xc0] sm:$0xff]   ;;  %2639 = vmatpush3.bf16.msra.mxu0 %v2958_v1  ;;  %v2963_v6 = vld [vmem:[%s3863_s1 + $0xc8] sm:$0xff]   ;;  %v2967_v10 = vld [vmem:[%s3863_s1 + $0xd0] sm:$0xff]   ;;  %v439_v28 = vunpack.c.0.s8 %v438_v22 }
   0x4   :  { %v2960_v3 = vld [vmem:[%s3863_s1 + $0x80] sm:$0xff]   ;;  %2660 = vmatprep.subr.bf16.mxu1 %v2959_v2  ;;  %2640 = vmatprep.subr.bf16.mxu0 %v2961_v4  ;;  %v2964_v7 = vld [vmem:[%s3863_s1 + $0x88] sm:$0xff]   ;;  %v2968_v11 = vld [vmem:[%s3863_s1 + $0x90] sm:$0xff]  }
   0x5   :  { %2661 = vmatpush3.bf16.msra.mxu1 %v2960_v3  ;;  %v2969_v12 = vld [vmem:[%s3863_s1 + $0x58] sm:$0xff]   ;;  %v2973_v16 = vld [vmem:[%s3863_s1 + $0x60] sm:$0xff]   ;;  %v2977_v20 = vld [vmem:[%s3863_s1 + $0x68] sm:$0xff]   ;;  %v3281_v34 = vsub.s32 %v439_v28, %v441_v29 }
   0x6   :  { %2662 = vmatprep.subr.bf16.mxu1 %v2963_v6  ;;  %v2970_v13 = vld [vmem:[%s3863_s1 + $0x18] sm:$0xff]   ;;  %v2974_v17 = vld [vmem:[%s3863_s1 + $0x20] sm:$0xff]   ;;  %v2978_v24 = vld [vmem:[%s3863_s1 + $0x28] sm:$0xff]  }
   0x7   :  { %2641 = vmatpush3.bf16.msra.mxu0 %v2962_v5  ;;  %v2971_v14 = vld [vmem:[%s3863_s1 + $0xd8] sm:$0xff]   ;;  %v2975_v18 = vld [vmem:[%s3863_s1 + $0xe0] sm:$0xff]   ;;  %v2979_v25 = vld [vmem:[%s3863_s1 + $0xe8] sm:$0xff]  }
   0x8   :  { %2642 = vmatprep.subr.bf16.mxu0 %v2965_v8  ;;  %v2972_v15 = vld [vmem:[%s3863_s1 + $0x98] sm:$0xff]   ;;  %v2976_v19 = vld [vmem:[%s3863_s1 + $0xa0] sm:$0xff]   ;;  %v2980_v26 = vld [vmem:[%s3863_s1 + $0xa8] sm:$0xff]  }
   0x9   :  { %2663 = vmatpush3.bf16.msra.mxu1 %v2964_v7  ;;  %v2981_v27 = vld [vmem:[%s3863_s1 + $0x70] sm:$0xff]   ;;  %v2985_v33 = vld [vmem:[%s3863_s1 + $0x78] sm:$0xff]   ;;  %v21_v37 = vld [vmem:[%s3864_s0] sm:$0xff] }
   0xa   :  { %2664 = vmatprep.subr.bf16.mxu1 %v2967_v10  ;;  %v2982_v30 = vld [vmem:[%s3863_s1 + $0x30] sm:$0xff]   ;;  %v2986_v35 = vld [vmem:[%s3863_s1 + $0x38] sm:$0xff]   ;;  %v436_v38 = vcombine.high %v21_v37, %v21_v37  ;;  %v443_v39 = vrot.slane %v21_v37, %v3281_v34  ;;  %v2990_v41 = vld [vmem:[%s3863_s1 + $0x140] sm:$0xff]  }
   0xb   :  { %2643 = vmatpush3.bf16.msra.mxu0 %v2966_v9  ;;  %v2983_v31 = vld [vmem:[%s3863_s1 + $0xf0] sm:$0xff]   ;;  %v2987_v36 = vld [vmem:[%s3863_s1 + $0xf8] sm:$0xff]   ;;  %v2992_v45 = vld [vmem:[%s3863_s1 + $0x1c0] sm:$0xff]  }
   0xc   :  { %2644 = vmatprep.subr.bf16.mxu0 %v2969_v12  ;;  %v2984_v32 = vld [vmem:[%s3863_s1 + $0xb0] sm:$0xff]   ;;  %v2989_v40 = vld [vmem:[%s3863_s1 + $0xb8] sm:$0xff]   ;;  %v451_v42 = vcombine.high %v443_v39, %v443_v39  ;;  %v459_v43 = vrot.slane %v443_v39, %v3281_v34  ;;  %v3301_v44 = vrot.slane %v436_v38, %v3281_v34  ;;  %v2991_v47 = vld [vmem:[%s3863_s1 + $0x100] sm:$0xff]  }
   0xd   :  { %2665 = vmatpush3.bf16.msra.mxu1 %v2968_v11  ;;  %v2994_v50 = vld [vmem:[%s3863_s1 + $0x148] sm:$0xff]   ;;  %v2993_v52 = vld [vmem:[%s3863_s1 + $0x180] sm:$0xff]   ;;  %v2998_v57 = vld [vmem:[%s3863_s1 + $0x150] sm:$0xff]  }
   0xe   :  { %2666 = vmatprep.subr.bf16.mxu1 %v2971_v14  ;;  %v473_v46 = vrot.slane %v451_v42, %v3281_v34  ;;  %v452_v48 = vcombine.high %v3301_v44, %v3301_v44  ;;  %v481_v49 = vcombine.high %v459_v43, %v459_v43  ;;  %v2996_v54 = vld [vmem:[%s3863_s1 + $0x1c8] sm:$0xff]   ;;  %v3000_v59 = vld [vmem:[%s3863_s1 + $0x1d0] sm:$0xff]   ;;  %v3002_v61 = vld [vmem:[%s3863_s1 + $0x158] sm:$0xff]  }
   0xf   :  { %2645 = vmatpush3.bf16.msra.mxu0 %v2970_v13  ;;  %v2995_v55 = vld [vmem:[%s3863_s1 + $0x108] sm:$0xff]   ;;  %v2999_v60 = vld [vmem:[%s3863_s1 + $0x110] sm:$0xff]   ;;  %v3004_v63 = vld [vmem:[%s3863_s1 + $0x1d8] sm:$0xff]  }
  0x10   :  { %2646 = vmatprep.subr.bf16.mxu0 %v2973_v16  ;;  %1854 = vmatprep.mubr.bf16.mxu0 %v473_v46  ;;  %v483_v51 = vcombine.high %v473_v46, %v473_v46  ;;  %v480_v53 = vrot.slane %v452_v48, %v3281_v34  ;;  %v2997_v58 = vld [vmem:[%s3863_s1 + $0x188] sm:$0xff]   ;;  %v3001_v62 = vld [vmem:[%s3863_s1 + $0x190] sm:$0xff]   ;;  %v3003_v0 = vld [vmem:[%s3863_s1 + $0x118] sm:$0xff]  }
  0x11   :  { %2667 = vmatpush3.bf16.msra.mxu1 %v2972_v15  ;;  %v3006_v1 = vld [vmem:[%s3863_s1 + $0x160] sm:$0xff]   ;;  %v3005_v2 = vld [vmem:[%s3863_s1 + $0x198] sm:$0xff]   ;;  %v3010_v5 = vld [vmem:[%s3863_s1 + $0x168] sm:$0xff]  }
  0x12   :  { %2668 = vmatprep.subr.bf16.mxu1 %v2975_v18  ;;  %1894 = vmatprep.mubr.bf16.mxu1 %v483_v51  ;;  %v484_v56 = vcombine.high %v480_v53, %v480_v53  ;;  %v3008_v3 = vld [vmem:[%s3863_s1 + $0x1e0] sm:$0xff]   ;;  %v3012_v7 = vld [vmem:[%s3863_s1 + $0x1e8] sm:$0xff]   ;;  %v3014_v9 = vld [vmem:[%s3863_s1 + $0x170] sm:$0xff]  }
  0x13   :  { %2647 = vmatpush3.bf16.msra.mxu0 %v2974_v17  ;;  %v3007_v4 = vld [vmem:[%s3863_s1 + $0x120] sm:$0xff]   ;;  %v3011_v8 = vld [vmem:[%s3863_s1 + $0x128] sm:$0xff]   ;;  %v3016_v11 = vld [vmem:[%s3863_s1 + $0x1f0] sm:$0xff]   ;;  %v466_v17 = vrot.slane %v3301_v44, %v3281_v34 }
  0x14   :  { %2648 = vmatprep.subr.bf16.mxu0 %v2977_v20  ;;  %v3009_v6 = vld [vmem:[%s3863_s1 + $0x1a0] sm:$0xff]   ;;  %v3013_v10 = vld [vmem:[%s3863_s1 + $0x1a8] sm:$0xff]   ;;  %v3015_v12 = vld [vmem:[%s3863_s1 + $0x130] sm:$0xff]  }
  0x15   :  { %2669 = vmatpush3.bf16.msra.mxu1 %v2976_v19  ;;  %v3018_v13 = vld [vmem:[%s3863_s1 + $0x178] sm:$0xff]   ;;  %v3017_v14 = vld [vmem:[%s3863_s1 + $0x1b0] sm:$0xff]   ;;  %v3022_v18 = vld [vmem:[%s3863_s1 + $0x240] sm:$0xff]   ;;  %v482_v22 = vcombine.high %v466_v17, %v466_v17 }
  0x16   :  { %2670 = vmatprep.subr.bf16.mxu1 %v2979_v25  ;;  %v3020_v15 = vld [vmem:[%s3863_s1 + $0x1f8] sm:$0xff]   ;;  %v3024_v20 = vld [vmem:[%s3863_s1 + $0x2c0] sm:$0xff]   ;;  %v3026_v23 = vld [vmem:[%s3863_s1 + $0x248] sm:$0xff]  }
  0x17   :  { %2649 = vmatpush3.bf16.msra.mxu0 %v2978_v24  ;;  %v3019_v16 = vld [vmem:[%s3863_s1 + $0x138] sm:$0xff]   ;;  %v3023_v21 = vld [vmem:[%s3863_s1 + $0x200] sm:$0xff]   ;;  %v3028_v25 = vld [vmem:[%s3863_s1 + $0x2c8] sm:$0xff]  }
  0x18   :  { %2650 = vmatprep.subr.bf16.mxu0 %v2981_v27  ;;  %v3021_v19 = vld [vmem:[%s3863_s1 + $0x1b8] sm:$0xff]   ;;  %v3025_v24 = vld [vmem:[%s3863_s1 + $0x280] sm:$0xff]   ;;  %v3030_v27 = vld [vmem:[%s3863_s1 + $0x250] sm:$0xff]  }
  0x19   :  { %2671 = vmatpush3.bf16.msra.mxu1 %v2980_v26  ;;  %v3027_v26 = vld [vmem:[%s3863_s1 + $0x208] sm:$0xff]   ;;  %v3032_v29 = vld [vmem:[%s3863_s1 + $0x2d0] sm:$0xff]   ;;  %v3037_v37 = vld [vmem:[%s3863_s1 + $0x298] sm:$0xff]  }
  0x1a   :  { %2672 = vmatprep.subr.bf16.mxu1 %v2983_v31  ;;  %v3029_v28 = vld [vmem:[%s3863_s1 + $0x288] sm:$0xff]   ;;  %v3034_v31 = vld [vmem:[%s3863_s1 + $0x258] sm:$0xff]   ;;  %v3040_v38 = vld [vmem:[%s3863_s1 + $0x2e0] sm:$0xff]  }
  0x1b   :  { %2651 = vmatpush3.bf16.msra.mxu0 %v2982_v30  ;;  %v3031_v30 = vld [vmem:[%s3863_s1 + $0x210] sm:$0xff]   ;;  %v3039_v39 = vld [vmem:[%s3863_s1 + $0x220] sm:$0xff]   ;;  %v3044_v42 = vld [vmem:[%s3863_s1 + $0x2e8] sm:$0xff]  }
  0x1c   :  { %2652 = vmatprep.subr.bf16.mxu0 %v2985_v33  ;;  %v3036_v33 = vld [vmem:[%s3863_s1 + $0x2d8] sm:$0xff]   ;;  %v3046_v44 = vld [vmem:[%s3863_s1 + $0x270] sm:$0xff]   ;;  %v22_v51 = vld [vmem:[%s3864_s0 + $0x8] sm:$0xff] }
  0x1d   :  { %2673 = vmatpush3.bf16.msra.mxu1 %v2984_v32  ;;  %v3033_v32 = vld [vmem:[%s3863_s1 + $0x290] sm:$0xff]   ;;  %v3050_v48 = vld [vmem:[%s3863_s1 + $0x278] sm:$0xff]  }
  0x1e   :  { %2674 = vmatprep.subr.bf16.mxu1 %v2987_v36  ;;  %v3038_v36 = vld [vmem:[%s3863_s1 + $0x260] sm:$0xff]   ;;  %v3048_v46 = vld [vmem:[%s3863_s1 + $0x2f0] sm:$0xff]  }
  0x1f   :  { %2653 = vmatpush3.bf16.msra.mxu0 %v2986_v35  ;;  %v3035_v35 = vld [vmem:[%s3863_s1 + $0x218] sm:$0xff]  }
  0x20   :  { %2682 = vmatprep.subr.bf16.mxu0 %v2990_v41  ;;  %v3041_v41 = vld [vmem:[%s3863_s1 + $0x2a0] sm:$0xff]  }
  0x21   :  { %2675 = vmatpush3.bf16.msra.mxu1 %v2989_v40  ;;  %v3042_v40 = vld [vmem:[%s3863_s1 + $0x268] sm:$0xff]  }
  0x22   :  { %2704 = vmatprep.subr.bf16.mxu1 %v2992_v45  ;;  %1855 = vmatmul.mubr.bf16.vlgmr.msra.gmra.mrb[0].mxu0 %v459_v43  ;;  %v3043_v43 = vld [vmem:[%s3863_s1 + $0x228] sm:$0xff]  }
  0x23   :  { %2683 = vmatpush3.bf16.msra.mxu0 %v2991_v47  ;;  %1934 = vmatprep.mubr.bf16.mxu0 %v480_v53  ;;  %v3045_v45 = vld [vmem:[%s3863_s1 + $0x2a8] sm:$0xff]   ;;  %v3047_v47 = vld [vmem:[%s3863_s1 + $0x230] sm:$0xff]   ;;  %v492_v53 = vrot.slane %v22_v51, %v3281_v34 }
  0x24   :  { %1895 = vmatmul.mubr.bf16.vlgmr.msra.gmra.mrb[0].mxu1 %v481_v49  ;;  %2684 = vmatprep.subr.bf16.mxu0 %v2994_v50  ;;  %v3049_v49 = vld [vmem:[%s3863_s1 + $0x2b0] sm:$0xff]   ;;  %v3052_v50 = vld [vmem:[%s3863_s1 + $0x2f8] sm:$0xff]  }
  0x25   :  { %2705 = vmatpush3.bf16.msra.mxu1 %v2993_v52  ;;  %1974 = vmatprep.mubr.bf16.mxu1 %v484_v56  ;;  %v3051_v52 = vld [vmem:[%s3863_s1 + $0x238] sm:$0xff]   ;;  %v500_v56 = vcombine.high %v492_v53, %v492_v53 }
  0x26   :  { %2706 = vmatprep.subr.bf16.mxu1 %v2996_v54  ;;  %v485_v54 = vcombine.high %v22_v51, %v22_v51  ;;  %v3103_v51 = vld [vmem:[%s3863_s1 + $0x460] sm:$0xff]  }
  0x27   :  { %2685 = vmatpush3.bf16.msra.mxu0 %v2995_v55  ;;  %v3054_v55 = vld [vmem:[%s3863_s1 + $0x340] sm:$0xff]  }
  0x28   :  { %2686 = vmatprep.subr.bf16.mxu0 %v2998_v57  ;;  %v3053_v57 = vld [vmem:[%s3863_s1 + $0x2b8] sm:$0xff]  }
  0x29   :  { %2707 = vmatpush3.bf16.msra.mxu1 %v2997_v58  ;;  %v508_v58 = vrot.slane %v492_v53, %v3281_v34  ;;  %v3105_v53 = vld [vmem:[%s3863_s1 + $0x4e0] sm:$0xff]  }
  0x2a   :  { %2708 = vmatprep.subr.bf16.mxu1 %v3000_v59  ;;  %v3507_v59 = vrot.slane %v485_v54, %v3281_v34  ;;  %v3104_v54 = vld [vmem:[%s3863_s1 + $0x420] sm:$0xff]  }
  0x2b   :  { %2687 = vmatpush3.bf16.msra.mxu0 %v2999_v60  ;;  %v3056_v60 = vld [vmem:[%s3863_s1 + $0x3c0] sm:$0xff]  }
  0x2c   :  { %2688 = vmatprep.subr.bf16.mxu0 %v3002_v61  ;;  %v522_v61 = vrot.slane %v500_v56, %v3281_v34  ;;  %v3106_v56 = vld [vmem:[%s3863_s1 + $0x4a0] sm:$0xff]  }
  0x2d   :  { %2709 = vmatpush3.bf16.msra.mxu1 %v3001_v62  ;;  %v3055_v62 = vld [vmem:[%s3863_s1 + $0x300] sm:$0xff]  }
  0x2e   :  { %2710 = vmatprep.subr.bf16.mxu1 %v3004_v63  ;;  %v501_v63 = vcombine.high %v3507_v59, %v3507_v59 }
  0x2f   :  { %2689 = vmatpush3.bf16.msra.mxu0 %v3003_v0  ;;  %v530_v0 = vcombine.high %v508_v58, %v508_v58 }
  0x30   :  { %2690 = vmatprep.subr.bf16.mxu0 %v3006_v1  ;;  %v3058_v1 = vld [vmem:[%s3863_s1 + $0x348] sm:$0xff]  }
  0x31   :  { %2711 = vmatpush3.bf16.msra.mxu1 %v3005_v2  ;;  %v532_v2 = vcombine.high %v522_v61, %v522_v61 }
  0x32   :  { %2712 = vmatprep.subr.bf16.mxu1 %v3008_v3  ;;  %v3057_v3 = vld [vmem:[%s3863_s1 + $0x380] sm:$0xff]  }
  0x33   :  { %2691 = vmatpush3.bf16.msra.mxu0 %v3007_v4  ;;  %v529_v4 = vrot.slane %v501_v63, %v3281_v34  ;;  %v3115_v63 = vld [vmem:[%s3863_s1 + $0x478] sm:$0xff]  }
  0x34   :  { %2692 = vmatprep.subr.bf16.mxu0 %v3010_v5  ;;  %v3060_v5 = vld [vmem:[%s3863_s1 + $0x3c8] sm:$0xff]  }
  0x35   :  { %2713 = vmatpush3.bf16.msra.mxu1 %v3009_v6  ;;  %v3059_v6 = vld [vmem:[%s3863_s1 + $0x308] sm:$0xff]  }
  0x36   :  { %2714 = vmatprep.subr.bf16.mxu1 %v3012_v7  ;;  %v533_v7 = vcombine.high %v529_v4, %v529_v4 }
  0x37   :  { %2693 = vmatpush3.bf16.msra.mxu0 %v3011_v8  ;;  %v3062_v8 = vld [vmem:[%s3863_s1 + $0x350] sm:$0xff]  }
  0x38   :  { %2694 = vmatprep.subr.bf16.mxu0 %v3014_v9  ;;  %v3061_v9 = vld [vmem:[%s3863_s1 + $0x388] sm:$0xff]  }
  0x39   :  { %2715 = vmatpush3.bf16.msra.mxu1 %v3013_v10  ;;  %v3064_v10 = vld [vmem:[%s3863_s1 + $0x3d0] sm:$0xff]  }
  0x3a   :  { %2716 = vmatprep.subr.bf16.mxu1 %v3016_v11  ;;  %v3063_v11 = vld [vmem:[%s3863_s1 + $0x310] sm:$0xff]  }
  0x3b   :  { %2695 = vmatpush3.bf16.msra.mxu0 %v3015_v12  ;;  %v3066_v12 = vld [vmem:[%s3863_s1 + $0x358] sm:$0xff]  }
  0x3c   :  { %2696 = vmatprep.subr.bf16.mxu0 %v3018_v13  ;;  %v3065_v13 = vld [vmem:[%s3863_s1 + $0x390] sm:$0xff]  }
  0x3d   :  { %2717 = vmatpush3.bf16.msra.mxu1 %v3017_v14  ;;  %v3068_v14 = vld [vmem:[%s3863_s1 + $0x3d8] sm:$0xff]  }
  0x3e   :  { %2718 = vmatprep.subr.bf16.mxu1 %v3020_v15  ;;  %v3067_v15 = vld [vmem:[%s3863_s1 + $0x318] sm:$0xff]  }
  0x3f   :  { %2697 = vmatpush3.bf16.msra.mxu0 %v3019_v16  ;;  %v3070_v16 = vld [vmem:[%s3863_s1 + $0x360] sm:$0xff]  }
  0x40   :  { %2726 = vmatprep.subr.bf16.mxu0 %v3022_v18  ;;  %v3072_v18 = vld [vmem:[%s3863_s1 + $0x3e0] sm:$0xff]  }
  0x41   :  { %2719 = vmatpush3.bf16.msra.mxu1 %v3021_v19  ;;  %v3071_v19 = vld [vmem:[%s3863_s1 + $0x320] sm:$0xff]  }
  0x42   :  { %1935 = vmatmul.mubr.bf16.vlgmr.msra.gmra.mrb[4].mxu0 %v466_v17  ;;  %2748 = vmatprep.subr.bf16.mxu1 %v3024_v20  ;;  %v3069_v17 = vld [vmem:[%s3863_s1 + $0x398] sm:$0xff]   ;;  %v3074_v20 = vld [vmem:[%s3863_s1 + $0x368] sm:$0xff]  }
  0x43   :  { %2727 = vmatpush3.bf16.msra.mxu0 %v3023_v21  ;;  %2014 = vmatprep.mubr.bf16.mxu0 %v522_v61  ;;  %v3073_v21 = vld [vmem:[%s3863_s1 + $0x3a0] sm:$0xff]   ;;  %v3113_v61 = vld [vmem:[%s3863_s1 + $0x4f0] sm:$0xff]  }
  0x44   :  { %1975 = vmatmul.mubr.bf16.vlgmr.msra.gmra.mrb[4].mxu1 %v482_v22  ;;  %2728 = vmatprep.subr.bf16.mxu0 %v3026_v23  ;;  %v3076_v22 = vld [vmem:[%s3863_s1 + $0x3e8] sm:$0xff]  }
  0x45   :  { %2749 = vmatpush3.bf16.msra.mxu1 %v3025_v24  ;;  %2054 = vmatprep.mubr.bf16.mxu1 %v532_v2  ;;  %v3075_v23 = vld [vmem:[%s3863_s1 + $0x328] sm:$0xff]   ;;  %v3078_v24 = vld [vmem:[%s3863_s1 + $0x370] sm:$0xff]  }
  0x46   :  { %2750 = vmatprep.subr.bf16.mxu1 %v3028_v25  ;;  %v3077_v25 = vld [vmem:[%s3863_s1 + $0x3a8] sm:$0xff]   ;;  %v23_v2 = vld [vmem:[%s3864_s0 + $0x10] sm:$0xff] }
  0x47   :  { %2729 = vmatpush3.bf16.msra.mxu0 %v3027_v26  ;;  %v3080_v26 = vld [vmem:[%s3863_s1 + $0x3f0] sm:$0xff]  }
  0x48   :  { %2730 = vmatprep.subr.bf16.mxu0 %v3030_v27  ;;  %v3079_v27 = vld [vmem:[%s3863_s1 + $0x330] sm:$0xff]  }
  0x49   :  { %2751 = vmatpush3.bf16.msra.mxu1 %v3029_v28  ;;  %v3082_v28 = vld [vmem:[%s3863_s1 + $0x378] sm:$0xff]  }
  0x4a   :  { %2752 = vmatprep.subr.bf16.mxu1 %v3032_v29  ;;  %v3081_v29 = vld [vmem:[%s3863_s1 + $0x3b0] sm:$0xff]  }
  0x4b   :  { %2731 = vmatpush3.bf16.msra.mxu0 %v3031_v30  ;;  %v3084_v30 = vld [vmem:[%s3863_s1 + $0x3f8] sm:$0xff]  }
  0x4c   :  { %2732 = vmatprep.subr.bf16.mxu0 %v3034_v31  ;;  %v3083_v31 = vld [vmem:[%s3863_s1 + $0x338] sm:$0xff]  }
  0x4d   :  { %2753 = vmatpush3.bf16.msra.mxu1 %v3033_v32  ;;  %v515_v32 = vrot.slane %v3507_v59, %v3281_v34  ;;  %v3111_v59 = vld [vmem:[%s3863_s1 + $0x470] sm:$0xff]  }
  0x4e   :  { %2754 = vmatprep.subr.bf16.mxu1 %v3036_v33  ;;  %v3087_v33 = vld [vmem:[%s3863_s1 + $0x440] sm:$0xff]  }
  0x4f   :  { %2733 = vmatpush3.bf16.msra.mxu0 %v3035_v35  ;;  %v3086_v35 = vld [vmem:[%s3863_s1 + $0x3b8] sm:$0xff]  }
  0x50   :  { %2734 = vmatprep.subr.bf16.mxu0 %v3038_v36  ;;  %v3089_v36 = vld [vmem:[%s3863_s1 + $0x4c0] sm:$0xff]  }
  0x51   :  { %2755 = vmatpush3.bf16.msra.mxu1 %v3037_v37  ;;  %v3088_v37 = vld [vmem:[%s3863_s1 + $0x400] sm:$0xff]  }
  0x52   :  { %2756 = vmatprep.subr.bf16.mxu1 %v3040_v38  ;;  %v531_v38 = vcombine.high %v515_v32, %v515_v32 }
  0x53   :  { %2735 = vmatpush3.bf16.msra.mxu0 %v3039_v39  ;;  %v3091_v39 = vld [vmem:[%s3863_s1 + $0x448] sm:$0xff]  }
  0x54   :  { %2736 = vmatprep.subr.bf16.mxu0 %v3042_v40  ;;  %v3090_v40 = vld [vmem:[%s3863_s1 + $0x480] sm:$0xff]  }
  0x55   :  { %2757 = vmatpush3.bf16.msra.mxu1 %v3041_v41  ;;  %v3093_v41 = vld [vmem:[%s3863_s1 + $0x4c8] sm:$0xff]  }
  0x56   :  { %2758 = vmatprep.subr.bf16.mxu1 %v3044_v42  ;;  %v3092_v42 = vld [vmem:[%s3863_s1 + $0x408] sm:$0xff]  }
  0x57   :  { %2737 = vmatpush3.bf16.msra.mxu0 %v3043_v43  ;;  %v3095_v43 = vld [vmem:[%s3863_s1 + $0x450] sm:$0xff]  }
  0x58   :  { %2738 = vmatprep.subr.bf16.mxu0 %v3046_v44  ;;  %v3094_v44 = vld [vmem:[%s3863_s1 + $0x488] sm:$0xff]  }
  0x59   :  { %2759 = vmatpush3.bf16.msra.mxu1 %v3045_v45  ;;  %v3097_v45 = vld [vmem:[%s3863_s1 + $0x4d0] sm:$0xff]  }
  0x5a   :  { %2760 = vmatprep.subr.bf16.mxu1 %v3048_v46  ;;  %v3096_v46 = vld [vmem:[%s3863_s1 + $0x410] sm:$0xff]  }
  0x5b   :  { %2739 = vmatpush3.bf16.msra.mxu0 %v3047_v47  ;;  %v3099_v47 = vld [vmem:[%s3863_s1 + $0x458] sm:$0xff]  }
  0x5c   :  { %2740 = vmatprep.subr.bf16.mxu0 %v3050_v48  ;;  %v3098_v48 = vld [vmem:[%s3863_s1 + $0x490] sm:$0xff]  }
  0x5d   :  { %2761 = vmatpush3.bf16.msra.mxu1 %v3049_v49  ;;  %v3101_v49 = vld [vmem:[%s3863_s1 + $0x4d8] sm:$0xff]  }
  0x5e   :  { %2762 = vmatprep.subr.bf16.mxu1 %v3052_v50  ;;  %v3100_v50 = vld [vmem:[%s3863_s1 + $0x418] sm:$0xff]  }
  0x5f   :  { %2741 = vmatpush3.bf16.msra.mxu0 %v3051_v52  ;;  %v3102_v52 = vld [vmem:[%s3863_s1 + $0x498] sm:$0xff]  }
  0x60   :  { %2770 = vmatprep.subr.bf16.mxu0 %v3054_v55  ;;  %v3107_v55 = vld [vmem:[%s3863_s1 + $0x468] sm:$0xff]  }
  0x61   :  { %2763 = vmatpush3.bf16.msra.mxu1 %v3053_v57  ;;  %v3109_v57 = vld [vmem:[%s3863_s1 + $0x4e8] sm:$0xff]  }
  0x62   :  { %2015 = vmatmul.mubr.bf16.vlgmr.msra.gmra.mrb[8].mxu0 %v508_v58  ;;  %2792 = vmatprep.subr.bf16.mxu1 %v3056_v60  ;;  %v3108_v58 = vld [vmem:[%s3863_s1 + $0x428] sm:$0xff]  }
  0x63   :  { %2771 = vmatpush3.bf16.msra.mxu0 %v3055_v62  ;;  %2094 = vmatprep.mubr.bf16.mxu0 %v529_v4  ;;  %v3110_v60 = vld [vmem:[%s3863_s1 + $0x4a8] sm:$0xff]   ;;  %v3112_v62 = vld [vmem:[%s3863_s1 + $0x430] sm:$0xff]   ;;  %v541_v4 = vrot.slane %v23_v2, %v3281_v34 }
  0x64   :  { %2055 = vmatmul.mubr.bf16.vlgmr.msra.gmra.mrb[8].mxu1 %v530_v0  ;;  %2772 = vmatprep.subr.bf16.mxu0 %v3058_v1  ;;  %v3114_v0 = vld [vmem:[%s3863_s1 + $0x4b0] sm:$0xff]   ;;  %v3117_v1 = vld [vmem:[%s3863_s1 + $0x4f8] sm:$0xff]  }
  0x65   :  { %2793 = vmatpush3.bf16.msra.mxu1 %v3057_v3  ;;  %2134 = vmatprep.mubr.bf16.mxu1 %v533_v7  ;;  %v3116_v3 = vld [vmem:[%s3863_s1 + $0x438] sm:$0xff]   ;;  %v549_v7 = vcombine.high %v541_v4, %v541_v4 }
  0x66   :  { %2794 = vmatprep.subr.bf16.mxu1 %v3060_v5  ;;  %v534_v5 = vcombine.high %v23_v2, %v23_v2 }
  0x67   :  { %2773 = vmatpush3.bf16.msra.mxu0 %v3059_v6  ;;  %v3119_v6 = vld [vmem:[%s3863_s1 + $0x540] sm:$0xff]  }
  0x68   :  { %2774 = vmatprep.subr.bf16.mxu0 %v3062_v8  ;;  %v3118_v8 = vld [vmem:[%s3863_s1 + $0x4b8] sm:$0xff]  }
  0x69   :  { %2795 = vmatpush3.bf16.msra.mxu1 %v3061_v9  ;;  %v557_v9 = vrot.slane %v541_v4, %v3281_v34 }
  0x6a   :  { %2796 = vmatprep.subr.bf16.mxu1 %v3064_v10  ;;  %v3713_v10 = vrot.slane %v534_v5, %v3281_v34 }
  0x6b   :  { %2775 = vmatpush3.bf16.msra.mxu0 %v3063_v11  ;;  %v3121_v11 = vld [vmem:[%s3863_s1 + $0x5c0] sm:$0xff]  }
  0x6c   :  { %2776 = vmatprep.subr.bf16.mxu0 %v3066_v12  ;;  %v571_v12 = vrot.slane %v549_v7, %v3281_v34 }
  0x6d   :  { %2797 = vmatpush3.bf16.msra.mxu1 %v3065_v13  ;;  %v3120_v13 = vld [vmem:[%s3863_s1 + $0x500] sm:$0xff]  }
  0x6e   :  { %2798 = vmatprep.subr.bf16.mxu1 %v3068_v14  ;;  %v550_v14 = vcombine.high %v3713_v10, %v3713_v10 }
  0x6f   :  { %2777 = vmatpush3.bf16.msra.mxu0 %v3067_v15  ;;  %v579_v15 = vcombine.high %v557_v9, %v557_v9 }
  0x70   :  { %2778 = vmatprep.subr.bf16.mxu0 %v3070_v16  ;;  %v3123_v16 = vld [vmem:[%s3863_s1 + $0x548] sm:$0xff]  }
  0x71   :  { %2799 = vmatpush3.bf16.msra.mxu1 %v3069_v17  ;;  %v581_v17 = vcombine.high %v571_v12, %v571_v12 }
  0x72   :  { %2800 = vmatprep.subr.bf16.mxu1 %v3072_v18  ;;  %v3122_v18 = vld [vmem:[%s3863_s1 + $0x580] sm:$0xff]  }
  0x73   :  { %2779 = vmatpush3.bf16.msra.mxu0 %v3071_v19  ;;  %v578_v19 = vrot.slane %v550_v14, %v3281_v34 }
  0x74   :  { %2780 = vmatprep.subr.bf16.mxu0 %v3074_v20  ;;  %v3125_v20 = vld [vmem:[%s3863_s1 + $0x5c8] sm:$0xff]  }
  0x75   :  { %2801 = vmatpush3.bf16.msra.mxu1 %v3073_v21  ;;  %v3124_v21 = vld [vmem:[%s3863_s1 + $0x508] sm:$0xff]  }
  0x76   :  { %2802 = vmatprep.subr.bf16.mxu1 %v3076_v22  ;;  %v582_v22 = vcombine.high %v578_v19, %v578_v19 }
  0x77   :  { %2781 = vmatpush3.bf16.msra.mxu0 %v3075_v23  ;;  %v3127_v23 = vld [vmem:[%s3863_s1 + $0x550] sm:$0xff]  }
  0x78   :  { %2782 = vmatprep.subr.bf16.mxu0 %v3078_v24  ;;  %v3126_v24 = vld [vmem:[%s3863_s1 + $0x588] sm:$0xff]  }
  0x79   :  { %2803 = vmatpush3.bf16.msra.mxu1 %v3077_v25  ;;  %v3129_v25 = vld [vmem:[%s3863_s1 + $0x5d0] sm:$0xff]  }
  0x7a   :  { %2804 = vmatprep.subr.bf16.mxu1 %v3080_v26  ;;  %v3128_v26 = vld [vmem:[%s3863_s1 + $0x510] sm:$0xff]  }
  0x7b   :  { %2783 = vmatpush3.bf16.msra.mxu0 %v3079_v27  ;;  %v3131_v27 = vld [vmem:[%s3863_s1 + $0x558] sm:$0xff]  }
  0x7c   :  { %2784 = vmatprep.subr.bf16.mxu0 %v3082_v28  ;;  %v3130_v28 = vld [vmem:[%s3863_s1 + $0x590] sm:$0xff]  }
  0x7d   :  { %2805 = vmatpush3.bf16.msra.mxu1 %v3081_v29  ;;  %v3133_v29 = vld [vmem:[%s3863_s1 + $0x5d8] sm:$0xff]  }
  0x7e   :  { %2806 = vmatprep.subr.bf16.mxu1 %v3084_v30  ;;  %v3132_v30 = vld [vmem:[%s3863_s1 + $0x518] sm:$0xff]  }
  0x7f   :  { %2785 = vmatpush3.bf16.msra.mxu0 %v3083_v31  ;;  %v3135_v31 = vld [vmem:[%s3863_s1 + $0x560] sm:$0xff]  }
  0x80   :  { %2814 = vmatprep.subr.bf16.mxu0 %v3087_v33  ;;  %v3137_v33 = vld [vmem:[%s3863_s1 + $0x5e0] sm:$0xff]  }
  0x81   :  { %2807 = vmatpush3.bf16.msra.mxu1 %v3086_v35  ;;  %v3136_v35 = vld [vmem:[%s3863_s1 + $0x520] sm:$0xff]  }
  0x82   :  { %2095 = vmatmul.mubr.bf16.vlgmr.msra.gmra.mrb[12].mxu0 %v515_v32  ;;  %2836 = vmatprep.subr.bf16.mxu1 %v3089_v36  ;;  %v3134_v32 = vld [vmem:[%s3863_s1 + $0x598] sm:$0xff]   ;;  %v3139_v36 = vld [vmem:[%s3863_s1 + $0x568] sm:$0xff]  }
  0x83   :  { %2815 = vmatpush3.bf16.msra.mxu0 %v3088_v37  ;;  %2174 = vmatprep.mubr.bf16.mxu0 %v571_v12  ;;  %v3138_v37 = vld [vmem:[%s3863_s1 + $0x5a0] sm:$0xff]  }
  0x84   :  { %2135 = vmatmul.mubr.bf16.vlgmr.msra.gmra.mrb[12].mxu1 %v531_v38  ;;  %2816 = vmatprep.subr.bf16.mxu0 %v3091_v39  ;;  %v3141_v38 = vld [vmem:[%s3863_s1 + $0x5e8] sm:$0xff]  }
  0x85   :  { %2837 = vmatpush3.bf16.msra.mxu1 %v3090_v40  ;;  %2214 = vmatprep.mubr.bf16.mxu1 %v581_v17  ;;  %v3140_v39 = vld [vmem:[%s3863_s1 + $0x528] sm:$0xff]   ;;  %v3143_v40 = vld [vmem:[%s3863_s1 + $0x570] sm:$0xff]  }
  0x86   :  { %2838 = vmatprep.subr.bf16.mxu1 %v3093_v41  ;;  %v3142_v41 = vld [vmem:[%s3863_s1 + $0x5a8] sm:$0xff]  }
  0x87   :  { %2817 = vmatpush3.bf16.msra.mxu0 %v3092_v42  ;;  %v3145_v42 = vld [vmem:[%s3863_s1 + $0x5f0] sm:$0xff]  }
  0x88   :  { %2818 = vmatprep.subr.bf16.mxu0 %v3095_v43  ;;  %v3144_v43 = vld [vmem:[%s3863_s1 + $0x530] sm:$0xff]  }
  0x89   :  { %2839 = vmatpush3.bf16.msra.mxu1 %v3094_v44  ;;  %v3147_v44 = vld [vmem:[%s3863_s1 + $0x578] sm:$0xff]  }
  0x8a   :  { %2840 = vmatprep.subr.bf16.mxu1 %v3097_v45  ;;  %v3146_v45 = vld [vmem:[%s3863_s1 + $0x5b0] sm:$0xff]  }
  0x8b   :  { %2819 = vmatpush3.bf16.msra.mxu0 %v3096_v46  ;;  %v3149_v46 = vld [vmem:[%s3863_s1 + $0x5f8] sm:$0xff]  }
  0x8c   :  { %2820 = vmatprep.subr.bf16.mxu0 %v3099_v47  ;;  %v3148_v47 = vld [vmem:[%s3863_s1 + $0x538] sm:$0xff]  }
  0x8d   :  { %2841 = vmatpush3.bf16.msra.mxu1 %v3098_v48  ;;  %v564_v48 = vrot.slane %v3713_v10, %v3281_v34 }
  0x8e   :  { %2842 = vmatprep.subr.bf16.mxu1 %v3101_v49  ;;  %v3151_v49 = vld [vmem:[%s3863_s1 + $0x5b8] sm:$0xff]  }
  0x8f   :  { %2821 = vmatpush3.bf16.msra.mxu0 %v3100_v50  ;;  %v3152_v50 = vld [vmem:[%s3863_s1 + $0x600] sm:$0xff]  }
  0x90   :  { %2822 = vmatprep.subr.bf16.mxu0 %v3103_v51  ;;  %v3161_v51 = vmov 0.0  }
  0x91   :  { %2843 = vmatpush3.bf16.msra.mxu1 %v3102_v52  ;;  %v580_v52 = vcombine.high %v564_v48, %v564_v48 }
  0x92   :  { %2844 = vmatprep.subr.bf16.mxu1 %v3105_v53  ;;  %v3153_v53 = vld [vmem:[%s3863_s1 + $0x608] sm:$0xff]  }
  0x93   :  { %2823 = vmatpush3.bf16.msra.mxu0 %v3104_v54  ;;  %v3154_v54 = vld [vmem:[%s3863_s1 + $0x610] sm:$0xff]  }
  0x94   :  { %2824 = vmatprep.subr.bf16.mxu0 %v3107_v55  ;;  %v3155_v55 = vld [vmem:[%s3863_s1 + $0x618] sm:$0xff]  }
  0x95   :  { %2845 = vmatpush3.bf16.msra.mxu1 %v3106_v56  ;;  %v3156_v56 = vld [vmem:[%s3863_s1 + $0x620] sm:$0xff]  }
  0x96   :  { %2846 = vmatprep.subr.bf16.mxu1 %v3109_v57  ;;  %v3157_v57 = vld [vmem:[%s3863_s1 + $0x628] sm:$0xff]  }
  0x97   :  { %2825 = vmatpush3.bf16.msra.mxu0 %v3108_v58  ;;  %v3158_v58 = vld [vmem:[%s3863_s1 + $0x630] sm:$0xff]  }
  0x98   :  { %2826 = vmatprep.subr.bf16.mxu0 %v3111_v59  ;;  %v3159_v59 = vld [vmem:[%s3863_s1 + $0x638] sm:$0xff]  }
  0x99   :  { %2847 = vmatpush3.bf16.msra.mxu1 %v3110_v60  ;;  %v2435_v60 = vld.sshfl [vmem:[%s3864_s0 + $0x18] sm:$0x1 pattern:$0x75316420] }
  0x9a   :  { %2848 = vmatprep.subr.bf16.mxu1 %v3113_v61  ;;  %v596_v61 = vrot.slane %v2435_v60, %v3281_v34 }
  0x9b   :  { %2827 = vmatpush3.bf16.msra.mxu0 %v3112_v62 }
  0x9c   :  { %2828 = vmatprep.subr.bf16.mxu0 %v3115_v63  ;;  %v2434_v63 = vld [vmem:[%s3865_s2] ss:$0 sm:$0xff] }
  0x9d   :  { %2849 = vmatpush3.bf16.msra.mxu1 %v3114_v0 }
  0x9e   :  { %2850 = vmatprep.subr.bf16.mxu1 %v3117_v1 }
  0x9f   :  { %2829 = vmatpush3.bf16.msra.mxu0 %v3116_v3 }
  0xa0   :  { %2858 = vmatprep.subr.bf16.mxu0 %v3119_v6 }
  0xa1   :  { %2851 = vmatpush3.bf16.msra.mxu1 %v3118_v8 }
  0xa2   :  { %2175 = vmatmul.mubr.bf16.vlgmr.msra.gmra.mrb[16].mxu0 %v557_v9  ;;  %2880 = vmatprep.subr.bf16.mxu1 %v3121_v11 }
  0xa3   :  { %2859 = vmatpush3.bf16.msra.mxu0 %v3120_v13  ;;  %2254 = vmatprep.mubr.bf16.mxu0 %v578_v19 }
  0xa4   :  { %2215 = vmatmul.mubr.bf16.vlgmr.msra.gmra.mrb[16].mxu1 %v579_v15  ;;  %2860 = vmatprep.subr.bf16.mxu0 %v3123_v16 }
  0xa5   :  { %2881 = vmatpush3.bf16.msra.mxu1 %v3122_v18  ;;  %2294 = vmatprep.mubr.bf16.mxu1 %v582_v22  ;;  %v3163_v22 = vmov 0.0|0.0  }
  0xa6   :  { %2882 = vmatprep.subr.bf16.mxu1 %v3125_v20 }
  0xa7   :  { %2861 = vmatpush3.bf16.msra.mxu0 %v3124_v21 }
  0xa8   :  { %2862 = vmatprep.subr.bf16.mxu0 %v3127_v23  ;;  %v2343_v23 = vld [vmem:[%s3866_s3] sm:$0xff] }
  0xa9   :  { %2883 = vmatpush3.bf16.msra.mxu1 %v3126_v24  ;;  %v2344_v24 = vld [vmem:[%s3866_s3 + $0x8] sm:$0xff] }
  0xaa   :  { %2884 = vmatprep.subr.bf16.mxu1 %v3129_v25  ;;  %v2948_v25 = vpack.c.bf16 %v2344_v24, %v2343_v23 }
  0xab   :  { %2863 = vmatpush3.bf16.msra.mxu0 %v3128_v26  ;;  %v2345_v26 = vld [vmem:[%s3866_s3 + $0x10] sm:$0xff] }
  0xac   :  { %2864 = vmatprep.subr.bf16.mxu0 %v3131_v27  ;;  %v2346_v27 = vld [vmem:[%s3866_s3 + $0x18] sm:$0xff] }
  0xad   :  { %2885 = vmatpush3.bf16.msra.mxu1 %v3130_v28 }
  0xae   :  { %2886 = vmatprep.subr.bf16.mxu1 %v3133_v29  ;;  %v2951_v29 = vpack.c.bf16 %v2346_v27, %v2345_v26 }
  0xaf   :  { %2865 = vmatpush3.bf16.msra.mxu0 %v3132_v30 }
  0xb0   :  { %2866 = vmatprep.subr.bf16.mxu0 %v3135_v31 }
  0xb1   :  { %2887 = vmatpush3.bf16.msra.mxu1 %v3134_v32 }
  0xb2   :  { %2888 = vmatprep.subr.bf16.mxu1 %v3137_v33 }
  0xb3   :  { %2867 = vmatpush3.bf16.msra.mxu0 %v3136_v35 }
  0xb4   :  { %2868 = vmatprep.subr.bf16.mxu0 %v3139_v36 }
  0xb5   :  { %2889 = vmatpush3.bf16.msra.mxu1 %v3138_v37 }
  0xb6   :  { %2890 = vmatprep.subr.bf16.mxu1 %v3141_v38 }
  0xb7   :  { %2869 = vmatpush3.bf16.msra.mxu0 %v3140_v39 }
  0xb8   :  { %2870 = vmatprep.subr.bf16.mxu0 %v3143_v40 }
  0xb9   :  { %2891 = vmatpush3.bf16.msra.mxu1 %v3142_v41 }
  0xba   :  { %2892 = vmatprep.subr.bf16.mxu1 %v3145_v42 }
  0xbb   :  { %2871 = vmatpush3.bf16.msra.mxu0 %v3144_v43 }
  0xbc   :  { %2872 = vmatprep.subr.bf16.mxu0 %v3147_v44 }
  0xbd   :  { %2893 = vmatpush3.bf16.msra.mxu1 %v3146_v45 }
  0xbe   :  { %2894 = vmatprep.subr.bf16.mxu1 %v3149_v46 }
  0xbf   :  { %2873 = vmatpush3.bf16.msra.mxu0 %v3148_v47 }
  0xc0   :  { %2916 = vmatprep.subr.bf16.mxu0 %v3161_v51 }
  0xc1   :  { %2895 = vmatpush3.bf16.msra.mxu1 %v3151_v49 }
  0xc2   :  { %2255 = vmatmul.mubr.bf16.vlgmr.msra.gmra.mrb[20].mxu0 %v564_v48  ;;  %2947 = vmatprep.subr.bf16.mxu1 %v3163_v22 }
  0xc3   :  { %2917 = vmatpush3.bf16.msra.mxu0 %v3152_v50  ;;  %2932 = vmatprep.mubr.msk.bf16.mxu0 %vm3162_vm0, %v3161_v51 }
  0xc4   :  { %2295 = vmatmul.mubr.bf16.vlgmr.msra.gmra.mrb[20].mxu1 %v580_v52  ;;  %2918 = vmatprep.subr.bf16.mxu0 %v3161_v51 }
  0xc5   :  { %2944 = vmatprep.mubr.msk.f32.mxu1 %vm3162_vm0, %v3161_v51  ;;  %2949 = vmatpush3.bf16.msra.mxu1 %v2948_v25 }
  0xc6   :  { %2950 = vmatprep.subr.bf16.mxu1 %v3163_v22 }
  0xc7   :  { %2919 = vmatpush3.bf16.msra.mxu0 %v3153_v53 }
  0xc8   :  { %2920 = vmatprep.subr.bf16.mxu0 %v3161_v51 }
  0xc9   :  { %2952 = vmatpush3.bf16.msra.mxu1 %v2951_v29 }
  0xcb   :  { %2921 = vmatpush3.bf16.msra.mxu0 %v3154_v54 }
  0xcc   :  { %2922 = vmatprep.subr.bf16.mxu0 %v3161_v51 }
  0xcf   :  { %2923 = vmatpush3.bf16.msra.mxu0 %v3155_v55 }
  0xd0   :  { %2924 = vmatprep.subr.bf16.mxu0 %v3161_v51 }
  0xd3   :  { %2925 = vmatpush3.bf16.msra.mxu0 %v3156_v56 }
  0xd4   :  { %2926 = vmatprep.subr.bf16.mxu0 %v3161_v51 }
  0xd7   :  { %2927 = vmatpush3.bf16.msra.mxu0 %v3157_v57 }
  0xd8   :  { %2928 = vmatprep.subr.bf16.mxu0 %v3161_v51 }
  0xdb   :  { %2929 = vmatpush3.bf16.msra.mxu0 %v3158_v58 }
  0xdc   :  { %2930 = vmatprep.subr.bf16.mxu0 %v3161_v51 }
  0xdf   :  { %2931 = vmatpush3.bf16.msra.mxu0 %v3159_v59 }
  0xe2   :  { %2933 = vmatmul.mubr.bf16.vlgmr.msra.gmra.mrb[24].mxu0 %v596_v61 }
  0xf5   :  { %v2654_v62 = vpop.f32.mrb[0].mxu0 }
  0xf6   :  { %v2655_v0 = vpop.f32.mrb[1].mxu0 }
  0xf7   :  { %v2656_v1 = vadd.f32 %v2655_v0, %v2654_v62  ;;  %v2657_v2 = vpop.f32.mrb[2].mxu0  ;;  %v2676_v3 = vpop.f32.mrb[0].mxu1 }
  0xf8   :  { %v2658_v4 = vpop.f32.mrb[3].mxu0  ;;  %v2677_v5 = vpop.f32.mrb[1].mxu1 }
  0xf9   :  { %v1857_v6 = vadd.f32 %v2656_v1, %v2434_v63  ;;  %v2678_v7 = vadd.f32 %v2677_v5, %v2676_v3  ;;  %v2679_v8 = vpop.f32.mrb[2].mxu1 }
  0xfa   :  { %v2680_v9 = vpop.f32.mrb[3].mxu1 }
  0xfb   :  { %v1897_v10 = vadd.f32 %v2678_v7, %v1857_v6 }
 0x115   :  { %v2698_v11 = vpop.f32.mrb[4].mxu0 }
 0x116   :  { %v2699_v34 = vpop.f32.mrb[5].mxu0 }
 0x117   :  { %v2700_v12 = vadd.f32 %v2699_v34, %v2698_v11  ;;  %v2701_v13 = vpop.f32.mrb[6].mxu0  ;;  %v2720_v14 = vpop.f32.mrb[4].mxu1 }
 0x118   :  { %v2702_v15 = vpop.f32.mrb[7].mxu0  ;;  %v2721_v16 = vpop.f32.mrb[5].mxu1 }
 0x119   :  { %v1937_v17 = vadd.f32 %v2700_v12, %v1897_v10  ;;  %v2722_v18 = vadd.f32 %v2721_v16, %v2720_v14  ;;  %v2723_v19 = vpop.f32.mrb[6].mxu1 }
 0x11a   :  { %v2724_v20 = vpop.f32.mrb[7].mxu1  ;;  %v2636_v19 = vld [vmem:[%s3867_s4] ss:$0 sm:$0xff] }
 0x11b   :  { %v1977_v21 = vadd.f32 %v2722_v18, %v1937_v17 }
 0x135   :  { %v2742_v28 = vpop.f32.mrb[8].mxu0 }
 0x136   :  { %v2743_v30 = vpop.f32.mrb[9].mxu0 }
 0x137   :  { %v2744_v31 = vadd.f32 %v2743_v30, %v2742_v28  ;;  %v2745_v32 = vpop.f32.mrb[10].mxu0  ;;  %v2764_v33 = vpop.f32.mrb[8].mxu1 }
 0x138   :  { %v2746_v35 = vpop.f32.mrb[11].mxu0  ;;  %v2765_v36 = vpop.f32.mrb[9].mxu1 }
 0x139   :  { %v2017_v37 = vadd.f32 %v2744_v31, %v1977_v21  ;;  %v2766_v38 = vadd.f32 %v2765_v36, %v2764_v33  ;;  %v2767_v39 = vpop.f32.mrb[10].mxu1 }
 0x13a   :  { %v2768_v40 = vpop.f32.mrb[11].mxu1 }
 0x13b   :  { %v2057_v41 = vadd.f32 %v2766_v38, %v2017_v37 }
 0x155   :  { %v2786_v42 = vpop.f32.mrb[12].mxu0 }
 0x156   :  { %v2787_v43 = vpop.f32.mrb[13].mxu0 }
 0x157   :  { %v2788_v44 = vadd.f32 %v2787_v43, %v2786_v42  ;;  %v2789_v45 = vpop.f32.mrb[14].mxu0  ;;  %v2808_v46 = vpop.f32.mrb[12].mxu1 }
 0x158   :  { %v2790_v47 = vpop.f32.mrb[15].mxu0  ;;  %v2809_v48 = vpop.f32.mrb[13].mxu1 }
 0x159   :  { %v2097_v49 = vadd.f32 %v2788_v44, %v2057_v41  ;;  %v2810_v50 = vadd.f32 %v2809_v48, %v2808_v46  ;;  %v2811_v51 = vpop.f32.mrb[14].mxu1 }
 0x15a   :  { %v2812_v52 = vpop.f32.mrb[15].mxu1 }
 0x15b   :  { %v2137_v53 = vadd.f32 %v2810_v50, %v2097_v49 }
 0x175   :  { %v2830_v54 = vpop.f32.mrb[16].mxu0 }
 0x176   :  { %v2831_v55 = vpop.f32.mrb[17].mxu0 }
 0x177   :  { %v2832_v56 = vadd.f32 %v2831_v55, %v2830_v54  ;;  %v2833_v57 = vpop.f32.mrb[18].mxu0  ;;  %v2852_v58 = vpop.f32.mrb[16].mxu1 }
 0x178   :  { %v2834_v59 = vpop.f32.mrb[19].mxu0  ;;  %v2853_v60 = vpop.f32.mrb[17].mxu1 }
 0x179   :  { %v2177_v61 = vadd.f32 %v2832_v56, %v2137_v53  ;;  %v2854_v62 = vadd.f32 %v2853_v60, %v2852_v58  ;;  %v2855_v63 = vpop.f32.mrb[18].mxu1 }
 0x17a   :  { %v2856_v0 = vpop.f32.mrb[19].mxu1 }
 0x17b   :  { %v2217_v1 = vadd.f32 %v2854_v62, %v2177_v61 }
 0x195   :  { %v2874_v2 = vpop.f32.mrb[20].mxu0 }
 0x196   :  { %v2875_v3 = vpop.f32.mrb[21].mxu0 }
 0x197   :  { %v2876_v4 = vadd.f32 %v2875_v3, %v2874_v2  ;;  %v2877_v5 = vpop.f32.mrb[22].mxu0  ;;  %v2896_v6 = vpop.f32.mrb[20].mxu1 }
 0x198   :  { %v2878_v7 = vpop.f32.mrb[23].mxu0  ;;  %v2897_v8 = vpop.f32.mrb[21].mxu1 }
 0x199   :  { %v2257_v9 = vadd.f32 %v2876_v4, %v2217_v1  ;;  %v2898_v10 = vadd.f32 %v2897_v8, %v2896_v6  ;;  %v2899_v11 = vpop.f32.mrb[22].mxu1 }
 0x19a   :  { %v2900_v34 = vpop.f32.mrb[23].mxu1 }
 0x19b   :  { %v2297_v12 = vadd.f32 %v2898_v10, %v2257_v9 }
 0x1b5   :  { %v2336_v13 = vpop.f32.mrb[24].mxu0 }
 0x1b6   :  { %v2337_v14 = vadd.f32 %v2336_v13, %v2297_v12  ;;  %v2934_v15 = vpop.f32.mrb[25].mxu0 }
 0x1b7   :  { %v2339_v16 = vpop.f32.mrb[26].mxu0 }
 0x1b8   :  { %v2342_v17 = vmax.f32 %v2337_v14, 0.0  ;;  %v2935_v18 = vpop.f32.mrb[27].mxu0 }
 0x1ba   :  { %2945 = vmatmul.mubr.msk.f32.vlgmr.msra.gmra.mrb[24].mxu1 %vm2354_vm1, %v2342_v17 }
 0x28d   :  { %v2424_v20 = vpop.f32.mrb[24].mxu1 }
 0x28e   :  { %v2425_v21 = vadd.f32 %v2636_v19, %v2424_v20  ;;  %v2946_v22 = vpop.f32.mrb[25].mxu1 }
 0x290   :  { %2429 = vst.msk [vmem:[%s3868_s5] sm:$0x3] %vm2428_vm2, %v2425_v21 }

// kernel: _lambda_.3
= control target key start
LH: loop header
LB: loop body
LE: loop exit
PB: predicated region body
PF: predicated region fallthrough
CT: control target
= control target key end

     0   :  { %s13955_s18 = smov 0   ;;  %s18029_s0 = inlined_call_operand.vmem [shape: bf16[2,60,80], index: 0, kind: input, shape index: {}]   ;;  %s18030_s1 = inlined_call_operand.vmem [shape: bf16[3,640,60], index: 1, kind: input, shape index: {}]   ;;  %s18031_s2 = inlined_call_operand.vmem [shape: f32[320,1], index: 2, kind: input, shape index: {}]   ;;  %s18032_s3 = inlined_call_operand.vmem [shape: bf16[5,320,320], index: 3, kind: input, shape index: {}]   ;;  %s18033_s4 = inlined_call_operand.vmem [shape: f32[160,1], index: 4, kind: input, shape index: {}]   ;;  %s18034_s5 = inlined_call_operand.vmem [shape: f32[2,160,20], index: 5, kind: output, shape index: {}]  }
   0x1 LB: > { %s10122_s19 = sadd.s32 4294967295, %s13919_s18   ;;  %p10126_p0 = scmp.ge.s32.totalorder %s13919_s18, 1  ;;  %s13919_s18 = sphi %s13955_s18, %s15_s18  }
   0x2   : > { %p187_p1 = scmp.lt.s32.totalorder %s13919_s18, 3 }
   0x4   : > { %p188_p2 = pnand %p10126_p0, %p187_p1 }
   0x6   : > { %191 = sbr.rel (%p188_p2) target bundleno = 3372 (0xd2c), region = 40 }
   0xd   : > { %v234_v0 = vlaneseq  ;;  %p215_p3 = scmp.lt.s32.totalorder %s10122_s19, 1  ;;  %vm18036_vm0 = vcmask 654336   ;;  %v18143_v12 = vmov 0  ;;  %v18041_v13 = vmov 1.0|1.0   ;;  %v13390_v26 = vld [vmem:[%s18030_s1 + $0x140] sm:$0xff]  }
   0xe   : > { %v18146_v14 = vmov 0  ;;  %v18156_v20 = vmov 0  ;;  %v18159_v21 = vmov 0  ;;  %v18172_v28 = vmov 0  ;;  %v13391_v46 = vld [vmem:[%s18030_s1 + $0x148] sm:$0xff]   ;;  %v13392_v47 = vld [vmem:[%s18030_s1 + $0x150] sm:$0xff]  }
   0xf   : > { %v13963_v1 = vshrl.u32 %v234_v0, 7  ;;  %v13965_v2 = vand.u32 127, %v234_v0  ;;  %s18538_s19 = smov (!%p215_p3, %s10122_s19), 1  ;;  %v18175_v29 = vmov 0  ;;  %v13393_v53 = vld [vmem:[%s18030_s1 + $0x158] sm:$0xff]   ;;  %v13394_v55 = vld [vmem:[%s18030_s1 + $0x160] sm:$0xff]  }
  0x10   : > { %s11568_s20 = sshll.u32 %s18538_s19, 5  ;;  %v13395_v61 = vld [vmem:[%s18030_s1 + $0x168] sm:$0xff]   ;;  %v13396_v63 = vld [vmem:[%s18030_s1 + $0x170] sm:$0xff]   ;;  %v13398_v17 = vld [vmem:[%s18030_s1 + $0x180] sm:$0xff]   ;;  %s13371_s16 = smul.u32 160, %s18538_s19 }
  0x11   : > { %18137 = vst [vmem:[#allocation2_spill] sm:$0xff] %v13963_v1  ;;  %18138 = vst [vmem:[#allocation3_spill] sm:$0xff] %v13965_v2  ;;  %v13970_v3 = vadd.s32 8, %v13963_v1  ;;  %vm455_vm1 = vcmp.eq.s32.totalorder %v13963_v1, %v13965_v2  ;;  %v13975_v4 = vadd.s32 16, %v13963_v1  ;;  %v13978_v5 = vadd.s32 24, %v13963_v1  ;;  %s13996_s23 = scalar_lea.vmem %s18029_s0, %s11568_s20  ;;  %v13399_v18 = vld [vmem:[%s18030_s1 + $0x188] sm:$0xff]  }
  0x12   : > { %v13982_v6 = vadd.s32 32, %v13963_v1  ;;  %v13985_v7 = vadd.s32 40, %v13963_v1  ;;  %v13988_v8 = vadd.s32 48, %v13963_v1  ;;  %v13991_v9 = vadd.s32 56, %v13963_v1  ;;  %v13386_v11 = vld [vmem:[%s13996_s23] sm:$0xff]   ;;  %v13387_v23 = vld [vmem:[%s13996_s23 + $0x8] sm:$0xff]   ;;  %s17978_s21 = scalar_lea.vmem %s18034_s5, %s13371_s16 }
  0x13   : > { %18139 = vst [vmem:[#allocation4_spill] sm:$0xff] %v13970_v3  ;;  %18140 = vst [vmem:[#allocation5_spill] sm:$0xff] %v13975_v4  ;;  %vm456_vm2 = vcmp.eq.s32.totalorder %v13970_v3, %v13965_v2  ;;  %vm457_vm3 = vcmp.eq.s32.totalorder %v13975_v4, %v13965_v2  ;;  %vm458_vm4 = vcmp.eq.s32.totalorder %v13978_v5, %v13965_v2  ;;  %v14005_v10 = vadd.s32 64, %v13963_v1  ;;  %v13388_v24 = vld [vmem:[%s13996_s23 + $0x10] sm:$0xff]   ;;  %v13389_v25 = vld [vmem:[%s13996_s23 + $0x18] sm:$0x3f]  }
  0x14   : > { %18141 = vst [vmem:[#allocation6_spill] sm:$0xff] %v13978_v5  ;;  %18142 = vst [vmem:[#allocation7_spill] sm:$0xff] %v13982_v6  ;;  %vm18035_vm6 = vcmp.eq.s32.totalorder %v13982_v6, %v13965_v2  ;;  %vm460_vm7 = vcmp.eq.s32.totalorder %v13985_v7, %v13965_v2  ;;  %vm461_vm8 = vcmp.eq.s32.totalorder %v13988_v8, %v13965_v2  ;;  %v14028_v15 = vadd.s32 72, %v13963_v1  ;;  %v13910_v30 = vld [vmem:[%s13996_s23 + $0x8] sm:$0xff]   ;;  %v13911_v31 = vld [vmem:[%s13996_s23 + $0x10] sm:$0xff]  }
  0x15   : > { %vm14008_vm5 = vmpackc.low %vm456_vm2, %vm455_vm1  ;;  %vm462_vm9 = vcmp.eq.s32.totalorder %v13991_v9, %v13965_v2  ;;  %vm463_vm11 = vcmp.eq.s32.totalorder %v14005_v10, %v13965_v2  ;;  %12141 = vmatprep.mubr.msk.bf16.mxu1 %vm18036_vm0, %v13386_v11  ;;  %v14034_v16 = vadd.s32 4294967295, %v13965_v2  ;;  %12123 = vmatprep.mubr.msk.bf16.mxu0 %vm18036_vm0, %v13386_v11  ;;  %v14153_v27 = vadd.s32 1, %v13965_v2  ;;  %v13912_v32 = vld [vmem:[%s13996_s23 + $0x18] sm:$0x3f]   ;;  %v13400_v19 = vld [vmem:[%s18030_s1 + $0x190] sm:$0xff]  }
  0x16   : > { %v18144_v12 = vsel %vm14008_vm5, 4294967295, %v18143_v12  ;;  %12131 = vmatprep.subr.msk.bf16.mxu1 %vm14008_vm5, %v18041_v13  ;;  %vm14023_vm10 = vmpackc.low %vm458_vm4, %vm457_vm3  ;;  %vm464_vm14 = vcmp.eq.s32.totalorder %v14028_v15, %v13965_v2  ;;  %v13401_v22 = vld [vmem:[%s18030_s1 + $0x198] sm:$0xff]  }
  0x17   : > { %18145 = vst [vmem:[#allocation8_spill] sm:$0xff] %v18144_v12  ;;  %v18147_v14 = vsel %vm14023_vm10, 4294967295, %v18146_v14  ;;  %18149 = vst [vmem:[#allocation10_spill] sm:$0xff] %v14034_v16  ;;  %12132 = vmatpush3.bf16.msk.msra.mxu1 %vm14008_vm5, %v18041_v13  ;;  %vm248_vm15 = vcmp.eq.s32.totalorder %v13963_v1, %v14034_v16  ;;  %vm249_vm1 = vcmp.eq.s32.totalorder %v13970_v3, %v14034_v16 }
  0x18   : > { %18148 = vst [vmem:[#allocation9_spill] sm:$0xff] %v18147_v14  ;;  %vm14042_vm12 = vmpackc.low %vm460_vm7, %vm18035_vm6  ;;  %12133 = vmatprep.subr.msk.bf16.mxu1 %vm14023_vm10, %v18041_v13  ;;  %vm250_vm2 = vcmp.eq.s32.totalorder %v13975_v4, %v14034_v16  ;;  %vm251_vm4 = vcmp.eq.s32.totalorder %v13978_v5, %v14034_v16  ;;  %vm18069_vm7 = vcmp.eq.s32.totalorder %v13982_v6, %v14034_v16 }
  0x19   : > { %vm14050_vm13 = vmpackc.low %vm462_vm9, %vm461_vm8  ;;  %vm253_vm8 = vcmp.eq.s32.totalorder %v13985_v7, %v14034_v16  ;;  %vm254_vm6 = vcmp.eq.s32.totalorder %v13988_v8, %v14034_v16  ;;  %18171 = vst [vmem:[#allocation13_spill] sm:$0xff] %v14153_v27 }
  0x1a   : > { %vm14062_vm3 = vmpackc.low %vm464_vm14, %vm463_vm11  ;;  %vm255_vm11 = vcmp.eq.s32.totalorder %v13991_v9, %v14034_v16 }
  0x1b   : > { %vm14072_vm9 = vmpackc.low %vm249_vm1, %vm248_vm15  ;;  %12134 = vmatpush3.bf16.msk.msra.mxu1 %vm14023_vm10, %v18041_v13  ;;  %vm256_vm15 = vcmp.eq.s32.totalorder %v14005_v10, %v14034_v16  ;;  %vm257_vm1 = vcmp.eq.s32.totalorder %v14028_v15, %v14034_v16 }
  0x1c   : > { %v18157_v20 = vsel %vm14072_vm9, 4294967295, %v18156_v20  ;;  %12113 = vmatprep.subr.msk.bf16.mxu0 %vm14072_vm9, %v18041_v13  ;;  %vm14086_vm14 = vmpackc.low %vm251_vm4, %vm250_vm2  ;;  %12135 = vmatprep.subr.msk.bf16.mxu1 %vm14042_vm12, %v18041_v13 }
  0x1d   : > { %18158 = vst [vmem:[#allocation11_spill] sm:$0xff] %v18157_v20  ;;  %v18160_v21 = vsel %vm14086_vm14, 4294967295, %v18159_v21  ;;  %12114 = vmatpush3.bf16.msk.msra.mxu0 %vm14072_vm9, %v18041_v13  ;;  %vm10138_vm2 = vmpackc.low %vm253_vm8, %vm18069_vm7 }
  0x1e   : > { %18161 = vst [vmem:[#allocation12_spill] sm:$0xff] %v18160_v21  ;;  %12115 = vmatprep.subr.msk.bf16.mxu0 %vm14086_vm14, %v18041_v13  ;;  %vm10140_vm4 = vmpackc.low %vm255_vm11, %vm254_vm6  ;;  %vm18164_vm6 = vcmask 654336  }
  0x1f   : > { %vm14106_vm0 = vmpackc.low %vm257_vm1, %vm256_vm15  ;;  %12136 = vmatpush3.bf16.msk.msra.mxu1 %vm14042_vm12, %v18041_v13  ;;  %vm830_vm1 = vcmask 490496  }
  0x20   : > { %12137 = vmatprep.subr.msk.bf16.mxu1 %vm14050_vm13, %v18041_v13  ;;  %vm18165_vm12 = vmmov %vm18164_vm6 }
  0x21   : > { %12116 = vmatpush3.bf16.msk.msra.mxu0 %vm14086_vm14, %v18041_v13  ;;  %vm18167_vm8 = vmmov %vm18164_vm6 }
  0x22   : > { %12117 = vmatprep.subr.msk.bf16.mxu0 %vm10138_vm2, %v18041_v13 }
  0x23   : > { %12138 = vmatpush3.bf16.msk.msra.mxu1 %vm14050_vm13, %v18041_v13  ;;  %vm18166_vm13 = vmmov %vm18164_vm6 }
  0x24   : > { %12139 = vmatprep.subr.msk.bf16.mxu1 %vm14062_vm3, %v18041_v13 }
  0x25   : > { %12118 = vmatpush3.bf16.msk.msra.mxu0 %vm10138_vm2, %v18041_v13  ;;  %vm1986_vm2 = vcmp.eq.s32.totalorder %v13970_v3, %v14153_v27 }
  0x26   : > { %12119 = vmatprep.subr.msk.bf16.mxu0 %vm10140_vm4, %v18041_v13 }
  0x27   : > { %12140 = vmatpush3.bf16.msk.msra.mxu1 %vm14062_vm3, %v18041_v13  ;;  %vm18168_vm3 = vmmov %vm18164_vm6 }
  0x28   : > { %vm18169_vm11 = vmmov %vm18168_vm3 }
  0x29   : > { %12120 = vmatpush3.bf16.msk.msra.mxu0 %vm10140_vm4, %v18041_v13  ;;  %vm18170_vm15 = vmmov %vm18168_vm3  ;;  %vm1987_vm4 = vcmp.eq.s32.totalorder %v13975_v4, %v14153_v27 }
  0x2a   : > { %12121 = vmatprep.subr.msk.bf16.mxu0 %vm14106_vm0, %v18041_v13  ;;  %12142 = vmatmul.mubr.msk.bf16.vlgmr.msra.gmra.mrb[0].mxu1 %vm18164_vm6, %v13387_v23  ;;  %vm1988_vm6 = vcmp.eq.s32.totalorder %v13978_v5, %v14153_v27 }
  0x2b   : > { %12145 = vmatprep.mubr.msk.bf16.mxu1 %vm18165_vm12, %v13388_v24 }
  0x2d   : > { %12122 = vmatpush3.bf16.msk.msra.mxu0 %vm14106_vm0, %v18041_v13  ;;  %vm1985_vm0 = vcmp.eq.s32.totalorder %v13963_v1, %v14153_v27 }
  0x2e   : > { %vm14163_vm12 = vmpackc.low %vm1986_vm2, %vm1985_vm0  ;;  %vm1992_vm0 = vcmp.eq.s32.totalorder %v13991_v9, %v14153_v27 }
  0x2f   : > { %v18173_v28 = vsel %vm14163_vm12, 4294967295, %v18172_v28  ;;  %12325 = vmatprep.subr.msk.bf16.mxu1 %vm14163_vm12, %v18041_v13 }
  0x30   : > { %12124 = vmatmul.mubr.msk.bf16.vlgmr.msra.gmra.mrb[0].mxu0 %vm18166_vm13, %v13387_v23  ;;  %18174 = vst [vmem:[#allocation14_spill] sm:$0xff] %v18173_v28  ;;  %vm14170_vm13 = vmpackc.low %vm1988_vm6, %vm1987_vm4  ;;  %12326 = vmatpush3.bf16.msk.msra.mxu1 %vm14163_vm12, %v18041_v13  ;;  %vm1993_vm4 = vcmp.eq.s32.totalorder %v14005_v10, %v14153_v27  ;;  %vm1994_vm6 = vcmp.eq.s32.totalorder %v14028_v15, %v14153_v27  ;;  %v13402_v23 = vld [vmem:[%s18030_s1 + $0x1a0] sm:$0xff]  }
  0x31   : > { %12127 = vmatprep.mubr.msk.bf16.mxu0 %vm18167_vm8, %v13388_v24  ;;  %v18176_v29 = vsel %vm14170_vm13, 4294967295, %v18175_v29  ;;  %12327 = vmatprep.subr.msk.bf16.mxu1 %vm14170_vm13, %v18041_v13  ;;  %vm18037_vm8 = vcmp.eq.s32.totalorder %v13982_v6, %v14153_v27  ;;  %v13403_v24 = vld [vmem:[%s18030_s1 + $0x1a8] sm:$0xff]  }
  0x32   : > { %12146 = vmatmul.mubr.msk.bf16.gmra.mrb[4].mxu1 %vm18168_vm3, %v13389_v25  ;;  %18177 = vst [vmem:[#allocation15_spill] sm:$0xff] %v18176_v29  ;;  %vm1990_vm3 = vcmp.eq.s32.totalorder %v13985_v7, %v14153_v27 }
  0x33   : > { %12335 = vmatprep.mubr.msk.bf16.mxu1 %vm18169_vm11, %v13386_v11  ;;  %vm10406_vm11 = vmpackc.low %vm1990_vm3, %vm18037_vm8  ;;  %vm18178_vm8 = vcmask 654336   ;;  %v13397_v11 = vld [vmem:[%s18030_s1 + $0x178] sm:$0xff]  }
  0x34   : > { %12328 = vmatpush3.bf16.msk.msra.mxu1 %vm14170_vm13, %v18041_v13  ;;  %vm10410_vm3 = vmpackc.low %vm1994_vm6, %vm1993_vm4 }
  0x35   : > { %12329 = vmatprep.subr.msk.bf16.mxu1 %vm10406_vm11, %v18041_v13 }
  0x38   : > { %12128 = vmatmul.mubr.msk.bf16.gmra.mrb[4].mxu0 %vm18170_vm15, %v13389_v25  ;;  %vm1991_vm15 = vcmp.eq.s32.totalorder %v13988_v8, %v14153_v27  ;;  %12330 = vmatpush3.bf16.msk.msra.mxu1 %vm10406_vm11, %v18041_v13  ;;  %vm18179_vm11 = vmmov %vm18178_vm8  ;;  %v13404_v25 = vld [vmem:[%s18030_s1 + $0x1b0] sm:$0xff]  }
  0x39   : > { %12157 = vmatprep.mubr.msk.bf16.mxu0 %vm830_vm1, %v13390_v26  ;;  %vm10408_vm2 = vmpackc.low %vm1992_vm0, %vm1991_vm15  ;;  %v13405_v26 = vld [vmem:[%s18030_s1 + $0x1b8] sm:$0xff]  }
  0x3a   : > { %12331 = vmatprep.subr.msk.bf16.mxu1 %vm10408_vm2, %v18041_v13  ;;  %vm18180_vm15 = vmmov %vm18178_vm8 }
  0x3c   : > { %12332 = vmatpush3.bf16.msk.msra.mxu1 %vm10408_vm2, %v18041_v13 }
  0x3d   : > { %12333 = vmatprep.subr.msk.bf16.mxu1 %vm10410_vm3, %v18041_v13 }
  0x40   : > { %12334 = vmatpush3.bf16.msk.msra.mxu1 %vm10410_vm3, %v18041_v13 }
  0x43   : > { %12336 = vmatmul.mubr.msk.bf16.vlgmr.msra.gmra.mrb[8].mxu1 %vm18178_vm8, %v13910_v30  ;;  %vm951_vm8 = vcmask 1045504   ;;  %v13406_v30 = vld [vmem:[%s18030_s1 + $0x1c0] sm:$0xff]  }
  0x44   : > { %12339 = vmatprep.mubr.msk.bf16.mxu1 %vm18179_vm11, %v13911_v31  ;;  %v13407_v31 = vld [vmem:[%s18030_s1 + $0x1c8] sm:$0xff]  }
  0x4b   : > { %12340 = vmatmul.mubr.msk.bf16.gmra.mrb[12].mxu1 %vm18180_vm15, %v13912_v32  ;;  %v13408_v32 = vld [vmem:[%s18030_s1 + $0x1d0] sm:$0xff]  }
  0xfd   : > { %v12143_v33 = vpop.f32.mrb[0].mxu1 }
  0xfe   : > { %v514_v34 = vpop.f32.mrb[1].mxu1 }
  0xff   : > { %v12144_v35 = vpop.f32.mrb[2].mxu1 }
 0x100   : > { %v546_v36 = vpack.c.bf16 %v12144_v35, %v12143_v33  ;;  %v517_v37 = vpop.f32.mrb[3].mxu1  ;;  %v13409_v33 = vld [vmem:[%s18030_s1 + $0x1d8] sm:$0xff]   ;;  %v13411_v35 = vld [vmem:[%s18030_s1 + $0x1e8] sm:$0xff]  }
 0x101   : > { %v545_v38 = vpack.c.bf16 %v517_v37, %v514_v34  ;;  %v13410_v34 = vld [vmem:[%s18030_s1 + $0x1e0] sm:$0xff]   ;;  %v13413_v37 = vld [vmem:[%s18030_s1 + $0x1f8] sm:$0xff]  }
 0x103   : > { %12149 = vmatprep.subr.bf16.mxu0 %v545_v38  ;;  %v12125_v48 = vpop.f32.mrb[0].mxu0 }
 0x104   : > { %12150 = vmatpush3.bf16.msra.mxu0 %v545_v38  ;;  %v340_v49 = vpop.f32.mrb[1].mxu0  ;;  %v13414_v38 = vld [vmem:[%s18030_s1 + $0x200] sm:$0xff]  }
 0x105   : > { %v12147_v39 = vpop.f32.mrb[4].mxu1  ;;  %12151 = vmatprep.subr.bf16.mxu0 %v546_v36  ;;  %v12126_v50 = vpop.f32.mrb[2].mxu0 }
 0x106   : > { %v530_v40 = vpop.f32.mrb[5].mxu1  ;;  %v372_v51 = vpack.c.bf16 %v12126_v50, %v12125_v48  ;;  %v343_v52 = vpop.f32.mrb[3].mxu0  ;;  %v13424_v48 = vld [vmem:[%s18030_s1 + $0x250] sm:$0xff]   ;;  %v13426_v50 = vld [vmem:[%s18030_s1 + $0x260] sm:$0xff]  }
 0x107   : > { %v12148_v41 = vpop.f32.mrb[6].mxu1  ;;  %v371_v54 = vpack.c.bf16 %v343_v52, %v340_v49  ;;  %v13425_v49 = vld [vmem:[%s18030_s1 + $0x258] sm:$0xff]   ;;  %v13428_v52 = vld [vmem:[%s18030_s1 + $0x270] sm:$0xff]  }
 0x108   : > { %v548_v42 = vpack.c.bf16 %v12148_v41, %v12147_v39  ;;  %v533_v43 = vpop.f32.mrb[7].mxu1  ;;  %12152 = vmatpush3.bf16.msra.mxu0 %v546_v36  ;;  %v13412_v36 = vld [vmem:[%s18030_s1 + $0x1f0] sm:$0xff]   ;;  %v13415_v39 = vld [vmem:[%s18030_s1 + $0x208] sm:$0xff]   ;;  %v13417_v41 = vld [vmem:[%s18030_s1 + $0x218] sm:$0xff]  }
 0x109   : > { %v547_v44 = vpack.c.bf16 %v533_v43, %v530_v40  ;;  %v13416_v40 = vld [vmem:[%s18030_s1 + $0x210] sm:$0xff]   ;;  %v13419_v43 = vld [vmem:[%s18030_s1 + $0x228] sm:$0xff]  }
 0x10a   : > { %v953_v45 = vsel %vm951_vm8, %v548_v42, 0 }
 0x10b   : > { %12153 = vmatprep.subr.bf16.mxu0 %v547_v44  ;;  %v12129_v56 = vpop.f32.mrb[4].mxu0 }
 0x10c   : > { %12154 = vmatpush3.bf16.msra.mxu0 %v547_v44  ;;  %v356_v57 = vpop.f32.mrb[5].mxu0  ;;  %v13420_v44 = vld [vmem:[%s18030_s1 + $0x230] sm:$0xff]  }
 0x10d   : > { %13363 = vmatprep.subr.msk.bf16.mxu0 %vm951_vm8, %v548_v42  ;;  %v12130_v58 = vpop.f32.mrb[6].mxu0  ;;  %v13418_v42 = vld [vmem:[%s18030_s1 + $0x220] sm:$0xff]  }
 0x10e   : > { %v374_v59 = vpack.c.bf16 %v12130_v58, %v12129_v56  ;;  %v359_v60 = vpop.f32.mrb[7].mxu0  ;;  %v13432_v56 = vld [vmem:[%s18030_s1 + $0x10] sm:$0xff]  }
 0x10f   : > { %v373_v62 = vpack.c.bf16 %v359_v60, %v356_v57 }
 0x110   : > { %12156 = vmatpush3.bf16.msra.mxu0 %v953_v45  ;;  %v1629_v0 = vsel %vm951_vm8, %v374_v59, 0  ;;  %v13421_v45 = vld [vmem:[%s18030_s1 + $0x238] sm:$0xff]  }
 0x111   : > { %12237 = vmatprep.subr.bf16.mxu0 %v371_v54 }
 0x113   : > { %12158 = vmatmul.mubr.msk.bf16.vlgmr.msra.gmra.mrb[8].mxu0 %vm830_vm1, %v13391_v46  ;;  %v13422_v46 = vld [vmem:[%s18030_s1 + $0x240] sm:$0xff]  }
 0x114   : > { %12161 = vmatprep.mubr.msk.bf16.mxu0 %vm830_vm1, %v13392_v47  ;;  %12238 = vmatpush3.bf16.msra.mxu0 %v371_v54  ;;  %v13423_v47 = vld [vmem:[%s18030_s1 + $0x248] sm:$0xff]   ;;  %v13430_v54 = vld [vmem:[%s18030_s1] sm:$0xff]  }
 0x115   : > { %12239 = vmatprep.subr.bf16.mxu0 %v372_v51 }
 0x116   : > { %v12337_v57 = vpop.f32.mrb[8].mxu1 }
 0x117   : > { %v2044_v58 = vpop.f32.mrb[9].mxu1 }
 0x118   : > { %12240 = vmatpush3.bf16.msra.mxu0 %v372_v51  ;;  %v13427_v51 = vld [vmem:[%s18030_s1 + $0x268] sm:$0xff]   ;;  %v12338_v60 = vpop.f32.mrb[10].mxu1 }
 0x119   : > { %12241 = vmatprep.subr.bf16.mxu0 %v373_v62 }
 0x11b   : > { %12162 = vmatmul.mubr.msk.bf16.gmra.mrb[12].mxu0 %vm830_vm1, %v13393_v53  ;;  %v13429_v53 = vld [vmem:[%s18030_s1 + $0x278] sm:$0xff]  }
 0x11c   : > { %12165 = vmatprep.mubr.msk.bf16.mxu0 %vm830_vm1, %v13394_v55  ;;  %12242 = vmatpush3.bf16.msra.mxu0 %v373_v62  ;;  %v13431_v55 = vld [vmem:[%s18030_s1 + $0x8] sm:$0xff]   ;;  %v2076_v62 = vpack.c.bf16 %v12338_v60, %v12337_v57  ;;  %v13456_v57 = vld [vmem:[%s18030_s1 + $0xd0] sm:$0xff]  }
 0x11d   : > { %13364 = vmatprep.subr.msk.bf16.mxu0 %vm951_vm8, %v374_v59  ;;  %v13433_v59 = vld [vmem:[%s18030_s1 + $0x18] sm:$0xff]   ;;  %v2965_v60 = vld [vmem:[%s18031_s2 + $0x48] sm:$0xff] }
 0x120   : > { %12244 = vmatpush3.bf16.msra.mxu0 %v1629_v0 }
 0x123   : > { %12166 = vmatmul.mubr.msk.bf16.gmra.mrb[16].mxu0 %vm830_vm1, %v13395_v61  ;;  %v13434_v61 = vld [vmem:[%s18030_s1 + $0x20] sm:$0xff]  }
 0x124   : > { %12169 = vmatprep.mubr.msk.bf16.mxu0 %vm830_vm1, %v13396_v63  ;;  %v2047_v63 = vpop.f32.mrb[11].mxu1 }
 0x125   : > { %v2075_v0 = vpack.c.bf16 %v2047_v63, %v2044_v58  ;;  %v2963_v58 = vld [vmem:[%s18031_s2 + $0x38] sm:$0xff]  ;;  %v13458_v63 = vld [vmem:[%s18030_s1 + $0xe0] sm:$0xff]  }
 0x127   : > { %12343 = vmatprep.subr.bf16.mxu0 %v2075_v0 }
 0x12b   : > { %12170 = vmatmul.mubr.msk.bf16.gmra.mrb[20].mxu0 %vm830_vm1, %v13397_v11  ;;  %v12341_v11 = vpop.f32.mrb[12].mxu1 }
 0x12c   : > { %12173 = vmatprep.mubr.msk.bf16.mxu0 %vm830_vm1, %v13398_v17  ;;  %v2060_v17 = vpop.f32.mrb[13].mxu1 }
 0x133   : > { %12174 = vmatmul.mubr.msk.bf16.gmra.mrb[24].mxu0 %vm830_vm1, %v13399_v18  ;;  %v13435_v18 = vld [vmem:[%s18030_s1 + $0x28] sm:$0xff]  }
 0x134   : > { %12177 = vmatprep.mubr.msk.bf16.mxu0 %vm830_vm1, %v13400_v19  ;;  %v12342_v19 = vpop.f32.mrb[14].mxu1 }
 0x13b   : > { %12178 = vmatmul.mubr.msk.bf16.gmra.mrb[28].mxu0 %vm830_vm1, %v13401_v22  ;;  %v13436_v22 = vld [vmem:[%s18030_s1 + $0x30] sm:$0xff]  }
 0x13c   : > { %12181 = vmatprep.mubr.msk.bf16.mxu0 %vm830_vm1, %v13402_v23  ;;  %v2078_v23 = vpack.c.bf16 %v12342_v19, %v12341_v11  ;;  %v2968_v11 = vld [vmem:[%s18031_s2 + $0x60] sm:$0xff]  ;;  %v13459_v19 = vld [vmem:[%s18030_s1 + $0xe8] sm:$0xff]  }
 0x143   : > { %12182 = vmatmul.mubr.msk.bf16.gmra.mrb[32].mxu0 %vm830_vm1, %v13403_v24  ;;  %v2063_v24 = vpop.f32.mrb[15].mxu1 }
 0x144   : > { %12185 = vmatprep.mubr.msk.bf16.mxu0 %vm830_vm1, %v13404_v25  ;;  %v2077_v25 = vpack.c.bf16 %v2063_v24, %v2060_v17  ;;  %v2969_v17 = vld [vmem:[%s18031_s2 + $0x68] sm:$0xff]  ;;  %v2972_v24 = vld [vmem:[%s18031_s2 + $0x80] sm:$0xff] }
 0x14b   : > { %12186 = vmatmul.mubr.msk.bf16.gmra.mrb[36].mxu0 %vm830_vm1, %v13405_v26  ;;  %v2481_v26 = vsel %vm951_vm8, %v2078_v23, 0 }
 0x14c   : > { %12189 = vmatprep.mubr.msk.bf16.mxu0 %vm830_vm1, %v13406_v30  ;;  %v13437_v30 = vld [vmem:[%s18030_s1 + $0x38] sm:$0xff]  }
 0x153   : > { %12190 = vmatmul.mubr.msk.bf16.gmra.mrb[40].mxu0 %vm830_vm1, %v13407_v31  ;;  %v13438_v31 = vld [vmem:[%s18030_s1 + $0x40] sm:$0xff]  }
 0x154   : > { %12193 = vmatprep.mubr.msk.bf16.mxu0 %vm830_vm1, %v13408_v32  ;;  %v13439_v32 = vld [vmem:[%s18030_s1 + $0x48] sm:$0xff]  }
 0x15b   : > { %12194 = vmatmul.mubr.msk.bf16.gmra.mrb[44].mxu0 %vm830_vm1, %v13409_v33  ;;  %v13440_v33 = vld [vmem:[%s18030_s1 + $0x50] sm:$0xff]  }
 0x15c   : > { %12197 = vmatprep.mubr.msk.bf16.mxu0 %vm830_vm1, %v13410_v34  ;;  %v13441_v34 = vld [vmem:[%s18030_s1 + $0x58] sm:$0xff]  }
 0x163   : > { %12198 = vmatmul.mubr.msk.bf16.gmra.mrb[48].mxu0 %vm830_vm1, %v13411_v35  ;;  %v13442_v35 = vld [vmem:[%s18030_s1 + $0x60] sm:$0xff]  }
 0x164   : > { %12201 = vmatprep.mubr.msk.bf16.mxu0 %vm830_vm1, %v13412_v36  ;;  %v13443_v36 = vld [vmem:[%s18030_s1 + $0x68] sm:$0xff]  }
 0x16b   : > { %12202 = vmatmul.mubr.msk.bf16.gmra.mrb[52].mxu0 %vm830_vm1, %v13413_v37  ;;  %v13444_v37 = vld [vmem:[%s18030_s1 + $0x70] sm:$0xff]  }
 0x16c   : > { %12205 = vmatprep.mubr.msk.bf16.mxu0 %vm830_vm1, %v13414_v38  ;;  %v13445_v38 = vld [vmem:[%s18030_s1 + $0x78] sm:$0xff]  }
 0x173   : > { %12206 = vmatmul.mubr.msk.bf16.gmra.mrb[56].mxu0 %vm830_vm1, %v13415_v39  ;;  %v13446_v39 = vld [vmem:[%s18030_s1 + $0x80] sm:$0xff]  }
 0x174   : > { %12209 = vmatprep.mubr.msk.bf16.mxu0 %vm830_vm1, %v13416_v40  ;;  %v13447_v40 = vld [vmem:[%s18030_s1 + $0x88] sm:$0xff]  }
 0x17b   : > { %12210 = vmatmul.mubr.msk.bf16.gmra.mrb[60].mxu0 %vm830_vm1, %v13417_v41  ;;  %v13448_v41 = vld [vmem:[%s18030_s1 + $0x90] sm:$0xff]  }
 0x17c   : > { %12213 = vmatprep.mubr.msk.bf16.mxu0 %vm830_vm1, %v13418_v42  ;;  %v13449_v42 = vld [vmem:[%s18030_s1 + $0x98] sm:$0xff]  }
 0x183   : > { %12214 = vmatmul.mubr.msk.bf16.gmra.mrb[64].mxu0 %vm830_vm1, %v13419_v43  ;;  %v13450_v43 = vld [vmem:[%s18030_s1 + $0xa0] sm:$0xff]  }
 0x184   : > { %12217 = vmatprep.mubr.msk.bf16.mxu0 %vm830_vm1, %v13420_v44  ;;  %v18039_v44 = vmov 0  }
 0x185   : > { %13384 = vset.pattern.permute.xlu0 %v18039_v44  ;;  %13385 = vset.pattern.permute.xlu1 %v18039_v44 }
 0x18b   : > { %12218 = vmatmul.mubr.msk.bf16.gmra.mrb[68].mxu0 %vm830_vm1, %v13421_v45  ;;  %v13451_v45 = vld [vmem:[%s18030_s1 + $0xa8] sm:$0xff]  }
 0x18c   : > { %12221 = vmatprep.mubr.msk.bf16.mxu0 %vm830_vm1, %v13422_v46  ;;  %v13452_v46 = vld [vmem:[%s18030_s1 + $0xb0] sm:$0xff]  }
 0x193   : > { %12222 = vmatmul.mubr.msk.bf16.gmra.mrb[72].mxu0 %vm830_vm1, %v13423_v47  ;;  %v2956_v47 = vld [vmem:[%s18031_s2] sm:$0xff] }
 0x194   : > { %12225 = vmatprep.mubr.msk.bf16.mxu0 %vm830_vm1, %v13424_v48  ;;  %v2958_v48 = vld [vmem:[%s18031_s2 + $0x10] sm:$0xff]  ;;  %2998 = vperm.xlu0 %13384, %v2956_v47   ;;  %v2985_v47 = vld [vmem:[%s18031_s2 + $0xe8] sm:$0xff] }
 0x195   : > { %3008 = vperm.xlu1 %13385, %v2958_v48   ;;  %v2986_v48 = vld [vmem:[%s18031_s2 + $0xf0] sm:$0xff] }
 0x19b   : > { %12226 = vmatmul.mubr.msk.bf16.gmra.mrb[76].mxu0 %vm830_vm1, %v13425_v49  ;;  %v2957_v49 = vld [vmem:[%s18031_s2 + $0x8] sm:$0xff] }
 0x19c   : > { %12229 = vmatprep.mubr.msk.bf16.mxu0 %vm830_vm1, %v13426_v50  ;;  %v13453_v50 = vld [vmem:[%s18030_s1 + $0xb8] sm:$0xff]   ;;  %3003 = vperm.xlu0 %13384, %v2957_v49   ;;  %v13467_v49 = vld [vmem:[%s18030_s1 + $0x128] sm:$0xff]  }
 0x1a3   : > { %12230 = vmatmul.mubr.msk.bf16.gmra.mrb[80].mxu0 %vm830_vm1, %v13427_v51  ;;  %v13454_v51 = vld [vmem:[%s18030_s1 + $0xc0] sm:$0xff]  }
 0x1a4   : > { %12233 = vmatprep.mubr.msk.bf16.mxu0 %vm830_vm1, %v13428_v52  ;;  %v2959_v52 = vld [vmem:[%s18031_s2 + $0x18] sm:$0xff] }
 0x1a5   : > { %3013 = vperm.xlu1 %13385, %v2959_v52   ;;  %v2988_v52 = vld [vmem:[%s18031_s2 + $0x100] sm:$0xff] }
 0x1ab   : > { %12234 = vmatmul.mubr.msk.bf16.gmra.mrb[84].mxu0 %vm830_vm1, %v13429_v53  ;;  %v2960_v53 = vld [vmem:[%s18031_s2 + $0x20] sm:$0xff] }
 0x1ac   : > { %12245 = vmatprep.mubr.msk.bf16.mxu0 %vm830_vm1, %v13430_v54  ;;  %3018 = vperm.xlu0 %13384, %v2960_v53   ;;  %v2961_v54 = vld [vmem:[%s18031_s2 + $0x28] sm:$0xff] }
 0x1ad   : > { %3023 = vperm.xlu1 %13385, %v2961_v54   ;;  %v2989_v53 = vld [vmem:[%s18031_s2 + $0x108] sm:$0xff]  ;;  %v2990_v54 = vld [vmem:[%s18031_s2 + $0x110] sm:$0xff] }
 0x1b1   : > { %3033 = vperm.xlu1 %13385, %v2963_v58   ;;  %v2992_v58 = vld [vmem:[%s18031_s2 + $0x120] sm:$0xff] }
 0x1b3   : > { %12246 = vmatmul.mubr.msk.bf16.vlgmr.msra.gmra.mrb[8].mxu0 %vm830_vm1, %v13431_v55  ;;  %v2962_v55 = vld [vmem:[%s18031_s2 + $0x30] sm:$0xff] }
 0x1b4   : > { %12249 = vmatprep.mubr.msk.bf16.mxu0 %vm830_vm1, %v13432_v56  ;;  %12344 = vmatpush3.bf16.msra.mxu0 %v2075_v0  ;;  %v13455_v56 = vld [vmem:[%s18030_s1 + $0xc8] sm:$0xff]   ;;  %v2967_v0 = vld [vmem:[%s18031_s2 + $0x58] sm:$0xff] }
 0x1b5   : > { %12345 = vmatprep.subr.bf16.mxu0 %v2076_v62  ;;  %3028 = vperm.xlu0 %13384, %v2962_v55   ;;  %v13469_v55 = vld [vmem:[%s18030_s1 + $0x138] sm:$0xff]  }
 0x1b6   : > { %3043 = vperm.xlu1 %13385, %v2965_v60   ;;  %v2994_v60 = vld [vmem:[%s18031_s2 + $0x130] sm:$0xff] }
 0x1b8   : > { %12346 = vmatpush3.bf16.msra.mxu0 %v2076_v62  ;;  %v13457_v62 = vld [vmem:[%s18030_s1 + $0xd8] sm:$0xff]  }
 0x1b9   : > { %12347 = vmatprep.subr.bf16.mxu0 %v2077_v25 }
 0x1ba   : > { %3053 = vperm.xlu1 %13385, %v2967_v0   ;;  %v9476_v0 = vld [vmem:[%s18033_s4] sm:$0xff] }
 0x1bb   : > { %12250 = vmatmul.mubr.msk.bf16.gmra.mrb[12].mxu0 %vm830_vm1, %v13433_v59  ;;  %v2964_v59 = vld [vmem:[%s18031_s2 + $0x40] sm:$0xff] }
 0x1bc   : > { %12253 = vmatprep.mubr.msk.bf16.mxu0 %vm830_vm1, %v13434_v61  ;;  %12348 = vmatpush3.bf16.msra.mxu0 %v2077_v25  ;;  %v2966_v61 = vld [vmem:[%s18031_s2 + $0x50] sm:$0xff]  ;;  %v2973_v25 = vld [vmem:[%s18031_s2 + $0x88] sm:$0xff] }
 0x1bd   : > { %13365 = vmatprep.subr.msk.bf16.mxu0 %vm951_vm8, %v2078_v23  ;;  %3038 = vperm.xlu0 %13384, %v2964_v59   ;;  %v2971_v23 = vld [vmem:[%s18031_s2 + $0x78] sm:$0xff]  ;;  %v2993_v59 = vld [vmem:[%s18031_s2 + $0x128] sm:$0xff] }
 0x1be   : > { %3063 = vperm.xlu1 %13385, %v2969_v17   ;;  %v9478_v17 = vld [vmem:[%s18033_s4 + $0x10] sm:$0xff] }
 0x1c0   : > { %12350 = vmatpush3.bf16.msra.mxu0 %v2481_v26  ;;  %v2974_v26 = vld [vmem:[%s18031_s2 + $0x90] sm:$0xff] }
 0x1c1   : > { %3048 = vperm.xlu0 %13384, %v2966_v61   ;;  %v13471_v61 = vld [vmem:[%s18030_s1 + $0x288] sm:$0xff]  }
 0x1c2   : > { %3073 = vperm.xlu1 %13385, %v2971_v23   ;;  %v9480_v23 = vld [vmem:[%s18033_s4 + $0x20] sm:$0xff] }
 0x1c3   : > { %12254 = vmatmul.mubr.msk.bf16.gmra.mrb[16].mxu0 %vm830_vm1, %v13435_v18  ;;  %v2970_v18 = vld [vmem:[%s18031_s2 + $0x70] sm:$0xff] }
 0x1c4   : > { %12257 = vmatprep.mubr.msk.bf16.mxu0 %vm830_vm1, %v13436_v22  ;;  %v13460_v22 = vld [vmem:[%s18030_s1 + $0xf0] sm:$0xff]  }
 0x1c5   : > { %3058 = vperm.xlu0 %13384, %v2968_v11   ;;  %v9477_v11 = vld [vmem:[%s18033_s4 + $0x8] sm:$0xff] }
 0x1c6   : > { %3083 = vperm.xlu1 %13385, %v2973_v25   ;;  %v9482_v25 = vld [vmem:[%s18033_s4 + $0x30] sm:$0xff] }
 0x1c9   : > { %3068 = vperm.xlu0 %13384, %v2970_v18   ;;  %v13473_v18 = vld [vmem:[%s18030_s1 + $0x298] sm:$0xff]  }
 0x1cb   : > { %12258 = vmatmul.mubr.msk.bf16.gmra.mrb[20].mxu0 %vm830_vm1, %v13437_v30  ;;  %v13461_v30 = vld [vmem:[%s18030_s1 + $0xf8] sm:$0xff]  }
 0x1cc   : > { %12261 = vmatprep.mubr.msk.bf16.mxu0 %vm830_vm1, %v13438_v31  ;;  %v13462_v31 = vld [vmem:[%s18030_s1 + $0x100] sm:$0xff]  }
 0x1cd   : > { %3078 = vperm.xlu0 %13384, %v2972_v24   ;;  %v9481_v24 = vld [vmem:[%s18033_s4 + $0x28] sm:$0xff] }
 0x1d1   : > { %3088 = vperm.xlu0 %13384, %v2974_v26   ;;  %v13475_v26 = vld [vmem:[%s18030_s1 + $0x2a8] sm:$0xff]  }
 0x1d3   : > { %12262 = vmatmul.mubr.msk.bf16.gmra.mrb[24].mxu0 %vm830_vm1, %v13439_v32  ;;  %v2975_v32 = vld [vmem:[%s18031_s2 + $0x98] sm:$0xff] }
 0x1d4   : > { %12265 = vmatprep.mubr.msk.bf16.mxu0 %vm830_vm1, %v13440_v33  ;;  %v2976_v33 = vld [vmem:[%s18031_s2 + $0xa0] sm:$0xff]  ;;  %3093 = vperm.xlu1 %13385, %v2975_v32  }
 0x1d5   : > { %3098 = vperm.xlu0 %13384, %v2976_v33   ;;  %v9484_v32 = vld [vmem:[%s18033_s4 + $0x40] sm:$0xff]  ;;  %v9485_v33 = vld [vmem:[%s18033_s4 + $0x48] sm:$0xff] }
 0x1db   : > { %12266 = vmatmul.mubr.msk.bf16.gmra.mrb[28].mxu0 %vm830_vm1, %v13441_v34  ;;  %v2977_v34 = vld [vmem:[%s18031_s2 + $0xa8] sm:$0xff] }
 0x1dc   : > { %12269 = vmatprep.mubr.msk.bf16.mxu0 %vm830_vm1, %v13442_v35  ;;  %v2978_v35 = vld [vmem:[%s18031_s2 + $0xb0] sm:$0xff]  ;;  %3103 = vperm.xlu1 %13385, %v2977_v34  }
 0x1dd   : > { %3108 = vperm.xlu0 %13384, %v2978_v35   ;;  %v9486_v34 = vld [vmem:[%s18033_s4 + $0x50] sm:$0xff]  ;;  %v13477_v35 = vld [vmem:[%s18030_s1 + $0x2b8] sm:$0xff]  }
 0x1e3   : > { %12270 = vmatmul.mubr.msk.bf16.gmra.mrb[32].mxu0 %vm830_vm1, %v13443_v36  ;;  %v13463_v36 = vld [vmem:[%s18030_s1 + $0x108] sm:$0xff]  }
 0x1e4   : > { %12273 = vmatprep.mubr.msk.bf16.mxu0 %vm830_vm1, %v13444_v37  ;;  %v13464_v37 = vld [vmem:[%s18030_s1 + $0x110] sm:$0xff]  }
 0x1eb   : > { %12274 = vmatmul.mubr.msk.bf16.gmra.mrb[36].mxu0 %vm830_vm1, %v13445_v38  ;;  %v2979_v38 = vld [vmem:[%s18031_s2 + $0xb8] sm:$0xff] }
 0x1ec   : > { %12277 = vmatprep.mubr.msk.bf16.mxu0 %vm830_vm1, %v13446_v39  ;;  %v2980_v39 = vld [vmem:[%s18031_s2 + $0xc0] sm:$0xff]  ;;  %3113 = vperm.xlu1 %13385, %v2979_v38  }
 0x1ed   : > { %3118 = vperm.xlu0 %13384, %v2980_v39   ;;  %v9488_v38 = vld [vmem:[%s18033_s4 + $0x60] sm:$0xff]  ;;  %v9489_v39 = vld [vmem:[%s18033_s4 + $0x68] sm:$0xff] }
 0x1f3   : > { %12278 = vmatmul.mubr.msk.bf16.gmra.mrb[40].mxu0 %vm830_vm1, %v13447_v40  ;;  %v2981_v40 = vld [vmem:[%s18031_s2 + $0xc8] sm:$0xff] }
 0x1f4   : > { %12281 = vmatprep.mubr.msk.bf16.mxu0 %vm830_vm1, %v13448_v41  ;;  %v2982_v41 = vld [vmem:[%s18031_s2 + $0xd0] sm:$0xff]  ;;  %3123 = vperm.xlu1 %13385, %v2981_v40  }
 0x1f5   : > { %3128 = vperm.xlu0 %13384, %v2982_v41   ;;  %v9490_v40 = vld [vmem:[%s18033_s4 + $0x70] sm:$0xff]  ;;  %v13479_v41 = vld [vmem:[%s18030_s1 + $0x2c8] sm:$0xff]  }
 0x1fb   : > { %12282 = vmatmul.mubr.msk.bf16.gmra.mrb[44].mxu0 %vm830_vm1, %v13449_v42  ;;  %v13465_v42 = vld [vmem:[%s18030_s1 + $0x118] sm:$0xff]  }
 0x1fc   : > { %12285 = vmatprep.mubr.msk.bf16.mxu0 %vm830_vm1, %v13450_v43  ;;  %v13466_v43 = vld [vmem:[%s18030_s1 + $0x120] sm:$0xff]  }
 0x203   : > { %12286 = vmatmul.mubr.msk.bf16.gmra.mrb[48].mxu0 %vm830_vm1, %v13451_v45  ;;  %v2983_v45 = vld [vmem:[%s18031_s2 + $0xd8] sm:$0xff] }
 0x204   : > { %12289 = vmatprep.mubr.msk.bf16.mxu0 %vm830_vm1, %v13452_v46  ;;  %v2984_v46 = vld [vmem:[%s18031_s2 + $0xe0] sm:$0xff]  ;;  %3133 = vperm.xlu1 %13385, %v2983_v45  }
 0x205   : > { %3138 = vperm.xlu0 %13384, %v2984_v46   ;;  %v9492_v45 = vld [vmem:[%s18033_s4 + $0x80] sm:$0xff]  ;;  %v9493_v46 = vld [vmem:[%s18033_s4 + $0x88] sm:$0xff] }
 0x208   : > { %3143 = vperm.xlu1 %13385, %v2985_v47   ;;  %v9494_v47 = vld [vmem:[%s18033_s4 + $0x90] sm:$0xff] }
 0x209   : > { %3148 = vperm.xlu0 %13384, %v2986_v48   ;;  %v13481_v48 = vld [vmem:[%s18030_s1 + $0x2d8] sm:$0xff]  }
 0x20b   : > { %12290 = vmatmul.mubr.msk.bf16.gmra.mrb[52].mxu0 %vm830_vm1, %v13453_v50  ;;  %v13468_v50 = vld [vmem:[%s18030_s1 + $0x130] sm:$0xff]  }
 0x20c   : > { %12293 = vmatprep.mubr.msk.bf16.mxu0 %vm830_vm1, %v13454_v51  ;;  %v2987_v51 = vld [vmem:[%s18031_s2 + $0xf8] sm:$0xff] }
 0x20d   : > { %3153 = vperm.xlu1 %13385, %v2987_v51   ;;  %3158 = vperm.xlu0 %13384, %v2988_v52   ;;  %v13483_v51 = vld [vmem:[%s18030_s1 + $0x2e8] sm:$0xff]   ;;  %v13484_v52 = vld [vmem:[%s18030_s1 + $0x2f0] sm:$0xff]  }
 0x211   : > { %3163 = vperm.xlu1 %13385, %v2989_v53   ;;  %3168 = vperm.xlu0 %13384, %v2990_v54   ;;  %v13485_v53 = vld [vmem:[%s18030_s1 + $0x2f8] sm:$0xff]   ;;  %v13486_v54 = vld [vmem:[%s18030_s1 + $0x300] sm:$0xff]  }
 0x213   : > { %12294 = vmatmul.mubr.msk.bf16.gmra.mrb[56].mxu0 %vm830_vm1, %v13455_v56  ;;  %v13470_v56 = vld [vmem:[%s18030_s1 + $0x280] sm:$0xff]  }
 0x214   : > { %12297 = vmatprep.mubr.msk.bf16.mxu0 %vm830_vm1, %v13456_v57  ;;  %v2991_v57 = vld [vmem:[%s18031_s2 + $0x118] sm:$0xff] }
 0x215   : > { %3173 = vperm.xlu1 %13385, %v2991_v57   ;;  %3178 = vperm.xlu0 %13384, %v2992_v58   ;;  %v13489_v57 = vld [vmem:[%s18030_s1 + $0x318] sm:$0xff]   ;;  %v13490_v58 = vld [vmem:[%s18030_s1 + $0x320] sm:$0xff]  }
 0x219   : > { %3183 = vperm.xlu1 %13385, %v2993_v59   ;;  %3188 = vperm.xlu0 %13384, %v2994_v60   ;;  %v13491_v59 = vld [vmem:[%s18030_s1 + $0x328] sm:$0xff]   ;;  %v13492_v60 = vld [vmem:[%s18030_s1 + $0x330] sm:$0xff]  }
 0x21b   : > { %12298 = vmatmul.mubr.msk.bf16.gmra.mrb[60].mxu0 %vm830_vm1, %v13457_v62  ;;  %v13472_v62 = vld [vmem:[%s18030_s1 + $0x290] sm:$0xff]  }
 0x21c   : > { %12301 = vmatprep.mubr.msk.bf16.mxu0 %vm830_vm1, %v13458_v63  ;;  %v2995_v63 = vld [vmem:[%s18031_s2 + $0x138] sm:$0xff] }
 0x21d   : > { %3193 = vperm.xlu1 %13385, %v2995_v63   ;;  %9498 = vperm.xlu0 %13384, %v9476_v0   ;;  %v13495_v63 = vld [vmem:[%s18030_s1 + $0x348] sm:$0xff]   ;;  %v13496_v0 = vld [vmem:[%s18030_s1 + $0x350] sm:$0xff]  }
 0x221   : > { %9503 = vperm.xlu1 %13385, %v9477_v11   ;;  %9508 = vperm.xlu0 %13384, %v9478_v17   ;;  %v13497_v11 = vld [vmem:[%s18030_s1 + $0x358] sm:$0xff]   ;;  %v13498_v17 = vld [vmem:[%s18030_s1 + $0x360] sm:$0xff]  }
 0x223   : > { %12302 = vmatmul.mubr.msk.bf16.gmra.mrb[64].mxu0 %vm830_vm1, %v13459_v19  ;;  %v13474_v19 = vld [vmem:[%s18030_s1 + $0x2a0] sm:$0xff]  }
 0x224   : > { %12305 = vmatprep.mubr.msk.bf16.mxu0 %vm830_vm1, %v13460_v22  ;;  %v9479_v22 = vld [vmem:[%s18033_s4 + $0x18] sm:$0xff] }
 0x225   : > { %9513 = vperm.xlu1 %13385, %v9479_v22   ;;  %9518 = vperm.xlu0 %13384, %v9480_v23   ;;  %v13501_v22 = vld [vmem:[%s18030_s1 + $0x378] sm:$0xff]   ;;  %v13502_v23 = vld [vmem:[%s18030_s1 + $0x380] sm:$0xff]  }
 0x229   : > { %9523 = vperm.xlu1 %13385, %v9481_v24   ;;  %9528 = vperm.xlu0 %13384, %v9482_v25   ;;  %v13503_v24 = vld [vmem:[%s18030_s1 + $0x388] sm:$0xff]   ;;  %v13504_v25 = vld [vmem:[%s18030_s1 + $0x390] sm:$0xff]  }
 0x22b   : > { %12306 = vmatmul.mubr.msk.bf16.gmra.mrb[68].mxu0 %vm830_vm1, %v13461_v30  ;;  %v13476_v30 = vld [vmem:[%s18030_s1 + $0x2b0] sm:$0xff]  }
 0x22c   : > { %12309 = vmatprep.mubr.msk.bf16.mxu0 %vm830_vm1, %v13462_v31  ;;  %v9483_v31 = vld [vmem:[%s18033_s4 + $0x38] sm:$0xff] }
 0x22d   : > { %9533 = vperm.xlu1 %13385, %v9483_v31   ;;  %9538 = vperm.xlu0 %13384, %v9484_v32   ;;  %v13507_v31 = vld [vmem:[%s18030_s1 + $0x3a8] sm:$0xff]   ;;  %v13508_v32 = vld [vmem:[%s18030_s1 + $0x3b0] sm:$0xff]  }
 0x231   : > { %9543 = vperm.xlu1 %13385, %v9485_v33   ;;  %9548 = vperm.xlu0 %13384, %v9486_v34   ;;  %v14871_v33 = vmul.u32 2, %v13965_v2  ;;  %v13509_v34 = vld [vmem:[%s18030_s1 + $0x3b8] sm:$0xff]  }
 0x233   : > { %12310 = vmatmul.mubr.msk.bf16.gmra.mrb[72].mxu0 %vm830_vm1, %v13463_v36  ;;  %v13478_v36 = vld [vmem:[%s18030_s1 + $0x2c0] sm:$0xff]   ;;  %18181 = vst [vmem:[#allocation16_spill] sm:$0xff] %v14871_v33  ;;  %vm3237_vm0 = vcmp.eq.s32.totalorder %v13963_v1, %v14871_v33  ;;  %vm3238_vm2 = vcmp.eq.s32.totalorder %v13970_v3, %v14871_v33  ;;  %vm3239_vm6 = vcmp.eq.s32.totalorder %v13975_v4, %v14871_v33 }
 0x234   : > { %12313 = vmatprep.mubr.msk.bf16.mxu0 %vm830_vm1, %v13464_v37  ;;  %v9487_v37 = vld [vmem:[%s18033_s4 + $0x58] sm:$0xff]  ;;  %vm14880_vm4 = vmpackc.low %vm3238_vm2, %vm3237_vm0  ;;  %vm3240_vm3 = vcmp.eq.s32.totalorder %v13978_v5, %v14871_v33  ;;  %vm3242_vm15 = vcmp.eq.s32.totalorder %v13985_v7, %v14871_v33  ;;  %vm3243_vm0 = vcmp.eq.s32.totalorder %v13988_v8, %v14871_v33  ;;  %vm3244_vm2 = vcmp.eq.s32.totalorder %v13991_v9, %v14871_v33 }
 0x235   : > { %9553 = vperm.xlu1 %13385, %v9487_v37   ;;  %9558 = vperm.xlu0 %13384, %v9488_v38   ;;  %vm14895_vm11 = vmpackc.low %vm3240_vm3, %vm3239_vm6  ;;  %vm3245_vm3 = vcmp.eq.s32.totalorder %v14005_v10, %v14871_v33 }
 0x236   : > { %13142 = vmatprep.subr.msk.bf16.mxu1 %vm14880_vm4, %v18041_v13  ;;  %vm13153_vm6 = vmpackc.low %vm3244_vm2, %vm3243_vm0 }
 0x237   : > { %13144 = vmatpush3.bf16.msk.msra.mxu1 %vm14880_vm4, %v18041_v13 }
 0x238   : > { %13146 = vmatprep.subr.msk.bf16.mxu1 %vm14895_vm11, %v18041_v13 }
 0x239   : > { %9563 = vperm.xlu1 %13385, %v9489_v39   ;;  %9568 = vperm.xlu0 %13384, %v9490_v40  }
 0x23b   : > { %12314 = vmatmul.mubr.msk.bf16.gmra.mrb[76].mxu0 %vm830_vm1, %v13465_v42  ;;  %v13480_v42 = vld [vmem:[%s18030_s1 + $0x2d0] sm:$0xff]   ;;  %13148 = vmatpush3.bf16.msk.msra.mxu1 %vm14895_vm11, %v18041_v13 }
 0x23c   : > { %12317 = vmatprep.mubr.msk.bf16.mxu0 %vm830_vm1, %v13466_v43  ;;  %v9491_v43 = vld [vmem:[%s18033_s4 + $0x78] sm:$0xff] }
 0x23d   : > { %9573 = vperm.xlu1 %13385, %v9491_v43   ;;  %9578 = vperm.xlu0 %13384, %v9492_v45  }
 0x241   : > { %9583 = vperm.xlu1 %13385, %v9493_v46   ;;  %9588 = vperm.xlu0 %13384, %v9494_v47   ;;  %v14945_v47 = vadd.s32 1, %v14871_v33 }
 0x243   : > { %12318 = vmatmul.mubr.msk.bf16.gmra.mrb[80].mxu0 %vm830_vm1, %v13467_v49  ;;  %v13482_v49 = vld [vmem:[%s18030_s1 + $0x2e0] sm:$0xff]   ;;  %vm3260_vm2 = vcmp.eq.s32.totalorder %v13975_v4, %v14945_v47  ;;  %vm3263_vm7 = vcmp.eq.s32.totalorder %v13985_v7, %v14945_v47 }
 0x244   : > { %12321 = vmatprep.mubr.msk.bf16.mxu0 %vm830_vm1, %v13468_v50  ;;  %v9495_v50 = vld [vmem:[%s18033_s4 + $0x98] sm:$0xff] }
 0x245   : > { %9593 = vperm.xlu1 %13385, %v9495_v50  }
 0x24b   : > { %12322 = vmatmul.mubr.msk.bf16.gmra.mrb[84].mxu0 %vm830_vm1, %v13469_v55  ;;  %v13487_v55 = vld [vmem:[%s18030_s1 + $0x308] sm:$0xff]  }
 0x24c   : > { %12351 = vmatprep.mubr.msk.bf16.mxu0 %vm830_vm1, %v13470_v56  ;;  %v13488_v56 = vld [vmem:[%s18030_s1 + $0x310] sm:$0xff]  }
 0x253   : > { %12352 = vmatmul.mubr.msk.bf16.vlgmr.msra.gmra.mrb[8].mxu0 %vm830_vm1, %v13471_v61  ;;  %v13493_v61 = vld [vmem:[%s18030_s1 + $0x338] sm:$0xff]  }
 0x254   : > { %12355 = vmatprep.mubr.msk.bf16.mxu0 %vm830_vm1, %v13472_v62  ;;  %v13494_v62 = vld [vmem:[%s18030_s1 + $0x340] sm:$0xff]  }
 0x25b   : > { %12356 = vmatmul.mubr.msk.bf16.gmra.mrb[12].mxu0 %vm830_vm1, %v13473_v18  ;;  %v13499_v18 = vld [vmem:[%s18030_s1 + $0x368] sm:$0xff]  }
 0x25c   : > { %12359 = vmatprep.mubr.msk.bf16.mxu0 %vm830_vm1, %v13474_v19  ;;  %v13500_v19 = vld [vmem:[%s18030_s1 + $0x370] sm:$0xff]  }
 0x263   : > { %12360 = vmatmul.mubr.msk.bf16.gmra.mrb[16].mxu0 %vm830_vm1, %v13475_v26  ;;  %v13505_v26 = vld [vmem:[%s18030_s1 + $0x398] sm:$0xff]  }
 0x264   : > { %12363 = vmatprep.mubr.msk.bf16.mxu0 %vm830_vm1, %v13476_v30  ;;  %v13506_v30 = vld [vmem:[%s18030_s1 + $0x3a0] sm:$0xff]  }
 0x26b   : > { %12364 = vmatmul.mubr.msk.bf16.gmra.mrb[20].mxu0 %vm830_vm1, %v13477_v35  ;;  %v18182_v35 = vmov 0 }
 0x26c   : > { %12367 = vmatprep.mubr.msk.bf16.mxu0 %vm830_vm1, %v13478_v36  ;;  %v18183_v35 = vsel %vm14880_vm4, 4294967295, %v18182_v35  ;;  %v18185_v36 = vmov 0 }
 0x26d   : > { %18184 = vst [vmem:[#allocation17_spill] sm:$0xff] %v18183_v35  ;;  %v18186_v36 = vsel %vm14895_vm11, 4294967295, %v18185_v36  ;;  %vm3266_vm11 = vcmp.eq.s32.totalorder %v14005_v10, %v14945_v47 }
 0x26e   : > { %18187 = vst [vmem:[#allocation18_spill] sm:$0xff] %v18186_v36 }
 0x273   : > { %12368 = vmatmul.mubr.msk.bf16.gmra.mrb[24].mxu0 %vm830_vm1, %v13479_v41 }
 0x274   : > { %12371 = vmatprep.mubr.msk.bf16.mxu0 %vm830_vm1, %v13480_v42 }
 0x27b   : > { %12372 = vmatmul.mubr.msk.bf16.gmra.mrb[28].mxu0 %vm830_vm1, %v13481_v48 }
 0x27c   : > { %12375 = vmatprep.mubr.msk.bf16.mxu0 %vm830_vm1, %v13482_v49 }
 0x283   : > { %12376 = vmatmul.mubr.msk.bf16.gmra.mrb[32].mxu0 %vm830_vm1, %v13483_v51  ;;  %v18188_v51 = vmov 0 }
 0x284   : > { %12379 = vmatprep.mubr.msk.bf16.mxu0 %vm830_vm1, %v13484_v52 }
 0x28b   : > { %12380 = vmatmul.mubr.msk.bf16.gmra.mrb[36].mxu0 %vm830_vm1, %v13485_v53 }
 0x28c   : > { %12383 = vmatprep.mubr.msk.bf16.mxu0 %vm830_vm1, %v13486_v54 }
 0x293   : > { %12384 = vmatmul.mubr.msk.bf16.gmra.mrb[40].mxu0 %vm830_vm1, %v13487_v55 }
 0x294   : > { %12387 = vmatprep.mubr.msk.bf16.mxu0 %vm830_vm1, %v13488_v56 }
 0x29b   : > { %12388 = vmatmul.mubr.msk.bf16.gmra.mrb[44].mxu0 %vm830_vm1, %v13489_v57 }
 0x29c   : > { %12391 = vmatprep.mubr.msk.bf16.mxu0 %vm830_vm1, %v13490_v58 }
 0x2a3   : > { %12392 = vmatmul.mubr.msk.bf16.gmra.mrb[48].mxu0 %vm830_vm1, %v13491_v59 }
 0x2a4   : > { %12395 = vmatprep.mubr.msk.bf16.mxu0 %vm830_vm1, %v13492_v60 }
 0x2ab   : > { %12396 = vmatmul.mubr.msk.bf16.gmra.mrb[52].mxu0 %vm830_vm1, %v13493_v61 }
 0x2ac   : > { %12399 = vmatprep.mubr.msk.bf16.mxu0 %vm830_vm1, %v13494_v62 }
 0x2b3   : > { %12400 = vmatmul.mubr.msk.bf16.gmra.mrb[56].mxu0 %vm830_vm1, %v13495_v63 }
 0x2b4   : > { %12403 = vmatprep.mubr.msk.bf16.mxu0 %vm830_vm1, %v13496_v0  ;;  %v2999_v0 = vpop.permute.xlu0 %2998 }
 0x2bb   : > { %12404 = vmatmul.mubr.msk.bf16.gmra.mrb[60].mxu0 %vm830_vm1, %v13497_v11  ;;  %v3009_v11 = vpop.permute.xlu1 %3008 }
 0x2bc   : > { %12407 = vmatprep.mubr.msk.bf16.mxu0 %vm830_vm1, %v13498_v17 }
 0x2c3   : > { %12408 = vmatmul.mubr.msk.bf16.gmra.mrb[64].mxu0 %vm830_vm1, %v13499_v18 }
 0x2c4   : > { %12411 = vmatprep.mubr.msk.bf16.mxu0 %vm830_vm1, %v13500_v19  ;;  %v3004_v19 = vpop.permute.xlu0 %3003 }
 0x2cb   : > { %12412 = vmatmul.mubr.msk.bf16.gmra.mrb[68].mxu0 %vm830_vm1, %v13501_v22 }
 0x2cc   : > { %12415 = vmatprep.mubr.msk.bf16.mxu0 %vm830_vm1, %v13502_v23 }
 0x2d3   : > { %12416 = vmatmul.mubr.msk.bf16.gmra.mrb[72].mxu0 %vm830_vm1, %v13503_v24  ;;  %v3014_v24 = vpop.permute.xlu1 %3013 }
 0x2d4   : > { %12419 = vmatprep.mubr.msk.bf16.mxu0 %vm830_vm1, %v13504_v25  ;;  %v3019_v25 = vpop.permute.xlu0 %3018 }
 0x2d8   : > { %v3029_v44 = vpop.permute.xlu0 %3028 }
 0x2db   : > { %12420 = vmatmul.mubr.msk.bf16.gmra.mrb[76].mxu0 %vm830_vm1, %v13505_v26 }
 0x2dc   : > { %12423 = vmatprep.mubr.msk.bf16.mxu0 %vm830_vm1, %v13506_v30  ;;  %v15014_v27 = vpop.permute.xlu0 %3038 }
 0x2e0   : > { %v15022_v21 = vpop.permute.xlu0 %3048 }
 0x2e3   : > { %12424 = vmatmul.mubr.msk.bf16.gmra.mrb[80].mxu0 %vm830_vm1, %v13507_v31 }
 0x2e4   : > { %12427 = vmatprep.mubr.msk.bf16.mxu0 %vm830_vm1, %v13508_v32  ;;  %v3024_v32 = vpop.permute.xlu1 %3023 }
 0x2eb   : > { %12428 = vmatmul.mubr.msk.bf16.gmra.mrb[84].mxu0 %vm830_vm1, %v13509_v34  ;;  %vm18038_vm1 = vcmp.eq.s32.totalorder %v13982_v6, %v14871_v33 }
 0x2ec   : > { %vm13149_vm8 = vmpackc.low %vm3242_vm15, %vm18038_vm1  ;;  %vm3246_vm15 = vcmp.eq.s32.totalorder %v14028_v15, %v14871_v33  ;;  %v15006_v33 = vpop.permute.xlu1 %3033 }
 0x2ed   : > { %13150 = vmatprep.subr.msk.bf16.mxu1 %vm13149_vm8, %v18041_v13  ;;  %vm13157_vm1 = vmpackc.low %vm3246_vm15, %vm3245_vm3  ;;  %vm18200_vm3 = vcmask 654336  }
 0x2ee   : > { %13152 = vmatpush3.bf16.msk.msra.mxu1 %vm13149_vm8, %v18041_v13  ;;  %vm3259_vm8 = vcmp.eq.s32.totalorder %v13970_v3, %v14945_v47 }
 0x2ef   : > { %13154 = vmatprep.subr.msk.bf16.mxu1 %vm13153_vm6, %v18041_v13 }
 0x2f0   : > { %v15016_v28 = vpop.permute.xlu1 %3043 }
 0x2f2   : > { %13156 = vmatpush3.bf16.msk.msra.mxu1 %vm13153_vm6, %v18041_v13  ;;  %vm3261_vm6 = vcmp.eq.s32.totalorder %v13978_v5, %v14945_v47 }
 0x2f3   : > { %13158 = vmatprep.subr.msk.bf16.mxu1 %vm13157_vm1, %v18041_v13  ;;  %vm15052_vm15 = vmpackc.low %vm3261_vm6, %vm3260_vm2 }
 0x2f4   : > { %v15028_v3 = vpop.permute.xlu1 %3053 }
 0x2f6   : > { %13160 = vmatpush3.bf16.msk.msra.mxu1 %vm13157_vm1, %v18041_v13  ;;  %vm3258_vm1 = vcmp.eq.s32.totalorder %v13963_v1, %v14945_v47  ;;  %v15030_v1 = vpop.permute.xlu0 %3058 }
 0x2f7   : > { %vm14957_vm0 = vmpackc.low %vm3259_vm8, %vm3258_vm1  ;;  %vm15060_vm8 = vcmp.eq.s32.totalorder %v13982_v6, %v14945_v47 }
 0x2f8   : > { %v18189_v51 = vsel %vm14957_vm0, 4294967295, %v18188_v51  ;;  %13162 = vmatprep.subr.msk.bf16.mxu1 %vm14957_vm0, %v18041_v13  ;;  %vm18204_vm1 = vmmov %vm18200_vm3 }
 0x2f9   : > { %18190 = vst [vmem:[#allocation19_spill] sm:$0xff] %v18189_v51  ;;  %vm18208_vm2 = vmmov %vm18204_vm1 }
 0x2fa   : > { %vm15083_vm6 = vmpackc.low %vm3263_vm7, %vm15060_vm8 }
 0x326   : > { %v14926_v37 = vpop.f32.mrb[8].mxu0 }
 0x327   : > { %v14928_v38 = vpop.f32.mrb[9].mxu0 }
 0x328   : > { %v14930_v39 = vpop.f32.mrb[10].mxu0 }
 0x329   : > { %v14932_v40 = vpop.f32.mrb[11].mxu0 }
 0x32e   : > { %v14934_v41 = vpop.f32.mrb[12].mxu0 }
 0x32f   : > { %v14936_v42 = vpop.f32.mrb[13].mxu0 }
 0x330   : > { %v14938_v43 = vpop.f32.mrb[14].mxu0 }
 0x331   : > { %v14940_v45 = vpop.f32.mrb[15].mxu0 }
 0x336   : > { %v14942_v46 = vpop.f32.mrb[16].mxu0 }
 0x337   : > { %v14947_v48 = vpop.f32.mrb[17].mxu0 }
 0x338   : > { %v14949_v49 = vpop.f32.mrb[18].mxu0 }
 0x339   : > { %v14955_v50 = vpop.f32.mrb[19].mxu0 }
 0x33e   : > { %v14964_v52 = vpop.f32.mrb[20].mxu0 }
 0x33f   : > { %v14966_v53 = vpop.f32.mrb[21].mxu0 }
 0x340   : > { %v14968_v54 = vpop.f32.mrb[22].mxu0 }
 0x341   : > { %v14970_v55 = vpop.f32.mrb[23].mxu0 }
 0x346   : > { %v14972_v56 = vpop.f32.mrb[24].mxu0 }
 0x347   : > { %v14974_v57 = vpop.f32.mrb[25].mxu0 }
 0x348   : > { %v14976_v58 = vpop.f32.mrb[26].mxu0 }
 0x349   : > { %v14978_v59 = vpop.f32.mrb[27].mxu0 }
 0x34e   : > { %v14980_v60 = vpop.f32.mrb[28].mxu0 }
 0x34f   : > { %v14982_v61 = vpop.f32.mrb[29].mxu0 }
 0x350   : > { %v14984_v62 = vpop.f32.mrb[30].mxu0 }
 0x351   : > { %v14986_v63 = vpop.f32.mrb[31].mxu0 }
 0x356   : > { %v14988_v17 = vpop.f32.mrb[32].mxu0 }
 0x357   : > { %v14990_v18 = vpop.f32.mrb[33].mxu0 }
 0x358   : > { %v14992_v22 = vpop.f32.mrb[34].mxu0 }
 0x359   : > { %v14994_v23 = vpop.f32.mrb[35].mxu0 }
 0x35e   : > { %v14996_v26 = vpop.f32.mrb[36].mxu0 }
 0x35f   : > { %v14998_v30 = vpop.f32.mrb[37].mxu0 }
 0x360   : > { %v15000_v31 = vpop.f32.mrb[38].mxu0 }
 0x361   : > { %18191 = vst [vmem:[#allocation20_spill] sm:$0xff] %v15000_v31  ;;  %v15002_v34 = vpop.f32.mrb[39].mxu0 }
 0x362   : > { %18192 = vst [vmem:[#allocation21_spill] sm:$0xff] %v15002_v34 }
 0x366   : > { %v15004_v13 = vpop.f32.mrb[40].mxu0 }
 0x367   : > { %18193 = vst [vmem:[#allocation22_spill] sm:$0xff] %v15004_v13  ;;  %v15008_v36 = vpop.f32.mrb[41].mxu0 }
 0x368   : > { %18194 = vst [vmem:[#allocation23_spill] sm:$0xff] %v15008_v36  ;;  %v15010_v35 = vpop.f32.mrb[42].mxu0 }
 0x369   : > { %18195 = vst [vmem:[#allocation24_spill] sm:$0xff] %v15010_v35  ;;  %v15012_v29 = vpop.f32.mrb[43].mxu0 }
 0x36a   : > { %18196 = vst [vmem:[#allocation25_spill] sm:$0xff] %v15012_v29 }
 0x36e   : > { %v15018_v14 = vpop.f32.mrb[44].mxu0 }
 0x36f   : > { %18197 = vst [vmem:[#allocation26_spill] sm:$0xff] %v15018_v14  ;;  %v15020_v12 = vpop.f32.mrb[45].mxu0  ;;  %v15034_v14 = vpop.permute.xlu1 %3063 }
 0x370   : > { %18198 = vst [vmem:[#allocation27_spill] sm:$0xff] %v15020_v12  ;;  %v15024_v16 = vpop.f32.mrb[46].mxu0 }
 0x371   : > { %v15026_v20 = vpop.f32.mrb[47].mxu0 }
 0x372   : > { %18199 = vst [vmem:[#allocation28_spill] sm:$0xff] %v15026_v20 }
 0x376   : > { %v12393_v2 = vpop.f32.mrb[48].mxu0 }
 0x377   : > { %v2918_v29 = vmax.f32 %v14926_v37, %v12393_v2  ;;  %v2677_v35 = vpop.f32.mrb[49].mxu0  ;;  %v15044_v2 = vpop.permute.xlu0 %3068 }
 0x378   : > { %v2916_v36 = vmax.f32 %v14928_v38, %v2677_v35  ;;  %v12394_v13 = vpop.f32.mrb[50].mxu0  ;;  %v18205_v38 = vmov 0 }
 0x379   : > { %v2919_v12 = vmax.f32 %v14930_v39, %v12394_v13  ;;  %v2680_v34 = vpop.f32.mrb[51].mxu0  ;;  %v15050_v35 = vadd.f32 %v3009_v11, %v2918_v29  ;;  %v18201_v13 = vmov 0  ;;  %v18206_v38 = vsel %vm15060_vm8, 4294967295, %v18205_v38 }
 0x37a   : > { %v15037_v31 = vadd.f32 %v2999_v0, %v2916_v36  ;;  %v2917_v20 = vmax.f32 %v14932_v40, %v2680_v34  ;;  %v18202_v13 = vsel %vm15052_vm15, 4294967295, %v18201_v13  ;;  %18207 = vst [vmem:[#allocation30_spill] sm:$0xff] %v18206_v38  ;;  %v18209_v40 = vmov 1.0|1.0  }
 0x37b   : > { %18203 = vst [vmem:[#allocation29_spill] sm:$0xff] %v18202_v13  ;;  %v15074_v0 = vadd.f32 %v3014_v24, %v2919_v12 }
 0x37c   : > { %v15046_v37 = vadd.f32 %v3004_v19, %v2917_v20  ;;  %12451 = vmatprep.mubr.msk.f32.mxu1 %vm18200_vm3, %v15037_v31  ;;  %v15066_v20 = vpop.permute.xlu1 %3073  ;;  %vm18212_vm3 = vmmov %vm18204_vm1 }
 0x37d   : > { %vm18213_vm7 = vmmov %vm18212_vm3 }
 0x37e   : > { %v12397_v36 = vpop.f32.mrb[52].mxu0  ;;  %12452 = vmatmul.mubr.msk.f32.vlgmr.msra.gmra.mrb[16].mxu1 %vm18204_vm1, %v15046_v37  ;;  %vm3264_vm1 = vcmp.eq.s32.totalorder %v13988_v8, %v14945_v47  ;;  %vm18216_vm8 = vmmov %vm18213_vm7 }
 0x37f   : > { %v2922_v29 = vmax.f32 %v14934_v41, %v12397_v36  ;;  %v2693_v39 = vpop.f32.mrb[53].mxu0  ;;  %12454 = vmatprep.mubr.msk.f32.mxu1 %vm18208_vm2, %v15050_v35  ;;  %13164 = vmatpush3.bf16.msk.msra.mxu1 %vm14957_vm0, %v18209_v40  ;;  %v15087_v36 = vpop.permute.xlu0 %3078  ;;  %vm3265_vm2 = vcmp.eq.s32.totalorder %v13991_v9, %v14945_v47  ;;  %vm18217_vm4 = vmmov %vm18216_vm8 }
 0x380   : > { %v2920_v11 = vmax.f32 %v14936_v42, %v2693_v39  ;;  %v12398_v19 = vpop.f32.mrb[54].mxu0  ;;  %13166 = vmatprep.subr.msk.bf16.mxu1 %vm15052_vm15, %v18209_v40 }
 0x381   : > { %v2923_v7 = vmax.f32 %v14938_v43, %v12398_v19  ;;  %v2696_v41 = vpop.f32.mrb[55].mxu0  ;;  %v15110_v24 = vadd.f32 %v3029_v44, %v2922_v29 }
 0x382   : > { %v15089_v12 = vadd.f32 %v3019_v25, %v2920_v11  ;;  %v2921_v42 = vmax.f32 %v14940_v45, %v2696_v41  ;;  %12455 = vmatmul.mubr.msk.f32.gmra.mrb[18].mxu1 %vm18212_vm3, %v15074_v0  ;;  %v15108_v45 = vpop.permute.xlu1 %3083  ;;  %vm15112_vm3 = vmpackc.low %vm3265_vm2, %vm3264_vm1 }
 0x383   : > { %13168 = vmatpush3.bf16.msk.msra.mxu1 %vm15052_vm15, %v18209_v40  ;;  %v3089_v44 = vpop.permute.xlu0 %3088  ;;  %v15129_v29 = vadd.f32 %v15006_v33, %v2923_v7  ;;  %vm18222_vm1 = vmmov %vm18217_vm4 }
 0x384   : > { %v15101_v43 = vadd.f32 %v3024_v32, %v2921_v42  ;;  %12457 = vmatprep.mubr.msk.f32.mxu1 %vm18213_vm7, %v15089_v12  ;;  %13170 = vmatprep.subr.msk.bf16.mxu1 %vm15083_vm6, %v18209_v40  ;;  %vm3267_vm7 = vcmp.eq.s32.totalorder %v14028_v15, %v14945_v47  ;;  %vm18223_vm2 = vmmov %vm18222_vm1 }
 0x385   : > { %vm18289_vm15 = vmmov %vm18222_vm1 }
 0x386   : > { %v12401_v9 = vpop.f32.mrb[56].mxu0  ;;  %12458 = vmatmul.mubr.msk.f32.gmra.mrb[20].mxu1 %vm18216_vm8, %v15101_v43  ;;  %vm15136_vm8 = vmpackc.low %vm3267_vm7, %vm3266_vm11 }
 0x387   : > { %v2926_v25 = vmax.f32 %v14942_v46, %v12401_v9  ;;  %v2709_v32 = vpop.f32.mrb[57].mxu0  ;;  %12460 = vmatprep.mubr.msk.f32.mxu1 %vm18217_vm4, %v15110_v24  ;;  %13172 = vmatpush3.bf16.msk.msra.mxu1 %vm15083_vm6, %v18209_v40  ;;  %vm18220_vm11 = vmmov %vm18217_vm4 }
 0x388   : > { %v2924_v39 = vmax.f32 %v14947_v48, %v2709_v32  ;;  %v12402_v10 = vpop.f32.mrb[58].mxu0  ;;  %13174 = vmatprep.subr.msk.bf16.mxu1 %vm15112_vm3, %v18209_v40  ;;  %v3094_v48 = vpop.permute.xlu1 %3093  ;;  %vm18221_vm6 = vmmov %vm18217_vm4 }
 0x389   : > { %v2927_v15 = vmax.f32 %v14949_v49, %v12402_v10  ;;  %v2712_v46 = vpop.f32.mrb[59].mxu0  ;;  %vm18225_vm7 = vmmov %vm18222_vm1 }
 0x38a   : > { %v15141_v11 = vadd.f32 %v15014_v27, %v2924_v39  ;;  %v2925_v33 = vmax.f32 %v14955_v50, %v2712_v46  ;;  %12461 = vmatmul.mubr.msk.f32.gmra.mrb[22].mxu1 %vm18217_vm4, %v15129_v29  ;;  %v15158_v27 = vadd.f32 %v15022_v21, %v2926_v25  ;;  %v3099_v50 = vpop.permute.xlu0 %3098  ;;  %vm18227_vm4 = vmmov %vm18222_vm1 }
 0x38b   : > { %13176 = vmatpush3.bf16.msk.msra.mxu1 %vm15112_vm3, %v18209_v40  ;;  %vm18224_vm3 = vmmov %vm18222_vm1 }
 0x38c   : > { %v15150_v49 = vadd.f32 %v15016_v28, %v2925_v33  ;;  %12463 = vmatprep.mubr.msk.f32.mxu1 %vm18220_vm11, %v15141_v11  ;;  %13178 = vmatprep.subr.msk.bf16.mxu1 %vm15136_vm8, %v18209_v40  ;;  %v15169_v28 = vadd.f32 %v15028_v3, %v2927_v15  ;;  %v3104_v42 = vpop.permute.xlu1 %3103  ;;  %vm18228_vm11 = vmmov %vm18222_vm1 }
 0x38d   : > { %vm18292_vm0 = vmmov %vm18222_vm1 }
 0x38e   : > { %v12405_v19 = vpop.f32.mrb[60].mxu0  ;;  %12464 = vmatmul.mubr.msk.f32.gmra.mrb[24].mxu1 %vm18221_vm6, %v15150_v49  ;;  %v3109_v32 = vpop.permute.xlu0 %3108  ;;  %vm18229_vm6 = vmmov %vm18222_vm1 }
 0x38f   : > { %v2930_v7 = vmax.f32 %v14964_v52, %v12405_v19  ;;  %v2725_v41 = vpop.f32.mrb[61].mxu0  ;;  %12466 = vmatprep.mubr.msk.f32.mxu1 %vm18222_vm1, %v15158_v27  ;;  %13180 = vmatpush3.bf16.msk.msra.mxu1 %vm15136_vm8, %v18209_v40  ;;  %vm18226_vm8 = vmmov %vm18222_vm1 }
 0x390   : > { %v2928_v21 = vmax.f32 %v14966_v53, %v2725_v41  ;;  %v12406_v34 = vpop.f32.mrb[62].mxu0 }
 0x391   : > { %v2931_v8 = vmax.f32 %v14968_v54, %v12406_v34  ;;  %v2728_v9 = vpop.f32.mrb[63].mxu0  ;;  %v15185_v3 = vadd.f32 %v15044_v2, %v2930_v7 }
 0x392   : > { %v15174_v52 = vadd.f32 %v15030_v1, %v2928_v21  ;;  %v2929_v25 = vmax.f32 %v14970_v55, %v2728_v9  ;;  %12467 = vmatmul.mubr.msk.f32.gmra.mrb[26].mxu1 %vm18223_vm2, %v15169_v28  ;;  %v3114_v1 = vpop.permute.xlu1 %3113  ;;  %v3119_v47 = vpop.permute.xlu0 %3118  ;;  %vm18230_vm2 = vmmov %vm18222_vm1 }
 0x394   : > { %v15180_v39 = vadd.f32 %v15034_v14, %v2929_v25  ;;  %12469 = vmatprep.mubr.msk.f32.mxu1 %vm18224_vm3, %v15174_v52  ;;  %v15193_v14 = vadd.f32 %v15066_v20, %v2931_v8  ;;  %vm18231_vm3 = vmmov %vm18222_vm1 }
 0x396   : > { %v12409_v53 = vpop.f32.mrb[64].mxu0  ;;  %12470 = vmatmul.mubr.msk.f32.gmra.mrb[28].mxu1 %vm18225_vm7, %v15180_v39  ;;  %vm18232_vm7 = vmmov %vm18222_vm1 }
 0x397   : > { %v2934_v54 = vmax.f32 %v14972_v56, %v12409_v53  ;;  %v2741_v55 = vpop.f32.mrb[65].mxu0  ;;  %12472 = vmatprep.mubr.msk.f32.mxu1 %vm18226_vm8, %v15185_v3  ;;  %vm18233_vm8 = vmmov %vm18222_vm1 }
 0x398   : > { %v2932_v10 = vmax.f32 %v14974_v57, %v2741_v55  ;;  %v12410_v15 = vpop.f32.mrb[66].mxu0  ;;  %v3124_v57 = vpop.permute.xlu1 %3123 }
 0x399   : > { %v2935_v2 = vmax.f32 %v14976_v58, %v12410_v15  ;;  %v2744_v46 = vpop.f32.mrb[67].mxu0  ;;  %v15208_v20 = vadd.f32 %v3089_v44, %v2934_v54 }
 0x39a   : > { %v15198_v33 = vadd.f32 %v15087_v36, %v2932_v10  ;;  %v2933_v19 = vmax.f32 %v14978_v59, %v2744_v46  ;;  %12473 = vmatmul.mubr.msk.f32.gmra.mrb[30].mxu1 %vm18227_vm4, %v15193_v14  ;;  %v3129_v59 = vpop.permute.xlu0 %3128  ;;  %vm18234_vm4 = vmmov %vm18222_vm1 }
 0x39b   : > { %v15215_v41 = vadd.f32 %v3094_v48, %v2935_v2 }
 0x39c   : > { %v15204_v56 = vadd.f32 %v15108_v45, %v2933_v19  ;;  %12475 = vmatprep.mubr.msk.f32.mxu1 %vm18228_vm11, %v15198_v33  ;;  %vm18235_vm11 = vmmov %vm18222_vm1 }
 0x39e   : > { %v12413_v58 = vpop.f32.mrb[68].mxu0  ;;  %12476 = vmatmul.mubr.msk.f32.gmra.mrb[32].mxu1 %vm18229_vm6, %v15204_v56  ;;  %vm18236_vm6 = vmmov %vm18222_vm1 }
 0x39f   : > { %v2938_v36 = vmax.f32 %v14980_v60, %v12413_v58  ;;  %v2757_v7 = vpop.f32.mrb[69].mxu0  ;;  %12478 = vmatprep.mubr.msk.f32.mxu1 %vm18222_vm1, %v15208_v20  ;;  %v3134_v60 = vpop.permute.xlu1 %3133 }
 0x3a0   : > { %v2936_v45 = vmax.f32 %v14982_v61, %v2757_v7  ;;  %v12414_v21 = vpop.f32.mrb[70].mxu0  ;;  %v3139_v61 = vpop.permute.xlu0 %3138 }
 0x3a1   : > { %v2939_v34 = vmax.f32 %v14984_v62, %v12414_v21  ;;  %v2760_v44 = vpop.f32.mrb[71].mxu0  ;;  %v15228_v48 = vadd.f32 %v3109_v32, %v2938_v36  ;;  %v18237_v36 = vld [vmem:[#allocation20_spill] sm:$0xff] }
 0x3a2   : > { %v15219_v8 = vadd.f32 %v3099_v50, %v2936_v45  ;;  %v2937_v9 = vmax.f32 %v14986_v63, %v2760_v44  ;;  %12479 = vmatmul.mubr.msk.f32.gmra.mrb[34].mxu1 %vm18230_vm2, %v15215_v41  ;;  %vm18239_vm2 = vmmov %vm18222_vm1 }
 0x3a3   : > { %v15235_v63 = vadd.f32 %v3114_v1, %v2939_v34  ;;  %v3144_v55 = vpop.permute.xlu1 %3143  ;;  %v18238_v34 = vld [vmem:[#allocation21_spill] sm:$0xff] }
 0x3a4   : > { %v15224_v25 = vadd.f32 %v3104_v42, %v2937_v9  ;;  %12481 = vmatprep.mubr.msk.f32.mxu1 %vm18231_vm3, %v15219_v8  ;;  %vm18240_vm3 = vmmov %vm18222_vm1 }
 0x3a6   : > { %v12417_v53 = vpop.f32.mrb[72].mxu0  ;;  %12482 = vmatmul.mubr.msk.f32.gmra.mrb[36].mxu1 %vm18232_vm7, %v15224_v25  ;;  %vm18241_vm7 = vmmov %vm18222_vm1 }
 0x3a7   : > { %v2942_v62 = vmax.f32 %v14988_v17, %v12417_v53  ;;  %v2773_v50 = vpop.f32.mrb[73].mxu0  ;;  %12484 = vmatprep.mubr.msk.f32.mxu1 %vm18233_vm8, %v15228_v48  ;;  %v3149_v17 = vpop.permute.xlu0 %3148  ;;  %v18242_v53 = vld [vmem:[#allocation22_spill] sm:$0xff]  ;;  %vm18243_vm8 = vmmov %vm18222_vm1 }
 0x3a8   : > { %v2940_v42 = vmax.f32 %v14990_v18, %v2773_v50  ;;  %v12418_v54 = vpop.f32.mrb[74].mxu0 }
 0x3a9   : > { %v2943_v32 = vmax.f32 %v14992_v22, %v12418_v54  ;;  %v2776_v10 = vpop.f32.mrb[75].mxu0  ;;  %v15248_v1 = vadd.f32 %v3129_v59, %v2942_v62  ;;  %v3154_v22 = vpop.permute.xlu1 %3153  ;;  %v18244_v54 = vld [vmem:[#allocation23_spill] sm:$0xff] }
 0x3aa   : > { %v15239_v15 = vadd.f32 %v3119_v47, %v2940_v42  ;;  %v2941_v2 = vmax.f32 %v14994_v23, %v2776_v10  ;;  %12485 = vmatmul.mubr.msk.f32.gmra.mrb[38].mxu1 %vm18234_vm4, %v15235_v63  ;;  %v18245_v10 = vld [vmem:[#allocation24_spill] sm:$0xff]  ;;  %vm18247_vm4 = vmmov %vm18222_vm1 }
 0x3ab   : > { %v15255_v23 = vadd.f32 %v3134_v60, %v2943_v32  ;;  %v3159_v45 = vpop.permute.xlu0 %3158 }
 0x3ac   : > { %v15244_v46 = vadd.f32 %v3124_v57, %v2941_v2  ;;  %12487 = vmatprep.mubr.msk.f32.mxu1 %vm18235_vm11, %v15239_v15  ;;  %vm18248_vm11 = vmmov %vm18222_vm1 }
 0x3ad   : > { %v3164_v9 = vpop.permute.xlu1 %3163 }
 0x3ae   : > { %v12421_v18 = vpop.f32.mrb[76].mxu0  ;;  %12488 = vmatmul.mubr.msk.f32.gmra.mrb[40].mxu1 %vm18236_vm6, %v15244_v46  ;;  %vm18249_vm6 = vmmov %vm18222_vm1 }
 0x3af   : > { %v2946_v47 = vmax.f32 %v14996_v26, %v12421_v18  ;;  %v2789_v19 = vpop.f32.mrb[77].mxu0  ;;  %12490 = vmatprep.mubr.msk.f32.mxu1 %vm18222_vm1, %v15248_v1  ;;  %v3169_v50 = vpop.permute.xlu0 %3168 }
 0x3b0   : > { %v2944_v57 = vmax.f32 %v14998_v30, %v2789_v19  ;;  %v12422_v58 = vpop.f32.mrb[78].mxu0 }
 0x3b1   : > { %v2947_v7 = vmax.f32 %v18237_v36, %v12422_v58  ;;  %v2792_v59 = vpop.f32.mrb[79].mxu0  ;;  %v15268_v60 = vadd.f32 %v3149_v17, %v2946_v47  ;;  %v18246_v47 = vld [vmem:[#allocation25_spill] sm:$0xff] }
 0x3b2   : > { %v15259_v21 = vadd.f32 %v3139_v61, %v2944_v57  ;;  %v2945_v44 = vmax.f32 %v18238_v34, %v2792_v59  ;;  %12491 = vmatmul.mubr.msk.f32.gmra.mrb[42].mxu1 %vm18239_vm2, %v15255_v23  ;;  %v3174_v57 = vpop.permute.xlu1 %3173  ;;  %v18250_v59 = vld [vmem:[#allocation26_spill] sm:$0xff]  ;;  %vm18253_vm2 = vmmov %vm18222_vm1 }
 0x3b3   : > { %v15275_v42 = vadd.f32 %v3154_v22, %v2947_v7  ;;  %v3179_v36 = vpop.permute.xlu0 %3178 }
 0x3b4   : > { %v15264_v26 = vadd.f32 %v3144_v55, %v2945_v44  ;;  %12493 = vmatprep.mubr.msk.f32.mxu1 %vm18240_vm3, %v15259_v21  ;;  %vm18254_vm3 = vmmov %vm18222_vm1 }
 0x3b6   : > { %v12425_v30 = vpop.f32.mrb[80].mxu0  ;;  %12494 = vmatmul.mubr.msk.f32.gmra.mrb[44].mxu1 %vm18241_vm7, %v15264_v26  ;;  %vm18255_vm7 = vmmov %vm18222_vm1 }
 0x3b7   : > { %v2950_v61 = vmax.f32 %v18242_v53, %v12425_v30  ;;  %v2805_v62 = vpop.f32.mrb[81].mxu0  ;;  %12496 = vmatprep.mubr.msk.f32.mxu1 %vm18243_vm8, %v15268_v60  ;;  %v18251_v30 = vld [vmem:[#allocation27_spill] sm:$0xff]  ;;  %vm18256_vm8 = vmmov %vm18222_vm1 }
 0x3b8   : > { %v2948_v55 = vmax.f32 %v18244_v54, %v2805_v62  ;;  %v12426_v32 = vpop.f32.mrb[82].mxu0  ;;  %v3184_v54 = vpop.permute.xlu1 %3183 }
 0x3b9   : > { %v2951_v2 = vmax.f32 %v18245_v10, %v12426_v32  ;;  %v2808_v17 = vpop.f32.mrb[83].mxu0  ;;  %v3230_v22 = vadd.f32 %v3169_v50, %v2950_v61  ;;  %v18252_v10 = vld [vmem:[#allocation28_spill] sm:$0xff]  ;;  %v3189_v50 = vpop.permute.xlu0 %3188 }
 0x3ba   : > { %v15279_v18 = vadd.f32 %v3159_v45, %v2948_v55  ;;  %v2949_v19 = vmax.f32 %v18246_v47, %v2808_v17  ;;  %12497 = vmatmul.mubr.msk.f32.gmra.mrb[46].mxu1 %vm18247_vm4, %v15275_v42  ;;  %vm18257_vm4 = vmmov %vm18222_vm1 }
 0x3bb   : > { %v3231_v45 = vadd.f32 %v3174_v57, %v2951_v2 }
 0x3bc   : > { %v3229_v58 = vadd.f32 %v3164_v9, %v2949_v19  ;;  %12499 = vmatprep.mubr.msk.f32.mxu1 %vm18248_vm11, %v15279_v18  ;;  %v3194_v2 = vpop.permute.xlu1 %3193  ;;  %vm18258_vm11 = vmmov %vm18222_vm1 }
 0x3be   : > { %v12429_v7 = vpop.f32.mrb[84].mxu0  ;;  %12500 = vmatmul.mubr.msk.f32.gmra.mrb[48].mxu1 %vm18249_vm6, %v3229_v58  ;;  %vm18259_vm6 = vmmov %vm18222_vm1 }
 0x3bf   : > { %v2954_v34 = vmax.f32 %v18250_v59, %v12429_v7  ;;  %v2821_v44 = vpop.f32.mrb[85].mxu0  ;;  %12502 = vmatprep.mubr.msk.f32.mxu1 %vm18222_vm1, %v3230_v22 }
 0x3c0   : > { %v2952_v53 = vmax.f32 %v18251_v30, %v2821_v44  ;;  %v12430_v62 = vpop.f32.mrb[86].mxu0 }
 0x3c1   : > { %v2955_v9 = vmax.f32 %v15024_v16, %v12430_v62  ;;  %v2824_v55 = vpop.f32.mrb[87].mxu0  ;;  %v3234_v47 = vadd.f32 %v3189_v50, %v2954_v34  ;;  %v18293_v16 = vld [vmem:[#allocation3_spill] sm:$0xff] }
 0x3c2   : > { %v3232_v32 = vadd.f32 %v3179_v36, %v2952_v53  ;;  %v2953_v61 = vmax.f32 %v18252_v10, %v2824_v55  ;;  %12503 = vmatmul.mubr.msk.f32.gmra.mrb[50].mxu1 %vm18253_vm2, %v3231_v45  ;;  %vm18260_vm2 = vmmov %vm18222_vm1 }
 0x3c3   : > { %v3235_v19 = vadd.f32 %v3194_v2, %v2955_v9 }
 0x3c4   : > { %v3233_v17 = vadd.f32 %v3184_v54, %v2953_v61  ;;  %12505 = vmatprep.mubr.msk.f32.mxu1 %vm18254_vm3, %v3232_v32  ;;  %vm18261_vm3 = vmmov %vm18222_vm1 }
 0x3c6   : > { %12506 = vmatmul.mubr.msk.f32.gmra.mrb[52].mxu1 %vm18255_vm7, %v3233_v17  ;;  %vm18262_vm7 = vmmov %vm18222_vm1 }
 0x3c7   : > { %12508 = vmatprep.mubr.msk.f32.mxu1 %vm18256_vm8, %v3234_v47  ;;  %vm18263_vm8 = vmmov %vm18222_vm1 }
 0x3ca   : > { %12509 = vmatmul.mubr.msk.f32.gmra.mrb[54].mxu1 %vm18257_vm4, %v3235_v19  ;;  %vm18264_vm4 = vmmov %vm18222_vm1 }
 0x3cb   : > { %12531 = vmatprep.mubr.msk.f32.mxu1 %vm18258_vm11, %v15037_v31  ;;  %vm18265_vm11 = vmmov %vm18222_vm1  ;;  %v4028_v31 = vadd.s32 4294967294, %v18293_v16 }
 0x3ce   : > { %12532 = vmatmul.mubr.msk.f32.vlgmr.msra.gmra.mrb[56].mxu1 %vm18259_vm6, %v15046_v37  ;;  %vm18266_vm6 = vmmov %vm18222_vm1  ;;  %v18294_v37 = vld [vmem:[#allocation2_spill] sm:$0xff] }
 0x3cf   : > { %12534 = vmatprep.mubr.msk.f32.mxu1 %vm18222_vm1, %v15050_v35  ;;  %v18295_v35 = vld [vmem:[#allocation4_spill] sm:$0xff] }
 0x3d2   : > { %12535 = vmatmul.mubr.msk.f32.gmra.mrb[58].mxu1 %vm18260_vm2, %v15074_v0  ;;  %vm18267_vm2 = vmmov %vm18222_vm1  ;;  %v18080_v0 = vmov 0.0  }
 0x3d3   : > { %12537 = vmatprep.mubr.msk.f32.mxu1 %vm18261_vm3, %v15089_v12  ;;  %vm18268_vm3 = vmmov %vm18222_vm1 }
 0x3d6   : > { %12538 = vmatmul.mubr.msk.f32.gmra.mrb[60].mxu1 %vm18262_vm7, %v15101_v43  ;;  %vm18269_vm7 = vmmov %vm18222_vm1 }
 0x3d7   : > { %12540 = vmatprep.mubr.msk.f32.mxu1 %vm18263_vm8, %v15110_v24  ;;  %vm18270_vm8 = vmmov %vm18222_vm1 }
 0x3da   : > { %12541 = vmatmul.mubr.msk.f32.gmra.mrb[62].mxu1 %vm18264_vm4, %v15129_v29  ;;  %vm18271_vm4 = vmmov %vm18222_vm1 }
 0x3db   : > { %12543 = vmatprep.mubr.msk.f32.mxu1 %vm18265_vm11, %v15141_v11  ;;  %vm18272_vm11 = vmmov %vm18222_vm1 }
 0x3de   : > { %12544 = vmatmul.mubr.msk.f32.gmra.mrb[64].mxu1 %vm18266_vm6, %v15150_v49  ;;  %vm18273_vm6 = vmmov %vm18222_vm1 }
 0x3df   : > { %12546 = vmatprep.mubr.msk.f32.mxu1 %vm18222_vm1, %v15158_v27 }
 0x3e2   : > { %12547 = vmatmul.mubr.msk.f32.gmra.mrb[66].mxu1 %vm18267_vm2, %v15169_v28  ;;  %vm18274_vm2 = vmmov %vm18222_vm1 }
 0x3e3   : > { %12549 = vmatprep.mubr.msk.f32.mxu1 %vm18268_vm3, %v15174_v52  ;;  %vm18275_vm3 = vmmov %vm18222_vm1 }
 0x3e6   : > { %12550 = vmatmul.mubr.msk.f32.gmra.mrb[68].mxu1 %vm18269_vm7, %v15180_v39  ;;  %vm18276_vm7 = vmmov %vm18222_vm1 }
 0x3e7   : > { %12552 = vmatprep.mubr.msk.f32.mxu1 %vm18270_vm8, %v15185_v3  ;;  %vm18277_vm8 = vmmov %vm18222_vm1 }
 0x3ea   : > { %12553 = vmatmul.mubr.msk.f32.gmra.mrb[70].mxu1 %vm18271_vm4, %v15193_v14  ;;  %vm18278_vm4 = vmmov %vm18222_vm1 }
 0x3eb   : > { %12555 = vmatprep.mubr.msk.f32.mxu1 %vm18272_vm11, %v15198_v33  ;;  %vm18279_vm11 = vmmov %vm18222_vm1 }
 0x3ee   : > { %12556 = vmatmul.mubr.msk.f32.gmra.mrb[72].mxu1 %vm18273_vm6, %v15204_v56  ;;  %vm18280_vm6 = vmmov %vm18222_vm1 }
 0x3ef   : > { %12558 = vmatprep.mubr.msk.f32.mxu1 %vm18222_vm1, %v15208_v20 }
 0x3f2   : > { %12559 = vmatmul.mubr.msk.f32.gmra.mrb[74].mxu1 %vm18274_vm2, %v15215_v41  ;;  %vm18281_vm2 = vmmov %vm18222_vm1 }
 0x3f3   : > { %12561 = vmatprep.mubr.msk.f32.mxu1 %vm18275_vm3, %v15219_v8  ;;  %vm18282_vm3 = vmmov %vm18222_vm1 }
 0x3f6   : > { %12562 = vmatmul.mubr.msk.f32.gmra.mrb[76].mxu1 %vm18276_vm7, %v15224_v25  ;;  %vm18283_vm7 = vmmov %vm18222_vm1 }
 0x3f7   : > { %12564 = vmatprep.mubr.msk.f32.mxu1 %vm18277_vm8, %v15228_v48  ;;  %vm18284_vm8 = vmmov %vm18222_vm1 }
 0x3fa   : > { %12565 = vmatmul.mubr.msk.f32.gmra.mrb[78].mxu1 %vm18278_vm4, %v15235_v63  ;;  %vm18285_vm4 = vmmov %vm18222_vm1 }
 0x3fb   : > { %12567 = vmatprep.mubr.msk.f32.mxu1 %vm18279_vm11, %v15239_v15  ;;  %vm18286_vm11 = vmmov %vm18222_vm1 }
 0x3fe   : > { %12568 = vmatmul.mubr.msk.f32.gmra.mrb[80].mxu1 %vm18280_vm6, %v15244_v46  ;;  %vm18287_vm6 = vmmov %vm18222_vm1 }
 0x3ff   : > { %12570 = vmatprep.mubr.msk.f32.mxu1 %vm18222_vm1, %v15248_v1 }
 0x402   : > { %12571 = vmatmul.mubr.msk.f32.gmra.mrb[82].mxu1 %vm18281_vm2, %v15255_v23  ;;  %vm18288_vm2 = vmmov %vm18222_vm1 }
 0x403   : > { %12573 = vmatprep.mubr.msk.f32.mxu1 %vm18282_vm3, %v15259_v21  ;;  %vm18290_vm3 = vmmov %vm18222_vm1 }
 0x406   : > { %12574 = vmatmul.mubr.msk.f32.gmra.mrb[84].mxu1 %vm18283_vm7, %v15264_v26  ;;  %vm18291_vm7 = vmmov %vm18222_vm1 }
 0x407   : > { %12576 = vmatprep.mubr.msk.f32.mxu1 %vm18284_vm8, %v15268_v60  ;;  %vm4029_vm8 = vcmp.eq.s32.totalorder %v18294_v37, %v4028_v31 }
 0x40a   : > { %12577 = vmatmul.mubr.msk.f32.gmra.mrb[86].mxu1 %vm18285_vm4, %v15275_v42  ;;  %vm4030_vm4 = vcmp.eq.s32.totalorder %v18295_v35, %v4028_v31 }
 0x40b   : > { %12579 = vmatprep.mubr.msk.f32.mxu1 %vm18286_vm11, %v15279_v18  ;;  %vm10676_vm11 = vmpackc.low %vm4030_vm4, %vm4029_vm8 }
 0x40c   : > { %12591 = vmatprep.subr.msk.bf16.mxu1 %vm10676_vm11, %v18209_v40 }
 0x40d   : > { %12592 = vmatpush3.bf16.msk.msra.mxu1 %vm10676_vm11, %v18209_v40 }
 0x40e   : > { %12580 = vmatmul.mubr.msk.f32.gmra.mrb[88].mxu1 %vm18287_vm6, %v3229_v58  ;;  %vm4031_vm6 = vcmp.eq.s32.totalorder %v13975_v4, %v4028_v31 }
 0x40f   : > { %12582 = vmatprep.mubr.msk.f32.mxu1 %vm18222_vm1, %v3230_v22 }
 0x412   : > { %12583 = vmatmul.mubr.msk.f32.gmra.mrb[90].mxu1 %vm18288_vm2, %v3231_v45  ;;  %vm4103_vm2 = vcmask 1043456  }
 0x413   : > { %12585 = vmatprep.mubr.msk.f32.mxu1 %vm18289_vm15, %v3232_v32  ;;  %vm4032_vm15 = vcmp.eq.s32.totalorder %v13978_v5, %v4028_v31 }
 0x414   : > { %vm10678_vm1 = vmpackc.low %vm4032_vm15, %vm4031_vm6 }
 0x415   : > { %12593 = vmatprep.subr.msk.bf16.mxu1 %vm10678_vm1, %v18209_v40 }
 0x416   : > { %12586 = vmatmul.mubr.msk.f32.gmra.mrb[92].mxu1 %vm18290_vm3, %v3233_v17  ;;  %vm4042_vm3 = vcmask 326656  }
 0x417   : > { %12588 = vmatprep.mubr.msk.f32.mxu1 %vm18291_vm7, %v3234_v47  ;;  %12594 = vmatpush3.bf16.msk.msra.mxu1 %vm10678_vm1, %v18209_v40 }
 0x41a   : > { %12589 = vmatmul.mubr.msk.f32.gmra.mrb[94].mxu1 %vm18292_vm0, %v3235_v19  ;;  %vm4033_vm0 = vcmp.eq.s32.totalorder %v13982_v6, %v4028_v31 }
 0x41b   : > { %v4038_v12 = vsel %vm4033_vm0, 1.0, %v18080_v0 }
 0x41c   : > { %v4041_v43 = vpack.c.bf16 %v4038_v12, %v4038_v12 }
 0x41e   : > { %13366 = vmatprep.subr.msk.bf16.mxu1 %vm4103_vm2, %v4041_v43  ;;  %v4105_v24 = vsel %vm4103_vm2, %v4041_v43, 0 }
 0x41f   : > { %12596 = vmatpush3.bf16.msra.mxu1 %v4105_v24 }
 0x420   : > { %12637 = vmatprep.subr.msk.bf16.mxu1 %vm14072_vm9, %v18209_v40 }
 0x451   : > { %v12453_v11 = vpop.f32.mrb[16].mxu1 }
 0x452   : > { %v3464_v49 = vpop.f32.mrb[17].mxu1 }
 0x455   : > { %v12456_v27 = vpop.f32.mrb[18].mxu1 }
 0x456   : > { %v3474_v28 = vpop.f32.mrb[19].mxu1 }
 0x459   : > { %v12459_v52 = vpop.f32.mrb[20].mxu1 }
 0x45a   : > { %v3484_v39 = vpop.f32.mrb[21].mxu1 }
 0x45d   : > { %v15386_v3 = vpop.f32.mrb[22].mxu1 }
 0x45e   : > { %v15388_v14 = vpop.f32.mrb[23].mxu1 }
 0x461   : > { %v15390_v33 = vpop.f32.mrb[24].mxu1 }
 0x462   : > { %v15392_v56 = vpop.f32.mrb[25].mxu1 }
 0x465   : > { %v15394_v20 = vpop.f32.mrb[26].mxu1 }
 0x466   : > { %v15396_v41 = vpop.f32.mrb[27].mxu1 }
 0x469   : > { %v15398_v8 = vpop.f32.mrb[28].mxu1 }
 0x46a   : > { %v15400_v25 = vpop.f32.mrb[29].mxu1 }
 0x46d   : > { %v15402_v48 = vpop.f32.mrb[30].mxu1 }
 0x46e   : > { %v15404_v63 = vpop.f32.mrb[31].mxu1 }
 0x471   : > { %v15406_v15 = vpop.f32.mrb[32].mxu1 }
 0x472   : > { %v15408_v46 = vpop.f32.mrb[33].mxu1 }
 0x475   : > { %v15410_v1 = vpop.f32.mrb[34].mxu1 }
 0x476   : > { %v15412_v23 = vpop.f32.mrb[35].mxu1 }
 0x479   : > { %v15414_v21 = vpop.f32.mrb[36].mxu1 }
 0x47a   : > { %v15416_v26 = vpop.f32.mrb[37].mxu1 }
 0x47d   : > { %v15418_v60 = vpop.f32.mrb[38].mxu1 }
 0x47e   : > { %v15420_v42 = vpop.f32.mrb[39].mxu1 }
 0x481   : > { %v15422_v18 = vpop.f32.mrb[40].mxu1 }
 0x482   : > { %v15424_v57 = vpop.f32.mrb[41].mxu1 }
 0x485   : > { %v15426_v58 = vpop.f32.mrb[42].mxu1 }
 0x486   : > { %v15428_v22 = vpop.f32.mrb[43].mxu1 }
 0x489   : > { %v15430_v36 = vpop.f32.mrb[44].mxu1 }
 0x48a   : > { %v15432_v7 = vpop.f32.mrb[45].mxu1 }
 0x48d   : > { %v15434_v59 = vpop.f32.mrb[46].mxu1 }
 0x48e   : > { %v15436_v34 = vpop.f32.mrb[47].mxu1 }
 0x491   : > { %v15438_v44 = vpop.f32.mrb[48].mxu1 }
 0x492   : > { %v15440_v45 = vpop.f32.mrb[49].mxu1 }
 0x495   : > { %v15442_v30 = vpop.f32.mrb[50].mxu1 }
 0x496   : > { %v15444_v53 = vpop.f32.mrb[51].mxu1 }
 0x499   : > { %v15446_v62 = vpop.f32.mrb[52].mxu1 }
 0x49a   : > { %v15448_v54 = vpop.f32.mrb[53].mxu1 }
 0x49d   : > { %v15450_v9 = vpop.f32.mrb[54].mxu1 }
 0x49e   : > { %v15452_v55 = vpop.f32.mrb[55].mxu1 }
 0x4a1   : > { %v12533_v32 = vpop.f32.mrb[56].mxu1 }
 0x4a2   : > { %v3929_v10 = vmax.f32 %v12453_v11, %v12533_v32  ;;  %v3729_v61 = vpop.f32.mrb[57].mxu1  ;;  %v18299_v32 = vmov 0.0  }
 0x4a3   : > { %v3928_v50 = vmax.f32 %v3464_v49, %v3729_v61 }
 0x4a4   : > { %v3969_v17 = vmax.f32 %v3929_v10, 0.0  ;;  %v18300_v10 = vld [vmem:[#allocation10_spill] sm:$0xff] }
 0x4a5   : > { %v3968_v47 = vmax.f32 %v3928_v50, 0.0  ;;  %v12536_v2 = vpop.f32.mrb[58].mxu1  ;;  %vm18301_vm7 = vcmp.eq.s32.totalorder %v13982_v6, %v18300_v10 }
 0x4a6   : > { %v3931_v19 = vmax.f32 %v12456_v27, %v12536_v2  ;;  %v3739_v31 = vpop.f32.mrb[59].mxu1  ;;  %v262_v27 = vsel %vm18301_vm7, 1.0, %v18299_v32 }
 0x4a7   : > { %v15454_v12 = vpack.c.bf16 %v3969_v17, %v3968_v47  ;;  %v3930_v43 = vmax.f32 %v3474_v28, %v3739_v31 }
 0x4a8   : > { %v3971_v24 = vmax.f32 %v3931_v19, 0.0 }
 0x4a9   : > { %18297 = vst [vmem:[#allocation20_spill] sm:$0xff] %v15454_v12  ;;  %v3970_v0 = vmax.f32 %v3930_v43, 0.0  ;;  %v12539_v38 = vpop.f32.mrb[60].mxu1  ;;  %12597 = vmatprep.mubr.msk.bf16.mxu1 %vm4042_vm3, %v15454_v12 }
 0x4aa   : > { %v3933_v13 = vmax.f32 %v12459_v52, %v12539_v38  ;;  %v3749_v51 = vpop.f32.mrb[61].mxu1  ;;  %v4400_v38 = vpack.c.bf16 %v262_v27, %v262_v27 }
 0x4ab   : > { %v15458_v11 = vpack.c.bf16 %v3971_v24, %v3970_v0  ;;  %v3932_v49 = vmax.f32 %v3484_v39, %v3749_v51 }
 0x4ac   : > { %v3973_v61 = vmax.f32 %v3933_v13, 0.0  ;;  %v4402_v31 = vsel %vm4103_vm2, %v4400_v38, 0 }
 0x4ad   : > { %18298 = vst [vmem:[#allocation21_spill] sm:$0xff] %v15458_v11  ;;  %v3972_v50 = vmax.f32 %v3932_v49, 0.0  ;;  %v12542_v17 = vpop.f32.mrb[62].mxu1  ;;  %12598 = vmatmul.mubr.msk.bf16.vlgmr.msra.gmra.mrb[96].mxu1 %vm4042_vm3, %v15458_v11 }
 0x4ae   : > { %v3935_v28 = vmax.f32 %v15386_v3, %v12542_v17  ;;  %v3759_v47 = vpop.f32.mrb[63].mxu1  ;;  %12638 = vmatpush3.bf16.msk.msra.mxu1 %vm14072_vm9, %v18209_v40  ;;  %vm4998_vm9 = vcmask 523264  }
 0x4af   : > { %v15470_v51 = vpack.c.bf16 %v3973_v61, %v3972_v50  ;;  %v3934_v0 = vmax.f32 %v15388_v14, %v3759_v47  ;;  %12639 = vmatprep.subr.msk.bf16.mxu1 %vm14086_vm14, %v18209_v40  ;;  %v18306_v50 = vmov 0  }
 0x4b0   : > { %v3975_v13 = vmax.f32 %v3935_v28, 0.0 }
 0x4b1   : > { %18302 = vst [vmem:[#allocation22_spill] sm:$0xff] %v15470_v51  ;;  %v3974_v39 = vmax.f32 %v3934_v0, 0.0  ;;  %v12545_v2 = vpop.f32.mrb[64].mxu1  ;;  %12601 = vmatprep.mubr.msk.bf16.mxu1 %vm4042_vm3, %v15470_v51 }
 0x4b2   : > { %v3937_v3 = vmax.f32 %v15390_v33, %v12545_v2  ;;  %v3769_v19 = vpop.f32.mrb[65].mxu1  ;;  %12640 = vmatpush3.bf16.msk.msra.mxu1 %vm14086_vm14, %v18209_v40  ;;  %vm18339_vm14 = vcmp.eq.s32.totalorder %v13982_v6, %v18293_v16 }
 0x4b3   : > { %v15482_v29 = vpack.c.bf16 %v3975_v13, %v3974_v39  ;;  %v3936_v14 = vmax.f32 %v15392_v56, %v3769_v19  ;;  %13367 = vmatprep.subr.msk.bf16.mxu1 %vm4103_vm2, %v4400_v38 }
 0x4b4   : > { %v3977_v43 = vmax.f32 %v3937_v3, 0.0 }
 0x4b5   : > { %18304 = vst [vmem:[#allocation23_spill] sm:$0xff] %v15482_v29  ;;  %v3976_v24 = vmax.f32 %v3936_v14, 0.0  ;;  %v12548_v49 = vpop.f32.mrb[66].mxu1  ;;  %12602 = vmatmul.mubr.msk.bf16.gmra.mrb[100].mxu1 %vm4042_vm3, %v15482_v29 }
 0x4b6   : > { %v3939_v33 = vmax.f32 %v15394_v20, %v12548_v49  ;;  %v3779_v10 = vpop.f32.mrb[67].mxu1  ;;  %12642 = vmatpush3.bf16.msra.mxu1 %v4402_v31 }
 0x4b7   : > { %v15490_v27 = vpack.c.bf16 %v3977_v43, %v3976_v24  ;;  %v3938_v61 = vmax.f32 %v15396_v41, %v3779_v10  ;;  %5059 = vmatprep.subr.bf16.mxu1 %v18306_v50 }
 0x4b8   : > { %v3979_v56 = vmax.f32 %v3939_v33, 0.0 }
 0x4b9   : > { %18305 = vst [vmem:[#allocation24_spill] sm:$0xff] %v15490_v27  ;;  %v3978_v17 = vmax.f32 %v3938_v61, 0.0  ;;  %v12551_v28 = vpop.f32.mrb[68].mxu1  ;;  %12605 = vmatprep.mubr.msk.bf16.mxu1 %vm4042_vm3, %v15490_v27 }
 0x4ba   : > { %v3941_v47 = vmax.f32 %v15398_v8, %v12551_v28  ;;  %v3789_v38 = vpop.f32.mrb[69].mxu1 }
 0x4bb   : > { %v15497_v0 = vpack.c.bf16 %v3979_v56, %v3978_v17  ;;  %v3940_v20 = vmax.f32 %v15400_v25, %v3789_v38 }
 0x4bc   : > { %v3981_v52 = vmax.f32 %v3941_v47, 0.0 }
 0x4bd   : > { %18307 = vst [vmem:[#allocation25_spill] sm:$0xff] %v15497_v0  ;;  %v3980_v13 = vmax.f32 %v3940_v20, 0.0  ;;  %v12554_v39 = vpop.f32.mrb[70].mxu1  ;;  %12606 = vmatmul.mubr.msk.bf16.gmra.mrb[104].mxu1 %vm4042_vm3, %v15497_v0 }
 0x4be   : > { %v3943_v41 = vmax.f32 %v15402_v48, %v12554_v39  ;;  %v3799_v2 = vpop.f32.mrb[71].mxu1 }
 0x4bf   : > { %v15503_v3 = vpack.c.bf16 %v3981_v52, %v3980_v13  ;;  %v3942_v19 = vmax.f32 %v15404_v63, %v3799_v2 }
 0x4c0   : > { %v3983_v14 = vmax.f32 %v3943_v41, 0.0 }
 0x4c1   : > { %18308 = vst [vmem:[#allocation26_spill] sm:$0xff] %v15503_v3  ;;  %v3982_v8 = vmax.f32 %v3942_v19, 0.0  ;;  %v12557_v31 = vpop.f32.mrb[72].mxu1  ;;  %12609 = vmatprep.mubr.msk.bf16.mxu1 %vm4042_vm3, %v15503_v3 }
 0x4c2   : > { %v3945_v25 = vmax.f32 %v15406_v15, %v12557_v31  ;;  %v3809_v43 = vpop.f32.mrb[73].mxu1 }
 0x4c3   : > { %v15509_v24 = vpack.c.bf16 %v3983_v14, %v3982_v8  ;;  %v3944_v49 = vmax.f32 %v15408_v46, %v3809_v43 }
 0x4c4   : > { %v3985_v33 = vmax.f32 %v3945_v25, 0.0 }
 0x4c5   : > { %18309 = vst [vmem:[#allocation27_spill] sm:$0xff] %v15509_v24  ;;  %v3984_v48 = vmax.f32 %v3944_v49, 0.0  ;;  %v12560_v10 = vpop.f32.mrb[74].mxu1  ;;  %12610 = vmatmul.mubr.msk.bf16.gmra.mrb[108].mxu1 %vm4042_vm3, %v15509_v24 }
 0x4c6   : > { %v3947_v63 = vmax.f32 %v15410_v1, %v12560_v10  ;;  %v3819_v61 = vpop.f32.mrb[75].mxu1 }
 0x4c7   : > { %v15515_v56 = vpack.c.bf16 %v3985_v33, %v3984_v48  ;;  %v3946_v17 = vmax.f32 %v15412_v23, %v3819_v61 }
 0x4c8   : > { %v3987_v28 = vmax.f32 %v3947_v63, 0.0 }
 0x4c9   : > { %18310 = vst [vmem:[#allocation28_spill] sm:$0xff] %v15515_v56  ;;  %v3986_v15 = vmax.f32 %v3946_v17, 0.0  ;;  %v12563_v47 = vpop.f32.mrb[76].mxu1  ;;  %12613 = vmatprep.mubr.msk.bf16.mxu1 %vm4042_vm3, %v15515_v56 }
 0x4ca   : > { %v3949_v46 = vmax.f32 %v15414_v21, %v12563_v47  ;;  %v3829_v38 = vpop.f32.mrb[77].mxu1 }
 0x4cb   : > { %v15521_v20 = vpack.c.bf16 %v3987_v28, %v3986_v15  ;;  %v3948_v52 = vmax.f32 %v15416_v26, %v3829_v38 }
 0x4cc   : > { %v3989_v13 = vmax.f32 %v3949_v46, 0.0 }
 0x4cd   : > { %18311 = vst [vmem:[#allocation11_spill] sm:$0xff] %v15521_v20  ;;  %v3988_v1 = vmax.f32 %v3948_v52, 0.0  ;;  %v12566_v39 = vpop.f32.mrb[78].mxu1  ;;  %12614 = vmatmul.mubr.msk.bf16.gmra.mrb[112].mxu1 %vm4042_vm3, %v15521_v20 }
 0x4ce   : > { %v3951_v23 = vmax.f32 %v15418_v60, %v12566_v39  ;;  %v3839_v41 = vpop.f32.mrb[79].mxu1 }
 0x4cf   : > { %v15527_v2 = vpack.c.bf16 %v3989_v13, %v3988_v1  ;;  %v3950_v19 = vmax.f32 %v15420_v42, %v3839_v41 }
 0x4d0   : > { %v3991_v14 = vmax.f32 %v3951_v23, 0.0 }
 0x4d1   : > { %18312 = vst [vmem:[#allocation10_spill] sm:$0xff] %v15527_v2  ;;  %v3990_v21 = vmax.f32 %v3950_v19, 0.0  ;;  %v12569_v8 = vpop.f32.mrb[80].mxu1  ;;  %12617 = vmatprep.mubr.msk.bf16.mxu1 %vm4042_vm3, %v15527_v2 }
 0x4d2   : > { %v3953_v26 = vmax.f32 %v15422_v18, %v12569_v8  ;;  %v3849_v31 = vpop.f32.mrb[81].mxu1 }
 0x4d3   : > { %v15533_v25 = vpack.c.bf16 %v3991_v14, %v3990_v21  ;;  %v3952_v43 = vmax.f32 %v15424_v57, %v3849_v31 }
 0x4d4   : > { %v3993_v49 = vmax.f32 %v3953_v26, 0.0 }
 0x4d5   : > { %18313 = vst [vmem:[#allocation12_spill] sm:$0xff] %v15533_v25  ;;  %v3992_v60 = vmax.f32 %v3952_v43, 0.0  ;;  %v12572_v33 = vpop.f32.mrb[82].mxu1  ;;  %12618 = vmatmul.mubr.msk.bf16.gmra.mrb[116].mxu1 %vm4042_vm3, %v15533_v25 }
 0x4d6   : > { %v3955_v42 = vmax.f32 %v15426_v58, %v12572_v33  ;;  %v3859_v48 = vpop.f32.mrb[83].mxu1 }
 0x4d7   : > { %v15539_v10 = vpack.c.bf16 %v3993_v49, %v3992_v60  ;;  %v3954_v63 = vmax.f32 %v15428_v22, %v3859_v48 }
 0x4d8   : > { %v3995_v61 = vmax.f32 %v3955_v42, 0.0 }
 0x4d9   : > { %18314 = vst [vmem:[#allocation31_spill] sm:$0xff] %v15539_v10  ;;  %v3994_v18 = vmax.f32 %v3954_v63, 0.0  ;;  %v12575_v17 = vpop.f32.mrb[84].mxu1  ;;  %12621 = vmatprep.mubr.msk.bf16.mxu1 %vm4042_vm3, %v15539_v10 }
 0x4da   : > { %v3957_v57 = vmax.f32 %v15430_v36, %v12575_v17  ;;  %v3869_v28 = vpop.f32.mrb[85].mxu1 }
 0x4db   : > { %v15545_v15 = vpack.c.bf16 %v3995_v61, %v3994_v18  ;;  %v3956_v47 = vmax.f32 %v15432_v7, %v3869_v28 }
 0x4dc   : > { %v3997_v46 = vmax.f32 %v3957_v57, 0.0 }
 0x4dd   : > { %18315 = vst [vmem:[#allocation32_spill] sm:$0xff] %v15545_v15  ;;  %v3996_v58 = vmax.f32 %v3956_v47, 0.0  ;;  %v12578_v38 = vpop.f32.mrb[86].mxu1  ;;  %12622 = vmatmul.mubr.msk.bf16.gmra.mrb[120].mxu1 %vm4042_vm3, %v15545_v15 }
 0x4de   : > { %v3959_v22 = vmax.f32 %v15434_v59, %v12578_v38  ;;  %v3879_v52 = vpop.f32.mrb[87].mxu1 }
 0x4df   : > { %v15551_v13 = vpack.c.bf16 %v3997_v46, %v3996_v58  ;;  %v3958_v1 = vmax.f32 %v15436_v34, %v3879_v52 }
 0x4e0   : > { %v3999_v39 = vmax.f32 %v3959_v22, 0.0 }
 0x4e1   : > { %18316 = vst [vmem:[#allocation33_spill] sm:$0xff] %v15551_v13  ;;  %v3998_v36 = vmax.f32 %v3958_v1, 0.0  ;;  %v12581_v23 = vpop.f32.mrb[88].mxu1  ;;  %12625 = vmatprep.mubr.msk.bf16.mxu1 %vm4042_vm3, %v15551_v13 }
 0x4e2   : > { %v3961_v7 = vmax.f32 %v15438_v44, %v12581_v23  ;;  %v3889_v41 = vpop.f32.mrb[89].mxu1 }
 0x4e3   : > { %v15557_v19 = vpack.c.bf16 %v3999_v39, %v3998_v36  ;;  %v3960_v14 = vmax.f32 %v15440_v45, %v3889_v41 }
 0x4e4   : > { %v4001_v21 = vmax.f32 %v3961_v7, 0.0 }
 0x4e5   : > { %18317 = vst [vmem:[#allocation34_spill] sm:$0xff] %v15557_v19  ;;  %v4000_v59 = vmax.f32 %v3960_v14, 0.0  ;;  %v12584_v8 = vpop.f32.mrb[90].mxu1  ;;  %12626 = vmatmul.mubr.msk.bf16.gmra.mrb[124].mxu1 %vm4042_vm3, %v15557_v19 }
 0x4e6   : > { %v3963_v34 = vmax.f32 %v15442_v30, %v12584_v8  ;;  %v3899_v26 = vpop.f32.mrb[91].mxu1 }
 0x4e7   : > { %v15563_v31 = vpack.c.bf16 %v4001_v21, %v4000_v59  ;;  %v3962_v43 = vmax.f32 %v15444_v53, %v3899_v26  ;;  %v13512_v21 = vld [vmem:[%s18032_s3 + $0x1e4] ss:$12 sps:$4 sm:$0xff]  }
 0x4e8   : > { %v4003_v49 = vmax.f32 %v3963_v34, 0.0 }
 0x4e9   : > { %18318 = vst [vmem:[#allocation35_spill] sm:$0xff] %v15563_v31  ;;  %v4002_v44 = vmax.f32 %v3962_v43, 0.0  ;;  %v12587_v60 = vpop.f32.mrb[92].mxu1  ;;  %12629 = vmatprep.mubr.msk.bf16.mxu1 %vm4042_vm3, %v15563_v31 }
 0x4ea   : > { %v3965_v45 = vmax.f32 %v15446_v62, %v12587_v60  ;;  %v3909_v33 = vpop.f32.mrb[93].mxu1 }
 0x4eb   : > { %v15569_v42 = vpack.c.bf16 %v4003_v49, %v4002_v44  ;;  %v3964_v48 = vmax.f32 %v15448_v54, %v3909_v33 }
 0x4ec   : > { %v4005_v63 = vmax.f32 %v3965_v45, 0.0 }
 0x4ed   : > { %18319 = vst [vmem:[#allocation36_spill] sm:$0xff] %v15569_v42  ;;  %v4004_v30 = vmax.f32 %v3964_v48, 0.0  ;;  %v12590_v61 = vpop.f32.mrb[94].mxu1  ;;  %12630 = vmatmul.mubr.msk.bf16.gmra.mrb[128].mxu1 %vm4042_vm3, %v15569_v42 }
 0x4ee   : > { %v3967_v53 = vmax.f32 %v15450_v9, %v12590_v61  ;;  %v3919_v18 = vpop.f32.mrb[95].mxu1 }
 0x4ef   : > { %v15575_v17 = vpack.c.bf16 %v4005_v63, %v4004_v30  ;;  %v3966_v57 = vmax.f32 %v15452_v55, %v3919_v18 }
 0x4f0   : > { %v4007_v28 = vmax.f32 %v3967_v53, 0.0  ;;  %v13519_v53 = vld [vmem:[%s18032_s3 + $0x1e8] ss:$12 sps:$4 sm:$0xff]  }
 0x4f1   : > { %18320 = vst [vmem:[#allocation37_spill] sm:$0xff] %v15575_v17  ;;  %v4006_v62 = vmax.f32 %v3966_v57, 0.0  ;;  %12633 = vmatprep.mubr.msk.bf16.mxu1 %vm4042_vm3, %v15575_v17  ;;  %12691 = vmatprep.mubr.msk.bf16.mxu0 %vm4998_vm9, %v13519_v53 }
 0x4f3   : > { %v15580_v47 = vpack.c.bf16 %v4007_v28, %v4006_v62 }
 0x4f5   : > { %18321 = vst [vmem:[#allocation38_spill] sm:$0xff] %v15580_v47  ;;  %12634 = vmatmul.mubr.msk.bf16.gmra.mrb[132].mxu1 %vm4042_vm3, %v15580_v47 }
 0x4f6   : > { %12643 = vmatprep.mubr.msk.bf16.mxu1 %vm4042_vm3, %v15454_v12 }
 0x4fd   : > { %12644 = vmatmul.mubr.msk.bf16.vlgmr.msra.gmra.mrb[136].mxu1 %vm4042_vm3, %v15458_v11 }
 0x4fe   : > { %12647 = vmatprep.mubr.msk.bf16.mxu1 %vm4042_vm3, %v15470_v51 }
 0x505   : > { %12648 = vmatmul.mubr.msk.bf16.gmra.mrb[140].mxu1 %vm4042_vm3, %v15482_v29 }
 0x506   : > { %12651 = vmatprep.mubr.msk.bf16.mxu1 %vm4042_vm3, %v15490_v27 }
 0x50d   : > { %12652 = vmatmul.mubr.msk.bf16.gmra.mrb[144].mxu1 %vm4042_vm3, %v15497_v0 }
 0x50e   : > { %12655 = vmatprep.mubr.msk.bf16.mxu1 %vm4042_vm3, %v15503_v3 }
 0x515   : > { %12656 = vmatmul.mubr.msk.bf16.gmra.mrb[148].mxu1 %vm4042_vm3, %v15509_v24 }
 0x516   : > { %12659 = vmatprep.mubr.msk.bf16.mxu1 %vm4042_vm3, %v15515_v56 }
 0x51d   : > { %12660 = vmatmul.mubr.msk.bf16.gmra.mrb[152].mxu1 %vm4042_vm3, %v15521_v20 }
 0x51e   : > { %12663 = vmatprep.mubr.msk.bf16.mxu1 %vm4042_vm3, %v15527_v2 }
 0x525   : > { %12664 = vmatmul.mubr.msk.bf16.gmra.mrb[156].mxu1 %vm4042_vm3, %v15533_v25 }
 0x526   : > { %12667 = vmatprep.mubr.msk.bf16.mxu1 %vm4042_vm3, %v15539_v10 }
 0x52d   : > { %12668 = vmatmul.mubr.msk.bf16.gmra.mrb[160].mxu1 %vm4042_vm3, %v15545_v15 }
 0x52e   : > { %12671 = vmatprep.mubr.msk.bf16.mxu1 %vm4042_vm3, %v15551_v13 }
 0x535   : > { %12672 = vmatmul.mubr.msk.bf16.gmra.mrb[164].mxu1 %vm4042_vm3, %v15557_v19 }
 0x536   : > { %12675 = vmatprep.mubr.msk.bf16.mxu1 %vm4042_vm3, %v15563_v31 }
 0x53d   : > { %12676 = vmatmul.mubr.msk.bf16.gmra.mrb[168].mxu1 %vm4042_vm3, %v15569_v42 }
 0x53e   : > { %12679 = vmatprep.mubr.msk.bf16.mxu1 %vm4042_vm3, %v15575_v17 }
 0x545   : > { %12680 = vmatmul.mubr.msk.bf16.gmra.mrb[172].mxu1 %vm4042_vm3, %v15580_v47 }
 0x546   : > { %5091 = vmatprep.mubr.bf16.mxu1 %v13512_v21 }
 0x580   : > { %v15624_v54 = vpop.f32.mrb[96].mxu1 }
 0x581   : > { %v15626_v9 = vpop.f32.mrb[97].mxu1 }
 0x582   : > { %v15628_v55 = vpop.f32.mrb[98].mxu1 }
 0x583   : > { %v15632_v58 = vpop.f32.mrb[99].mxu1 }
 0x588   : > { %v15636_v22 = vpop.f32.mrb[100].mxu1 }
 0x589   : > { %v15638_v52 = vpop.f32.mrb[101].mxu1 }
 0x58a   : > { %v15640_v1 = vpop.f32.mrb[102].mxu1 }
 0x58b   : > { %v15644_v36 = vpop.f32.mrb[103].mxu1 }
 0x590   : > { %v15648_v7 = vpop.f32.mrb[104].mxu1 }
 0x591   : > { %v15650_v41 = vpop.f32.mrb[105].mxu1 }
 0x592   : > { %v15652_v14 = vpop.f32.mrb[106].mxu1 }
 0x593   : > { %v15659_v8 = vpop.f32.mrb[107].mxu1 }
 0x598   : > { %v15663_v26 = vpop.f32.mrb[108].mxu1 }
 0x599   : > { %v15665_v43 = vpop.f32.mrb[109].mxu1 }
 0x59a   : > { %v15667_v49 = vpop.f32.mrb[110].mxu1 }
 0x59b   : > { %v15671_v60 = vpop.f32.mrb[111].mxu1 }
 0x5a0   : > { %v15675_v33 = vpop.f32.mrb[112].mxu1 }
 0x5a1   : > { %v15677_v48 = vpop.f32.mrb[113].mxu1 }
 0x5a2   : > { %v15679_v63 = vpop.f32.mrb[114].mxu1 }
 0x5a3   : > { %v15683_v61 = vpop.f32.mrb[115].mxu1 }
 0x5a8   : > { %v15691_v57 = vpop.f32.mrb[116].mxu1 }
 0x5a9   : > { %v15693_v28 = vpop.f32.mrb[117].mxu1 }
 0x5aa   : > { %v15695_v62 = vpop.f32.mrb[118].mxu1 }
 0x5ab   : > { %v15699_v30 = vpop.f32.mrb[119].mxu1 }
 0x5b0   : > { %v15703_v45 = vpop.f32.mrb[120].mxu1 }
 0x5b1   : > { %v15705_v18 = vpop.f32.mrb[121].mxu1 }
 0x5b2   : > { %v15707_v59 = vpop.f32.mrb[122].mxu1 }
 0x5b3   : > { %v15711_v34 = vpop.f32.mrb[123].mxu1 }
 0x5b8   : > { %v15715_v21 = vpop.f32.mrb[124].mxu1 }
 0x5b9   : > { %v15717_v23 = vpop.f32.mrb[125].mxu1 }
 0x5ba   : > { %v15719_v46 = vpop.f32.mrb[126].mxu1 }
 0x5bb   : > { %v15723_v38 = vpop.f32.mrb[127].mxu1 }
 0x5c0   : > { %v12631_v53 = vpop.f32.mrb[128].mxu1 }
 0x5c1   : > { %v4269_v4 = vpop.f32.mrb[129].mxu1 }
 0x5c2   : > { %v12632_v35 = vpop.f32.mrb[130].mxu1 }
 0x5c3   : > { %v15727_v37 = vpack.c.bf16 %v12632_v35, %v12631_v53  ;;  %v4272_v39 = vpop.f32.mrb[131].mxu1 }
 0x5c4   : > { %v15729_v47 = vpack.c.bf16 %v4272_v39, %v4269_v4 }
 0x5c8   : > { %v12635_v17 = vpop.f32.mrb[132].mxu1 }
 0x5c9   : > { %v4285_v42 = vpop.f32.mrb[133].mxu1 }
 0x5ca   : > { %v12636_v31 = vpop.f32.mrb[134].mxu1 }
 0x5cb   : > { %v15731_v19 = vpack.c.bf16 %v12636_v31, %v12635_v17  ;;  %v4288_v13 = vpop.f32.mrb[135].mxu1 }
 0x5cc   : > { %v15733_v44 = vpack.c.bf16 %v4288_v13, %v4285_v42 }
 0x5d0   : > { %v12645_v15 = vpop.f32.mrb[136].mxu1 }
 0x5d1   : > { %v4438_v10 = vpop.f32.mrb[137].mxu1 }
 0x5d2   : > { %v12646_v25 = vpop.f32.mrb[138].mxu1 }
 0x5d3   : > { %v4598_v5 = vpack.c.bf16 %v12646_v25, %v12645_v15  ;;  %v4441_v2 = vpop.f32.mrb[139].mxu1 }
 0x5d4   : > { %v4597_v20 = vpack.c.bf16 %v4441_v2, %v4438_v10 }
 0x5d6   : > { %5060 = vmatpush1.bf16.msra.mxu1 %v4597_v20 }
 0x5d7   : > { %5061 = vmatprep.subr.bf16.mxu1 %v18306_v50 }
 0x5d8   : > { %v12649_v35 = vpop.f32.mrb[140].mxu1 }
 0x5d9   : > { %v4454_v4 = vpop.f32.mrb[141].mxu1 }
 0x5da   : > { %v12650_v39 = vpop.f32.mrb[142].mxu1  ;;  %5062 = vmatpush1.bf16.msra.mxu1 %v4598_v5 }
 0x5db   : > { %v4600_v53 = vpack.c.bf16 %v12650_v39, %v12649_v35  ;;  %v4457_v56 = vpop.f32.mrb[143].mxu1  ;;  %5063 = vmatprep.subr.bf16.mxu1 %v18306_v50 }
 0x5dc   : > { %v4599_v31 = vpack.c.bf16 %v4457_v56, %v4454_v4 }
 0x5de   : > { %5064 = vmatpush1.bf16.msra.mxu1 %v4599_v31 }
 0x5df   : > { %5065 = vmatprep.subr.bf16.mxu1 %v18306_v50 }
 0x5e0   : > { %v12653_v13 = vpop.f32.mrb[144].mxu1 }
 0x5e1   : > { %v4470_v42 = vpop.f32.mrb[145].mxu1 }
 0x5e2   : > { %v12654_v25 = vpop.f32.mrb[146].mxu1  ;;  %5066 = vmatpush1.bf16.msra.mxu1 %v4600_v53 }
 0x5e3   : > { %v4602_v2 = vpack.c.bf16 %v12654_v25, %v12653_v13  ;;  %v4473_v20 = vpop.f32.mrb[147].mxu1  ;;  %5067 = vmatprep.subr.bf16.mxu1 %v18306_v50 }
 0x5e4   : > { %v4601_v10 = vpack.c.bf16 %v4473_v20, %v4470_v42 }
 0x5e6   : > { %5068 = vmatpush1.bf16.msra.mxu1 %v4601_v10 }
 0x5e7   : > { %5069 = vmatprep.subr.bf16.mxu1 %v18306_v50 }
 0x5e8   : > { %v12657_v5 = vpop.f32.mrb[148].mxu1 }
 0x5e9   : > { %v4486_v15 = vpop.f32.mrb[149].mxu1 }
 0x5ea   : > { %v12658_v17 = vpop.f32.mrb[150].mxu1  ;;  %5070 = vmatpush1.bf16.msra.mxu1 %v4602_v2 }
 0x5eb   : > { %v4604_v56 = vpack.c.bf16 %v12658_v17, %v12657_v5  ;;  %v4489_v35 = vpop.f32.mrb[151].mxu1  ;;  %5071 = vmatprep.subr.bf16.mxu1 %v18306_v50 }
 0x5ec   : > { %v4603_v4 = vpack.c.bf16 %v4489_v35, %v4486_v15 }
 0x5ee   : > { %5072 = vmatpush1.bf16.msra.mxu1 %v4603_v4 }
 0x5ef   : > { %5073 = vmatprep.subr.bf16.mxu1 %v18306_v50 }
 0x5f0   : > { %v12661_v39 = vpop.f32.mrb[152].mxu1 }
 0x5f1   : > { %v4502_v53 = vpop.f32.mrb[153].mxu1 }
 0x5f2   : > { %v12662_v31 = vpop.f32.mrb[154].mxu1  ;;  %5074 = vmatpush1.bf16.msra.mxu1 %v4604_v56 }
 0x5f3   : > { %v4606_v13 = vpack.c.bf16 %v12662_v31, %v12661_v39  ;;  %v4505_v42 = vpop.f32.mrb[155].mxu1  ;;  %5075 = vmatprep.subr.bf16.mxu1 %v18306_v50 }
 0x5f4   : > { %v4605_v25 = vpack.c.bf16 %v4505_v42, %v4502_v53 }
 0x5f6   : > { %5076 = vmatpush1.bf16.msra.mxu1 %v4605_v25 }
 0x5f7   : > { %5077 = vmatprep.subr.bf16.mxu1 %v18306_v50 }
 0x5f8   : > { %v12665_v2 = vpop.f32.mrb[156].mxu1 }
 0x5f9   : > { %v4518_v20 = vpop.f32.mrb[157].mxu1 }
 0x5fa   : > { %v12666_v10 = vpop.f32.mrb[158].mxu1  ;;  %5078 = vmatpush1.bf16.msra.mxu1 %v4606_v13 }
 0x5fb   : > { %v4608_v5 = vpack.c.bf16 %v12666_v10, %v12665_v2  ;;  %v4521_v15 = vpop.f32.mrb[159].mxu1  ;;  %5079 = vmatprep.subr.bf16.mxu1 %v18306_v50 }
 0x5fc   : > { %v4607_v17 = vpack.c.bf16 %v4521_v15, %v4518_v20 }
 0x5fe   : > { %5080 = vmatpush1.bf16.msra.mxu1 %v4607_v17  ;;  %v13510_v17 = vld [vmem:[%s18032_s3 + $0x1e0] ss:$12 sps:$4 sm:$0xff]  }
 0x5ff   : > { %5081 = vmatprep.subr.bf16.mxu1 %v18306_v50 }
 0x600   : > { %v12669_v56 = vpop.f32.mrb[160].mxu1 }
 0x601   : > { %v4534_v35 = vpop.f32.mrb[161].mxu1 }
 0x602   : > { %v12670_v4 = vpop.f32.mrb[162].mxu1  ;;  %5082 = vmatpush1.bf16.msra.mxu1 %v4608_v5 }
 0x603   : > { %v4610_v39 = vpack.c.bf16 %v12670_v4, %v12669_v56  ;;  %v4537_v53 = vpop.f32.mrb[163].mxu1  ;;  %5083 = vmatprep.subr.bf16.mxu1 %v18306_v50 }
 0x604   : > { %v4609_v31 = vpack.c.bf16 %v4537_v53, %v4534_v35  ;;  %v13513_v53 = vld [vmem:[%s18032_s3 + $0x1fc] ss:$12 sps:$4 sm:$0xff]  }
 0x606   : > { %5084 = vmatpush1.bf16.msra.mxu1 %v4609_v31  ;;  %v18322_v31 = vpack.c.bf16 %v15632_v58, %v15626_v9  ;;  %v13516_v58 = vld [vmem:[%s18032_s3 + $0x214] ss:$12 sps:$4 sm:$0xff]  }
 0x607   : > { %5085 = vmatprep.subr.bf16.mxu1 %v18306_v50 }
 0x608   : > { %v12673_v13 = vpop.f32.mrb[164].mxu1 }
 0x609   : > { %v4550_v42 = vpop.f32.mrb[165].mxu1 }
 0x60a   : > { %v12674_v25 = vpop.f32.mrb[166].mxu1  ;;  %5086 = vmatpush1.bf16.msra.mxu1 %v4610_v39 }
 0x60b   : > { %v4612_v2 = vpack.c.bf16 %v12674_v25, %v12673_v13  ;;  %v4553_v20 = vpop.f32.mrb[167].mxu1  ;;  %5087 = vmatprep.subr.bf16.mxu1 %v18306_v50  ;;  %v13515_v25 = vld [vmem:[%s18032_s3 + $0x1f8] ss:$12 sps:$4 sm:$0xff]  }
 0x60c   : > { %v4611_v10 = vpack.c.bf16 %v4553_v20, %v4550_v42  ;;  %v18323_v20 = vpack.c.bf16 %v15628_v55, %v15624_v54  ;;  %v13518_v54 = vld [vmem:[%s18032_s3 + $0x210] ss:$12 sps:$4 sm:$0xff]   ;;  %v18325_v55 = vpack.c.bf16 %v15640_v1, %v15636_v22  ;;  %v18326_v22 = vpack.c.bf16 %v15659_v8, %v15650_v41  ;;  %v13523_v1 = vld [vmem:[%s18032_s3 + $0x228] ss:$12 sps:$4 sm:$0xff]  }
 0x60d   : > { %v13525_v41 = vld [vmem:[%s18032_s3 + $0x230] ss:$12 sps:$4 sm:$0xff]   ;;  %v18329_v8 = vpack.c.bf16 %v15667_v49, %v15663_v26  ;;  %v13533_v26 = vld [vmem:[%s18032_s3 + $0x258] ss:$12 sps:$4 sm:$0xff]   ;;  %v18332_v49 = vpack.c.bf16 %v15679_v63, %v15675_v33  ;;  %v18333_v33 = vpack.c.bf16 %v15699_v30, %v15693_v28 }
 0x60e   : > { %5088 = vmatpush1.bf16.msra.mxu1 %v4611_v10  ;;  %v13538_v63 = vld [vmem:[%s18032_s3 + $0x270] ss:$12 sps:$4 sm:$0xff]   ;;  %v13541_v30 = vld [vmem:[%s18032_s3 + $0x28c] ss:$12 sps:$4 sm:$0xff]  }
 0x60f   : > { %5089 = vmatprep.subr.bf16.mxu1 %v18306_v50  ;;  %v13544_v28 = vld [vmem:[%s18032_s3 + $0x2d8] ss:$12 sps:$4 sm:$0xff]  }
 0x610   : > { %v12677_v5 = vpop.f32.mrb[168].mxu1 }
 0x611   : > { %v4566_v15 = vpop.f32.mrb[169].mxu1 }
 0x612   : > { %v12678_v56 = vpop.f32.mrb[170].mxu1  ;;  %5090 = vmatpush1.bf16.msra.mxu1 %v4612_v2 }
 0x613   : > { %v4614_v35 = vpack.c.bf16 %v12678_v56, %v12677_v5  ;;  %v4569_v4 = vpop.f32.mrb[171].mxu1  ;;  %5805 = vmatprep.subr.bf16.mxu1 %v18306_v50  ;;  %v18327_v56 = vpack.c.bf16 %v15652_v14, %v15648_v7  ;;  %v13529_v7 = vld [vmem:[%s18032_s3 + $0x248] ss:$12 sps:$4 sm:$0xff]   ;;  %v18328_v14 = vpack.c.bf16 %v15671_v60, %v15665_v43  ;;  %v13530_v43 = vld [vmem:[%s18032_s3 + $0x260] ss:$12 sps:$4 sm:$0xff]  }
 0x614   : > { %v4613_v39 = vpack.c.bf16 %v4569_v4, %v4566_v15  ;;  %v18324_v15 = vpack.c.bf16 %v15644_v36, %v15638_v52  ;;  %v13521_v52 = vld [vmem:[%s18032_s3 + $0x22c] ss:$12 sps:$4 sm:$0xff]   ;;  %v13535_v4 = vld [vmem:[%s18032_s3 + $0x290] ss:$12 sps:$4 sm:$0xff]  }
 0x615   : > { %5092 = vmatmul.mubr.bf16.vlgmr.msra.gmra.mrb[176].mxu1 %v13510_v17  ;;  %v13520_v17 = vld [vmem:[%s18032_s3 + $0x200] ss:$12 sps:$4 sm:$0xff]   ;;  %v13524_v36 = vld [vmem:[%s18032_s3 + $0x218] ss:$12 sps:$4 sm:$0xff]  }
 0x616   : > { %12683 = vmatprep.subr.bf16.mxu0 %v4613_v39  ;;  %5806 = vmatpush1.bf16.msra.mxu1 %v18322_v31  ;;  %v13534_v60 = vld [vmem:[%s18032_s3 + $0x278] ss:$12 sps:$4 sm:$0xff]   ;;  %v18336_v31 = vpack.c.bf16 %v15707_v59, %v15703_v45  ;;  %v18337_v59 = vpack.c.bf16 %v15723_v38, %v15717_v23  ;;  %v13548_v45 = vld [vmem:[%s18032_s3 + $0x2a0] ss:$12 sps:$4 sm:$0xff]   ;;  %v13551_v38 = vld [vmem:[%s18032_s3 + $0x2bc] ss:$12 sps:$4 sm:$0xff]  }
 0x617   : > { %12684 = vmatpush3.bf16.msra.mxu0 %v4613_v39  ;;  %5807 = vmatprep.subr.bf16.mxu1 %v18306_v50  ;;  %v18334_v39 = vpack.c.bf16 %v15695_v62, %v15691_v57  ;;  %v18335_v57 = vpack.c.bf16 %v15711_v34, %v15705_v18  ;;  %v13543_v62 = vld [vmem:[%s18032_s3 + $0x288] ss:$12 sps:$4 sm:$0xff]   ;;  %v13546_v34 = vld [vmem:[%s18032_s3 + $0x2a4] ss:$12 sps:$4 sm:$0xff]  }
 0x618   : > { %v12681_v13 = vpop.f32.mrb[172].mxu1  ;;  %12685 = vmatprep.subr.bf16.mxu0 %v4614_v35  ;;  %5099 = vmatprep.mubr.bf16.mxu1 %v13513_v53  ;;  %v13540_v53 = vld [vmem:[%s18032_s3 + $0x2c0] ss:$12 sps:$4 sm:$0xff]   ;;  %v13549_v18 = vld [vmem:[%s18032_s3 + $0x308] ss:$12 sps:$4 sm:$0xff]  }
 0x619   : > { %v4582_v42 = vpop.f32.mrb[173].mxu1  ;;  %v13554_v23 = vld [vmem:[%s18032_s3 + $0x338] ss:$12 sps:$4 sm:$0xff]  }
 0x61a   : > { %v12682_v2 = vpop.f32.mrb[174].mxu1  ;;  %5808 = vmatpush1.bf16.msra.mxu1 %v18323_v20  ;;  %v13559_v20 = vld [vmem:[%s18032_s3 + $0x368] ss:$12 sps:$4 sm:$0xff]  }
 0x61b   : > { %v4616_v10 = vpack.c.bf16 %v12682_v2, %v12681_v13  ;;  %v4585_v5 = vpop.f32.mrb[175].mxu1  ;;  %12686 = vmatpush3.bf16.msra.mxu0 %v4614_v35  ;;  %5809 = vmatprep.subr.bf16.mxu1 %v18306_v50  ;;  %v13545_v13 = vld [vmem:[%s18032_s3 + $0x2f0] ss:$12 sps:$4 sm:$0xff]   ;;  %v13556_v2 = vld [vmem:[%s18032_s3 + $0x2d4] ss:$12 sps:$4 sm:$0xff]  }
 0x61c   : > { %v4615_v9 = vpack.c.bf16 %v4585_v5, %v4582_v42  ;;  %v18338_v42 = vpack.c.bf16 %v15719_v46, %v15715_v21  ;;  %v13553_v46 = vld [vmem:[%s18032_s3 + $0x2b8] ss:$12 sps:$4 sm:$0xff]   ;;  %v13555_v21 = vld [vmem:[%s18032_s3 + $0x350] ss:$12 sps:$4 sm:$0xff]   ;;  %v13560_v5 = vld [vmem:[%s18032_s3 + $0x380] ss:$12 sps:$4 sm:$0xff]  }
 0x61d   : > { %5100 = vmatmul.mubr.bf16.gmra.mrb[180].mxu1 %v13515_v25  ;;  %v13550_v25 = vld [vmem:[%s18032_s3 + $0x320] ss:$12 sps:$4 sm:$0xff]  }
 0x61e   : > { %12687 = vmatprep.subr.bf16.mxu0 %v4615_v9  ;;  %5810 = vmatpush1.bf16.msra.mxu1 %v18324_v15  ;;  %v13563_v15 = vld [vmem:[%s18032_s3 + $0x2e8] ss:$12 sps:$4 sm:$0xff]   ;;  %v13581_v35 = vld [vmem:[%s18032_s3 + $0x34c] ss:$12 sps:$4 sm:$0xff]  }
 0x61f   : > { %12688 = vmatpush3.bf16.msra.mxu0 %v4615_v9  ;;  %5811 = vmatprep.subr.bf16.mxu1 %v18306_v50  ;;  %v13561_v9 = vld [vmem:[%s18032_s3 + $0x2ec] ss:$12 sps:$4 sm:$0xff]  }
 0x620   : > { %12689 = vmatprep.subr.bf16.mxu0 %v4616_v10  ;;  %5107 = vmatprep.mubr.bf16.mxu1 %v13516_v58  ;;  %v13564_v58 = vld [vmem:[%s18032_s3 + $0x398] ss:$12 sps:$4 sm:$0xff]  }
 0x622   : > { %5812 = vmatpush1.bf16.msra.mxu1 %v18325_v55  ;;  %v13566_v55 = vld [vmem:[%s18032_s3 + $0x304] ss:$12 sps:$4 sm:$0xff]  }
 0x623   : > { %12690 = vmatpush3.bf16.msra.mxu0 %v4616_v10  ;;  %5813 = vmatprep.subr.bf16.mxu1 %v18306_v50  ;;  %v13558_v10 = vld [vmem:[%s18032_s3 + $0x2d0] ss:$12 sps:$4 sm:$0xff]  }
 0x624   : > { %12731 = vmatprep.subr.bf16.mxu0 %v15729_v47 }
 0x625   : > { %5108 = vmatmul.mubr.bf16.gmra.mrb[184].mxu1 %v13518_v54  ;;  %v13565_v54 = vld [vmem:[%s18032_s3 + $0x3b0] ss:$12 sps:$4 sm:$0xff]  }
 0x626   : > { %12692 = vmatmul.mubr.msk.bf16.vlgmr.msra.gmra.mrb[88].mxu0 %vm4998_vm9, %v13520_v17  ;;  %5814 = vmatpush1.bf16.msra.mxu1 %v18326_v22  ;;  %v13569_v17 = vld [vmem:[%s18032_s3 + $0x8] ss:$12 sps:$4 sm:$0xff]  }
 0x627   : > { %12732 = vmatpush3.bf16.msra.mxu0 %v15729_v47  ;;  %5815 = vmatprep.subr.bf16.mxu1 %v18306_v50  ;;  %v13526_v47 = vld [vmem:[%s18032_s3 + $0x244] ss:$12 sps:$4 sm:$0xff]   ;;  %v13571_v22 = vld [vmem:[%s18032_s3 + $0x31c] ss:$12 sps:$4 sm:$0xff]  }
 0x628   : > { %12733 = vmatprep.subr.bf16.mxu0 %v15727_v37  ;;  %5115 = vmatprep.mubr.bf16.mxu1 %v13521_v52  ;;  %v13568_v52 = vld [vmem:[%s18032_s3 + $0x300] ss:$12 sps:$4 sm:$0xff]  }
 0x629   : > { %12695 = vmatprep.mubr.msk.bf16.mxu0 %vm4998_vm9, %v13524_v36  ;;  %v13570_v36 = vld [vmem:[%s18032_s3 + $0x20] ss:$12 sps:$4 sm:$0xff]  }
 0x62a   : > { %5816 = vmatpush1.bf16.msra.mxu1 %v18327_v56  ;;  %v469_v56 = vsel %vm18339_vm14, 1.0, %v18299_v32 }
 0x62b   : > { %12734 = vmatpush3.bf16.msra.mxu0 %v15727_v37  ;;  %5817 = vmatprep.subr.bf16.mxu1 %v18306_v50  ;;  %v13528_v37 = vld [vmem:[%s18032_s3 + $0x240] ss:$12 sps:$4 sm:$0xff]  }
 0x62c   : > { %12735 = vmatprep.subr.bf16.mxu0 %v15733_v44 }
 0x62d   : > { %5116 = vmatmul.mubr.bf16.gmra.mrb[188].mxu1 %v13523_v1  ;;  %v13574_v1 = vld [vmem:[%s18032_s3 + $0x38] ss:$12 sps:$4 sm:$0xff]  }
 0x62e   : > { %12696 = vmatmul.mubr.msk.bf16.gmra.mrb[92].mxu0 %vm4998_vm9, %v13525_v41  ;;  %5818 = vmatpush1.bf16.msra.mxu1 %v18328_v14  ;;  %v6191_v41 = vpack.c.bf16 %v469_v56, %v469_v56  ;;  %v13575_v14 = vld [vmem:[%s18032_s3 + $0x50] ss:$12 sps:$4 sm:$0xff]   ;;  %v18343_v56 = vld [vmem:[#allocation10_spill] sm:$0xff] }
 0x62f   : > { %12736 = vmatpush3.bf16.msra.mxu0 %v15733_v44  ;;  %5819 = vmatprep.subr.bf16.mxu1 %v18306_v50  ;;  %v13531_v44 = vld [vmem:[%s18032_s3 + $0x25c] ss:$12 sps:$4 sm:$0xff]  }
 0x630   : > { %12737 = vmatprep.subr.bf16.mxu0 %v15731_v19  ;;  %5123 = vmatprep.mubr.bf16.mxu1 %v13526_v47  ;;  %v13631_v47 = vld [vmem:[%s18032_s3 + $0xa8] ss:$12 sps:$4 sm:$0xff]  }
 0x631   : > { %12699 = vmatprep.mubr.msk.bf16.mxu0 %vm4998_vm9, %v13529_v7  ;;  %v13573_v7 = vld [vmem:[%s18032_s3 + $0x318] ss:$12 sps:$4 sm:$0xff]  }
 0x632   : > { %5820 = vmatpush1.bf16.msra.mxu1 %v18329_v8  ;;  %v13579_v8 = vld [vmem:[%s18032_s3 + $0x68] ss:$12 sps:$4 sm:$0xff]  }
 0x633   : > { %12738 = vmatpush3.bf16.msra.mxu0 %v15731_v19  ;;  %5821 = vmatprep.subr.bf16.mxu1 %v18306_v50  ;;  %v18331_v19 = vpack.c.bf16 %v15683_v61, %v15677_v48  ;;  %v13536_v48 = vld [vmem:[%s18032_s3 + $0x274] ss:$12 sps:$4 sm:$0xff]  }
 0x634   : > { %12779 = vmatprep.subr.msk.bf16.mxu0 %vm14008_vm5, %v18209_v40  ;;  %v13539_v61 = vld [vmem:[%s18032_s3 + $0x2a8] ss:$12 sps:$4 sm:$0xff]  }
 0x635   : > { %5124 = vmatmul.mubr.bf16.gmra.mrb[192].mxu1 %v13528_v37  ;;  %v13576_v37 = vld [vmem:[%s18032_s3 + $0x334] ss:$12 sps:$4 sm:$0xff]  }
 0x636   : > { %12700 = vmatmul.mubr.msk.bf16.gmra.mrb[96].mxu0 %vm4998_vm9, %v13530_v43  ;;  %5822 = vmatpush1.bf16.msra.mxu1 %v18331_v19  ;;  %v6193_v43 = vsel %vm4103_vm2, %v6191_v41, 0  ;;  %v13584_v19 = vld [vmem:[%s18032_s3 + $0x98] ss:$12 sps:$4 sm:$0xff]  }
 0x637   : > { %5823 = vmatprep.subr.bf16.mxu1 %v18306_v50  ;;  %5131 = vmatprep.mubr.bf16.mxu1 %v13531_v44  ;;  %v13578_v44 = vld [vmem:[%s18032_s3 + $0x330] ss:$12 sps:$4 sm:$0xff]  }
 0x638   : > { %12703 = vmatprep.mubr.msk.bf16.mxu0 %vm4998_vm9, %v13534_v60  ;;  %v13580_v60 = vld [vmem:[%s18032_s3 + $0x80] ss:$12 sps:$4 sm:$0xff]  }
 0x63a   : > { %5824 = vmatpush1.bf16.msra.mxu1 %v18332_v49  ;;  %v13585_v49 = vld [vmem:[%s18032_s3 + $0xb0] ss:$12 sps:$4 sm:$0xff]  }
 0x63b   : > { %5825 = vmatprep.subr.bf16.mxu1 %v18306_v50 }
 0x63d   : > { %5132 = vmatmul.mubr.bf16.gmra.mrb[196].mxu1 %v13533_v26  ;;  %v13583_v26 = vld [vmem:[%s18032_s3 + $0x348] ss:$12 sps:$4 sm:$0xff]  }
 0x63e   : > { %12704 = vmatmul.mubr.msk.bf16.gmra.mrb[100].mxu0 %vm4998_vm9, %v13535_v4  ;;  %5826 = vmatpush1.bf16.msra.mxu1 %v18333_v33  ;;  %v13586_v4 = vld [vmem:[%s18032_s3 + $0x364] ss:$12 sps:$4 sm:$0xff]   ;;  %v13590_v33 = vld [vmem:[%s18032_s3 + $0xe0] ss:$12 sps:$4 sm:$0xff]  }
 0x63f   : > { %5827 = vmatprep.subr.bf16.mxu1 %v18306_v50  ;;  %5139 = vmatprep.mubr.bf16.mxu1 %v13536_v48  ;;  %v13589_v48 = vld [vmem:[%s18032_s3 + $0xc8] ss:$12 sps:$4 sm:$0xff]  }
 0x640   : > { %12707 = vmatprep.mubr.msk.bf16.mxu0 %vm4998_vm9, %v13539_v61  ;;  %v13588_v61 = vld [vmem:[%s18032_s3 + $0x360] ss:$12 sps:$4 sm:$0xff]  }
 0x642   : > { %5828 = vmatpush1.bf16.msra.mxu1 %v18334_v39  ;;  %v13594_v39 = vld [vmem:[%s18032_s3 + $0xf8] ss:$12 sps:$4 sm:$0xff]  }
 0x643   : > { %5829 = vmatprep.subr.bf16.mxu1 %v18306_v50 }
 0x645   : > { %5140 = vmatmul.mubr.bf16.gmra.mrb[200].mxu1 %v13538_v63  ;;  %v13591_v63 = vld [vmem:[%s18032_s3 + $0x37c] ss:$12 sps:$4 sm:$0xff]  }
 0x646   : > { %12708 = vmatmul.mubr.msk.bf16.gmra.mrb[104].mxu0 %vm4998_vm9, %v13540_v53  ;;  %5830 = vmatpush1.bf16.msra.mxu1 %v18335_v57  ;;  %v13593_v53 = vld [vmem:[%s18032_s3 + $0x378] ss:$12 sps:$4 sm:$0xff]   ;;  %v13599_v57 = vld [vmem:[%s18032_s3 + $0x128] ss:$12 sps:$4 sm:$0xff]  }
 0x647   : > { %5831 = vmatprep.subr.bf16.mxu1 %v18306_v50  ;;  %5147 = vmatprep.mubr.bf16.mxu1 %v13541_v30  ;;  %v13595_v30 = vld [vmem:[%s18032_s3 + $0x110] ss:$12 sps:$4 sm:$0xff]  }
 0x648   : > { %12711 = vmatprep.mubr.msk.bf16.mxu0 %vm4998_vm9, %v13544_v28  ;;  %v13596_v28 = vld [vmem:[%s18032_s3 + $0x394] ss:$12 sps:$4 sm:$0xff]  }
 0x64a   : > { %5832 = vmatpush1.bf16.msra.mxu1 %v18336_v31  ;;  %v13600_v31 = vld [vmem:[%s18032_s3 + $0x140] ss:$12 sps:$4 sm:$0xff]  }
 0x64b   : > { %5833 = vmatprep.subr.bf16.mxu1 %v18306_v50 }
 0x64d   : > { %5148 = vmatmul.mubr.bf16.gmra.mrb[204].mxu1 %v13543_v62  ;;  %v13598_v62 = vld [vmem:[%s18032_s3 + $0x390] ss:$12 sps:$4 sm:$0xff]  }
 0x64e   : > { %12712 = vmatmul.mubr.msk.bf16.gmra.mrb[108].mxu0 %vm4998_vm9, %v13545_v13  ;;  %5834 = vmatpush1.bf16.msra.mxu1 %v18337_v59  ;;  %v13601_v13 = vld [vmem:[%s18032_s3 + $0x3ac] ss:$12 sps:$4 sm:$0xff]   ;;  %v13605_v59 = vld [vmem:[%s18032_s3 + $0x170] ss:$12 sps:$4 sm:$0xff]  }
 0x64f   : > { %5835 = vmatprep.subr.bf16.mxu1 %v18306_v50  ;;  %5155 = vmatprep.mubr.bf16.mxu1 %v13546_v34  ;;  %v13604_v34 = vld [vmem:[%s18032_s3 + $0x158] ss:$12 sps:$4 sm:$0xff]  }
 0x650   : > { %12715 = vmatprep.mubr.msk.bf16.mxu0 %vm4998_vm9, %v13549_v18  ;;  %v13603_v18 = vld [vmem:[%s18032_s3 + $0x3a8] ss:$12 sps:$4 sm:$0xff]  }
 0x652   : > { %5836 = vmatpush1.bf16.msra.mxu1 %v18338_v42  ;;  %v13609_v42 = vld [vmem:[%s18032_s3 + $0x188] ss:$12 sps:$4 sm:$0xff]  }
 0x653   : > { %6849 = vmatprep.subr.bf16.mxu1 %v18306_v50 }
 0x655   : > { %5156 = vmatmul.mubr.bf16.gmra.mrb[208].mxu1 %v13548_v45  ;;  %v13608_v45 = vld [vmem:[%s18032_s3 + $0x4] ss:$12 sps:$4 sm:$0xff]  }
 0x656   : > { %12716 = vmatmul.mubr.msk.bf16.gmra.mrb[112].mxu0 %vm4998_vm9, %v13550_v25  ;;  %5163 = vmatprep.mubr.bf16.mxu1 %v13551_v38  ;;  %v13606_v25 = vld [vmem:[%s18032_s3] ss:$12 sps:$4 sm:$0xff]  }
 0x657   : > { %12719 = vmatprep.mubr.msk.bf16.mxu0 %vm4998_vm9, %v13554_v23  ;;  %v13610_v38 = vld [vmem:[%s18032_s3 + $0x1a0] ss:$12 sps:$4 sm:$0xff]   ;;  %v13613_v23 = vld [vmem:[%s18032_s3 + $0x1c] ss:$12 sps:$4 sm:$0xff]  }
 0x65d   : > { %5164 = vmatmul.mubr.bf16.gmra.mrb[212].mxu1 %v13553_v46  ;;  %v13614_v46 = vld [vmem:[%s18032_s3 + $0x1b8] ss:$12 sps:$4 sm:$0xff]  }
 0x65e   : > { %12720 = vmatmul.mubr.msk.bf16.gmra.mrb[116].mxu0 %vm4998_vm9, %v13555_v21  ;;  %5171 = vmatprep.mubr.bf16.mxu1 %v13556_v2  ;;  %v13611_v21 = vld [vmem:[%s18032_s3 + $0x18] ss:$12 sps:$4 sm:$0xff]   ;;  %v13615_v2 = vld [vmem:[%s18032_s3 + $0x1d0] ss:$12 sps:$4 sm:$0xff]  }
 0x65f   : > { %12723 = vmatprep.mubr.msk.bf16.mxu0 %vm4998_vm9, %v13559_v20  ;;  %v13618_v20 = vld [vmem:[%s18032_s3 + $0x34] ss:$12 sps:$4 sm:$0xff]  }
 0x665   : > { %5172 = vmatmul.mubr.bf16.gmra.mrb[216].mxu1 %v13558_v10  ;;  %v13616_v10 = vld [vmem:[%s18032_s3 + $0x30] ss:$12 sps:$4 sm:$0xff]  }
 0x666   : > { %12724 = vmatmul.mubr.msk.bf16.gmra.mrb[120].mxu0 %vm4998_vm9, %v13560_v5  ;;  %5179 = vmatprep.mubr.bf16.mxu1 %v13561_v9  ;;  %v13621_v5 = vld [vmem:[%s18032_s3 + $0x4c] ss:$12 sps:$4 sm:$0xff]   ;;  %v13619_v9 = vld [vmem:[%s18032_s3 + $0x48] ss:$12 sps:$4 sm:$0xff]  }
 0x667   : > { %12727 = vmatprep.mubr.msk.bf16.mxu0 %vm4998_vm9, %v13564_v58  ;;  %v13624_v58 = vld [vmem:[%s18032_s3 + $0x64] ss:$12 sps:$4 sm:$0xff]  }
 0x66d   : > { %5180 = vmatmul.mubr.bf16.gmra.mrb[220].mxu1 %v13563_v15  ;;  %v13622_v15 = vld [vmem:[%s18032_s3 + $0x60] ss:$12 sps:$4 sm:$0xff]  }
 0x66e   : > { %12728 = vmatmul.mubr.msk.bf16.gmra.mrb[124].mxu0 %vm4998_vm9, %v13565_v54  ;;  %5187 = vmatprep.mubr.bf16.mxu1 %v13566_v55  ;;  %v13627_v54 = vld [vmem:[%s18032_s3 + $0x7c] ss:$12 sps:$4 sm:$0xff]   ;;  %v13625_v55 = vld [vmem:[%s18032_s3 + $0x78] ss:$12 sps:$4 sm:$0xff]  }
 0x66f   : > { %12739 = vmatprep.mubr.msk.bf16.mxu0 %vm4998_vm9, %v13569_v17  ;;  %v13630_v17 = vld [vmem:[%s18032_s3 + $0x94] ss:$12 sps:$4 sm:$0xff]  }
 0x675   : > { %5188 = vmatmul.mubr.bf16.gmra.mrb[224].mxu1 %v13568_v52  ;;  %v18341_v52 = vld [vmem:[#allocation28_spill] sm:$0xff] }
 0x676   : > { %12740 = vmatmul.mubr.msk.bf16.vlgmr.msra.gmra.mrb[128].mxu0 %vm4998_vm9, %v13570_v36  ;;  %5195 = vmatprep.mubr.bf16.mxu1 %v13571_v22  ;;  %v13628_v36 = vld [vmem:[%s18032_s3 + $0x90] ss:$12 sps:$4 sm:$0xff]   ;;  %v13633_v22 = vld [vmem:[%s18032_s3 + $0xac] ss:$12 sps:$4 sm:$0xff]  }
 0x677   : > { %12743 = vmatprep.mubr.msk.bf16.mxu0 %vm4998_vm9, %v13574_v1  ;;  %12780 = vmatpush3.bf16.msk.msra.mxu0 %vm14008_vm5, %v18209_v40  ;;  %v18342_v1 = vld [vmem:[#allocation11_spill] sm:$0xff] }
 0x678   : > { %12781 = vmatprep.subr.msk.bf16.mxu0 %vm14023_vm10, %v18209_v40 }
 0x67b   : > { %12782 = vmatpush3.bf16.msk.msra.mxu0 %vm14023_vm10, %v18209_v40 }
 0x67c   : > { %13368 = vmatprep.subr.msk.bf16.mxu0 %vm4103_vm2, %v6191_v41 }
 0x67d   : > { %5196 = vmatmul.mubr.bf16.gmra.mrb[228].mxu1 %v13573_v7 }
 0x67e   : > { %12744 = vmatmul.mubr.msk.bf16.gmra.mrb[132].mxu0 %vm4998_vm9, %v13575_v14  ;;  %5203 = vmatprep.mubr.bf16.mxu1 %v13576_v37  ;;  %v13636_v14 = vld [vmem:[%s18032_s3 + $0xc4] ss:$12 sps:$4 sm:$0xff]  }
 0x67f   : > { %12747 = vmatprep.mubr.msk.bf16.mxu0 %vm4998_vm9, %v13579_v8  ;;  %12784 = vmatpush3.bf16.msra.mxu0 %v6193_v43  ;;  %v18344_v43 = vld [vmem:[#allocation12_spill] sm:$0xff] }
 0x685   : > { %5204 = vmatmul.mubr.bf16.gmra.mrb[232].mxu1 %v13578_v44  ;;  %v18345_v44 = vld [vmem:[#allocation31_spill] sm:$0xff] }
 0x686   : > { %12748 = vmatmul.mubr.msk.bf16.gmra.mrb[136].mxu0 %vm4998_vm9, %v13580_v60  ;;  %5211 = vmatprep.mubr.bf16.mxu1 %v13581_v35  ;;  %v13634_v35 = vld [vmem:[%s18032_s3 + $0xc0] ss:$12 sps:$4 sm:$0xff]  }
 0x687   : > { %12751 = vmatprep.mubr.msk.bf16.mxu0 %vm4998_vm9, %v13584_v19 }
 0x68d   : > { %5212 = vmatmul.mubr.bf16.gmra.mrb[236].mxu1 %v13583_v26  ;;  %v13639_v26 = vld [vmem:[%s18032_s3 + $0xdc] ss:$12 sps:$4 sm:$0xff]  }
 0x68e   : > { %12752 = vmatmul.mubr.msk.bf16.gmra.mrb[140].mxu0 %vm4998_vm9, %v13585_v49  ;;  %5219 = vmatprep.mubr.bf16.mxu1 %v13586_v4 }
 0x68f   : > { %12755 = vmatprep.mubr.msk.bf16.mxu0 %vm4998_vm9, %v13589_v48  ;;  %v18346_v48 = vld [vmem:[#allocation32_spill] sm:$0xff] }
 0x695   : > { %5220 = vmatmul.mubr.bf16.gmra.mrb[240].mxu1 %v13588_v61  ;;  %v18347_v61 = vld [vmem:[#allocation33_spill] sm:$0xff] }
 0x696   : > { %12756 = vmatmul.mubr.msk.bf16.gmra.mrb[144].mxu0 %vm4998_vm9, %v13590_v33  ;;  %5227 = vmatprep.mubr.bf16.mxu1 %v13591_v63  ;;  %v13637_v63 = vld [vmem:[%s18032_s3 + $0xd8] ss:$12 sps:$4 sm:$0xff]  }
 0x697   : > { %12759 = vmatprep.mubr.msk.bf16.mxu0 %vm4998_vm9, %v13594_v39 }
 0x69d   : > { %5228 = vmatmul.mubr.bf16.gmra.mrb[244].mxu1 %v13593_v53 }
 0x69e   : > { %12760 = vmatmul.mubr.msk.bf16.gmra.mrb[148].mxu0 %vm4998_vm9, %v13595_v30  ;;  %5235 = vmatprep.mubr.bf16.mxu1 %v13596_v28  ;;  %v13642_v30 = vld [vmem:[%s18032_s3 + $0xf4] ss:$12 sps:$4 sm:$0xff]  }
 0x69f   : > { %12763 = vmatprep.mubr.msk.bf16.mxu0 %vm4998_vm9, %v13599_v57 }
 0x6a5   : > { %5236 = vmatmul.mubr.bf16.gmra.mrb[248].mxu1 %v13598_v62 }
 0x6a6   : > { %12764 = vmatmul.mubr.msk.bf16.gmra.mrb[152].mxu0 %vm4998_vm9, %v13600_v31  ;;  %5243 = vmatprep.mubr.bf16.mxu1 %v13601_v13 }
 0x6a7   : > { %12767 = vmatprep.mubr.msk.bf16.mxu0 %vm4998_vm9, %v13604_v34 }
 0x6ad   : > { %5244 = vmatmul.mubr.bf16.gmra.mrb[252].mxu1 %v13603_v18 }
 0x6ae   : > { %12768 = vmatmul.mubr.msk.bf16.gmra.mrb[156].mxu0 %vm4998_vm9, %v13605_v59  ;;  %5837 = vmatprep.mubr.bf16.mxu1 %v13608_v45 }
 0x6af   : > { %12771 = vmatprep.mubr.msk.bf16.mxu0 %vm4998_vm9, %v13609_v42  ;;  %v18348_v42 = vld [vmem:[#allocation34_spill] sm:$0xff] }
 0x6b5   : > { %5838 = vmatmul.mubr.bf16.vlgmr.msra.gmra.mrb[0].mxu1 %v13606_v25  ;;  %v18349_v25 = vld [vmem:[#allocation35_spill] sm:$0xff] }
 0x6b6   : > { %12772 = vmatmul.mubr.msk.bf16.gmra.mrb[160].mxu0 %vm4998_vm9, %v13610_v38  ;;  %5845 = vmatprep.mubr.bf16.mxu1 %v13613_v23  ;;  %v13640_v23 = vld [vmem:[%s18032_s3 + $0xf0] ss:$12 sps:$4 sm:$0xff]  }
 0x6b7   : > { %12775 = vmatprep.mubr.msk.bf16.mxu0 %vm4998_vm9, %v13614_v46 }
 0x6bd   : > { %5846 = vmatmul.mubr.bf16.gmra.mrb[4].mxu1 %v13611_v21 }
 0x6be   : > { %12776 = vmatmul.mubr.msk.bf16.gmra.mrb[164].mxu0 %vm4998_vm9, %v13615_v2  ;;  %5853 = vmatprep.mubr.bf16.mxu1 %v13618_v20  ;;  %v13645_v2 = vld [vmem:[%s18032_s3 + $0x10c] ss:$12 sps:$4 sm:$0xff]  }
 0x6bf   : > { %12785 = vmatprep.mubr.msk.bf16.mxu0 %vm4042_vm3, %v15454_v12 }
 0x6c5   : > { %5854 = vmatmul.mubr.bf16.gmra.mrb[8].mxu1 %v13616_v10 }
 0x6c6   : > { %12786 = vmatmul.mubr.msk.bf16.vlgmr.msra.gmra.mrb[168].mxu0 %vm4042_vm3, %v15458_v11  ;;  %5861 = vmatprep.mubr.bf16.mxu1 %v13621_v5 }
 0x6c7   : > { %12789 = vmatprep.mubr.msk.bf16.mxu0 %vm4042_vm3, %v15470_v51 }
 0x6cd   : > { %5862 = vmatmul.mubr.bf16.gmra.mrb[12].mxu1 %v13619_v9 }
 0x6ce   : > { %12790 = vmatmul.mubr.msk.bf16.gmra.mrb[172].mxu0 %vm4042_vm3, %v15482_v29  ;;  %5869 = vmatprep.mubr.bf16.mxu1 %v13624_v58 }
 0x6cf   : > { %12793 = vmatprep.mubr.msk.bf16.mxu0 %vm4042_vm3, %v15490_v27 }
 0x6d5   : > { %5870 = vmatmul.mubr.bf16.gmra.mrb[16].mxu1 %v13622_v15 }
 0x6d6   : > { %12794 = vmatmul.mubr.msk.bf16.gmra.mrb[176].mxu0 %vm4042_vm3, %v15497_v0  ;;  %5877 = vmatprep.mubr.bf16.mxu1 %v13627_v54 }
 0x6d7   : > { %12797 = vmatprep.mubr.msk.bf16.mxu0 %vm4042_vm3, %v15503_v3 }
 0x6dd   : > { %5878 = vmatmul.mubr.bf16.gmra.mrb[20].mxu1 %v13625_v55 }
 0x6de   : > { %12798 = vmatmul.mubr.msk.bf16.gmra.mrb[180].mxu0 %vm4042_vm3, %v15509_v24  ;;  %5885 = vmatprep.mubr.bf16.mxu1 %v13630_v17 }
 0x6df   : > { %12801 = vmatprep.mubr.msk.bf16.mxu0 %vm4042_vm3, %v18341_v52 }
 0x6e5   : > { %5886 = vmatmul.mubr.bf16.gmra.mrb[24].mxu1 %v13628_v36  ;;  %v18350_v36 = vld [vmem:[#allocation36_spill] sm:$0xff] }
 0x6e6   : > { %12802 = vmatmul.mubr.msk.bf16.gmra.mrb[184].mxu0 %vm4042_vm3, %v18342_v1  ;;  %5893 = vmatprep.mubr.bf16.mxu1 %v13633_v22  ;;  %v18351_v22 = vld [vmem:[#allocation37_spill] sm:$0xff] }
 0x6e7   : > { %12805 = vmatprep.mubr.msk.bf16.mxu0 %vm4042_vm3, %v18343_v56 }
 0x6e8   : > { %v5093_v41 = vpop.f32.mrb[176].mxu1 }
 0x6e9   : > { %v5095_v7 = vpop.f32.mrb[177].mxu1 }
 0x6ea   : > { %v5096_v37 = vpop.f32.mrb[178].mxu1 }
 0x6eb   : > { %v5098_v8 = vpop.f32.mrb[179].mxu1 }
 0x6ed   : > { %5894 = vmatmul.mubr.bf16.gmra.mrb[28].mxu1 %v13631_v47  ;;  %v13643_v47 = vld [vmem:[%s18032_s3 + $0x108] ss:$12 sps:$4 sm:$0xff]  }
 0x6ee   : > { %12806 = vmatmul.mubr.msk.bf16.gmra.mrb[188].mxu0 %vm4042_vm3, %v18344_v43  ;;  %5901 = vmatprep.mubr.bf16.mxu1 %v13636_v14 }
 0x6ef   : > { %12809 = vmatprep.mubr.msk.bf16.mxu0 %vm4042_vm3, %v18345_v44 }
 0x6f0   : > { %v5101_v60 = vpop.f32.mrb[180].mxu1 }
 0x6f1   : > { %v5103_v19 = vpop.f32.mrb[181].mxu1 }
 0x6f2   : > { %v5104_v49 = vpop.f32.mrb[182].mxu1 }
 0x6f3   : > { %v5106_v4 = vpop.f32.mrb[183].mxu1 }
 0x6f5   : > { %5902 = vmatmul.mubr.bf16.gmra.mrb[32].mxu1 %v13634_v35 }
 0x6f6   : > { %12810 = vmatmul.mubr.msk.bf16.gmra.mrb[192].mxu0 %vm4042_vm3, %v18346_v48  ;;  %5909 = vmatprep.mubr.bf16.mxu1 %v13639_v26 }
 0x6f7   : > { %12813 = vmatprep.mubr.msk.bf16.mxu0 %vm4042_vm3, %v18347_v61 }
 0x6f8   : > { %v5109_v33 = vpop.f32.mrb[184].mxu1 }
 0x6f9   : > { %v12693_v39 = vpop.f32.mrb[88].mxu0  ;;  %v5111_v53 = vpop.f32.mrb[185].mxu1 }
 0x6fa   : > { %v16207_v28 = vadd.f32 %v12693_v39, %v5101_v60  ;;  %v5286_v57 = vpop.f32.mrb[89].mxu0  ;;  %v5112_v62 = vpop.f32.mrb[186].mxu1  ;;  %v13646_v39 = vld [vmem:[%s18032_s3 + $0x120] ss:$12 sps:$4 sm:$0xff]  }
 0x6fb   : > { %v16209_v31 = vadd.f32 %v5286_v57, %v5093_v41  ;;  %v12694_v13 = vpop.f32.mrb[90].mxu0  ;;  %v5114_v34 = vpop.f32.mrb[187].mxu1 }
 0x6fc   : > { %v16211_v18 = vadd.f32 %v12694_v13, %v5104_v49  ;;  %v5289_v59 = vpop.f32.mrb[91].mxu0 }
 0x6fd   : > { %5910 = vmatmul.mubr.bf16.gmra.mrb[36].mxu1 %v13637_v63  ;;  %v16213_v45 = vadd.f32 %v5289_v59, %v5096_v37  ;;  %v13648_v37 = vld [vmem:[%s18032_s3 + $0x124] ss:$12 sps:$4 sm:$0xff]  }
 0x6fe   : > { %12814 = vmatmul.mubr.msk.bf16.gmra.mrb[196].mxu0 %vm4042_vm3, %v18348_v42  ;;  %5917 = vmatprep.mubr.bf16.mxu1 %v13642_v30 }
 0x6ff   : > { %12817 = vmatprep.mubr.msk.bf16.mxu0 %vm4042_vm3, %v18349_v25 }
 0x700   : > { %v5117_v38 = vpop.f32.mrb[188].mxu1 }
 0x701   : > { %v12697_v46 = vpop.f32.mrb[92].mxu0  ;;  %v5119_v21 = vpop.f32.mrb[189].mxu1 }
 0x702   : > { %v16225_v20 = vadd.f32 %v12697_v46, %v5117_v38  ;;  %v5302_v10 = vpop.f32.mrb[93].mxu0  ;;  %v5120_v5 = vpop.f32.mrb[190].mxu1 }
 0x703   : > { %v16227_v9 = vadd.f32 %v5302_v10, %v5109_v33  ;;  %v12698_v58 = vpop.f32.mrb[94].mxu0  ;;  %v5122_v15 = vpop.f32.mrb[191].mxu1  ;;  %v18352_v33 = vld [vmem:[#allocation38_spill] sm:$0xff] }
 0x704   : > { %v16229_v54 = vadd.f32 %v12698_v58, %v5120_v5  ;;  %v5305_v55 = vpop.f32.mrb[95].mxu0  ;;  %v13654_v15 = vld [vmem:[%s18032_s3 + $0x154] ss:$12 sps:$4 sm:$0xff]  }
 0x705   : > { %5918 = vmatmul.mubr.bf16.gmra.mrb[40].mxu1 %v13640_v23  ;;  %v16231_v17 = vadd.f32 %v5305_v55, %v5112_v62  ;;  %v13651_v62 = vld [vmem:[%s18032_s3 + $0x13c] ss:$12 sps:$4 sm:$0xff]  }
 0x706   : > { %12818 = vmatmul.mubr.msk.bf16.gmra.mrb[200].mxu0 %vm4042_vm3, %v18350_v36  ;;  %5925 = vmatprep.mubr.bf16.mxu1 %v13645_v2  ;;  %v13649_v2 = vld [vmem:[%s18032_s3 + $0x138] ss:$12 sps:$4 sm:$0xff]  }
 0x707   : > { %12821 = vmatprep.mubr.msk.bf16.mxu0 %vm4042_vm3, %v18351_v22 }
 0x708   : > { %v5125_v41 = vpop.f32.mrb[192].mxu1 }
 0x709   : > { %v5127_v7 = vpop.f32.mrb[193].mxu1  ;;  %v12701_v14 = vpop.f32.mrb[96].mxu0 }
 0x70a   : > { %v5128_v8 = vpop.f32.mrb[194].mxu1  ;;  %v5318_v60 = vpop.f32.mrb[97].mxu0 }
 0x70b   : > { %v5130_v35 = vpop.f32.mrb[195].mxu1  ;;  %v16243_v19 = vadd.f32 %v5318_v60, %v5125_v41  ;;  %v12702_v26 = vpop.f32.mrb[98].mxu0  ;;  %v13652_v60 = vld [vmem:[%s18032_s3 + $0x150] ss:$12 sps:$4 sm:$0xff]  }
 0x70c   : > { %v5321_v49 = vpop.f32.mrb[99].mxu0 }
 0x70d   : > { %5926 = vmatmul.mubr.bf16.gmra.mrb[44].mxu1 %v13643_v47  ;;  %v16245_v4 = vadd.f32 %v5321_v49, %v5128_v8 }
 0x70e   : > { %12822 = vmatmul.mubr.msk.bf16.gmra.mrb[204].mxu0 %vm4042_vm3, %v18352_v33  ;;  %5933 = vmatprep.mubr.bf16.mxu1 %v13648_v37 }
 0x710   : > { %v5133_v63 = vpop.f32.mrb[196].mxu1 }
 0x711   : > { %v16252_v53 = vadd.f32 %v12701_v14, %v5133_v63  ;;  %v5135_v30 = vpop.f32.mrb[197].mxu1  ;;  %v12705_v57 = vpop.f32.mrb[100].mxu0  ;;  %v13657_v63 = vld [vmem:[%s18032_s3 + $0x16c] ss:$12 sps:$4 sm:$0xff]  }
 0x712   : > { %v5136_v13 = vpop.f32.mrb[198].mxu1  ;;  %v5334_v34 = vpop.f32.mrb[101].mxu0 }
 0x713   : > { %v16257_v59 = vadd.f32 %v12702_v26, %v5136_v13  ;;  %v5138_v38 = vpop.f32.mrb[199].mxu1  ;;  %v12706_v23 = vpop.f32.mrb[102].mxu0 }
 0x714   : > { %v5337_v46 = vpop.f32.mrb[103].mxu0 }
 0x715   : > { %5934 = vmatmul.mubr.bf16.gmra.mrb[48].mxu1 %v13646_v39 }
 0x716   : > { %5941 = vmatprep.mubr.bf16.mxu1 %v13651_v62 }
 0x718   : > { %v5141_v21 = vpop.f32.mrb[200].mxu1 }
 0x719   : > { %v5143_v10 = vpop.f32.mrb[201].mxu1  ;;  %v16262_v5 = vadd.f32 %v5334_v34, %v5141_v21  ;;  %v12709_v58 = vpop.f32.mrb[104].mxu0 }
 0x71a   : > { %v5144_v55 = vpop.f32.mrb[202].mxu1  ;;  %v5350_v41 = vpop.f32.mrb[105].mxu0 }
 0x71b   : > { %v5146_v47 = vpop.f32.mrb[203].mxu1  ;;  %v16267_v7 = vadd.f32 %v5337_v46, %v5144_v55  ;;  %v12710_v14 = vpop.f32.mrb[106].mxu0 }
 0x71c   : > { %v5353_v37 = vpop.f32.mrb[107].mxu0 }
 0x71d   : > { %5942 = vmatmul.mubr.bf16.gmra.mrb[52].mxu1 %v13649_v2 }
 0x71e   : > { %5949 = vmatprep.mubr.bf16.mxu1 %v13654_v15 }
 0x720   : > { %v5149_v8 = vpop.f32.mrb[204].mxu1 }
 0x721   : > { %v16272_v35 = vadd.f32 %v12705_v57, %v5149_v8  ;;  %v5151_v26 = vpop.f32.mrb[205].mxu1  ;;  %v12713_v49 = vpop.f32.mrb[108].mxu0  ;;  %v13655_v57 = vld [vmem:[%s18032_s3 + $0x168] ss:$12 sps:$4 sm:$0xff]  }
 0x722   : > { %v5152_v39 = vpop.f32.mrb[206].mxu1  ;;  %v5366_v30 = vpop.f32.mrb[109].mxu0 }
 0x723   : > { %v16277_v62 = vadd.f32 %v12706_v23, %v5152_v39  ;;  %v5154_v13 = vpop.f32.mrb[207].mxu1  ;;  %v12714_v34 = vpop.f32.mrb[110].mxu0  ;;  %v13660_v23 = vld [vmem:[%s18032_s3 + $0x184] ss:$12 sps:$4 sm:$0xff]  }
 0x724   : > { %v5369_v38 = vpop.f32.mrb[111].mxu0 }
 0x725   : > { %5950 = vmatmul.mubr.bf16.gmra.mrb[56].mxu1 %v13652_v60 }
 0x726   : > { %5957 = vmatprep.mubr.bf16.mxu1 %v13657_v63 }
 0x728   : > { %v5157_v46 = vpop.f32.mrb[208].mxu1 }
 0x729   : > { %v5159_v21 = vpop.f32.mrb[209].mxu1  ;;  %v16282_v2 = vadd.f32 %v5350_v41, %v5157_v46  ;;  %v16284_v10 = vpop.f32.mrb[112].mxu0  ;;  %v13658_v41 = vld [vmem:[%s18032_s3 + $0x180] ss:$12 sps:$4 sm:$0xff]  }
 0x72a   : > { %v5160_v15 = vpop.f32.mrb[210].mxu1  ;;  %v5382_v55 = vpop.f32.mrb[113].mxu0 }
 0x72b   : > { %v5162_v47 = vpop.f32.mrb[211].mxu1  ;;  %v16289_v8 = vadd.f32 %v5353_v37, %v5160_v15  ;;  %v16291_v60 = vpop.f32.mrb[114].mxu0  ;;  %v13663_v37 = vld [vmem:[%s18032_s3 + $0x19c] ss:$12 sps:$4 sm:$0xff]  }
 0x72c   : > { %v5385_v26 = vpop.f32.mrb[115].mxu0 }
 0x72d   : > { %5958 = vmatmul.mubr.bf16.gmra.mrb[60].mxu1 %v13655_v57 }
 0x72e   : > { %5965 = vmatprep.mubr.bf16.mxu1 %v13660_v23 }
 0x730   : > { %v5165_v63 = vpop.f32.mrb[212].mxu1 }
 0x731   : > { %v16296_v39 = vadd.f32 %v12709_v58, %v5165_v63  ;;  %v5167_v13 = vpop.f32.mrb[213].mxu1  ;;  %v16298_v46 = vpop.f32.mrb[116].mxu0  ;;  %v13661_v58 = vld [vmem:[%s18032_s3 + $0x198] ss:$12 sps:$4 sm:$0xff]  }
 0x732   : > { %v5168_v21 = vpop.f32.mrb[214].mxu1  ;;  %v5398_v15 = vpop.f32.mrb[117].mxu0 }
 0x733   : > { %v16303_v47 = vadd.f32 %v12710_v14, %v5168_v21  ;;  %v5170_v57 = vpop.f32.mrb[215].mxu1  ;;  %v16305_v23 = vpop.f32.mrb[118].mxu0  ;;  %v13666_v14 = vld [vmem:[%s18032_s3 + $0x1b4] ss:$12 sps:$4 sm:$0xff]  }
 0x734   : > { %v5401_v16 = vpop.f32.mrb[119].mxu0 }
 0x735   : > { %5966 = vmatmul.mubr.bf16.gmra.mrb[64].mxu1 %v13658_v41 }
 0x736   : > { %5973 = vmatprep.mubr.bf16.mxu1 %v13663_v37 }
 0x738   : > { %v5173_v33 = vpop.f32.mrb[216].mxu1 }
 0x739   : > { %v5175_v63 = vpop.f32.mrb[217].mxu1  ;;  %v16310_v13 = vadd.f32 %v5366_v30, %v5173_v33  ;;  %v16312_v22 = vpop.f32.mrb[120].mxu0  ;;  %v13664_v30 = vld [vmem:[%s18032_s3 + $0x1b0] ss:$12 sps:$4 sm:$0xff]  }
 0x73a   : > { %v5176_v21 = vpop.f32.mrb[218].mxu1  ;;  %v16317_v57 = vpop.f32.mrb[121].mxu0 }
 0x73b   : > { %v5178_v36 = vpop.f32.mrb[219].mxu1  ;;  %v16319_v41 = vadd.f32 %v5369_v38, %v5176_v21  ;;  %v16321_v37 = vpop.f32.mrb[122].mxu0 }
 0x73c   : > { %v16323_v25 = vpop.f32.mrb[123].mxu0  ;;  %v13669_v36 = vld [vmem:[%s18032_s3 + $0x1cc] ss:$12 sps:$4 sm:$0xff]  }
 0x73d   : > { %5974 = vmatmul.mubr.bf16.gmra.mrb[68].mxu1 %v13661_v58 }
 0x73e   : > { %5981 = vmatprep.mubr.bf16.mxu1 %v13666_v14 }
 0x740   : > { %v5181_v33 = vpop.f32.mrb[220].mxu1 }
 0x741   : > { %v16328_v63 = vadd.f32 %v12713_v49, %v5181_v33  ;;  %v5183_v42 = vpop.f32.mrb[221].mxu1  ;;  %v16330_v61 = vpop.f32.mrb[124].mxu0 }
 0x742   : > { %v5184_v38 = vpop.f32.mrb[222].mxu1  ;;  %v16335_v21 = vpop.f32.mrb[125].mxu0  ;;  %v13667_v42 = vld [vmem:[%s18032_s3 + $0x1c8] ss:$12 sps:$4 sm:$0xff]  }
 0x743   : > { %v16337_v48 = vadd.f32 %v12714_v34, %v5184_v38  ;;  %v5186_v58 = vpop.f32.mrb[223].mxu1  ;;  %v16339_v14 = vpop.f32.mrb[126].mxu0 }
 0x744   : > { %v16341_v44 = vpop.f32.mrb[127].mxu0 }
 0x745   : > { %5982 = vmatmul.mubr.bf16.gmra.mrb[72].mxu1 %v13664_v30 }
 0x746   : > { %5989 = vmatprep.mubr.bf16.mxu1 %v13669_v36 }
 0x748   : > { %v5189_v49 = vpop.f32.mrb[224].mxu1 }
 0x749   : > { %v5191_v33 = vpop.f32.mrb[225].mxu1  ;;  %v16346_v43 = vadd.f32 %v5382_v55, %v5189_v49  ;;  %v16348_v56 = vpop.f32.mrb[128].mxu0 }
 0x74a   : > { %v5192_v1 = vpop.f32.mrb[226].mxu1  ;;  %v16350_v34 = vpop.f32.mrb[129].mxu0 }
 0x74b   : > { %18353 = vst [vmem:[#allocation8_spill] sm:$0xff] %v16346_v43  ;;  %v5194_v38 = vpop.f32.mrb[227].mxu1  ;;  %v16352_v58 = vadd.f32 %v5385_v26, %v5192_v1  ;;  %v16354_v52 = vpop.f32.mrb[130].mxu0 }
 0x74c   : > { %v16356_v30 = vpop.f32.mrb[131].mxu0 }
 0x74d   : > { %18354 = vst [vmem:[#allocation9_spill] sm:$0xff] %v16352_v58  ;;  %5990 = vmatmul.mubr.bf16.gmra.mrb[76].mxu1 %v13667_v42 }
 0x750   : > { %v5197_v36 = vpop.f32.mrb[228].mxu1 }
 0x751   : > { %v16359_v24 = vadd.f32 %v16284_v10, %v5197_v36  ;;  %v5199_v33 = vpop.f32.mrb[229].mxu1  ;;  %v16361_v55 = vpop.f32.mrb[132].mxu0 }
 0x752   : > { %v5200_v49 = vpop.f32.mrb[230].mxu1  ;;  %v16363_v3 = vpop.f32.mrb[133].mxu0 }
 0x753   : > { %18355 = vst [vmem:[#allocation39_spill] sm:$0xff] %v16359_v24  ;;  %v16366_v0 = vadd.f32 %v16291_v60, %v5200_v49  ;;  %v5202_v1 = vpop.f32.mrb[231].mxu1  ;;  %v16368_v26 = vpop.f32.mrb[134].mxu0  ;;  %v13672_v60 = vld [vmem:[%s18032_s3 + $0x3c4] ss:$12 sps:$4 sm:$0xff]  }
 0x754   : > { %v16370_v38 = vpop.f32.mrb[135].mxu0  ;;  %6881 = vmatprep.mubr.bf16.mxu1 %v13672_v60 }
 0x755   : > { %18356 = vst [vmem:[#allocation40_spill] sm:$0xff] %v16366_v0 }
 0x758   : > { %v5205_v27 = vpop.f32.mrb[232].mxu1 }
 0x759   : > { %v5207_v42 = vpop.f32.mrb[233].mxu1  ;;  %v16372_v29 = vadd.f32 %v5398_v15, %v5205_v27  ;;  %v16374_v10 = vpop.f32.mrb[136].mxu0 }
 0x75a   : > { %v5208_v36 = vpop.f32.mrb[234].mxu1  ;;  %v16376_v33 = vpop.f32.mrb[137].mxu0 }
 0x75b   : > { %18357 = vst [vmem:[#allocation41_spill] sm:$0xff] %v16372_v29  ;;  %v5210_v51 = vpop.f32.mrb[235].mxu1  ;;  %v16378_v11 = vadd.f32 %v5401_v16, %v5208_v36  ;;  %v16380_v12 = vpop.f32.mrb[138].mxu0 }
 0x75c   : > { %v16385_v49 = vpop.f32.mrb[139].mxu0 }
 0x75d   : > { %18358 = vst [vmem:[#allocation42_spill] sm:$0xff] %v16378_v11 }
 0x760   : > { %v5213_v1 = vpop.f32.mrb[236].mxu1 }
 0x761   : > { %v16388_v27 = vadd.f32 %v16298_v46, %v5213_v1  ;;  %v5215_v15 = vpop.f32.mrb[237].mxu1  ;;  %v16390_v42 = vpop.f32.mrb[140].mxu0 }
 0x762   : > { %v5216_v29 = vpop.f32.mrb[238].mxu1  ;;  %v16392_v51 = vpop.f32.mrb[141].mxu0 }
 0x763   : > { %18359 = vst [vmem:[#allocation43_spill] sm:$0xff] %v16388_v27  ;;  %v16395_v16 = vadd.f32 %v16305_v23, %v5216_v29  ;;  %v5218_v36 = vpop.f32.mrb[239].mxu1  ;;  %v16397_v11 = vpop.f32.mrb[142].mxu0 }
 0x764   : > { %v16399_v0 = vpop.f32.mrb[143].mxu0 }
 0x765   : > { %18360 = vst [vmem:[#allocation44_spill] sm:$0xff] %v16395_v16  ;;  %v13679_v16 = vld [vmem:[%s18032_s3 + $0x3c8] ss:$12 sps:$4 sm:$0xff]  }
 0x766   : > { %12833 = vmatprep.mubr.msk.bf16.mxu0 %vm4998_vm9, %v13679_v16 }
 0x768   : > { %v5221_v24 = vpop.f32.mrb[240].mxu1 }
 0x769   : > { %v16402_v60 = vadd.f32 %v16317_v57, %v5221_v24  ;;  %v5223_v46 = vpop.f32.mrb[241].mxu1  ;;  %v16404_v1 = vpop.f32.mrb[144].mxu0 }
 0x76a   : > { %v5224_v15 = vpop.f32.mrb[242].mxu1  ;;  %v16406_v27 = vpop.f32.mrb[145].mxu0 }
 0x76b   : > { %18361 = vst [vmem:[#allocation45_spill] sm:$0xff] %v16402_v60  ;;  %v16409_v6 = vadd.f32 %v16323_v25, %v5224_v15  ;;  %v5226_v29 = vpop.f32.mrb[243].mxu1  ;;  %v16411_v23 = vpop.f32.mrb[146].mxu0 }
 0x76c   : > { %v16413_v36 = vpop.f32.mrb[147].mxu0 }
 0x76d   : > { %18362 = vst [vmem:[#allocation46_spill] sm:$0xff] %v16409_v6 }
 0x770   : > { %v5229_v24 = vpop.f32.mrb[244].mxu1 }
 0x771   : > { %v16420_v57 = vadd.f32 %v16312_v22, %v5229_v24  ;;  %v5231_v46 = vpop.f32.mrb[245].mxu1  ;;  %v16422_v60 = vpop.f32.mrb[148].mxu0 }
 0x772   : > { %v5232_v25 = vpop.f32.mrb[246].mxu1  ;;  %v16424_v15 = vpop.f32.mrb[149].mxu0 }
 0x773   : > { %18363 = vst [vmem:[#allocation47_spill] sm:$0xff] %v16420_v57  ;;  %v16427_v29 = vadd.f32 %v16321_v37, %v5232_v25  ;;  %v5234_v6 = vpop.f32.mrb[247].mxu1  ;;  %v16429_v32 = vpop.f32.mrb[150].mxu0 }
 0x774   : > { %18365 = vst [vmem:[#allocation49_spill] sm:$0xff] %v16429_v32  ;;  %v16431_v40 = vpop.f32.mrb[151].mxu0 }
 0x775   : > { %18364 = vst [vmem:[#allocation48_spill] sm:$0xff] %v16427_v29 }
 0x778   : > { %v5237_v58 = vpop.f32.mrb[248].mxu1 }
 0x779   : > { %v16434_v16 = vadd.f32 %v16335_v21, %v5237_v58  ;;  %v5239_v22 = vpop.f32.mrb[249].mxu1  ;;  %v16436_v24 = vpop.f32.mrb[152].mxu0 }
 0x77a   : > { %18367 = vst [vmem:[#allocation51_spill] sm:$0xff] %v16436_v24  ;;  %v5240_v46 = vpop.f32.mrb[250].mxu1  ;;  %v16438_v57 = vpop.f32.mrb[153].mxu0 }
 0x77b   : > { %18366 = vst [vmem:[#allocation50_spill] sm:$0xff] %v16434_v16  ;;  %18368 = vst [vmem:[#allocation52_spill] sm:$0xff] %v16438_v57  ;;  %v16441_v43 = vadd.f32 %v16341_v44, %v5240_v46  ;;  %v5242_v37 = vpop.f32.mrb[251].mxu1  ;;  %v16443_v25 = vpop.f32.mrb[154].mxu0 }
 0x77c   : > { %18370 = vst [vmem:[#allocation54_spill] sm:$0xff] %v16443_v25  ;;  %v16445_v6 = vpop.f32.mrb[155].mxu0 }
 0x77d   : > { %18369 = vst [vmem:[#allocation53_spill] sm:$0xff] %v16441_v43 }
 0x780   : > { %v5245_v29 = vpop.f32.mrb[252].mxu1 }
 0x781   : > { %v16448_v32 = vadd.f32 %v16330_v61, %v5245_v29  ;;  %v5247_v21 = vpop.f32.mrb[253].mxu1  ;;  %v16450_v58 = vpop.f32.mrb[156].mxu0 }
 0x782   : > { %18372 = vst [vmem:[#allocation56_spill] sm:$0xff] %v16450_v58  ;;  %v5248_v22 = vpop.f32.mrb[254].mxu1  ;;  %v16452_v16 = vpop.f32.mrb[157].mxu0 }
 0x783   : > { %18371 = vst [vmem:[#allocation55_spill] sm:$0xff] %v16448_v32  ;;  %v5250_v24 = vpop.f32.mrb[255].mxu1  ;;  %v16454_v57 = vpop.f32.mrb[158].mxu0  ;;  %v16457_v44 = vadd.f32 %v16339_v14, %v5248_v22 }
 0x784   : > { %18373 = vst [vmem:[#allocation57_spill] sm:$0xff] %v16454_v57  ;;  %v16459_v46 = vpop.f32.mrb[159].mxu0 }
 0x785   : > { %18374 = vst [vmem:[#allocation58_spill] sm:$0xff] %v16457_v44 }
 0x788   : > { %v5839_v37 = vpop.f32.mrb[0].mxu1 }
 0x789   : > { %v5840_v43 = vadd.f32 %v5839_v37, %v16209_v31  ;;  %v5841_v25 = vpop.f32.mrb[1].mxu1  ;;  %v16462_v61 = vpop.f32.mrb[160].mxu0 }
 0x78a   : > { %18375 = vst [vmem:[#allocation59_spill] sm:$0xff] %v16462_v61  ;;  %v5842_v29 = vpop.f32.mrb[2].mxu1  ;;  %v16464_v21 = vpop.f32.mrb[161].mxu0 }
 0x78b   : > { %18376 = vst [vmem:[#allocation60_spill] sm:$0xff] %v16464_v21  ;;  %v5843_v32 = vadd.f32 %v5842_v29, %v16213_v45  ;;  %v5844_v58 = vpop.f32.mrb[3].mxu1  ;;  %v16467_v24 = vpop.f32.mrb[162].mxu0  ;;  %v16470_v57 = vadd.f32 %v16350_v34, %v5840_v43 }
 0x78c   : > { %v16472_v14 = vpop.f32.mrb[163].mxu0 }
 0x78d   : > { %18377 = vst [vmem:[#allocation61_spill] sm:$0xff] %v16470_v57  ;;  %v16475_v22 = vadd.f32 %v16356_v30, %v5843_v32 }
 0x78f   : > { %18378 = vst [vmem:[#allocation62_spill] sm:$0xff] %v16475_v22 }
 0x790   : > { %v5847_v31 = vpop.f32.mrb[4].mxu1 }
 0x791   : > { %v5848_v25 = vadd.f32 %v5847_v31, %v16207_v28  ;;  %v5849_v37 = vpop.f32.mrb[5].mxu1  ;;  %v16478_v44 = vpop.f32.mrb[164].mxu0 }
 0x792   : > { %v5850_v61 = vpop.f32.mrb[6].mxu1  ;;  %v16480_v21 = vpop.f32.mrb[165].mxu0 }
 0x793   : > { %v5851_v45 = vadd.f32 %v5850_v61, %v16211_v18  ;;  %v5852_v58 = vpop.f32.mrb[7].mxu1  ;;  %v16483_v29 = vpop.f32.mrb[166].mxu0  ;;  %v16486_v43 = vadd.f32 %v16348_v56, %v5848_v25 }
 0x794   : > { %18379 = vst [vmem:[#allocation63_spill] sm:$0xff] %v16483_v29  ;;  %v16488_v34 = vpop.f32.mrb[167].mxu0 }
 0x795   : > { %18380 = vst [vmem:[#allocation64_spill] sm:$0xff] %v16486_v43  ;;  %v16491_v32 = vadd.f32 %v16354_v52, %v5851_v45 }
 0x798   : > { %v5855_v28 = vpop.f32.mrb[8].mxu1 }
 0x799   : > { %v5856_v30 = vadd.f32 %v5855_v28, %v16227_v9  ;;  %v5857_v31 = vpop.f32.mrb[9].mxu1  ;;  %v12787_v37 = vpop.f32.mrb[168].mxu0 }
 0x79a   : > { %v5858_v22 = vpop.f32.mrb[10].mxu1  ;;  %v6229_v57 = vpop.f32.mrb[169].mxu0 }
 0x79b   : > { %v5859_v18 = vadd.f32 %v5858_v22, %v16231_v17  ;;  %v12788_v61 = vpop.f32.mrb[170].mxu0  ;;  %v5860_v58 = vpop.f32.mrb[11].mxu1  ;;  %v16496_v29 = vadd.f32 %v16363_v3, %v5856_v30 }
 0x79c   : > { %v6389_v56 = vpack.c.bf16 %v12788_v61, %v12787_v37  ;;  %v6232_v25 = vpop.f32.mrb[171].mxu0 }
 0x79d   : > { %v6388_v43 = vpack.c.bf16 %v6232_v25, %v6229_v57  ;;  %v16499_v52 = vadd.f32 %v16370_v38, %v5859_v18 }
 0x79f   : > { %6850 = vmatpush1.bf16.msra.mxu1 %v6388_v43 }
 0x7a0   : > { %v5863_v45 = vpop.f32.mrb[12].mxu1  ;;  %6851 = vmatprep.subr.bf16.mxu1 %v18306_v50 }
 0x7a1   : > { %v5864_v9 = vadd.f32 %v5863_v45, %v16225_v20  ;;  %v5865_v28 = vpop.f32.mrb[13].mxu1  ;;  %v12791_v31 = vpop.f32.mrb[172].mxu0 }
 0x7a2   : > { %v5866_v17 = vpop.f32.mrb[14].mxu1  ;;  %v6245_v22 = vpop.f32.mrb[173].mxu0 }
 0x7a3   : > { %v5867_v58 = vadd.f32 %v5866_v17, %v16229_v54  ;;  %v12792_v3 = vpop.f32.mrb[174].mxu0  ;;  %6852 = vmatpush1.bf16.msra.mxu1 %v6389_v56  ;;  %v5868_v30 = vpop.f32.mrb[15].mxu1  ;;  %v16505_v57 = vadd.f32 %v16361_v55, %v5864_v9 }
 0x7a4   : > { %v6391_v38 = vpack.c.bf16 %v12792_v3, %v12791_v31  ;;  %v6248_v37 = vpop.f32.mrb[175].mxu0  ;;  %6853 = vmatprep.subr.bf16.mxu1 %v18306_v50 }
 0x7a5   : > { %v6390_v43 = vpack.c.bf16 %v6248_v37, %v6245_v22  ;;  %v16509_v18 = vadd.f32 %v16368_v26, %v5867_v58 }
 0x7a7   : > { %6854 = vmatpush1.bf16.msra.mxu1 %v6390_v43 }
 0x7a8   : > { %v5871_v20 = vpop.f32.mrb[16].mxu1  ;;  %6855 = vmatprep.subr.bf16.mxu1 %v18306_v50 }
 0x7a9   : > { %v5872_v54 = vadd.f32 %v5871_v20, %v16243_v19  ;;  %v5873_v61 = vpop.f32.mrb[17].mxu1  ;;  %v12795_v56 = vpop.f32.mrb[176].mxu0 }
 0x7aa   : > { %v5874_v25 = vpop.f32.mrb[18].mxu1  ;;  %v6261_v45 = vpop.f32.mrb[177].mxu0 }
 0x7ab   : > { %v5875_v55 = vadd.f32 %v5874_v25, %v16245_v4  ;;  %v12796_v9 = vpop.f32.mrb[178].mxu0  ;;  %6856 = vmatpush1.bf16.msra.mxu1 %v6391_v38  ;;  %v5876_v28 = vpop.f32.mrb[19].mxu1  ;;  %v16515_v31 = vadd.f32 %v16376_v33, %v5872_v54 }
 0x7ac   : > { %v6393_v26 = vpack.c.bf16 %v12796_v9, %v12795_v56  ;;  %v6264_v17 = vpop.f32.mrb[179].mxu0  ;;  %6857 = vmatprep.subr.bf16.mxu1 %v18306_v50 }
 0x7ad   : > { %v6392_v22 = vpack.c.bf16 %v6264_v17, %v6261_v45  ;;  %v16519_v58 = vadd.f32 %v16385_v49, %v5875_v55 }
 0x7af   : > { %6858 = vmatpush1.bf16.msra.mxu1 %v6392_v22 }
 0x7b0   : > { %v5879_v19 = vpop.f32.mrb[20].mxu1  ;;  %6859 = vmatprep.subr.bf16.mxu1 %v18306_v50 }
 0x7b1   : > { %v5880_v4 = vadd.f32 %v5879_v19, %v16252_v53  ;;  %v5881_v3 = vpop.f32.mrb[21].mxu1  ;;  %v12799_v30 = vpop.f32.mrb[180].mxu0 }
 0x7b2   : > { %v5882_v38 = vpop.f32.mrb[22].mxu1  ;;  %v6277_v37 = vpop.f32.mrb[181].mxu0 }
 0x7b3   : > { %v5883_v33 = vadd.f32 %v5882_v38, %v16257_v59  ;;  %v12800_v43 = vpop.f32.mrb[182].mxu0  ;;  %6860 = vmatpush1.bf16.msra.mxu1 %v6393_v26  ;;  %v5884_v20 = vpop.f32.mrb[23].mxu1  ;;  %v16525_v54 = vadd.f32 %v16374_v10, %v5880_v4 }
 0x7b4   : > { %v6395_v49 = vpack.c.bf16 %v12800_v43, %v12799_v30  ;;  %v6280_v61 = vpop.f32.mrb[183].mxu0  ;;  %6861 = vmatprep.subr.bf16.mxu1 %v18306_v50 }
 0x7b5   : > { %v6394_v56 = vpack.c.bf16 %v6280_v61, %v6277_v37  ;;  %v16529_v25 = vadd.f32 %v16380_v12, %v5883_v33 }
 0x7b7   : > { %6862 = vmatpush1.bf16.msra.mxu1 %v6394_v56 }
 0x7b8   : > { %v5887_v53 = vpop.f32.mrb[24].mxu1  ;;  %6863 = vmatprep.subr.bf16.mxu1 %v18306_v50 }
 0x7b9   : > { %v5888_v59 = vadd.f32 %v5887_v53, %v16262_v5  ;;  %v5889_v45 = vpop.f32.mrb[25].mxu1  ;;  %v12803_v55 = vpop.f32.mrb[184].mxu0 }
 0x7ba   : > { %v5890_v9 = vpop.f32.mrb[26].mxu1  ;;  %v6293_v28 = vpop.f32.mrb[185].mxu0 }
 0x7bb   : > { %v5891_v10 = vadd.f32 %v5890_v9, %v16267_v7  ;;  %v12804_v26 = vpop.f32.mrb[186].mxu0  ;;  %6864 = vmatpush1.bf16.msra.mxu1 %v6395_v49  ;;  %v5892_v17 = vpop.f32.mrb[27].mxu1  ;;  %v16535_v22 = vadd.f32 %v16392_v51, %v5888_v59 }
 0x7bc   : > { %v6397_v12 = vpack.c.bf16 %v12804_v26, %v12803_v55  ;;  %v6296_v19 = vpop.f32.mrb[187].mxu0  ;;  %6865 = vmatprep.subr.bf16.mxu1 %v18306_v50 }
 0x7bd   : > { %v6396_v4 = vpack.c.bf16 %v6296_v19, %v6293_v28  ;;  %v16539_v3 = vadd.f32 %v16399_v0, %v5891_v10 }
 0x7bf   : > { %6866 = vmatpush1.bf16.msra.mxu1 %v6396_v4 }
 0x7c0   : > { %v5895_v5 = vpop.f32.mrb[28].mxu1  ;;  %6867 = vmatprep.subr.bf16.mxu1 %v18306_v50 }
 0x7c1   : > { %v5896_v7 = vadd.f32 %v5895_v5, %v16272_v35  ;;  %v5897_v30 = vpop.f32.mrb[29].mxu1  ;;  %v12807_v38 = vpop.f32.mrb[188].mxu0 }
 0x7c2   : > { %v5898_v37 = vpop.f32.mrb[30].mxu1  ;;  %v6309_v33 = vpop.f32.mrb[189].mxu0 }
 0x7c3   : > { %v5899_v51 = vadd.f32 %v5898_v37, %v16277_v62  ;;  %v12808_v43 = vpop.f32.mrb[190].mxu0  ;;  %6868 = vmatpush1.bf16.msra.mxu1 %v6397_v12  ;;  %v5900_v20 = vpop.f32.mrb[31].mxu1  ;;  %v16545_v49 = vadd.f32 %v16390_v42, %v5896_v7 }
 0x7c4   : > { %v6399_v0 = vpack.c.bf16 %v12808_v43, %v12807_v38  ;;  %v6312_v61 = vpop.f32.mrb[191].mxu0  ;;  %6869 = vmatprep.subr.bf16.mxu1 %v18306_v50 }
 0x7c5   : > { %v6398_v56 = vpack.c.bf16 %v6312_v61, %v6309_v33  ;;  %v16549_v53 = vadd.f32 %v16397_v11, %v5899_v51 }
 0x7c7   : > { %6870 = vmatpush1.bf16.msra.mxu1 %v6398_v56 }
 0x7c8   : > { %v5903_v35 = vpop.f32.mrb[32].mxu1  ;;  %6871 = vmatprep.subr.bf16.mxu1 %v18306_v50 }
 0x7c9   : > { %v5904_v62 = vadd.f32 %v5903_v35, %v16282_v2  ;;  %v5905_v59 = vpop.f32.mrb[33].mxu1  ;;  %v12811_v45 = vpop.f32.mrb[192].mxu0 }
 0x7ca   : > { %v5906_v55 = vpop.f32.mrb[34].mxu1  ;;  %v6325_v9 = vpop.f32.mrb[193].mxu0 }
 0x7cb   : > { %v5907_v42 = vadd.f32 %v5906_v55, %v16289_v8  ;;  %v12812_v28 = vpop.f32.mrb[194].mxu0  ;;  %6872 = vmatpush1.bf16.msra.mxu1 %v6399_v0  ;;  %v5908_v10 = vpop.f32.mrb[35].mxu1  ;;  %v16555_v26 = vadd.f32 %v16406_v27, %v5904_v62 }
 0x7cc   : > { %v6401_v11 = vpack.c.bf16 %v12812_v28, %v12811_v45  ;;  %v6328_v17 = vpop.f32.mrb[195].mxu0  ;;  %6873 = vmatprep.subr.bf16.mxu1 %v18306_v50  ;;  %v13675_v45 = vld [vmem:[%s18032_s3 + $0x3dc] ss:$12 sps:$4 sm:$0xff]  }
 0x7cd   : > { %v6400_v12 = vpack.c.bf16 %v6328_v17, %v6325_v9  ;;  %v16559_v19 = vadd.f32 %v16413_v36, %v5907_v42 }
 0x7cf   : > { %6874 = vmatpush1.bf16.msra.mxu1 %v6400_v12 }
 0x7d0   : > { %v5911_v2 = vpop.f32.mrb[36].mxu1  ;;  %6875 = vmatprep.subr.bf16.mxu1 %v18306_v50 }
 0x7d1   : > { %v5912_v8 = vadd.f32 %v5911_v2, %v16296_v39  ;;  %v5913_v4 = vpop.f32.mrb[37].mxu1  ;;  %v12815_v5 = vpop.f32.mrb[196].mxu0  ;;  %v13673_v2 = vld [vmem:[%s18032_s3 + $0x3d8] ss:$12 sps:$4 sm:$0xff]  }
 0x7d2   : > { %v5914_v7 = vpop.f32.mrb[38].mxu1  ;;  %v6341_v30 = vpop.f32.mrb[197].mxu0 }
 0x7d3   : > { %v5915_v27 = vadd.f32 %v5914_v7, %v16303_v47  ;;  %v12816_v38 = vpop.f32.mrb[198].mxu0  ;;  %6876 = vmatpush1.bf16.msra.mxu1 %v6401_v11  ;;  %v5916_v37 = vpop.f32.mrb[39].mxu1  ;;  %v16565_v33 = vadd.f32 %v16404_v1, %v5912_v8  ;;  %v13670_v1 = vld [vmem:[%s18032_s3 + $0x3c0] ss:$12 sps:$4 sm:$0xff]  }
 0x7d4   : > { %v6403_v36 = vpack.c.bf16 %v12816_v38, %v12815_v5  ;;  %v6344_v51 = vpop.f32.mrb[199].mxu0  ;;  %6877 = vmatprep.subr.bf16.mxu1 %v18306_v50  ;;  %v13678_v5 = vld [vmem:[%s18032_s3 + $0x3f4] ss:$12 sps:$4 sm:$0xff]   ;;  %v18381_v38 = vld [vmem:[#allocation49_spill] sm:$0xff] }
 0x7d5   : > { %v6402_v43 = vpack.c.bf16 %v6344_v51, %v6341_v30  ;;  %v16569_v20 = vadd.f32 %v16411_v23, %v5915_v27 }
 0x7d7   : > { %6878 = vmatpush1.bf16.msra.mxu1 %v6402_v43 }
 0x7d8   : > { %v5919_v39 = vpop.f32.mrb[40].mxu1  ;;  %6879 = vmatprep.subr.bf16.mxu1 %v18306_v50 }
 0x7d9   : > { %v5920_v47 = vadd.f32 %v5919_v39, %v16310_v13  ;;  %v5921_v0 = vpop.f32.mrb[41].mxu1  ;;  %v12819_v61 = vpop.f32.mrb[200].mxu0 }
 0x7da   : > { %v5922_v56 = vpop.f32.mrb[42].mxu1  ;;  %v6357_v35 = vpop.f32.mrb[201].mxu0 }
 0x7db   : > { %v5923_v62 = vadd.f32 %v5922_v56, %v16319_v41  ;;  %v12820_v59 = vpop.f32.mrb[202].mxu0  ;;  %6880 = vmatpush1.bf16.msra.mxu1 %v6403_v36  ;;  %v5924_v23 = vpop.f32.mrb[43].mxu1  ;;  %v16581_v55 = vadd.f32 %v16424_v15, %v5920_v47  ;;  %v18382_v36 = vld [vmem:[#allocation8_spill] sm:$0xff]  ;;  %v18383_v47 = vld [vmem:[#allocation9_spill] sm:$0xff]  ;;  %v13680_v56 = vld [vmem:[%s18032_s3 + $0x3e0] ss:$12 sps:$4 sm:$0xff]  }
 0x7dc   : > { %v6405_v13 = vpack.c.bf16 %v12820_v59, %v12819_v61  ;;  %v6360_v9 = vpop.f32.mrb[203].mxu0  ;;  %7933 = vmatprep.subr.bf16.mxu1 %v18306_v50  ;;  %v13684_v59 = vld [vmem:[%s18032_s3 + $0x3f8] ss:$12 sps:$4 sm:$0xff]   ;;  %v18385_v23 = vmov 1.0|1.0  }
 0x7dd   : > { %v6404_v42 = vpack.c.bf16 %v6360_v9, %v6357_v35  ;;  %v16585_v28 = vadd.f32 %v16431_v40, %v5923_v62  ;;  %v13683_v35 = vld [vmem:[%s18032_s3 + $0x40c] ss:$12 sps:$4 sm:$0xff]   ;;  %v18387_v9 = vmov 0.0  }
 0x7de   : > { %6882 = vmatmul.mubr.bf16.vlgmr.msra.gmra.mrb[80].mxu1 %v13670_v1  ;;  %v18384_v1 = vld [vmem:[#allocation52_spill] sm:$0xff] }
 0x7df   : > { %12825 = vmatprep.subr.bf16.mxu0 %v6404_v42  ;;  %6889 = vmatprep.mubr.bf16.mxu1 %v13675_v45 }
 0x7e0   : > { %v5927_v41 = vpop.f32.mrb[44].mxu1  ;;  %12826 = vmatpush3.bf16.msra.mxu0 %v6404_v42  ;;  %v18388_v42 = vld [vmem:[#allocation7_spill] sm:$0xff] }
 0x7e1   : > { %v5928_v10 = vadd.f32 %v5927_v41, %v16328_v63  ;;  %v5929_v11 = vpop.f32.mrb[45].mxu1  ;;  %v12823_v17 = vpop.f32.mrb[204].mxu0  ;;  %12827 = vmatprep.subr.bf16.mxu0 %v6405_v13  ;;  %v18389_v41 = vld [vmem:[#allocation13_spill] sm:$0xff] }
 0x7e2   : > { %v5930_v15 = vpop.f32.mrb[46].mxu1  ;;  %v6373_v12 = vpop.f32.mrb[205].mxu0  ;;  %vm18390_vm5 = vcmp.eq.s32.totalorder %v18388_v42, %v18389_v41  ;;  %v13690_v41 = vld [vmem:[%s18032_s3 + $0x440] ss:$12 sps:$4 sm:$0xff]  }
 0x7e3   : > { %v5931_v8 = vadd.f32 %v5930_v15, %v16337_v48  ;;  %v12824_v40 = vpop.f32.mrb[206].mxu0  ;;  %v5932_v4 = vpop.f32.mrb[47].mxu1  ;;  %v16596_v7 = vadd.f32 %v16422_v60, %v5928_v10  ;;  %v13676_v60 = vld [vmem:[%s18032_s3 + $0x3f0] ss:$12 sps:$4 sm:$0xff]   ;;  %v1999_v10 = vsel %vm18390_vm5, 1.0, %v18387_v9  ;;  %v18391_v15 = vld [vmem:[#allocation39_spill] sm:$0xff] }
 0x7e4   : > { %v6407_v63 = vpack.c.bf16 %v12824_v40, %v12823_v17  ;;  %v6376_v30 = vpop.f32.mrb[207].mxu0  ;;  %12828 = vmatpush3.bf16.msra.mxu0 %v6405_v13  ;;  %v7275_v17 = vpack.c.bf16 %v1999_v10, %v1999_v10  ;;  %v13681_v40 = vld [vmem:[%s18032_s3 + $0x408] ss:$12 sps:$4 sm:$0xff]  }
 0x7e5   : > { %v6406_v27 = vpack.c.bf16 %v6376_v30, %v6373_v12  ;;  %v16599_v37 = vadd.f32 %v18381_v38, %v5931_v8  ;;  %v18393_v4 = vld [vmem:[#allocation40_spill] sm:$0xff]  ;;  %v18394_v38 = vld [vmem:[#allocation51_spill] sm:$0xff] }
 0x7e6   : > { %6890 = vmatmul.mubr.bf16.gmra.mrb[84].mxu1 %v13673_v2  ;;  %v13685_v30 = vld [vmem:[%s18032_s3 + $0x410] ss:$12 sps:$4 sm:$0xff]  }
 0x7e7   : > { %12829 = vmatprep.subr.bf16.mxu0 %v6406_v27  ;;  %6897 = vmatprep.mubr.bf16.mxu1 %v13678_v5  ;;  %v13693_v10 = vld [vmem:[%s18032_s3 + $0x43c] ss:$12 sps:$4 sm:$0xff]  }
 0x7e8   : > { %v5935_v48 = vpop.f32.mrb[48].mxu1  ;;  %12830 = vmatpush3.bf16.msra.mxu0 %v6406_v27  ;;  %v13688_v27 = vld [vmem:[%s18032_s3 + $0x424] ss:$12 sps:$4 sm:$0xff]  }
 0x7e9   : > { %v5936_v51 = vadd.f32 %v5935_v48, %v18382_v36  ;;  %v5937_v43 = vpop.f32.mrb[49].mxu1  ;;  %12831 = vmatprep.subr.bf16.mxu0 %v6407_v63  ;;  %v13689_v36 = vld [vmem:[%s18032_s3 + $0x428] ss:$12 sps:$4 sm:$0xff]  }
 0x7ea   : > { %v5938_v39 = vpop.f32.mrb[50].mxu1  ;;  %v18395_v43 = vld [vmem:[#allocation54_spill] sm:$0xff] }
 0x7eb   : > { %v5939_v0 = vadd.f32 %v5938_v39, %v18383_v47  ;;  %v5940_v61 = vpop.f32.mrb[51].mxu1  ;;  %v16613_v62 = vadd.f32 %v18384_v1, %v5936_v51  ;;  %v7277_v51 = vsel %vm4103_vm2, %v7275_v17, 0  ;;  %v18396_v47 = vld [vmem:[#allocation41_spill] sm:$0xff]  ;;  %v18397_v1 = vld [vmem:[#allocation42_spill] sm:$0xff] }
 0x7ec   : > { %12832 = vmatpush3.bf16.msra.mxu0 %v6407_v63 }
 0x7ed   : > { %12873 = vmatprep.subr.msk.bf16.mxu0 %vm14163_vm12, %v18385_v23  ;;  %v16622_v13 = vadd.f32 %v16445_v6, %v5939_v0 }
 0x7ee   : > { %6898 = vmatmul.mubr.bf16.gmra.mrb[88].mxu1 %v13676_v60 }
 0x7ef   : > { %12834 = vmatmul.mubr.msk.bf16.vlgmr.msra.gmra.mrb[208].mxu0 %vm4998_vm9, %v13680_v56  ;;  %6905 = vmatprep.mubr.bf16.mxu1 %v13683_v35  ;;  %v13686_v35 = vld [vmem:[%s18032_s3 + $0x420] ss:$12 sps:$4 sm:$0xff]  }
 0x7f0   : > { %v5943_v11 = vpop.f32.mrb[52].mxu1  ;;  %12837 = vmatprep.mubr.msk.bf16.mxu0 %vm4998_vm9, %v13684_v59  ;;  %12874 = vmatpush3.bf16.msk.msra.mxu0 %vm14163_vm12, %v18385_v23 }
 0x7f1   : > { %v5944_v6 = vadd.f32 %v5943_v11, %v18391_v15  ;;  %v5945_v12 = vpop.f32.mrb[53].mxu1  ;;  %12875 = vmatprep.subr.msk.bf16.mxu0 %vm14170_vm13, %v18385_v23 }
 0x7f2   : > { %v5946_v8 = vpop.f32.mrb[54].mxu1  ;;  %v18398_v12 = vld [vmem:[#allocation43_spill] sm:$0xff] }
 0x7f3   : > { %v5947_v5 = vadd.f32 %v5946_v8, %v18393_v4  ;;  %v5948_v63 = vpop.f32.mrb[55].mxu1  ;;  %v16648_v48 = vadd.f32 %v18394_v38, %v5944_v6  ;;  %v18399_v4 = vld [vmem:[#allocation44_spill] sm:$0xff] }
 0x7f4   : > { %12876 = vmatpush3.bf16.msk.msra.mxu0 %vm14170_vm13, %v18385_v23 }
 0x7f5   : > { %13369 = vmatprep.subr.msk.bf16.mxu0 %vm4103_vm2, %v7275_v17  ;;  %v16659_v39 = vadd.f32 %v18395_v43, %v5947_v5  ;;  %v13694_v17 = vld [vmem:[%s18032_s3 + $0x458] ss:$12 sps:$4 sm:$0xff]  }
 0x7f6   : > { %6906 = vmatmul.mubr.bf16.gmra.mrb[92].mxu1 %v13681_v40 }
 0x7f7   : > { %12838 = vmatmul.mubr.msk.bf16.gmra.mrb[212].mxu0 %vm4998_vm9, %v13685_v30  ;;  %6913 = vmatprep.mubr.bf16.mxu1 %v13688_v27  ;;  %v13698_v30 = vld [vmem:[%s18032_s3 + $0x454] ss:$12 sps:$4 sm:$0xff]  }
 0x7f8   : > { %v5951_v60 = vpop.f32.mrb[56].mxu1  ;;  %12841 = vmatprep.mubr.msk.bf16.mxu0 %vm4998_vm9, %v13689_v36  ;;  %12878 = vmatpush3.bf16.msra.mxu0 %v7277_v51  ;;  %v18400_v27 = vld [vmem:[#allocation56_spill] sm:$0xff]  ;;  %v18401_v51 = vld [vmem:[#allocation57_spill] sm:$0xff] }
 0x7f9   : > { %v5952_v0 = vadd.f32 %v5951_v60, %v18396_v47  ;;  %v5953_v61 = vpop.f32.mrb[57].mxu1  ;;  %v13699_v36 = vld [vmem:[%s18032_s3 + $0x488] ss:$12 sps:$4 sm:$0xff]   ;;  %v18402_v47 = vld [vmem:[#allocation45_spill] sm:$0xff] }
 0x7fa   : > { %v5954_v56 = vpop.f32.mrb[58].mxu1 }
 0x7fb   : > { %v5955_v59 = vadd.f32 %v5954_v56, %v18397_v1  ;;  %v5956_v45 = vpop.f32.mrb[59].mxu1  ;;  %v16675_v11 = vadd.f32 %v16452_v16, %v5952_v0  ;;  %v13691_v16 = vld [vmem:[%s18032_s3 + $0x438] ss:$12 sps:$4 sm:$0xff]  }
 0x7fc   : > { %v18403_v1 = vld [vmem:[#allocation46_spill] sm:$0xff] }
 0x7fd   : > { %v16681_v15 = vadd.f32 %v16459_v46, %v5955_v59  ;;  %v13695_v46 = vld [vmem:[%s18032_s3 + $0x470] ss:$12 sps:$4 sm:$0xff]  }
 0x7fe   : > { %6914 = vmatmul.mubr.bf16.gmra.mrb[96].mxu1 %v13686_v35  ;;  %v13696_v35 = vld [vmem:[%s18032_s3 + $0x450] ss:$12 sps:$4 sm:$0xff]  }
 0x7ff   : > { %12842 = vmatmul.mubr.msk.bf16.gmra.mrb[216].mxu0 %vm4998_vm9, %v13690_v41  ;;  %6921 = vmatprep.mubr.bf16.mxu1 %v13693_v10  ;;  %v13700_v41 = vld [vmem:[%s18032_s3 + $0x4a0] ss:$12 sps:$4 sm:$0xff]  }
 0x800   : > { %v5959_v6 = vpop.f32.mrb[60].mxu1  ;;  %12845 = vmatprep.mubr.msk.bf16.mxu0 %vm4998_vm9, %v13694_v17  ;;  %v13703_v10 = vld [vmem:[%s18032_s3 + $0x46c] ss:$12 sps:$4 sm:$0xff]   ;;  %v18404_v17 = vld [vmem:[#allocation60_spill] sm:$0xff] }
 0x801   : > { %v5960_v2 = vadd.f32 %v5959_v6, %v18398_v12  ;;  %v5961_v8 = vpop.f32.mrb[61].mxu1  ;;  %v13704_v12 = vld [vmem:[%s18032_s3 + $0x4b8] ss:$12 sps:$4 sm:$0xff]  }
 0x802   : > { %v5962_v40 = vpop.f32.mrb[62].mxu1 }
 0x803   : > { %v5963_v5 = vadd.f32 %v5962_v40, %v18399_v4  ;;  %v5964_v63 = vpop.f32.mrb[63].mxu1  ;;  %v16697_v38 = vadd.f32 %v18400_v27, %v5960_v2  ;;  %v18405_v40 = vld [vmem:[#allocation47_spill] sm:$0xff] }
 0x804   : > { %v13701_v63 = vld [vmem:[%s18032_s3 + $0x468] ss:$12 sps:$4 sm:$0xff]  }
 0x805   : > { %v16703_v43 = vadd.f32 %v18401_v51, %v5963_v5  ;;  %v18407_v51 = vld [vmem:[#allocation59_spill] sm:$0xff] }
 0x806   : > { %6922 = vmatmul.mubr.bf16.gmra.mrb[100].mxu1 %v13691_v16 }
 0x807   : > { %12846 = vmatmul.mubr.msk.bf16.gmra.mrb[220].mxu0 %vm4998_vm9, %v13695_v46  ;;  %6929 = vmatprep.mubr.bf16.mxu1 %v13698_v30  ;;  %v18406_v46 = vld [vmem:[#allocation48_spill] sm:$0xff] }
 0x808   : > { %v5967_v60 = vpop.f32.mrb[64].mxu1  ;;  %12849 = vmatprep.mubr.msk.bf16.mxu0 %vm4998_vm9, %v13699_v36  ;;  %v13708_v36 = vld [vmem:[%s18032_s3 + $0x484] ss:$12 sps:$4 sm:$0xff]  }
 0x809   : > { %v5968_v0 = vadd.f32 %v5967_v60, %v18402_v47  ;;  %v5969_v61 = vpop.f32.mrb[65].mxu1  ;;  %v13709_v47 = vld [vmem:[%s18032_s3 + $0x4e8] ss:$12 sps:$4 sm:$0xff]  }
 0x80a   : > { %v5970_v56 = vpop.f32.mrb[66].mxu1 }
 0x80b   : > { %v5971_v59 = vadd.f32 %v5970_v56, %v18403_v1  ;;  %v5972_v45 = vpop.f32.mrb[67].mxu1  ;;  %v16719_v6 = vadd.f32 %v18404_v17, %v5968_v0  ;;  %v18408_v56 = vld [vmem:[#allocation50_spill] sm:$0xff] }
 0x80c   : > { %v13706_v45 = vld [vmem:[%s18032_s3 + $0x480] ss:$12 sps:$4 sm:$0xff]  }
 0x80d   : > { %v16725_v2 = vadd.f32 %v16472_v14, %v5971_v59  ;;  %v13705_v14 = vld [vmem:[%s18032_s3 + $0x4d0] ss:$12 sps:$4 sm:$0xff]  }
 0x80e   : > { %6930 = vmatmul.mubr.bf16.gmra.mrb[104].mxu1 %v13696_v35 }
 0x80f   : > { %12850 = vmatmul.mubr.msk.bf16.gmra.mrb[224].mxu0 %vm4998_vm9, %v13700_v41  ;;  %6937 = vmatprep.mubr.bf16.mxu1 %v13703_v10  ;;  %v18409_v41 = vld [vmem:[#allocation53_spill] sm:$0xff] }
 0x810   : > { %v5975_v8 = vpop.f32.mrb[68].mxu1  ;;  %12853 = vmatprep.mubr.msk.bf16.mxu0 %vm4998_vm9, %v13704_v12  ;;  %v13713_v12 = vld [vmem:[%s18032_s3 + $0x49c] ss:$12 sps:$4 sm:$0xff]  }
 0x811   : > { %v5976_v16 = vadd.f32 %v5975_v8, %v18405_v40  ;;  %v5977_v4 = vpop.f32.mrb[69].mxu1  ;;  %v13714_v40 = vld [vmem:[%s18032_s3 + $0x518] ss:$12 sps:$4 sm:$0xff]  }
 0x812   : > { %v5978_v5 = vpop.f32.mrb[70].mxu1 }
 0x813   : > { %v5979_v30 = vadd.f32 %v5978_v5, %v18406_v46  ;;  %v5980_v27 = vpop.f32.mrb[71].mxu1  ;;  %v16741_v60 = vadd.f32 %v18407_v51, %v5976_v16  ;;  %v18410_v5 = vld [vmem:[#allocation55_spill] sm:$0xff] }
 0x814   : > { %v18411_v27 = vld [vmem:[#allocation58_spill] sm:$0xff] }
 0x815   : > { %v16747_v0 = vadd.f32 %v16467_v24, %v5979_v30  ;;  %v13710_v24 = vld [vmem:[%s18032_s3 + $0x500] ss:$12 sps:$4 sm:$0xff]  }
 0x816   : > { %6938 = vmatmul.mubr.bf16.gmra.mrb[108].mxu1 %v13701_v63 }
 0x817   : > { %12854 = vmatmul.mubr.msk.bf16.gmra.mrb[228].mxu0 %vm4998_vm9, %v13705_v14  ;;  %6945 = vmatprep.mubr.bf16.mxu1 %v13708_v36  ;;  %v13718_v36 = vld [vmem:[%s18032_s3 + $0x4b4] ss:$12 sps:$4 sm:$0xff]  }
 0x818   : > { %v5983_v61 = vpop.f32.mrb[72].mxu1  ;;  %12857 = vmatprep.mubr.msk.bf16.mxu0 %vm4998_vm9, %v13709_v47 }
 0x819   : > { %v5984_v35 = vadd.f32 %v5983_v61, %v18408_v56  ;;  %v5985_v1 = vpop.f32.mrb[73].mxu1  ;;  %v13719_v61 = vld [vmem:[%s18032_s3 + $0x548] ss:$12 sps:$4 sm:$0xff]  }
 0x81a   : > { %v5986_v59 = vpop.f32.mrb[74].mxu1  ;;  %v18412_v56 = vld [vmem:[#allocation63_spill] sm:$0xff]  ;;  %v13716_v1 = vld [vmem:[%s18032_s3 + $0x4b0] ss:$12 sps:$4 sm:$0xff]  }
 0x81b   : > { %v5987_v10 = vadd.f32 %v5986_v59, %v18409_v41  ;;  %v5988_v17 = vpop.f32.mrb[75].mxu1  ;;  %v16763_v8 = vadd.f32 %v16480_v21, %v5984_v35  ;;  %v13711_v21 = vld [vmem:[%s18032_s3 + $0x498] ss:$12 sps:$4 sm:$0xff]   ;;  %v13721_v41 = vld [vmem:[%s18032_s3 + $0x4c8] ss:$12 sps:$4 sm:$0xff]  }
 0x81c   : > { %v13723_v59 = vld [vmem:[%s18032_s3 + $0x4cc] ss:$12 sps:$4 sm:$0xff]   ;;  %v13728_v17 = vld [vmem:[%s18032_s3 + $0x4e4] ss:$12 sps:$4 sm:$0xff]  }
 0x81d   : > { %v16769_v16 = vadd.f32 %v16488_v34, %v5987_v10  ;;  %v13715_v34 = vld [vmem:[%s18032_s3 + $0x530] ss:$12 sps:$4 sm:$0xff]  }
 0x81e   : > { %6946 = vmatmul.mubr.bf16.gmra.mrb[112].mxu1 %v13706_v45  ;;  %v13724_v45 = vld [vmem:[%s18032_s3 + $0x578] ss:$12 sps:$4 sm:$0xff]   ;;  %v13725_v10 = vld [vmem:[%s18032_s3 + $0x590] ss:$12 sps:$4 sm:$0xff]  }
 0x81f   : > { %12858 = vmatmul.mubr.msk.bf16.gmra.mrb[232].mxu0 %vm4998_vm9, %v13710_v24  ;;  %6953 = vmatprep.mubr.bf16.mxu1 %v13713_v12  ;;  %v18413_v24 = vld [vmem:[#allocation20_spill] sm:$0xff]  ;;  %v13726_v12 = vld [vmem:[%s18032_s3 + $0x4e0] ss:$12 sps:$4 sm:$0xff]  }
 0x820   : > { %v5991_v4 = vpop.f32.mrb[76].mxu1  ;;  %12861 = vmatprep.mubr.msk.bf16.mxu0 %vm4998_vm9, %v13714_v40  ;;  %v13731_v40 = vld [vmem:[%s18032_s3 + $0x4fc] ss:$12 sps:$4 sm:$0xff]  }
 0x821   : > { %v5992_v63 = vadd.f32 %v5991_v4, %v18410_v5  ;;  %v5993_v46 = vpop.f32.mrb[77].mxu1  ;;  %v18414_v4 = vld [vmem:[#allocation21_spill] sm:$0xff]  ;;  %v18415_v5 = vld [vmem:[#allocation22_spill] sm:$0xff] }
 0x822   : > { %v5994_v30 = vpop.f32.mrb[78].mxu1  ;;  %v13734_v46 = vld [vmem:[%s18032_s3 + $0x514] ss:$12 sps:$4 sm:$0xff]  }
 0x823   : > { %v5995_v14 = vadd.f32 %v5994_v30, %v18411_v27  ;;  %v5996_v51 = vpop.f32.mrb[79].mxu1  ;;  %v16785_v47 = vadd.f32 %v16478_v44, %v5992_v63  ;;  %v13720_v44 = vld [vmem:[%s18032_s3 + $0x560] ss:$12 sps:$4 sm:$0xff]   ;;  %v13729_v63 = vld [vmem:[%s18032_s3 + $0x4f8] ss:$12 sps:$4 sm:$0xff]  }
 0x824   : > { %v18416_v30 = vld [vmem:[#allocation23_spill] sm:$0xff]  ;;  %v13732_v27 = vld [vmem:[%s18032_s3 + $0x510] ss:$12 sps:$4 sm:$0xff]  }
 0x825   : > { %v16791_v35 = vadd.f32 %v18412_v56, %v5995_v14  ;;  %v13737_v14 = vld [vmem:[%s18032_s3 + $0x52c] ss:$12 sps:$4 sm:$0xff]   ;;  %v13735_v51 = vld [vmem:[%s18032_s3 + $0x528] ss:$12 sps:$4 sm:$0xff]  }
 0x826   : > { %6954 = vmatmul.mubr.bf16.gmra.mrb[116].mxu1 %v13711_v21  ;;  %v18417_v21 = vld [vmem:[#allocation24_spill] sm:$0xff]  ;;  %v18420_v56 = vld [vmem:[#allocation27_spill] sm:$0xff] }
 0x827   : > { %12862 = vmatmul.mubr.msk.bf16.gmra.mrb[236].mxu0 %vm4998_vm9, %v13715_v34  ;;  %6961 = vmatprep.mubr.bf16.mxu1 %v13718_v36  ;;  %v18418_v34 = vld [vmem:[#allocation25_spill] sm:$0xff]  ;;  %v18419_v36 = vld [vmem:[#allocation26_spill] sm:$0xff] }
 0x828   : > { %12865 = vmatprep.mubr.msk.bf16.mxu0 %vm4998_vm9, %v13719_v61  ;;  %v13740_v61 = vld [vmem:[%s18032_s3 + $0x544] ss:$12 sps:$4 sm:$0xff]  }
 0x82e   : > { %6962 = vmatmul.mubr.bf16.gmra.mrb[120].mxu1 %v13716_v1  ;;  %v18421_v1 = vld [vmem:[#allocation28_spill] sm:$0xff] }
 0x82f   : > { %12866 = vmatmul.mubr.msk.bf16.gmra.mrb[240].mxu0 %vm4998_vm9, %v13720_v44  ;;  %6969 = vmatprep.mubr.bf16.mxu1 %v13723_v59  ;;  %v13738_v44 = vld [vmem:[%s18032_s3 + $0x540] ss:$12 sps:$4 sm:$0xff]   ;;  %v13743_v59 = vld [vmem:[%s18032_s3 + $0x55c] ss:$12 sps:$4 sm:$0xff]  }
 0x830   : > { %12869 = vmatprep.mubr.msk.bf16.mxu0 %vm4998_vm9, %v13724_v45  ;;  %v18422_v45 = vld [vmem:[#allocation11_spill] sm:$0xff] }
 0x836   : > { %6970 = vmatmul.mubr.bf16.gmra.mrb[124].mxu1 %v13721_v41  ;;  %v18423_v41 = vld [vmem:[#allocation10_spill] sm:$0xff] }
 0x837   : > { %12870 = vmatmul.mubr.msk.bf16.gmra.mrb[244].mxu0 %vm4998_vm9, %v13725_v10  ;;  %6977 = vmatprep.mubr.bf16.mxu1 %v13728_v17  ;;  %v13741_v10 = vld [vmem:[%s18032_s3 + $0x558] ss:$12 sps:$4 sm:$0xff]   ;;  %v13746_v17 = vld [vmem:[%s18032_s3 + $0x574] ss:$12 sps:$4 sm:$0xff]  }
 0x838   : > { %12879 = vmatprep.mubr.msk.bf16.mxu0 %vm4042_vm3, %v18413_v24 }
 0x83e   : > { %6978 = vmatmul.mubr.bf16.gmra.mrb[128].mxu1 %v13726_v12  ;;  %v18424_v12 = vld [vmem:[#allocation12_spill] sm:$0xff] }
 0x83f   : > { %12880 = vmatmul.mubr.msk.bf16.vlgmr.msra.gmra.mrb[248].mxu0 %vm4042_vm3, %v18414_v4  ;;  %6985 = vmatprep.mubr.bf16.mxu1 %v13731_v40  ;;  %v18425_v40 = vld [vmem:[#allocation31_spill] sm:$0xff]  ;;  %v18435_v4 = vld [vmem:[#allocation62_spill] sm:$0xff] }
 0x840   : > { %12883 = vmatprep.mubr.msk.bf16.mxu0 %vm4042_vm3, %v18415_v5  ;;  %v18434_v5 = vld [vmem:[#allocation61_spill] sm:$0xff] }
 0x846   : > { %6986 = vmatmul.mubr.bf16.gmra.mrb[132].mxu1 %v13729_v63  ;;  %v13744_v63 = vld [vmem:[%s18032_s3 + $0x570] ss:$12 sps:$4 sm:$0xff]  }
 0x847   : > { %12884 = vmatmul.mubr.msk.bf16.gmra.mrb[252].mxu0 %vm4042_vm3, %v18416_v30  ;;  %6993 = vmatprep.mubr.bf16.mxu1 %v13734_v46  ;;  %v13749_v46 = vld [vmem:[%s18032_s3 + $0x58c] ss:$12 sps:$4 sm:$0xff]  }
 0x848   : > { %12887 = vmatprep.mubr.msk.bf16.mxu0 %vm4042_vm3, %v18417_v21  ;;  %v18433_v21 = vld [vmem:[#allocation64_spill] sm:$0xff] }
 0x84e   : > { %6994 = vmatmul.mubr.bf16.gmra.mrb[136].mxu1 %v13732_v27  ;;  %v18426_v27 = vld [vmem:[#allocation32_spill] sm:$0xff] }
 0x84f   : > { %12888 = vmatmul.mubr.msk.bf16.gmra.mrb[0].mxu0 %vm4042_vm3, %v18418_v34  ;;  %7001 = vmatprep.mubr.bf16.mxu1 %v13737_v14  ;;  %v18427_v14 = vld [vmem:[#allocation33_spill] sm:$0xff] }
 0x850   : > { %12891 = vmatprep.mubr.msk.bf16.mxu0 %vm4042_vm3, %v18419_v36 }
 0x856   : > { %7002 = vmatmul.mubr.bf16.gmra.mrb[140].mxu1 %v13735_v51  ;;  %v13747_v51 = vld [vmem:[%s18032_s3 + $0x588] ss:$12 sps:$4 sm:$0xff]  }
 0x857   : > { %12892 = vmatmul.mubr.msk.bf16.gmra.mrb[4].mxu0 %vm4042_vm3, %v18420_v56  ;;  %7009 = vmatprep.mubr.bf16.mxu1 %v13740_v61  ;;  %v18428_v61 = vld [vmem:[#allocation34_spill] sm:$0xff] }
 0x858   : > { %12895 = vmatprep.mubr.msk.bf16.mxu0 %vm4042_vm3, %v18421_v1 }
 0x85e   : > { %7010 = vmatmul.mubr.bf16.gmra.mrb[144].mxu1 %v13738_v44  ;;  %v18429_v44 = vld [vmem:[#allocation35_spill] sm:$0xff] }
 0x85f   : > { %12896 = vmatmul.mubr.msk.bf16.gmra.mrb[8].mxu0 %vm4042_vm3, %v18422_v45  ;;  %7017 = vmatprep.mubr.bf16.mxu1 %v13743_v59  ;;  %v18430_v59 = vld [vmem:[#allocation36_spill] sm:$0xff] }
 0x860   : > { %12899 = vmatprep.mubr.msk.bf16.mxu0 %vm4042_vm3, %v18423_v41 }
 0x866   : > { %7018 = vmatmul.mubr.bf16.gmra.mrb[148].mxu1 %v13741_v10  ;;  %v18431_v10 = vld [vmem:[#allocation37_spill] sm:$0xff] }
 0x867   : > { %12900 = vmatmul.mubr.msk.bf16.gmra.mrb[12].mxu0 %vm4042_vm3, %v18424_v12  ;;  %7025 = vmatprep.mubr.bf16.mxu1 %v13746_v17  ;;  %v18432_v17 = vld [vmem:[#allocation38_spill] sm:$0xff] }
 0x868   : > { %12903 = vmatprep.mubr.msk.bf16.mxu0 %vm4042_vm3, %v18425_v40 }
 0x86e   : > { %7026 = vmatmul.mubr.bf16.gmra.mrb[152].mxu1 %v13744_v63 }
 0x86f   : > { %12904 = vmatmul.mubr.msk.bf16.gmra.mrb[16].mxu0 %vm4042_vm3, %v18426_v27  ;;  %7033 = vmatprep.mubr.bf16.mxu1 %v13749_v46 }
 0x870   : > { %12907 = vmatprep.mubr.msk.bf16.mxu0 %vm4042_vm3, %v18427_v14 }
 0x876   : > { %7034 = vmatmul.mubr.bf16.gmra.mrb[156].mxu1 %v13747_v51 }
 0x877   : > { %12908 = vmatmul.mubr.msk.bf16.gmra.mrb[20].mxu0 %vm4042_vm3, %v18428_v61 }
 0x878   : > { %12911 = vmatprep.mubr.msk.bf16.mxu0 %vm4042_vm3, %v18429_v44 }
 0x87f   : > { %12912 = vmatmul.mubr.msk.bf16.gmra.mrb[24].mxu0 %vm4042_vm3, %v18430_v59 }
 0x880   : > { %12915 = vmatprep.mubr.msk.bf16.mxu0 %vm4042_vm3, %v18431_v10 }
 0x887   : > { %12916 = vmatmul.mubr.msk.bf16.gmra.mrb[28].mxu0 %vm4042_vm3, %v18432_v17 }
 0x8b1   : > { %v6883_v63 = vpop.f32.mrb[80].mxu1 }
 0x8b2   : > { %v6885_v46 = vpop.f32.mrb[81].mxu1 }
 0x8b3   : > { %v6886_v14 = vpop.f32.mrb[82].mxu1 }
 0x8b4   : > { %v6888_v27 = vpop.f32.mrb[83].mxu1 }
 0x8b9   : > { %v6891_v51 = vpop.f32.mrb[84].mxu1 }
 0x8ba   : > { %v6893_v40 = vpop.f32.mrb[85].mxu1 }
 0x8bb   : > { %v6894_v12 = vpop.f32.mrb[86].mxu1 }
 0x8bc   : > { %v6896_v61 = vpop.f32.mrb[87].mxu1 }
 0x8c1   : > { %v6899_v41 = vpop.f32.mrb[88].mxu1 }
 0x8c2   : > { %v12835_v45 = vpop.f32.mrb[208].mxu0  ;;  %v6901_v44 = vpop.f32.mrb[89].mxu1 }
 0x8c3   : > { %v7085_v1 = vadd.f32 %v12835_v45, %v6891_v51  ;;  %v7076_v56 = vpop.f32.mrb[209].mxu0  ;;  %v6902_v59 = vpop.f32.mrb[90].mxu1 }
 0x8c4   : > { %v7077_v36 = vadd.f32 %v7076_v56, %v6883_v63  ;;  %v12836_v34 = vpop.f32.mrb[210].mxu0  ;;  %v6904_v10 = vpop.f32.mrb[91].mxu1 }
 0x8c5   : > { %v16905_v30 = vadd.f32 %v7085_v1, %v18433_v21  ;;  %v7088_v17 = vadd.f32 %v12836_v34, %v6894_v12  ;;  %v7079_v46 = vpop.f32.mrb[211].mxu0 }
 0x8c6   : > { %v16908_v27 = vadd.f32 %v7077_v36, %v18434_v5  ;;  %v7080_v40 = vadd.f32 %v7079_v46, %v6886_v14 }
 0x8c7   : > { %v16911_v61 = vadd.f32 %v7088_v17, %v16491_v32 }
 0x8c8   : > { %v16914_v44 = vadd.f32 %v7080_v40, %v18435_v4 }
 0x8c9   : > { %v6907_v45 = vpop.f32.mrb[92].mxu1 }
 0x8ca   : > { %v12839_v51 = vpop.f32.mrb[212].mxu0  ;;  %v6909_v56 = vpop.f32.mrb[93].mxu1 }
 0x8cb   : > { %v7101_v63 = vadd.f32 %v12839_v51, %v6907_v45  ;;  %v7092_v10 = vpop.f32.mrb[213].mxu0  ;;  %v6910_v24 = vpop.f32.mrb[94].mxu1 }
 0x8cc   : > { %v7093_v21 = vadd.f32 %v7092_v10, %v6899_v41  ;;  %v12840_v1 = vpop.f32.mrb[214].mxu0  ;;  %v6912_v34 = vpop.f32.mrb[95].mxu1 }
 0x8cd   : > { %v16917_v12 = vadd.f32 %v7101_v63, %v16505_v57  ;;  %v7104_v5 = vadd.f32 %v12840_v1, %v6910_v24  ;;  %v7095_v36 = vpop.f32.mrb[215].mxu0 }
 0x8ce   : > { %v16920_v32 = vadd.f32 %v7093_v21, %v16496_v29  ;;  %v7096_v14 = vadd.f32 %v7095_v36, %v6902_v59  ;;  %v13752_v29 = vld [vmem:[%s18032_s3 + $0x5a4] ss:$12 sps:$4 sm:$0xff]  }
 0x8cf   : > { %v16923_v4 = vadd.f32 %v7104_v5, %v16509_v18  ;;  %7965 = vmatprep.mubr.bf16.mxu1 %v13752_v29 }
 0x8d0   : > { %v16926_v17 = vadd.f32 %v7096_v14, %v16499_v52 }
 0x8d1   : > { %v6915_v46 = vpop.f32.mrb[96].mxu1 }
 0x8d2   : > { %v12843_v40 = vpop.f32.mrb[216].mxu0  ;;  %v6917_v41 = vpop.f32.mrb[97].mxu1 }
 0x8d3   : > { %v7108_v45 = vpop.f32.mrb[217].mxu0  ;;  %v6918_v51 = vpop.f32.mrb[98].mxu1 }
 0x8d4   : > { %v7109_v56 = vadd.f32 %v7108_v45, %v6915_v46  ;;  %v12844_v57 = vpop.f32.mrb[218].mxu0  ;;  %v6920_v63 = vpop.f32.mrb[99].mxu1 }
 0x8d5   : > { %v7111_v24 = vpop.f32.mrb[219].mxu0 }
 0x8d6   : > { %v16932_v59 = vadd.f32 %v7109_v56, %v16515_v31  ;;  %v7112_v18 = vadd.f32 %v7111_v24, %v6918_v51 }
 0x8d8   : > { %v16935_v52 = vadd.f32 %v7112_v18, %v16519_v58 }
 0x8d9   : > { %v6923_v10 = vpop.f32.mrb[100].mxu1 }
 0x8da   : > { %v7117_v21 = vadd.f32 %v12843_v40, %v6923_v10  ;;  %v6925_v1 = vpop.f32.mrb[101].mxu1  ;;  %v12847_v34 = vpop.f32.mrb[220].mxu0 }
 0x8db   : > { %v6926_v5 = vpop.f32.mrb[102].mxu1  ;;  %v7124_v36 = vpop.f32.mrb[221].mxu0 }
 0x8dc   : > { %v16938_v14 = vadd.f32 %v7117_v21, %v16525_v54  ;;  %v7120_v46 = vadd.f32 %v12844_v57, %v6926_v5  ;;  %v6928_v41 = vpop.f32.mrb[103].mxu1  ;;  %v12848_v45 = vpop.f32.mrb[222].mxu0  ;;  %v13759_v57 = vld [vmem:[%s18032_s3 + $0x5a8] ss:$12 sps:$4 sm:$0xff]  }
 0x8dd   : > { %v7127_v63 = vpop.f32.mrb[223].mxu0  ;;  %12927 = vmatprep.mubr.msk.bf16.mxu0 %vm4998_vm9, %v13759_v57 }
 0x8de   : > { %18436 = vst [vmem:[#allocation49_spill] sm:$0xff] %v16938_v14  ;;  %v16941_v31 = vadd.f32 %v7120_v46, %v16529_v25 }
 0x8e0   : > { %18437 = vst [vmem:[#allocation8_spill] sm:$0xff] %v16941_v31 }
 0x8e1   : > { %v6931_v51 = vpop.f32.mrb[104].mxu1 }
 0x8e2   : > { %v7125_v56 = vadd.f32 %v7124_v36, %v6931_v51  ;;  %v6933_v58 = vpop.f32.mrb[105].mxu1  ;;  %v12851_v29 = vpop.f32.mrb[224].mxu0 }
 0x8e3   : > { %v6934_v24 = vpop.f32.mrb[106].mxu1  ;;  %v7140_v40 = vpop.f32.mrb[225].mxu0 }
 0x8e4   : > { %v16944_v18 = vadd.f32 %v7125_v56, %v16535_v22  ;;  %v7128_v10 = vadd.f32 %v7127_v63, %v6934_v24  ;;  %v6936_v1 = vpop.f32.mrb[107].mxu1  ;;  %v12852_v54 = vpop.f32.mrb[226].mxu0 }
 0x8e5   : > { %v7143_v21 = vpop.f32.mrb[227].mxu0 }
 0x8e6   : > { %18438 = vst [vmem:[#allocation9_spill] sm:$0xff] %v16944_v18  ;;  %v16950_v25 = vadd.f32 %v7128_v10, %v16539_v3 }
 0x8e8   : > { %18439 = vst [vmem:[#allocation52_spill] sm:$0xff] %v16950_v25 }
 0x8e9   : > { %v6939_v5 = vpop.f32.mrb[108].mxu1 }
 0x8ea   : > { %v7133_v36 = vadd.f32 %v12847_v34, %v6939_v5  ;;  %v6941_v46 = vpop.f32.mrb[109].mxu1  ;;  %v12855_v41 = vpop.f32.mrb[228].mxu0 }
 0x8eb   : > { %v6942_v51 = vpop.f32.mrb[110].mxu1  ;;  %v7156_v22 = vpop.f32.mrb[229].mxu0 }
 0x8ec   : > { %v16954_v63 = vadd.f32 %v7133_v36, %v16545_v49  ;;  %v7136_v56 = vadd.f32 %v12848_v45, %v6942_v51  ;;  %v6944_v58 = vpop.f32.mrb[111].mxu1  ;;  %v12856_v24 = vpop.f32.mrb[230].mxu0 }
 0x8ed   : > { %v7159_v1 = vpop.f32.mrb[231].mxu0 }
 0x8ee   : > { %v16957_v18 = vadd.f32 %v7136_v56, %v16549_v53 }
 0x8f0   : > { %18440 = vst [vmem:[#allocation14_spill] sm:$0xff] %v16957_v18 }
 0x8f1   : > { %v6947_v3 = vpop.f32.mrb[112].mxu1 }
 0x8f2   : > { %v7141_v10 = vadd.f32 %v7140_v40, %v6947_v3  ;;  %v6949_v25 = vpop.f32.mrb[113].mxu1  ;;  %v12859_v57 = vpop.f32.mrb[232].mxu0 }
 0x8f3   : > { %v6950_v31 = vpop.f32.mrb[114].mxu1  ;;  %v7172_v34 = vpop.f32.mrb[233].mxu0 }
 0x8f4   : > { %v16960_v5 = vadd.f32 %v7141_v10, %v16555_v26  ;;  %v7144_v46 = vadd.f32 %v7143_v21, %v6950_v31  ;;  %v6952_v14 = vpop.f32.mrb[115].mxu1  ;;  %v12860_v49 = vpop.f32.mrb[234].mxu0 }
 0x8f5   : > { %v7175_v36 = vpop.f32.mrb[235].mxu0 }
 0x8f6   : > { %18441 = vst [vmem:[#allocation7_spill] sm:$0xff] %v16960_v5  ;;  %v16963_v45 = vadd.f32 %v7144_v46, %v16559_v19 }
 0x8f8   : > { %18442 = vst [vmem:[#allocation13_spill] sm:$0xff] %v16963_v45 }
 0x8f9   : > { %v6955_v51 = vpop.f32.mrb[116].mxu1 }
 0x8fa   : > { %v7149_v58 = vadd.f32 %v12851_v29, %v6955_v51  ;;  %v6957_v53 = vpop.f32.mrb[117].mxu1  ;;  %v16965_v56 = vpop.f32.mrb[236].mxu0 }
 0x8fb   : > { %v6958_v40 = vpop.f32.mrb[118].mxu1  ;;  %v16967_v25 = vpop.f32.mrb[237].mxu0 }
 0x8fc   : > { %v16970_v3 = vadd.f32 %v7149_v58, %v16565_v33  ;;  %v7152_v26 = vadd.f32 %v12852_v54, %v6958_v40  ;;  %v6960_v10 = vpop.f32.mrb[119].mxu1  ;;  %v16972_v31 = vpop.f32.mrb[238].mxu0 }
 0x8fd   : > { %v16974_v14 = vpop.f32.mrb[239].mxu0 }
 0x8fe   : > { %18443 = vst [vmem:[#allocation39_spill] sm:$0xff] %v16970_v3  ;;  %v16977_v19 = vadd.f32 %v7152_v26, %v16569_v20 }
 0x900   : > { %18444 = vst [vmem:[#allocation15_spill] sm:$0xff] %v16977_v19 }
 0x901   : > { %v6963_v21 = vpop.f32.mrb[120].mxu1 }
 0x902   : > { %v7157_v29 = vadd.f32 %v7156_v22, %v6963_v21  ;;  %v6965_v46 = vpop.f32.mrb[121].mxu1  ;;  %v16979_v51 = vpop.f32.mrb[240].mxu0 }
 0x903   : > { %v6966_v53 = vpop.f32.mrb[122].mxu1  ;;  %v16981_v45 = vpop.f32.mrb[241].mxu0 }
 0x904   : > { %v16984_v33 = vadd.f32 %v7157_v29, %v16581_v55  ;;  %v7160_v54 = vadd.f32 %v7159_v1, %v6966_v53  ;;  %v6968_v58 = vpop.f32.mrb[123].mxu1  ;;  %v16986_v40 = vpop.f32.mrb[242].mxu0 }
 0x905   : > { %v16988_v10 = vpop.f32.mrb[243].mxu0 }
 0x906   : > { %18445 = vst [vmem:[#allocation40_spill] sm:$0xff] %v16984_v33  ;;  %v16991_v20 = vadd.f32 %v7160_v54, %v16585_v28 }
 0x908   : > { %18446 = vst [vmem:[#allocation51_spill] sm:$0xff] %v16991_v20 }
 0x909   : > { %v6971_v26 = vpop.f32.mrb[124].mxu1 }
 0x90a   : > { %v7165_v22 = vadd.f32 %v12855_v41, %v6971_v26  ;;  %v6973_v21 = vpop.f32.mrb[125].mxu1  ;;  %v16993_v46 = vpop.f32.mrb[244].mxu0 }
 0x90b   : > { %v6974_v19 = vpop.f32.mrb[126].mxu1  ;;  %v16995_v3 = vpop.f32.mrb[245].mxu0 }
 0x90c   : > { %v16998_v55 = vadd.f32 %v7165_v22, %v16596_v7  ;;  %v7168_v1 = vadd.f32 %v12856_v24, %v6974_v19  ;;  %v6976_v29 = vpop.f32.mrb[127].mxu1  ;;  %v17000_v53 = vpop.f32.mrb[246].mxu0 }
 0x90d   : > { %v17002_v58 = vpop.f32.mrb[247].mxu0 }
 0x90e   : > { %18447 = vst [vmem:[#allocation54_spill] sm:$0xff] %v16998_v55  ;;  %v17005_v28 = vadd.f32 %v7168_v1, %v16599_v37 }
 0x910   : > { %18448 = vst [vmem:[#allocation41_spill] sm:$0xff] %v17005_v28 }
 0x911   : > { %v6979_v54 = vpop.f32.mrb[128].mxu1 }
 0x912   : > { %v7173_v41 = vadd.f32 %v7172_v34, %v6979_v54  ;;  %v6981_v26 = vpop.f32.mrb[129].mxu1  ;;  %v12881_v21 = vpop.f32.mrb[248].mxu0 }
 0x913   : > { %v6982_v20 = vpop.f32.mrb[130].mxu1  ;;  %v7313_v33 = vpop.f32.mrb[249].mxu0 }
 0x914   : > { %v17008_v5 = vadd.f32 %v7173_v41, %v16613_v62  ;;  %v7176_v7 = vadd.f32 %v7175_v36, %v6982_v20  ;;  %v12882_v22 = vpop.f32.mrb[250].mxu0  ;;  %v6984_v24 = vpop.f32.mrb[131].mxu1 }
 0x915   : > { %v7473_v19 = vpack.c.bf16 %v12882_v22, %v12881_v21  ;;  %v7316_v29 = vpop.f32.mrb[251].mxu0 }
 0x916   : > { %v17011_v55 = vadd.f32 %v7176_v7, %v16622_v13  ;;  %v7472_v18 = vpack.c.bf16 %v7316_v29, %v7313_v33 }
 0x918   : > { %7934 = vmatpush1.bf16.msra.mxu1 %v7472_v18 }
 0x919   : > { %v6987_v37 = vpop.f32.mrb[132].mxu1  ;;  %7935 = vmatprep.subr.bf16.mxu1 %v18306_v50 }
 0x91a   : > { %v7181_v34 = vadd.f32 %v12859_v57, %v6987_v37  ;;  %v6989_v1 = vpop.f32.mrb[133].mxu1  ;;  %v12885_v54 = vpop.f32.mrb[252].mxu0 }
 0x91b   : > { %v6990_v26 = vpop.f32.mrb[134].mxu1  ;;  %v7329_v28 = vpop.f32.mrb[253].mxu0 }
 0x91c   : > { %v17015_v62 = vadd.f32 %v7181_v34, %v16648_v48  ;;  %v7184_v36 = vadd.f32 %v12860_v49, %v6990_v26  ;;  %v12886_v20 = vpop.f32.mrb[254].mxu0  ;;  %7936 = vmatpush1.bf16.msra.mxu1 %v7473_v19  ;;  %v6992_v41 = vpop.f32.mrb[135].mxu1 }
 0x91d   : > { %v7475_v21 = vpack.c.bf16 %v12886_v20, %v12885_v54  ;;  %v7332_v13 = vpop.f32.mrb[255].mxu0  ;;  %7937 = vmatprep.subr.bf16.mxu1 %v18306_v50 }
 0x91e   : > { %v17019_v18 = vadd.f32 %v7184_v36, %v16659_v39  ;;  %v7474_v33 = vpack.c.bf16 %v7332_v13, %v7329_v28 }
 0x920   : > { %7938 = vmatpush1.bf16.msra.mxu1 %v7474_v33 }
 0x921   : > { %v6995_v57 = vpop.f32.mrb[136].mxu1  ;;  %7939 = vmatprep.subr.bf16.mxu1 %v18306_v50 }
 0x922   : > { %v7189_v7 = vadd.f32 %v16967_v25, %v6995_v57  ;;  %v6997_v48 = vpop.f32.mrb[137].mxu1  ;;  %v12889_v22 = vpop.f32.mrb[0].mxu0 }
 0x923   : > { %v6998_v49 = vpop.f32.mrb[138].mxu1  ;;  %v7345_v24 = vpop.f32.mrb[1].mxu0 }
 0x924   : > { %v17024_v19 = vadd.f32 %v7189_v7, %v16675_v11  ;;  %v7192_v29 = vadd.f32 %v16974_v14, %v6998_v49  ;;  %v12890_v37 = vpop.f32.mrb[2].mxu0  ;;  %7940 = vmatpush1.bf16.msra.mxu1 %v7475_v21  ;;  %v7000_v39 = vpop.f32.mrb[139].mxu1 }
 0x925   : > { %v7477_v34 = vpack.c.bf16 %v12890_v37, %v12889_v22  ;;  %v7348_v28 = vpop.f32.mrb[3].mxu0  ;;  %7941 = vmatprep.subr.bf16.mxu1 %v18306_v50 }
 0x926   : > { %v17029_v1 = vadd.f32 %v7192_v29, %v16681_v15  ;;  %v7476_v25 = vpack.c.bf16 %v7348_v28, %v7345_v24 }
 0x928   : > { %7942 = vmatpush1.bf16.msra.mxu1 %v7476_v25 }
 0x929   : > { %v7003_v54 = vpop.f32.mrb[140].mxu1  ;;  %7943 = vmatprep.subr.bf16.mxu1 %v18306_v50 }
 0x92a   : > { %v7197_v11 = vadd.f32 %v16965_v56, %v7003_v54  ;;  %v7005_v26 = vpop.f32.mrb[141].mxu1  ;;  %v12893_v36 = vpop.f32.mrb[4].mxu0 }
 0x92b   : > { %v7006_v14 = vpop.f32.mrb[142].mxu1  ;;  %v7361_v20 = vpop.f32.mrb[5].mxu0 }
 0x92c   : > { %v17034_v41 = vadd.f32 %v7197_v11, %v16697_v38  ;;  %v7200_v21 = vadd.f32 %v16972_v31, %v7006_v14  ;;  %v12894_v13 = vpop.f32.mrb[6].mxu0  ;;  %7944 = vmatpush1.bf16.msra.mxu1 %v7477_v34  ;;  %v7008_v15 = vpop.f32.mrb[143].mxu1 }
 0x92d   : > { %v7479_v33 = vpack.c.bf16 %v12894_v13, %v12893_v36  ;;  %v7364_v57 = vpop.f32.mrb[7].mxu0  ;;  %7945 = vmatprep.subr.bf16.mxu1 %v18306_v50 }
 0x92e   : > { %v17039_v7 = vadd.f32 %v7200_v21, %v16703_v43  ;;  %v7478_v56 = vpack.c.bf16 %v7364_v57, %v7361_v20 }
 0x930   : > { %7946 = vmatpush1.bf16.msra.mxu1 %v7478_v56 }
 0x931   : > { %v7011_v48 = vpop.f32.mrb[144].mxu1  ;;  %7947 = vmatprep.subr.bf16.mxu1 %v18306_v50 }
 0x932   : > { %v7205_v38 = vadd.f32 %v16981_v45, %v7011_v48  ;;  %v7013_v22 = vpop.f32.mrb[145].mxu1  ;;  %v12897_v49 = vpop.f32.mrb[8].mxu0 }
 0x933   : > { %v7014_v31 = vpop.f32.mrb[146].mxu1  ;;  %v7377_v24 = vpop.f32.mrb[9].mxu0 }
 0x934   : > { %v17044_v29 = vadd.f32 %v7205_v38, %v16719_v6  ;;  %v7208_v37 = vadd.f32 %v16988_v10, %v7014_v31  ;;  %v12898_v39 = vpop.f32.mrb[10].mxu0  ;;  %7948 = vmatpush1.bf16.msra.mxu1 %v7479_v33  ;;  %v7016_v43 = vpop.f32.mrb[147].mxu1 }
 0x935   : > { %v7481_v34 = vpack.c.bf16 %v12898_v39, %v12897_v49  ;;  %v7380_v28 = vpop.f32.mrb[11].mxu0  ;;  %7949 = vmatprep.subr.bf16.mxu1 %v18306_v50 }
 0x936   : > { %v17049_v25 = vadd.f32 %v7208_v37, %v16725_v2  ;;  %v7480_v45 = vpack.c.bf16 %v7380_v28, %v7377_v24 }
 0x938   : > { %7950 = vmatpush1.bf16.msra.mxu1 %v7480_v45 }
 0x939   : > { %v7019_v54 = vpop.f32.mrb[148].mxu1  ;;  %7951 = vmatprep.subr.bf16.mxu1 %v18306_v50 }
 0x93a   : > { %v7213_v6 = vadd.f32 %v16979_v51, %v7019_v54  ;;  %v7021_v11 = vpop.f32.mrb[149].mxu1  ;;  %v12901_v26 = vpop.f32.mrb[12].mxu0 }
 0x93b   : > { %v7022_v10 = vpop.f32.mrb[150].mxu1  ;;  %v7393_v36 = vpop.f32.mrb[13].mxu0 }
 0x93c   : > { %v17054_v14 = vadd.f32 %v7213_v6, %v16741_v60  ;;  %v7216_v20 = vadd.f32 %v16986_v40, %v7022_v10  ;;  %v12902_v21 = vpop.f32.mrb[14].mxu0  ;;  %7952 = vmatpush1.bf16.msra.mxu1 %v7481_v34  ;;  %v7024_v2 = vpop.f32.mrb[151].mxu1 }
 0x93d   : > { %v7483_v13 = vpack.c.bf16 %v12902_v21, %v12901_v26  ;;  %v7396_v15 = vpop.f32.mrb[15].mxu0  ;;  %7953 = vmatprep.subr.bf16.mxu1 %v18306_v50  ;;  %v13755_v2 = vld [vmem:[%s18032_s3 + $0x5bc] ss:$12 sps:$4 sm:$0xff]  }
 0x93e   : > { %v17059_v33 = vadd.f32 %v7216_v20, %v16747_v0  ;;  %v7482_v51 = vpack.c.bf16 %v7396_v15, %v7393_v36 }
 0x940   : > { %7954 = vmatpush1.bf16.msra.mxu1 %v7482_v51 }
 0x941   : > { %v7027_v57 = vpop.f32.mrb[152].mxu1  ;;  %7955 = vmatprep.subr.bf16.mxu1 %v18306_v50 }
 0x942   : > { %v7221_v60 = vadd.f32 %v16995_v3, %v7027_v57  ;;  %v7029_v56 = vpop.f32.mrb[153].mxu1  ;;  %v12905_v48 = vpop.f32.mrb[16].mxu0 }
 0x943   : > { %v7030_v40 = vpop.f32.mrb[154].mxu1  ;;  %v7409_v38 = vpop.f32.mrb[17].mxu0 }
 0x944   : > { %v17064_v22 = vadd.f32 %v7221_v60, %v16763_v8  ;;  %v7224_v49 = vadd.f32 %v17002_v58, %v7030_v40  ;;  %v12906_v31 = vpop.f32.mrb[18].mxu0  ;;  %7956 = vmatpush1.bf16.msra.mxu1 %v7483_v13  ;;  %v7032_v0 = vpop.f32.mrb[155].mxu1  ;;  %v13753_v60 = vld [vmem:[%s18032_s3 + $0x5b8] ss:$12 sps:$4 sm:$0xff]   ;;  %v18449_v40 = vld [vmem:[#allocation3_spill] sm:$0xff] }
 0x945   : > { %v7485_v24 = vpack.c.bf16 %v12906_v31, %v12905_v48  ;;  %v7412_v37 = vpop.f32.mrb[19].mxu0  ;;  %7957 = vmatprep.subr.bf16.mxu1 %v18306_v50  ;;  %v13758_v48 = vld [vmem:[%s18032_s3 + $0x5d4] ss:$12 sps:$4 sm:$0xff]  }
 0x946   : > { %v17069_v39 = vadd.f32 %v7224_v49, %v16769_v16  ;;  %v7484_v3 = vpack.c.bf16 %v7412_v37, %v7409_v38  ;;  %v8359_v38 = vadd.s32 2, %v18449_v40  ;;  %v18451_v37 = vld [vmem:[#allocation4_spill] sm:$0xff] }
 0x947   : > { %v13788_v40 = vld [vmem:[%s18032_s3 + $0x664] ss:$12 sps:$4 sm:$0xff]  }
 0x948   : > { %7958 = vmatpush1.bf16.msra.mxu1 %v7484_v3  ;;  %vm8361_vm12 = vcmp.eq.s32.totalorder %v18451_v37, %v8359_v38  ;;  %v13756_v3 = vld [vmem:[%s18032_s3 + $0x5d0] ss:$12 sps:$4 sm:$0xff]   ;;  %vm8364_vm11 = vcmp.eq.s32.totalorder %v18388_v42, %v8359_v38  ;;  %v13791_v37 = vld [vmem:[%s18032_s3 + $0x678] ss:$12 sps:$4 sm:$0xff]  }
 0x949   : > { %v7035_v43 = vpop.f32.mrb[156].mxu1  ;;  %7959 = vmatprep.subr.bf16.mxu1 %v18306_v50 }
 0x94a   : > { %v7229_v8 = vadd.f32 %v16993_v46, %v7035_v43  ;;  %v7037_v34 = vpop.f32.mrb[157].mxu1  ;;  %v12909_v28 = vpop.f32.mrb[20].mxu0  ;;  %v13760_v43 = vld [vmem:[%s18032_s3 + $0x5c0] ss:$12 sps:$4 sm:$0xff]  }
 0x94b   : > { %v7038_v58 = vpop.f32.mrb[158].mxu1  ;;  %v7425_v45 = vpop.f32.mrb[21].mxu0  ;;  %v18452_v34 = vld [vmem:[#allocation5_spill] sm:$0xff] }
 0x94c   : > { %v17074_v54 = vadd.f32 %v7229_v8, %v16785_v47  ;;  %v7232_v6 = vadd.f32 %v17000_v53, %v7038_v58  ;;  %v12910_v11 = vpop.f32.mrb[22].mxu0  ;;  %7960 = vmatpush1.bf16.msra.mxu1 %v7485_v24  ;;  %v7040_v16 = vpop.f32.mrb[159].mxu1  ;;  %v13750_v47 = vld [vmem:[%s18032_s3 + $0x5a0] ss:$12 sps:$4 sm:$0xff]   ;;  %vm8362_vm8 = vcmp.eq.s32.totalorder %v18452_v34, %v8359_v38  ;;  %v13764_v58 = vld [vmem:[%s18032_s3 + $0x5d8] ss:$12 sps:$4 sm:$0xff]  }
 0x94d   : > { %v7487_v26 = vpack.c.bf16 %v12910_v11, %v12909_v28  ;;  %v7428_v10 = vpop.f32.mrb[23].mxu0  ;;  %7961 = vmatprep.subr.bf16.mxu1 %v18306_v50  ;;  %v18450_v24 = vld [vmem:[#allocation2_spill] sm:$0xff]  ;;  %v13763_v8 = vld [vmem:[%s18032_s3 + $0x5ec] ss:$12 sps:$4 sm:$0xff]   ;;  %v13761_v11 = vld [vmem:[%s18032_s3 + $0x5e8] ss:$12 sps:$4 sm:$0xff]  }
 0x94e   : > { %v17079_v36 = vadd.f32 %v7232_v6, %v16791_v35  ;;  %v7486_v46 = vpack.c.bf16 %v7428_v10, %v7425_v45  ;;  %vm8360_vm10 = vcmp.eq.s32.totalorder %v18450_v24, %v8359_v38  ;;  %v18453_v28 = vld [vmem:[#allocation6_spill] sm:$0xff]  ;;  %v8369_v45 = vsel %vm8364_vm11, 1.0, %v18387_v9  ;;  %v13765_v16 = vld [vmem:[%s18032_s3 + $0x5f0] ss:$12 sps:$4 sm:$0xff]  }
 0x94f   : > { %vm11332_vm13 = vmpackc.low %vm8361_vm12, %vm8360_vm10  ;;  %vm8363_vm4 = vcmp.eq.s32.totalorder %v18453_v28, %v8359_v38  ;;  %v8372_v6 = vpack.c.bf16 %v8369_v45, %v8369_v45  ;;  %v13768_v9 = vld [vmem:[%s18032_s3 + $0x604] ss:$12 sps:$4 sm:$0xff]   ;;  %v13789_v38 = vld [vmem:[%s18032_s3 + $0x6c8] ss:$12 sps:$4 sm:$0xff]  }
 0x950   : > { %7962 = vmatpush1.bf16.msra.mxu1 %v7486_v46  ;;  %vm11334_vm6 = vmpackc.low %vm8363_vm4, %vm8362_vm8  ;;  %v13766_v46 = vld [vmem:[%s18032_s3 + $0x600] ss:$12 sps:$4 sm:$0xff]   ;;  %v13794_v24 = vld [vmem:[%s18032_s3 + $0x6f8] ss:$12 sps:$4 sm:$0xff]  }
 0x951   : > { %7963 = vmatprep.subr.bf16.mxu1 %v18306_v50  ;;  %v8374_v10 = vsel %vm4103_vm2, %v8372_v6, 0  ;;  %v13796_v34 = vld [vmem:[%s18032_s3 + $0x690] ss:$12 sps:$4 sm:$0xff]   ;;  %v13800_v28 = vld [vmem:[%s18032_s3 + $0x740] ss:$12 sps:$4 sm:$0xff]  }
 0x952   : > { %v12913_v20 = vpop.f32.mrb[24].mxu0  ;;  %v13804_v45 = vld [vmem:[%s18032_s3 + $0x758] ss:$12 sps:$4 sm:$0xff]  }
 0x953   : > { %v7441_v21 = vpop.f32.mrb[25].mxu0 }
 0x954   : > { %v12914_v53 = vpop.f32.mrb[26].mxu0  ;;  %7964 = vmatpush1.bf16.msra.mxu1 %v7487_v26  ;;  %v13769_v26 = vld [vmem:[%s18032_s3 + $0x608] ss:$12 sps:$4 sm:$0xff]  }
 0x955   : > { %v7489_v13 = vpack.c.bf16 %v12914_v53, %v12913_v20  ;;  %v7444_v15 = vpop.f32.mrb[27].mxu0  ;;  %9030 = vmatprep.subr.bf16.mxu1 %v18306_v50  ;;  %v13770_v20 = vld [vmem:[%s18032_s3 + $0x620] ss:$12 sps:$4 sm:$0xff]   ;;  %v13771_v53 = vld [vmem:[%s18032_s3 + $0x618] ss:$12 sps:$4 sm:$0xff]  }
 0x956   : > { %v7488_v35 = vpack.c.bf16 %v7444_v15, %v7441_v21  ;;  %v13773_v21 = vld [vmem:[%s18032_s3 + $0x61c] ss:$12 sps:$4 sm:$0xff]  }
 0x957   : > { %7966 = vmatmul.mubr.bf16.vlgmr.msra.gmra.mrb[160].mxu1 %v13750_v47  ;;  %v13774_v47 = vld [vmem:[%s18032_s3 + $0x638] ss:$12 sps:$4 sm:$0xff]   ;;  %v13779_v15 = vld [vmem:[%s18032_s3 + $0x668] ss:$12 sps:$4 sm:$0xff]  }
 0x958   : > { %12919 = vmatprep.subr.bf16.mxu0 %v7488_v35  ;;  %7973 = vmatprep.mubr.bf16.mxu1 %v13755_v2  ;;  %v13775_v2 = vld [vmem:[%s18032_s3 + $0x650] ss:$12 sps:$4 sm:$0xff]  }
 0x959   : > { %12920 = vmatpush3.bf16.msra.mxu0 %v7488_v35  ;;  %v13776_v35 = vld [vmem:[%s18032_s3 + $0x630] ss:$12 sps:$4 sm:$0xff]  }
 0x95a   : > { %v12917_v51 = vpop.f32.mrb[28].mxu0  ;;  %12921 = vmatprep.subr.bf16.mxu0 %v7489_v13 }
 0x95b   : > { %v7457_v57 = vpop.f32.mrb[29].mxu0 }
 0x95c   : > { %v12918_v56 = vpop.f32.mrb[30].mxu0 }
 0x95d   : > { %v7491_v49 = vpack.c.bf16 %v12918_v56, %v12917_v51  ;;  %v7460_v31 = vpop.f32.mrb[31].mxu0  ;;  %12922 = vmatpush3.bf16.msra.mxu0 %v7489_v13  ;;  %v13778_v13 = vld [vmem:[%s18032_s3 + $0x634] ss:$12 sps:$4 sm:$0xff]  }
 0x95e   : > { %v7490_v0 = vpack.c.bf16 %v7460_v31, %v7457_v57  ;;  %v13780_v51 = vld [vmem:[%s18032_s3 + $0x680] ss:$12 sps:$4 sm:$0xff]   ;;  %v13781_v56 = vld [vmem:[%s18032_s3 + $0x648] ss:$12 sps:$4 sm:$0xff]  }
 0x95f   : > { %7974 = vmatmul.mubr.bf16.gmra.mrb[164].mxu1 %v13753_v60  ;;  %v13783_v57 = vld [vmem:[%s18032_s3 + $0x64c] ss:$12 sps:$4 sm:$0xff]  }
 0x960   : > { %12923 = vmatprep.subr.bf16.mxu0 %v7490_v0  ;;  %7981 = vmatprep.mubr.bf16.mxu1 %v13758_v48  ;;  %v13784_v60 = vld [vmem:[%s18032_s3 + $0x698] ss:$12 sps:$4 sm:$0xff]   ;;  %v13785_v48 = vld [vmem:[%s18032_s3 + $0x6b0] ss:$12 sps:$4 sm:$0xff]   ;;  %v13790_v31 = vld [vmem:[%s18032_s3 + $0x6e0] ss:$12 sps:$4 sm:$0xff]  }
 0x961   : > { %12924 = vmatpush3.bf16.msra.mxu0 %v7490_v0  ;;  %v13793_v0 = vld [vmem:[%s18032_s3 + $0x67c] ss:$12 sps:$4 sm:$0xff]  }
 0x962   : > { %12925 = vmatprep.subr.bf16.mxu0 %v7491_v49 }
 0x965   : > { %12926 = vmatpush3.bf16.msra.mxu0 %v7491_v49  ;;  %v13786_v49 = vld [vmem:[%s18032_s3 + $0x660] ss:$12 sps:$4 sm:$0xff]  }
 0x966   : > { %12967 = vmatprep.subr.msk.bf16.mxu0 %vm11332_vm13, %v18385_v23 }
 0x967   : > { %7982 = vmatmul.mubr.bf16.gmra.mrb[168].mxu1 %v13756_v3  ;;  %v13795_v3 = vld [vmem:[%s18032_s3 + $0x710] ss:$12 sps:$4 sm:$0xff]  }
 0x968   : > { %12928 = vmatmul.mubr.msk.bf16.vlgmr.msra.gmra.mrb[32].mxu0 %vm4998_vm9, %v13760_v43  ;;  %7989 = vmatprep.mubr.bf16.mxu1 %v13763_v8  ;;  %v13798_v43 = vld [vmem:[%s18032_s3 + $0x694] ss:$12 sps:$4 sm:$0xff]  }
 0x969   : > { %12931 = vmatprep.mubr.msk.bf16.mxu0 %vm4998_vm9, %v13764_v58  ;;  %12968 = vmatpush3.bf16.msk.msra.mxu0 %vm11332_vm13, %v18385_v23  ;;  %v13799_v8 = vld [vmem:[%s18032_s3 + $0x728] ss:$12 sps:$4 sm:$0xff]   ;;  %v13803_v58 = vld [vmem:[%s18032_s3 + $0x6ac] ss:$12 sps:$4 sm:$0xff]  }
 0x96a   : > { %12969 = vmatprep.subr.msk.bf16.mxu0 %vm11334_vm6, %v18385_v23 }
 0x96d   : > { %12970 = vmatpush3.bf16.msk.msra.mxu0 %vm11334_vm6, %v18385_v23 }
 0x96e   : > { %13370 = vmatprep.subr.msk.bf16.mxu0 %vm4103_vm2, %v8372_v6  ;;  %v13801_v6 = vld [vmem:[%s18032_s3 + $0x6a8] ss:$12 sps:$4 sm:$0xff]  }
 0x96f   : > { %7990 = vmatmul.mubr.bf16.gmra.mrb[172].mxu1 %v13761_v11  ;;  %v13805_v11 = vld [vmem:[%s18032_s3 + $0x770] ss:$12 sps:$4 sm:$0xff]  }
 0x970   : > { %12932 = vmatmul.mubr.msk.bf16.gmra.mrb[36].mxu0 %vm4998_vm9, %v13765_v16  ;;  %7997 = vmatprep.mubr.bf16.mxu1 %v13768_v9  ;;  %v13808_v16 = vld [vmem:[%s18032_s3 + $0x6c4] ss:$12 sps:$4 sm:$0xff]  }
 0x971   : > { %12935 = vmatprep.mubr.msk.bf16.mxu0 %vm4998_vm9, %v13769_v26  ;;  %12972 = vmatpush3.bf16.msra.mxu0 %v8374_v10  ;;  %v18454_v9 = vld [vmem:[#allocation20_spill] sm:$0xff]  ;;  %v13806_v26 = vld [vmem:[%s18032_s3 + $0x6c0] ss:$12 sps:$4 sm:$0xff]   ;;  %v13811_v10 = vld [vmem:[%s18032_s3 + $0x6dc] ss:$12 sps:$4 sm:$0xff]  }
 0x977   : > { %7998 = vmatmul.mubr.bf16.gmra.mrb[176].mxu1 %v13766_v46  ;;  %v18455_v46 = vld [vmem:[#allocation21_spill] sm:$0xff] }
 0x978   : > { %12936 = vmatmul.mubr.msk.bf16.gmra.mrb[40].mxu0 %vm4998_vm9, %v13770_v20  ;;  %8005 = vmatprep.mubr.bf16.mxu1 %v13773_v21  ;;  %v18456_v20 = vld [vmem:[#allocation22_spill] sm:$0xff] }
 0x979   : > { %12939 = vmatprep.mubr.msk.bf16.mxu0 %vm4998_vm9, %v13774_v47  ;;  %v13809_v21 = vld [vmem:[%s18032_s3 + $0x6d8] ss:$12 sps:$4 sm:$0xff]   ;;  %v13814_v47 = vld [vmem:[%s18032_s3 + $0x6f4] ss:$12 sps:$4 sm:$0xff]  }
 0x97f   : > { %8006 = vmatmul.mubr.bf16.gmra.mrb[180].mxu1 %v13771_v53  ;;  %v18457_v53 = vld [vmem:[#allocation23_spill] sm:$0xff] }
 0x980   : > { %12940 = vmatmul.mubr.msk.bf16.gmra.mrb[44].mxu0 %vm4998_vm9, %v13775_v2  ;;  %8013 = vmatprep.mubr.bf16.mxu1 %v13778_v13  ;;  %v18458_v2 = vld [vmem:[#allocation24_spill] sm:$0xff] }
 0x981   : > { %12943 = vmatprep.mubr.msk.bf16.mxu0 %vm4998_vm9, %v13779_v15  ;;  %v13812_v13 = vld [vmem:[%s18032_s3 + $0x6f0] ss:$12 sps:$4 sm:$0xff]   ;;  %v13817_v15 = vld [vmem:[%s18032_s3 + $0x70c] ss:$12 sps:$4 sm:$0xff]  }
 0x987   : > { %8014 = vmatmul.mubr.bf16.gmra.mrb[184].mxu1 %v13776_v35  ;;  %v18459_v35 = vld [vmem:[#allocation25_spill] sm:$0xff] }
 0x988   : > { %12944 = vmatmul.mubr.msk.bf16.gmra.mrb[48].mxu0 %vm4998_vm9, %v13780_v51  ;;  %8021 = vmatprep.mubr.bf16.mxu1 %v13783_v57  ;;  %v18460_v51 = vld [vmem:[#allocation26_spill] sm:$0xff]  ;;  %v13815_v57 = vld [vmem:[%s18032_s3 + $0x708] ss:$12 sps:$4 sm:$0xff]  }
 0x989   : > { %12947 = vmatprep.mubr.msk.bf16.mxu0 %vm4998_vm9, %v13784_v60  ;;  %v13820_v60 = vld [vmem:[%s18032_s3 + $0x724] ss:$12 sps:$4 sm:$0xff]  }
 0x98f   : > { %8022 = vmatmul.mubr.bf16.gmra.mrb[188].mxu1 %v13781_v56  ;;  %v18461_v56 = vld [vmem:[#allocation27_spill] sm:$0xff] }
 0x990   : > { %12948 = vmatmul.mubr.msk.bf16.gmra.mrb[52].mxu0 %vm4998_vm9, %v13785_v48  ;;  %8029 = vmatprep.mubr.bf16.mxu1 %v13788_v40  ;;  %v18462_v48 = vld [vmem:[#allocation28_spill] sm:$0xff]  ;;  %v13818_v40 = vld [vmem:[%s18032_s3 + $0x720] ss:$12 sps:$4 sm:$0xff]  }
 0x991   : > { %12951 = vmatprep.mubr.msk.bf16.mxu0 %vm4998_vm9, %v13789_v38  ;;  %v13823_v38 = vld [vmem:[%s18032_s3 + $0x73c] ss:$12 sps:$4 sm:$0xff]  }
 0x997   : > { %8030 = vmatmul.mubr.bf16.gmra.mrb[192].mxu1 %v13786_v49  ;;  %v18463_v49 = vld [vmem:[#allocation11_spill] sm:$0xff] }
 0x998   : > { %12952 = vmatmul.mubr.msk.bf16.gmra.mrb[56].mxu0 %vm4998_vm9, %v13790_v31  ;;  %8037 = vmatprep.mubr.bf16.mxu1 %v13793_v0  ;;  %v18464_v31 = vld [vmem:[#allocation10_spill] sm:$0xff] }
 0x999   : > { %12955 = vmatprep.mubr.msk.bf16.mxu0 %vm4998_vm9, %v13794_v24  ;;  %v13821_v0 = vld [vmem:[%s18032_s3 + $0x738] ss:$12 sps:$4 sm:$0xff]   ;;  %v13826_v24 = vld [vmem:[%s18032_s3 + $0x754] ss:$12 sps:$4 sm:$0xff]  }
 0x99f   : > { %8038 = vmatmul.mubr.bf16.gmra.mrb[196].mxu1 %v13791_v37  ;;  %v18465_v37 = vld [vmem:[#allocation12_spill] sm:$0xff] }
 0x9a0   : > { %12956 = vmatmul.mubr.msk.bf16.gmra.mrb[60].mxu0 %vm4998_vm9, %v13795_v3  ;;  %8045 = vmatprep.mubr.bf16.mxu1 %v13798_v43  ;;  %v18466_v3 = vld [vmem:[#allocation31_spill] sm:$0xff]  ;;  %v13824_v43 = vld [vmem:[%s18032_s3 + $0x750] ss:$12 sps:$4 sm:$0xff]  }
 0x9a1   : > { %12959 = vmatprep.mubr.msk.bf16.mxu0 %vm4998_vm9, %v13799_v8  ;;  %v13829_v8 = vld [vmem:[%s18032_s3 + $0x76c] ss:$12 sps:$4 sm:$0xff]  }
 0x9a7   : > { %8046 = vmatmul.mubr.bf16.gmra.mrb[200].mxu1 %v13796_v34  ;;  %v18467_v34 = vld [vmem:[#allocation32_spill] sm:$0xff] }
 0x9a8   : > { %12960 = vmatmul.mubr.msk.bf16.gmra.mrb[64].mxu0 %vm4998_vm9, %v13800_v28  ;;  %8053 = vmatprep.mubr.bf16.mxu1 %v13803_v58  ;;  %v18468_v28 = vld [vmem:[#allocation33_spill] sm:$0xff]  ;;  %v13827_v58 = vld [vmem:[%s18032_s3 + $0x768] ss:$12 sps:$4 sm:$0xff]  }
 0x9a9   : > { %12963 = vmatprep.mubr.msk.bf16.mxu0 %vm4998_vm9, %v13804_v45  ;;  %v18469_v45 = vld [vmem:[#allocation34_spill] sm:$0xff] }
 0x9af   : > { %8054 = vmatmul.mubr.bf16.gmra.mrb[204].mxu1 %v13801_v6  ;;  %v18470_v6 = vld [vmem:[#allocation35_spill] sm:$0xff] }
 0x9b0   : > { %12964 = vmatmul.mubr.msk.bf16.gmra.mrb[68].mxu0 %vm4998_vm9, %v13805_v11  ;;  %8061 = vmatprep.mubr.bf16.mxu1 %v13808_v16  ;;  %v18471_v11 = vld [vmem:[#allocation36_spill] sm:$0xff]  ;;  %v18472_v16 = vld [vmem:[#allocation37_spill] sm:$0xff] }
 0x9b1   : > { %12973 = vmatprep.mubr.msk.bf16.mxu0 %vm4042_vm3, %v18454_v9  ;;  %v18473_v9 = vld [vmem:[#allocation38_spill] sm:$0xff] }
 0x9b7   : > { %8062 = vmatmul.mubr.bf16.gmra.mrb[208].mxu1 %v13806_v26 }
 0x9b8   : > { %12974 = vmatmul.mubr.msk.bf16.vlgmr.msra.gmra.mrb[72].mxu0 %vm4042_vm3, %v18455_v46  ;;  %8069 = vmatprep.mubr.bf16.mxu1 %v13811_v10 }
 0x9b9   : > { %12977 = vmatprep.mubr.msk.bf16.mxu0 %vm4042_vm3, %v18456_v20 }
 0x9bf   : > { %8070 = vmatmul.mubr.bf16.gmra.mrb[212].mxu1 %v13809_v21 }
 0x9c0   : > { %12978 = vmatmul.mubr.msk.bf16.gmra.mrb[76].mxu0 %vm4042_vm3, %v18457_v53  ;;  %8077 = vmatprep.mubr.bf16.mxu1 %v13814_v47 }
 0x9c1   : > { %12981 = vmatprep.mubr.msk.bf16.mxu0 %vm4042_vm3, %v18458_v2 }
 0x9c7   : > { %8078 = vmatmul.mubr.bf16.gmra.mrb[216].mxu1 %v13812_v13 }
 0x9c8   : > { %12982 = vmatmul.mubr.msk.bf16.gmra.mrb[80].mxu0 %vm4042_vm3, %v18459_v35  ;;  %8085 = vmatprep.mubr.bf16.mxu1 %v13817_v15 }
 0x9c9   : > { %12985 = vmatprep.mubr.msk.bf16.mxu0 %vm4042_vm3, %v18460_v51 }
 0x9cf   : > { %8086 = vmatmul.mubr.bf16.gmra.mrb[220].mxu1 %v13815_v57 }
 0x9d0   : > { %12986 = vmatmul.mubr.msk.bf16.gmra.mrb[84].mxu0 %vm4042_vm3, %v18461_v56  ;;  %8093 = vmatprep.mubr.bf16.mxu1 %v13820_v60 }
 0x9d1   : > { %12989 = vmatprep.mubr.msk.bf16.mxu0 %vm4042_vm3, %v18462_v48 }
 0x9d7   : > { %8094 = vmatmul.mubr.bf16.gmra.mrb[224].mxu1 %v13818_v40 }
 0x9d8   : > { %12990 = vmatmul.mubr.msk.bf16.gmra.mrb[88].mxu0 %vm4042_vm3, %v18463_v49  ;;  %8101 = vmatprep.mubr.bf16.mxu1 %v13823_v38 }
 0x9d9   : > { %12993 = vmatprep.mubr.msk.bf16.mxu0 %vm4042_vm3, %v18464_v31 }
 0x9df   : > { %8102 = vmatmul.mubr.bf16.gmra.mrb[228].mxu1 %v13821_v0 }
 0x9e0   : > { %12994 = vmatmul.mubr.msk.bf16.gmra.mrb[92].mxu0 %vm4042_vm3, %v18465_v37  ;;  %8109 = vmatprep.mubr.bf16.mxu1 %v13826_v24 }
 0x9e1   : > { %12997 = vmatprep.mubr.msk.bf16.mxu0 %vm4042_vm3, %v18466_v3 }
 0x9e7   : > { %8110 = vmatmul.mubr.bf16.gmra.mrb[232].mxu1 %v13824_v43 }
 0x9e8   : > { %12998 = vmatmul.mubr.msk.bf16.gmra.mrb[96].mxu0 %vm4042_vm3, %v18467_v34  ;;  %8117 = vmatprep.mubr.bf16.mxu1 %v13829_v8 }
 0x9e9   : > { %13001 = vmatprep.mubr.msk.bf16.mxu0 %vm4042_vm3, %v18468_v28 }
 0x9ef   : > { %8118 = vmatmul.mubr.bf16.gmra.mrb[236].mxu1 %v13827_v58 }
 0x9f0   : > { %13002 = vmatmul.mubr.msk.bf16.gmra.mrb[100].mxu0 %vm4042_vm3, %v18469_v45 }
 0x9f1   : > { %13005 = vmatprep.mubr.msk.bf16.mxu0 %vm4042_vm3, %v18470_v6 }
 0x9f8   : > { %13006 = vmatmul.mubr.msk.bf16.gmra.mrb[104].mxu0 %vm4042_vm3, %v18471_v11 }
 0x9f9   : > { %13009 = vmatprep.mubr.msk.bf16.mxu0 %vm4042_vm3, %v18472_v16 }
 0xa00   : > { %13010 = vmatmul.mubr.msk.bf16.gmra.mrb[108].mxu0 %vm4042_vm3, %v18473_v9 }
 0xa2a   : > { %v7967_v26 = vpop.f32.mrb[160].mxu1 }
 0xa2b   : > { %v7969_v10 = vpop.f32.mrb[161].mxu1 }
 0xa2c   : > { %v7970_v46 = vpop.f32.mrb[162].mxu1 }
 0xa2d   : > { %v7972_v20 = vpop.f32.mrb[163].mxu1 }
 0xa32   : > { %v7975_v21 = vpop.f32.mrb[164].mxu1 }
 0xa33   : > { %v7977_v47 = vpop.f32.mrb[165].mxu1 }
 0xa34   : > { %v7978_v53 = vpop.f32.mrb[166].mxu1 }
 0xa35   : > { %v7980_v2 = vpop.f32.mrb[167].mxu1 }
 0xa3a   : > { %v7983_v13 = vpop.f32.mrb[168].mxu1 }
 0xa3b   : > { %v12929_v15 = vpop.f32.mrb[32].mxu0  ;;  %v7985_v35 = vpop.f32.mrb[169].mxu1 }
 0xa3c   : > { %v8169_v51 = vadd.f32 %v12929_v15, %v7975_v21  ;;  %v8160_v57 = vpop.f32.mrb[33].mxu0  ;;  %v7986_v60 = vpop.f32.mrb[170].mxu1 }
 0xa3d   : > { %v8161_v56 = vadd.f32 %v8160_v57, %v7967_v26  ;;  %v12930_v48 = vpop.f32.mrb[34].mxu0  ;;  %v7988_v40 = vpop.f32.mrb[171].mxu1 }
 0xa3e   : > { %v17330_v38 = vadd.f32 %v8169_v51, %v16905_v30  ;;  %v8172_v49 = vadd.f32 %v12930_v48, %v7978_v53  ;;  %v8163_v31 = vpop.f32.mrb[35].mxu0 }
 0xa3f   : > { %v17333_v0 = vadd.f32 %v8161_v56, %v16908_v27  ;;  %v8164_v24 = vadd.f32 %v8163_v31, %v7970_v46 }
 0xa40   : > { %v17336_v37 = vadd.f32 %v8172_v49, %v16911_v61  ;;  %v18474_v49 = vld [vmem:[#allocation49_spill] sm:$0xff] }
 0xa41   : > { %v17339_v3 = vadd.f32 %v8164_v24, %v16914_v44 }
 0xa42   : > { %v7991_v43 = vpop.f32.mrb[172].mxu1 }
 0xa43   : > { %v12933_v8 = vpop.f32.mrb[36].mxu0  ;;  %v7993_v34 = vpop.f32.mrb[173].mxu1 }
 0xa44   : > { %v8185_v28 = vadd.f32 %v12933_v8, %v7991_v43  ;;  %v8176_v58 = vpop.f32.mrb[37].mxu0  ;;  %v7994_v45 = vpop.f32.mrb[174].mxu1 }
 0xa45   : > { %v8177_v30 = vadd.f32 %v8176_v58, %v7983_v13  ;;  %v12934_v6 = vpop.f32.mrb[38].mxu0  ;;  %v7996_v11 = vpop.f32.mrb[175].mxu1 }
 0xa46   : > { %v17342_v16 = vadd.f32 %v8185_v28, %v16917_v12  ;;  %v8188_v27 = vadd.f32 %v12934_v6, %v7994_v45  ;;  %v8179_v9 = vpop.f32.mrb[39].mxu0 }
 0xa47   : > { %v17345_v61 = vadd.f32 %v8177_v30, %v16920_v32  ;;  %v8180_v26 = vadd.f32 %v8179_v9, %v7986_v60  ;;  %v13832_v32 = vld [vmem:[%s18032_s3 + $0x784] ss:$12 sps:$4 sm:$0xff]  }
 0xa48   : > { %v17348_v44 = vadd.f32 %v8188_v27, %v16923_v4  ;;  %9062 = vmatprep.mubr.bf16.mxu1 %v13832_v32  ;;  %v18476_v27 = vld [vmem:[#allocation9_spill] sm:$0xff] }
 0xa49   : > { %v17351_v10 = vadd.f32 %v8180_v26, %v16926_v17 }
 0xa4a   : > { %v7999_v46 = vpop.f32.mrb[176].mxu1 }
 0xa4b   : > { %v12937_v20 = vpop.f32.mrb[40].mxu0  ;;  %v8001_v21 = vpop.f32.mrb[177].mxu1 }
 0xa4c   : > { %v8192_v47 = vpop.f32.mrb[41].mxu0  ;;  %v8002_v53 = vpop.f32.mrb[178].mxu1 }
 0xa4d   : > { %v8193_v2 = vadd.f32 %v8192_v47, %v7999_v46  ;;  %v12938_v12 = vpop.f32.mrb[42].mxu0  ;;  %v8004_v13 = vpop.f32.mrb[179].mxu1  ;;  %v13839_v47 = vld [vmem:[%s18032_s3 + $0x788] ss:$12 sps:$4 sm:$0xff]  }
 0xa4e   : > { %v8195_v15 = vpop.f32.mrb[43].mxu0  ;;  %13021 = vmatprep.mubr.msk.bf16.mxu0 %vm4998_vm9, %v13839_v47 }
 0xa4f   : > { %v17357_v35 = vadd.f32 %v8193_v2, %v16932_v59  ;;  %v8196_v4 = vadd.f32 %v8195_v15, %v8002_v53  ;;  %v18475_v59 = vld [vmem:[#allocation8_spill] sm:$0xff] }
 0xa50   : > { %v18478_v53 = vld [vmem:[#allocation52_spill] sm:$0xff] }
 0xa51   : > { %v17360_v17 = vadd.f32 %v8196_v4, %v16935_v52 }
 0xa52   : > { %v8007_v51 = vpop.f32.mrb[180].mxu1 }
 0xa53   : > { %v8201_v57 = vadd.f32 %v12937_v20, %v8007_v51  ;;  %v8009_v60 = vpop.f32.mrb[181].mxu1  ;;  %v12941_v56 = vpop.f32.mrb[44].mxu0 }
 0xa54   : > { %v8010_v48 = vpop.f32.mrb[182].mxu1  ;;  %v8208_v40 = vpop.f32.mrb[45].mxu0 }
 0xa55   : > { %v17363_v31 = vadd.f32 %v8201_v57, %v18474_v49  ;;  %v8204_v24 = vadd.f32 %v12938_v12, %v8010_v48  ;;  %v8012_v43 = vpop.f32.mrb[183].mxu1  ;;  %v12942_v8 = vpop.f32.mrb[46].mxu0 }
 0xa56   : > { %v8211_v34 = vpop.f32.mrb[47].mxu0 }
 0xa57   : > { %v17366_v28 = vadd.f32 %v8204_v24, %v18475_v59  ;;  %v18481_v24 = vld [vmem:[#allocation14_spill] sm:$0xff] }
 0xa5a   : > { %v8015_v58 = vpop.f32.mrb[184].mxu1 }
 0xa5b   : > { %v8209_v45 = vadd.f32 %v8208_v40, %v8015_v58  ;;  %v8017_v52 = vpop.f32.mrb[185].mxu1  ;;  %v12945_v30 = vpop.f32.mrb[48].mxu0 }
 0xa5c   : > { %v8018_v6 = vpop.f32.mrb[186].mxu1  ;;  %v8224_v11 = vpop.f32.mrb[49].mxu0 }
 0xa5d   : > { %v17369_v9 = vadd.f32 %v8209_v45, %v18476_v27  ;;  %v8212_v26 = vadd.f32 %v8211_v34, %v8018_v6  ;;  %v8020_v46 = vpop.f32.mrb[187].mxu1  ;;  %v12946_v20 = vpop.f32.mrb[50].mxu0  ;;  %v18483_v6 = vld [vmem:[#allocation7_spill] sm:$0xff] }
 0xa5e   : > { %v8227_v21 = vpop.f32.mrb[51].mxu0 }
 0xa5f   : > { %18477 = vst [vmem:[#allocation42_spill] sm:$0xff] %v17369_v9  ;;  %v17375_v2 = vadd.f32 %v8212_v26, %v18478_v53 }
 0xa61   : > { %18479 = vst [vmem:[#allocation43_spill] sm:$0xff] %v17375_v2 }
 0xa62   : > { %v8023_v12 = vpop.f32.mrb[188].mxu1 }
 0xa63   : > { %v8217_v13 = vadd.f32 %v12941_v56, %v8023_v12  ;;  %v8025_v32 = vpop.f32.mrb[189].mxu1  ;;  %v12949_v15 = vpop.f32.mrb[52].mxu0 }
 0xa64   : > { %v8026_v4 = vpop.f32.mrb[190].mxu1  ;;  %v8240_v51 = vpop.f32.mrb[53].mxu0 }
 0xa65   : > { %v17379_v57 = vadd.f32 %v8217_v13, %v16954_v63  ;;  %v8220_v60 = vadd.f32 %v12942_v8, %v8026_v4  ;;  %v8028_v48 = vpop.f32.mrb[191].mxu1  ;;  %v12950_v40 = vpop.f32.mrb[54].mxu0  ;;  %v18485_v8 = vld [vmem:[#allocation13_spill] sm:$0xff] }
 0xa66   : > { %v8243_v49 = vpop.f32.mrb[55].mxu0  ;;  %v18487_v48 = vld [vmem:[#allocation39_spill] sm:$0xff] }
 0xa67   : > { %18480 = vst [vmem:[#allocation44_spill] sm:$0xff] %v17379_v57  ;;  %v17382_v43 = vadd.f32 %v8220_v60, %v18481_v24 }
 0xa69   : > { %18482 = vst [vmem:[#allocation56_spill] sm:$0xff] %v17382_v43  ;;  %v18495_v43 = vld [vmem:[#allocation54_spill] sm:$0xff] }
 0xa6a   : > { %v8031_v34 = vpop.f32.mrb[192].mxu1 }
 0xa6b   : > { %v8225_v59 = vadd.f32 %v8224_v11, %v8031_v34  ;;  %v8033_v58 = vpop.f32.mrb[193].mxu1  ;;  %v12953_v45 = vpop.f32.mrb[56].mxu0 }
 0xa6c   : > { %v8034_v52 = vpop.f32.mrb[194].mxu1  ;;  %v8256_v56 = vpop.f32.mrb[57].mxu0 }
 0xa6d   : > { %v17385_v27 = vadd.f32 %v8225_v59, %v18483_v6  ;;  %v8228_v26 = vadd.f32 %v8227_v21, %v8034_v52  ;;  %v8036_v46 = vpop.f32.mrb[195].mxu1  ;;  %v12954_v63 = vpop.f32.mrb[58].mxu0  ;;  %v18489_v52 = vld [vmem:[#allocation15_spill] sm:$0xff] }
 0xa6e   : > { %v8259_v47 = vpop.f32.mrb[59].mxu0 }
 0xa6f   : > { %18484 = vst [vmem:[#allocation57_spill] sm:$0xff] %v17385_v27  ;;  %v17388_v53 = vadd.f32 %v8228_v26, %v18485_v8 }
 0xa71   : > { %18486 = vst [vmem:[#allocation45_spill] sm:$0xff] %v17388_v53  ;;  %v18491_v53 = vld [vmem:[#allocation40_spill] sm:$0xff] }
 0xa72   : > { %v8039_v12 = vpop.f32.mrb[196].mxu1 }
 0xa73   : > { %v8233_v13 = vadd.f32 %v12945_v30, %v8039_v12  ;;  %v8041_v32 = vpop.f32.mrb[197].mxu1  ;;  %v17390_v4 = vpop.f32.mrb[60].mxu0 }
 0xa74   : > { %v8042_v11 = vpop.f32.mrb[198].mxu1  ;;  %v17392_v60 = vpop.f32.mrb[61].mxu0 }
 0xa75   : > { %v17395_v24 = vadd.f32 %v8233_v13, %v18487_v48  ;;  %v8236_v34 = vadd.f32 %v12946_v20, %v8042_v11  ;;  %v8044_v59 = vpop.f32.mrb[199].mxu1  ;;  %v17397_v21 = vpop.f32.mrb[62].mxu0 }
 0xa76   : > { %v17399_v58 = vpop.f32.mrb[63].mxu0 }
 0xa77   : > { %18488 = vst [vmem:[#allocation46_spill] sm:$0xff] %v17395_v24  ;;  %v17402_v6 = vadd.f32 %v8236_v34, %v18489_v52  ;;  %v18493_v24 = vld [vmem:[#allocation51_spill] sm:$0xff] }
 0xa79   : > { %18490 = vst [vmem:[#allocation60_spill] sm:$0xff] %v17402_v6 }
 0xa7a   : > { %v8047_v26 = vpop.f32.mrb[200].mxu1 }
 0xa7b   : > { %v8241_v30 = vadd.f32 %v8240_v51, %v8047_v26  ;;  %v8049_v46 = vpop.f32.mrb[201].mxu1  ;;  %v17404_v8 = vpop.f32.mrb[64].mxu0 }
 0xa7c   : > { %v8050_v12 = vpop.f32.mrb[202].mxu1  ;;  %v17406_v32 = vpop.f32.mrb[65].mxu0 }
 0xa7d   : > { %v17409_v13 = vadd.f32 %v8241_v30, %v18491_v53  ;;  %v8244_v20 = vadd.f32 %v8243_v49, %v8050_v12  ;;  %v8052_v11 = vpop.f32.mrb[203].mxu1  ;;  %v17411_v48 = vpop.f32.mrb[66].mxu0 }
 0xa7e   : > { %v17413_v59 = vpop.f32.mrb[67].mxu0 }
 0xa7f   : > { %18492 = vst [vmem:[#allocation47_spill] sm:$0xff] %v17409_v13  ;;  %v17416_v34 = vadd.f32 %v8244_v20, %v18493_v24  ;;  %v18497_v13 = vld [vmem:[#allocation41_spill] sm:$0xff] }
 0xa81   : > { %18494 = vst [vmem:[#allocation48_spill] sm:$0xff] %v17416_v34 }
 0xa82   : > { %v8055_v52 = vpop.f32.mrb[204].mxu1 }
 0xa83   : > { %v8249_v51 = vadd.f32 %v12949_v15, %v8055_v52  ;;  %v8057_v26 = vpop.f32.mrb[205].mxu1  ;;  %v17418_v46 = vpop.f32.mrb[68].mxu0 }
 0xa84   : > { %v8058_v6 = vpop.f32.mrb[206].mxu1  ;;  %v17420_v27 = vpop.f32.mrb[69].mxu0 }
 0xa85   : > { %v17423_v53 = vadd.f32 %v8249_v51, %v18495_v43  ;;  %v8252_v49 = vadd.f32 %v12950_v40, %v8058_v6  ;;  %v8060_v30 = vpop.f32.mrb[207].mxu1  ;;  %v17425_v12 = vpop.f32.mrb[70].mxu0 }
 0xa86   : > { %v17427_v11 = vpop.f32.mrb[71].mxu0 }
 0xa87   : > { %18496 = vst [vmem:[#allocation59_spill] sm:$0xff] %v17423_v53  ;;  %v17430_v24 = vadd.f32 %v8252_v49, %v18497_v13 }
 0xa89   : > { %18498 = vst [vmem:[#allocation50_spill] sm:$0xff] %v17430_v24 }
 0xa8a   : > { %v8063_v20 = vpop.f32.mrb[208].mxu1 }
 0xa8b   : > { %v8257_v15 = vadd.f32 %v8256_v56, %v8063_v20  ;;  %v8065_v52 = vpop.f32.mrb[209].mxu1  ;;  %v12975_v26 = vpop.f32.mrb[72].mxu0 }
 0xa8c   : > { %v8066_v34 = vpop.f32.mrb[210].mxu1  ;;  %v8410_v57 = vpop.f32.mrb[73].mxu0 }
 0xa8d   : > { %v17433_v2 = vadd.f32 %v8257_v15, %v17008_v5  ;;  %v8260_v43 = vadd.f32 %v8259_v47, %v8066_v34  ;;  %v12976_v51 = vpop.f32.mrb[74].mxu0  ;;  %v8068_v40 = vpop.f32.mrb[211].mxu1 }
 0xa8e   : > { %v8570_v6 = vpack.c.bf16 %v12976_v51, %v12975_v26  ;;  %v8413_v30 = vpop.f32.mrb[75].mxu0 }
 0xa8f   : > { %v17436_v53 = vadd.f32 %v8260_v43, %v17011_v55  ;;  %v8569_v9 = vpack.c.bf16 %v8413_v30, %v8410_v57 }
 0xa91   : > { %9031 = vmatpush1.bf16.msra.mxu1 %v8569_v9 }
 0xa92   : > { %v8071_v13 = vpop.f32.mrb[212].mxu1  ;;  %9032 = vmatprep.subr.bf16.mxu1 %v18306_v50 }
 0xa93   : > { %v8265_v56 = vadd.f32 %v12953_v45, %v8071_v13  ;;  %v8073_v49 = vpop.f32.mrb[213].mxu1  ;;  %v12979_v20 = vpop.f32.mrb[76].mxu0 }
 0xa94   : > { %v8074_v52 = vpop.f32.mrb[214].mxu1  ;;  %v8426_v24 = vpop.f32.mrb[77].mxu0 }
 0xa95   : > { %v17440_v5 = vadd.f32 %v8265_v56, %v17015_v62  ;;  %v8268_v47 = vadd.f32 %v12954_v63, %v8074_v52  ;;  %v12980_v34 = vpop.f32.mrb[78].mxu0  ;;  %9033 = vmatpush1.bf16.msra.mxu1 %v8570_v6  ;;  %v8076_v15 = vpop.f32.mrb[215].mxu1 }
 0xa96   : > { %v8572_v26 = vpack.c.bf16 %v12980_v34, %v12979_v20  ;;  %v8429_v55 = vpop.f32.mrb[79].mxu0  ;;  %9034 = vmatprep.subr.bf16.mxu1 %v18306_v50 }
 0xa97   : > { %v17444_v9 = vadd.f32 %v8268_v47, %v17019_v18  ;;  %v8571_v57 = vpack.c.bf16 %v8429_v55, %v8426_v24 }
 0xa99   : > { %9035 = vmatpush1.bf16.msra.mxu1 %v8571_v57 }
 0xa9a   : > { %v8079_v45 = vpop.f32.mrb[216].mxu1  ;;  %9036 = vmatprep.subr.bf16.mxu1 %v18306_v50 }
 0xa9b   : > { %v8273_v43 = vadd.f32 %v17392_v60, %v8079_v45  ;;  %v8081_v62 = vpop.f32.mrb[217].mxu1  ;;  %v12983_v51 = vpop.f32.mrb[80].mxu0 }
 0xa9c   : > { %v8082_v63 = vpop.f32.mrb[218].mxu1  ;;  %v8442_v40 = vpop.f32.mrb[81].mxu0 }
 0xa9d   : > { %v17449_v6 = vadd.f32 %v8273_v43, %v17024_v19  ;;  %v8276_v30 = vadd.f32 %v17399_v58, %v8082_v63  ;;  %v12984_v13 = vpop.f32.mrb[82].mxu0  ;;  %9037 = vmatpush1.bf16.msra.mxu1 %v8572_v26  ;;  %v8084_v18 = vpop.f32.mrb[219].mxu1 }
 0xa9e   : > { %v8574_v56 = vpack.c.bf16 %v12984_v13, %v12983_v51  ;;  %v8445_v24 = vpop.f32.mrb[83].mxu0  ;;  %9038 = vmatprep.subr.bf16.mxu1 %v18306_v50 }
 0xa9f   : > { %v17454_v49 = vadd.f32 %v8276_v30, %v17029_v1  ;;  %v8573_v60 = vpack.c.bf16 %v8445_v24, %v8442_v40 }
 0xaa1   : > { %9039 = vmatpush1.bf16.msra.mxu1 %v8573_v60 }
 0xaa2   : > { %v8087_v20 = vpop.f32.mrb[220].mxu1  ;;  %9040 = vmatprep.subr.bf16.mxu1 %v18306_v50 }
 0xaa3   : > { %v8281_v19 = vadd.f32 %v17390_v4, %v8087_v20  ;;  %v8089_v52 = vpop.f32.mrb[221].mxu1  ;;  %v12987_v47 = vpop.f32.mrb[84].mxu0 }
 0xaa4   : > { %v8090_v58 = vpop.f32.mrb[222].mxu1  ;;  %v8458_v34 = vpop.f32.mrb[85].mxu0 }
 0xaa5   : > { %v17459_v15 = vadd.f32 %v8281_v19, %v17034_v41  ;;  %v8284_v26 = vadd.f32 %v17397_v21, %v8090_v58  ;;  %v12988_v55 = vpop.f32.mrb[86].mxu0  ;;  %9041 = vmatpush1.bf16.msra.mxu1 %v8574_v56  ;;  %v8092_v1 = vpop.f32.mrb[223].mxu1 }
 0xaa6   : > { %v8576_v57 = vpack.c.bf16 %v12988_v55, %v12987_v47  ;;  %v8461_v45 = vpop.f32.mrb[87].mxu0  ;;  %9042 = vmatprep.subr.bf16.mxu1 %v18306_v50 }
 0xaa7   : > { %v17464_v43 = vadd.f32 %v8284_v26, %v17039_v7  ;;  %v8575_v4 = vpack.c.bf16 %v8461_v45, %v8458_v34 }
 0xaa9   : > { %9043 = vmatpush1.bf16.msra.mxu1 %v8575_v4 }
 0xaaa   : > { %v8095_v62 = vpop.f32.mrb[224].mxu1  ;;  %9044 = vmatprep.subr.bf16.mxu1 %v18306_v50 }
 0xaab   : > { %v8289_v41 = vadd.f32 %v17406_v32, %v8095_v62  ;;  %v8097_v51 = vpop.f32.mrb[225].mxu1  ;;  %v12991_v63 = vpop.f32.mrb[88].mxu0 }
 0xaac   : > { %v8098_v21 = vpop.f32.mrb[226].mxu1  ;;  %v8474_v40 = vpop.f32.mrb[89].mxu0 }
 0xaad   : > { %v17469_v30 = vadd.f32 %v8289_v41, %v17044_v29  ;;  %v8292_v13 = vadd.f32 %v17413_v59, %v8098_v21  ;;  %v12992_v18 = vpop.f32.mrb[90].mxu0  ;;  %9045 = vmatpush1.bf16.msra.mxu1 %v8576_v57  ;;  %v8100_v7 = vpop.f32.mrb[227].mxu1 }
 0xaae   : > { %v8578_v56 = vpack.c.bf16 %v12992_v18, %v12991_v63  ;;  %v8477_v24 = vpop.f32.mrb[91].mxu0  ;;  %9046 = vmatprep.subr.bf16.mxu1 %v18306_v50 }
 0xaaf   : > { %v17474_v60 = vadd.f32 %v8292_v13, %v17049_v25  ;;  %v8577_v32 = vpack.c.bf16 %v8477_v24, %v8474_v40 }
 0xab1   : > { %9047 = vmatpush1.bf16.msra.mxu1 %v8577_v32 }
 0xab2   : > { %v8103_v20 = vpop.f32.mrb[228].mxu1  ;;  %9048 = vmatprep.subr.bf16.mxu1 %v18306_v50 }
 0xab3   : > { %v8297_v29 = vadd.f32 %v17404_v8, %v8103_v20  ;;  %v8105_v19 = vpop.f32.mrb[229].mxu1  ;;  %v12995_v52 = vpop.f32.mrb[92].mxu0 }
 0xab4   : > { %v8106_v59 = vpop.f32.mrb[230].mxu1  ;;  %v8490_v47 = vpop.f32.mrb[93].mxu0 }
 0xab5   : > { %v17479_v58 = vadd.f32 %v8297_v29, %v17054_v14  ;;  %v8300_v34 = vadd.f32 %v17411_v48, %v8106_v59  ;;  %v12996_v26 = vpop.f32.mrb[94].mxu0  ;;  %9049 = vmatpush1.bf16.msra.mxu1 %v8578_v56  ;;  %v8108_v25 = vpop.f32.mrb[231].mxu1 }
 0xab6   : > { %v8580_v55 = vpack.c.bf16 %v12996_v26, %v12995_v52  ;;  %v8493_v1 = vpop.f32.mrb[95].mxu0  ;;  %9050 = vmatprep.subr.bf16.mxu1 %v18306_v50  ;;  %v13835_v25 = vld [vmem:[%s18032_s3 + $0x79c] ss:$12 sps:$4 sm:$0xff]  }
 0xab7   : > { %v17484_v57 = vadd.f32 %v8300_v34, %v17059_v33  ;;  %v8579_v8 = vpack.c.bf16 %v8493_v1, %v8490_v47 }
 0xab9   : > { %9051 = vmatpush1.bf16.msra.mxu1 %v8579_v8 }
 0xaba   : > { %v8111_v45 = vpop.f32.mrb[232].mxu1  ;;  %9052 = vmatprep.subr.bf16.mxu1 %v18306_v50 }
 0xabb   : > { %v8305_v14 = vadd.f32 %v17420_v27, %v8111_v45  ;;  %v8113_v4 = vpop.f32.mrb[233].mxu1  ;;  %v12999_v62 = vpop.f32.mrb[96].mxu0  ;;  %v18504_v45 = vld [vmem:[#allocation29_spill] sm:$0xff] }
 0xabc   : > { %v8114_v48 = vpop.f32.mrb[234].mxu1  ;;  %v8506_v41 = vpop.f32.mrb[97].mxu0  ;;  %vm18505_vm1 = vnez %v18504_v45  ;;  %v13833_v4 = vld [vmem:[%s18032_s3 + $0x798] ss:$12 sps:$4 sm:$0xff]  }
 0xabd   : > { %v17489_v51 = vadd.f32 %v8305_v14, %v17064_v22  ;;  %v8308_v63 = vadd.f32 %v17427_v11, %v8114_v48  ;;  %v13000_v21 = vpop.f32.mrb[98].mxu0  ;;  %9053 = vmatpush1.bf16.msra.mxu1 %v8580_v55  ;;  %v8116_v33 = vpop.f32.mrb[235].mxu1  ;;  %v13838_v48 = vld [vmem:[%s18032_s3 + $0x7b4] ss:$12 sps:$4 sm:$0xff]  }
 0xabe   : > { %v8582_v40 = vpack.c.bf16 %v13000_v21, %v12999_v62  ;;  %v8509_v13 = vpop.f32.mrb[99].mxu0  ;;  %9054 = vmatprep.subr.bf16.mxu1 %v18306_v50  ;;  %v13836_v33 = vld [vmem:[%s18032_s3 + $0x7b0] ss:$12 sps:$4 sm:$0xff]  }
 0xabf   : > { %v17494_v18 = vadd.f32 %v8308_v63, %v17069_v39  ;;  %v8581_v27 = vpack.c.bf16 %v8509_v13, %v8506_v41  ;;  %v13843_v13 = vld [vmem:[%s18032_s3 + $0x7cc] ss:$12 sps:$4 sm:$0xff]  }
 0xac1   : > { %18499 = vst [vmem:[#allocation53_spill] sm:$0xff] %v17494_v18  ;;  %9055 = vmatpush1.bf16.msra.mxu1 %v8581_v27  ;;  %v13844_v27 = vld [vmem:[%s18032_s3 + $0x7b8] ss:$12 sps:$4 sm:$0xff]  }
 0xac2   : > { %v8119_v7 = vpop.f32.mrb[236].mxu1  ;;  %9056 = vmatprep.subr.bf16.mxu1 %v18306_v50 }
 0xac3   : > { %v8313_v22 = vadd.f32 %v17418_v46, %v8119_v7  ;;  %v8121_v56 = vpop.f32.mrb[237].mxu1  ;;  %v13003_v24 = vpop.f32.mrb[100].mxu0  ;;  %v18506_v7 = vld [vmem:[#allocation17_spill] sm:$0xff] }
 0xac4   : > { %v8122_v11 = vpop.f32.mrb[238].mxu1  ;;  %v8522_v32 = vpop.f32.mrb[101].mxu0  ;;  %vm18507_vm0 = vnez %v18506_v7  ;;  %v13841_v56 = vld [vmem:[%s18032_s3 + $0x7c8] ss:$12 sps:$4 sm:$0xff]   ;;  %v13898_v7 = vld [vmem:[%s18032_s3 + $0x920] ss:$12 sps:$4 sm:$0xff]  }
 0xac5   : > { %v17499_v20 = vadd.f32 %v8313_v22, %v17074_v54  ;;  %v8316_v29 = vadd.f32 %v17425_v12, %v8122_v11  ;;  %v13004_v19 = vpop.f32.mrb[102].mxu0  ;;  %9057 = vmatpush1.bf16.msra.mxu1 %v8582_v40  ;;  %v8124_v39 = vpop.f32.mrb[239].mxu1  ;;  %v13830_v54 = vld [vmem:[%s18032_s3 + $0x780] ss:$12 sps:$4 sm:$0xff]   ;;  %v13848_v11 = vld [vmem:[%s18032_s3 + $0x7e4] ss:$12 sps:$4 sm:$0xff]  }
 0xac6   : > { %v8584_v52 = vpack.c.bf16 %v13004_v19, %v13003_v24  ;;  %v8525_v59 = vpop.f32.mrb[103].mxu0  ;;  %9058 = vmatprep.subr.bf16.mxu1 %v18306_v50  ;;  %v13840_v40 = vld [vmem:[%s18032_s3 + $0x7a0] ss:$12 sps:$4 sm:$0xff]   ;;  %v13845_v24 = vld [vmem:[%s18032_s3 + $0x7d0] ss:$12 sps:$4 sm:$0xff]  }
 0xac7   : > { %18500 = vst [vmem:[#allocation55_spill] sm:$0xff] %v17499_v20  ;;  %v17504_v47 = vadd.f32 %v8316_v29, %v17079_v36  ;;  %v8583_v46 = vpack.c.bf16 %v8525_v59, %v8522_v32  ;;  %v18502_v36 = vld [vmem:[#allocation19_spill] sm:$0xff]  ;;  %v18508_v22 = vld [vmem:[#allocation18_spill] sm:$0xff] }
 0xac8   : > { %vm18503_vm15 = vnez %v18502_v36  ;;  %vm18509_vm2 = vnez %v18508_v22  ;;  %v13849_v32 = vld [vmem:[%s18032_s3 + $0x7e8] ss:$12 sps:$4 sm:$0xff]   ;;  %v13846_v29 = vld [vmem:[%s18032_s3 + $0x7e0] ss:$12 sps:$4 sm:$0xff]   ;;  %v13851_v59 = vld [vmem:[%s18032_s3 + $0x7f8] ss:$12 sps:$4 sm:$0xff]  }
 0xac9   : > { %18501 = vst [vmem:[#allocation58_spill] sm:$0xff] %v17504_v47  ;;  %9059 = vmatpush1.bf16.msra.mxu1 %v8583_v46  ;;  %v13850_v19 = vld [vmem:[%s18032_s3 + $0x800] ss:$12 sps:$4 sm:$0xff]   ;;  %v13853_v39 = vld [vmem:[%s18032_s3 + $0x7fc] ss:$12 sps:$4 sm:$0xff]  }
 0xaca   : > { %9060 = vmatprep.subr.bf16.mxu1 %v18306_v50  ;;  %v13857_v46 = vld [vmem:[%s18032_s3 + $0x814] ss:$12 sps:$4 sm:$0xff]   ;;  %v13902_v22 = vld [vmem:[%s18032_s3 + $0x938] ss:$12 sps:$4 sm:$0xff]   ;;  %v18526_v20 = vld [vmem:[#allocation47_spill] sm:$0xff] }
 0xacb   : > { %v13007_v34 = vpop.f32.mrb[104].mxu0 }
 0xacc   : > { %v8538_v26 = vpop.f32.mrb[105].mxu0 }
 0xacd   : > { %v13008_v12 = vpop.f32.mrb[106].mxu0  ;;  %9061 = vmatpush1.bf16.msra.mxu1 %v8584_v52  ;;  %v13854_v52 = vld [vmem:[%s18032_s3 + $0x818] ss:$12 sps:$4 sm:$0xff]  }
 0xace   : > { %v8586_v55 = vpack.c.bf16 %v13008_v12, %v13007_v34  ;;  %v8541_v1 = vpop.f32.mrb[107].mxu0  ;;  %13197 = vmatprep.subr.msk.bf16.mxu1 %vm18503_vm15, %v18385_v23  ;;  %v13858_v34 = vld [vmem:[%s18032_s3 + $0x830] ss:$12 sps:$4 sm:$0xff]   ;;  %v13861_v12 = vld [vmem:[%s18032_s3 + $0x82c] ss:$12 sps:$4 sm:$0xff]  }
 0xacf   : > { %v8585_v8 = vpack.c.bf16 %v8541_v1, %v8538_v26  ;;  %v13862_v26 = vld [vmem:[%s18032_s3 + $0x848] ss:$12 sps:$4 sm:$0xff]  }
 0xad0   : > { %9063 = vmatmul.mubr.bf16.vlgmr.msra.gmra.mrb[240].mxu1 %v13830_v54  ;;  %v13855_v54 = vld [vmem:[%s18032_s3 + $0x810] ss:$12 sps:$4 sm:$0xff]   ;;  %v13859_v1 = vld [vmem:[%s18032_s3 + $0x828] ss:$12 sps:$4 sm:$0xff]  }
 0xad1   : > { %13013 = vmatprep.subr.bf16.mxu0 %v8585_v8  ;;  %9070 = vmatprep.mubr.bf16.mxu1 %v13835_v25  ;;  %v13866_v25 = vld [vmem:[%s18032_s3 + $0x860] ss:$12 sps:$4 sm:$0xff]  }
 0xad2   : > { %13014 = vmatpush3.bf16.msra.mxu0 %v8585_v8  ;;  %13200 = vmatpush3.bf16.msk.msra.mxu1 %vm18503_vm15, %v18385_v23  ;;  %v13865_v8 = vld [vmem:[%s18032_s3 + $0x844] ss:$12 sps:$4 sm:$0xff]  }
 0xad3   : > { %v13011_v50 = vpop.f32.mrb[108].mxu0  ;;  %13015 = vmatprep.subr.bf16.mxu0 %v8586_v55  ;;  %13198 = vmatprep.subr.msk.bf16.mxu1 %vm18505_vm1, %v18385_v23 }
 0xad4   : > { %v8554_v14 = vpop.f32.mrb[109].mxu0 }
 0xad5   : > { %v13012_v62 = vpop.f32.mrb[110].mxu0 }
 0xad6   : > { %v8588_v41 = vpack.c.bf16 %v13012_v62, %v13011_v50  ;;  %v8557_v63 = vpop.f32.mrb[111].mxu0  ;;  %13016 = vmatpush3.bf16.msra.mxu0 %v8586_v55  ;;  %13201 = vmatpush3.bf16.msk.msra.mxu1 %vm18505_vm1, %v18385_v23  ;;  %v13870_v55 = vld [vmem:[%s18032_s3 + $0x878] ss:$12 sps:$4 sm:$0xff]   ;;  %v13874_v50 = vld [vmem:[%s18032_s3 + $0x890] ss:$12 sps:$4 sm:$0xff]  }
 0xad7   : > { %v8587_v21 = vpack.c.bf16 %v8557_v63, %v8554_v14  ;;  %v13878_v14 = vld [vmem:[%s18032_s3 + $0x8a8] ss:$12 sps:$4 sm:$0xff]   ;;  %v13867_v63 = vld [vmem:[%s18032_s3 + $0x858] ss:$12 sps:$4 sm:$0xff]  }
 0xad8   : > { %9071 = vmatmul.mubr.bf16.gmra.mrb[244].mxu1 %v13833_v4  ;;  %v13863_v4 = vld [vmem:[%s18032_s3 + $0x840] ss:$12 sps:$4 sm:$0xff]   ;;  %v13869_v62 = vld [vmem:[%s18032_s3 + $0x85c] ss:$12 sps:$4 sm:$0xff]  }
 0xad9   : > { %13017 = vmatprep.subr.bf16.mxu0 %v8587_v21  ;;  %9078 = vmatprep.mubr.bf16.mxu1 %v13838_v48  ;;  %v13882_v48 = vld [vmem:[%s18032_s3 + $0x8c0] ss:$12 sps:$4 sm:$0xff]  }
 0xada   : > { %13018 = vmatpush3.bf16.msra.mxu0 %v8587_v21  ;;  %v13873_v21 = vld [vmem:[%s18032_s3 + $0x874] ss:$12 sps:$4 sm:$0xff]  }
 0xadb   : > { %13019 = vmatprep.subr.bf16.mxu0 %v8588_v41 }
 0xade   : > { %13020 = vmatpush3.bf16.msra.mxu0 %v8588_v41  ;;  %v13886_v41 = vld [vmem:[%s18032_s3 + $0x8d8] ss:$12 sps:$4 sm:$0xff]  }
 0xadf   : > { %13182 = vmatprep.subr.msk.bf16.mxu0 %vm18507_vm0, %v18385_v23 }
 0xae0   : > { %9079 = vmatmul.mubr.bf16.gmra.mrb[248].mxu1 %v13836_v33  ;;  %v13890_v33 = vld [vmem:[%s18032_s3 + $0x8f0] ss:$12 sps:$4 sm:$0xff]  }
 0xae1   : > { %13022 = vmatmul.mubr.msk.bf16.vlgmr.msra.gmra.mrb[112].mxu0 %vm4998_vm9, %v13840_v40  ;;  %9086 = vmatprep.mubr.bf16.mxu1 %v13843_v13  ;;  %v13894_v40 = vld [vmem:[%s18032_s3 + $0x908] ss:$12 sps:$4 sm:$0xff]   ;;  %v13871_v13 = vld [vmem:[%s18032_s3 + $0x870] ss:$12 sps:$4 sm:$0xff]  }
 0xae2   : > { %13025 = vmatprep.mubr.msk.bf16.mxu0 %vm4998_vm9, %v13844_v27  ;;  %13184 = vmatpush3.bf16.msk.msra.mxu0 %vm18507_vm0, %v18385_v23  ;;  %v13877_v27 = vld [vmem:[%s18032_s3 + $0x88c] ss:$12 sps:$4 sm:$0xff]  }
 0xae3   : > { %13186 = vmatprep.subr.msk.bf16.mxu0 %vm18509_vm2, %v18385_v23 }
 0xae6   : > { %13188 = vmatpush3.bf16.msk.msra.mxu0 %vm18509_vm2, %v18385_v23 }
 0xae8   : > { %9087 = vmatmul.mubr.bf16.gmra.mrb[252].mxu1 %v13841_v56  ;;  %v13875_v56 = vld [vmem:[%s18032_s3 + $0x888] ss:$12 sps:$4 sm:$0xff]  }
 0xae9   : > { %13026 = vmatmul.mubr.msk.bf16.gmra.mrb[116].mxu0 %vm4998_vm9, %v13845_v24  ;;  %9094 = vmatprep.mubr.bf16.mxu1 %v13848_v11  ;;  %v13881_v24 = vld [vmem:[%s18032_s3 + $0x8a4] ss:$12 sps:$4 sm:$0xff]  }
 0xaea   : > { %13029 = vmatprep.mubr.msk.bf16.mxu0 %vm4998_vm9, %v13849_v32  ;;  %v13906_v11 = vld [vmem:[%s18032_s3 + $0x950] ss:$12 sps:$4 sm:$0xff]   ;;  %v13879_v32 = vld [vmem:[%s18032_s3 + $0x8a0] ss:$12 sps:$4 sm:$0xff]  }
 0xaf0   : > { %9095 = vmatmul.mubr.bf16.gmra.mrb[0].mxu1 %v13846_v29  ;;  %v13885_v29 = vld [vmem:[%s18032_s3 + $0x8bc] ss:$12 sps:$4 sm:$0xff]  }
 0xaf1   : > { %13030 = vmatmul.mubr.msk.bf16.gmra.mrb[120].mxu0 %vm4998_vm9, %v13850_v19  ;;  %9102 = vmatprep.mubr.bf16.mxu1 %v13853_v39  ;;  %v13883_v19 = vld [vmem:[%s18032_s3 + $0x8b8] ss:$12 sps:$4 sm:$0xff]   ;;  %v13889_v39 = vld [vmem:[%s18032_s3 + $0x8d4] ss:$12 sps:$4 sm:$0xff]  }
 0xaf2   : > { %13033 = vmatprep.mubr.msk.bf16.mxu0 %vm4998_vm9, %v13854_v52  ;;  %v13887_v52 = vld [vmem:[%s18032_s3 + $0x8d0] ss:$12 sps:$4 sm:$0xff]  }
 0xaf8   : > { %9103 = vmatmul.mubr.bf16.gmra.mrb[4].mxu1 %v13851_v59  ;;  %v13893_v59 = vld [vmem:[%s18032_s3 + $0x8ec] ss:$12 sps:$4 sm:$0xff]  }
 0xaf9   : > { %9110 = vmatprep.mubr.bf16.mxu1 %v13857_v46  ;;  %13034 = vmatmul.mubr.msk.bf16.gmra.mrb[124].mxu0 %vm4998_vm9, %v13858_v34  ;;  %v13891_v46 = vld [vmem:[%s18032_s3 + $0x8e8] ss:$12 sps:$4 sm:$0xff]   ;;  %v13897_v34 = vld [vmem:[%s18032_s3 + $0x904] ss:$12 sps:$4 sm:$0xff]  }
 0xafa   : > { %13037 = vmatprep.mubr.msk.bf16.mxu0 %vm4998_vm9, %v13862_v26  ;;  %v13895_v26 = vld [vmem:[%s18032_s3 + $0x900] ss:$12 sps:$4 sm:$0xff]  }
 0xb00   : > { %9111 = vmatmul.mubr.bf16.gmra.mrb[8].mxu1 %v13855_v54  ;;  %v13901_v54 = vld [vmem:[%s18032_s3 + $0x91c] ss:$12 sps:$4 sm:$0xff]  }
 0xb01   : > { %9118 = vmatprep.mubr.bf16.mxu1 %v13861_v12  ;;  %13038 = vmatmul.mubr.msk.bf16.gmra.mrb[128].mxu0 %vm4998_vm9, %v13866_v25  ;;  %v13899_v12 = vld [vmem:[%s18032_s3 + $0x918] ss:$12 sps:$4 sm:$0xff]   ;;  %v13905_v25 = vld [vmem:[%s18032_s3 + $0x934] ss:$12 sps:$4 sm:$0xff]  }
 0xb02   : > { %13041 = vmatprep.mubr.msk.bf16.mxu0 %vm4998_vm9, %v13870_v55  ;;  %v13903_v55 = vld [vmem:[%s18032_s3 + $0x930] ss:$12 sps:$4 sm:$0xff]  }
 0xb08   : > { %9119 = vmatmul.mubr.bf16.gmra.mrb[12].mxu1 %v13859_v1  ;;  %v13909_v1 = vld [vmem:[%s18032_s3 + $0x94c] ss:$12 sps:$4 sm:$0xff]  }
 0xb09   : > { %9126 = vmatprep.mubr.bf16.mxu1 %v13865_v8  ;;  %13042 = vmatmul.mubr.msk.bf16.gmra.mrb[132].mxu0 %vm4998_vm9, %v13874_v50  ;;  %v13907_v8 = vld [vmem:[%s18032_s3 + $0x948] ss:$12 sps:$4 sm:$0xff]   ;;  %v18135_v50 = vmov 1.0  }
 0xb0a   : > { %13045 = vmatprep.mubr.msk.bf16.mxu0 %vm4998_vm9, %v13878_v14  ;;  %v18510_v14 = vld [vmem:[#allocation16_spill] sm:$0xff] }
 0xb0b   : > { %vm18511_vm7 = vcmp.eq.s32.totalorder %v18388_v42, %v18510_v14 }
 0xb0c   : > { %13069 = vmatprep.subr.msk.mxu0 %vm18511_vm7, %v18135_v50  ;;  %vm18514_vm14 = vmmov %vm18511_vm7 }
 0xb0d   : > { %13070 = vmatpush3.msk.msra.mxu0 %vm18514_vm14, %v18135_v50 }
 0xb0e   : > { %13190 = vmatprep.subr.msk.bf16.mxu0 %vm18503_vm15, %v18385_v23 }
 0xb10   : > { %9127 = vmatmul.mubr.bf16.gmra.mrb[16].mxu1 %v13863_v4  ;;  %v18512_v4 = vld [vmem:[#allocation30_spill] sm:$0xff] }
 0xb11   : > { %9134 = vmatprep.mubr.bf16.mxu1 %v13869_v62  ;;  %13046 = vmatmul.mubr.msk.bf16.gmra.mrb[136].mxu0 %vm4998_vm9, %v13882_v48 }
 0xb12   : > { %13049 = vmatprep.mubr.msk.bf16.mxu0 %vm4998_vm9, %v13886_v41 }
 0xb18   : > { %9135 = vmatmul.mubr.bf16.gmra.mrb[20].mxu1 %v13867_v63 }
 0xb19   : > { %9142 = vmatprep.mubr.bf16.mxu1 %v13873_v21  ;;  %13050 = vmatmul.mubr.msk.bf16.gmra.mrb[140].mxu0 %vm4998_vm9, %v13890_v33 }
 0xb1a   : > { %13053 = vmatprep.mubr.msk.bf16.mxu0 %vm4998_vm9, %v13894_v40 }
 0xb20   : > { %9143 = vmatmul.mubr.bf16.gmra.mrb[24].mxu1 %v13871_v13 }
 0xb21   : > { %9150 = vmatprep.mubr.bf16.mxu1 %v13877_v27  ;;  %13054 = vmatmul.mubr.msk.bf16.gmra.mrb[144].mxu0 %vm4998_vm9, %v13898_v7 }
 0xb22   : > { %13057 = vmatprep.mubr.msk.bf16.mxu0 %vm4998_vm9, %v13902_v22 }
 0xb28   : > { %9151 = vmatmul.mubr.bf16.gmra.mrb[28].mxu1 %v13875_v56 }
 0xb29   : > { %9158 = vmatprep.mubr.bf16.mxu1 %v13881_v24  ;;  %13058 = vmatmul.mubr.msk.bf16.gmra.mrb[148].mxu0 %vm4998_vm9, %v13906_v11  ;;  %vm18513_vm9 = vnez %v18512_v4 }
 0xb2a   : > { %13199 = vmatprep.subr.msk.mxu1 %vm18513_vm9, %v18135_v50 }
 0xb2b   : > { %13202 = vmatpush3.msk.msra.mxu1 %vm18513_vm9, %v18135_v50 }
 0xb30   : > { %9159 = vmatmul.mubr.bf16.gmra.mrb[32].mxu1 %v13879_v32 }
 0xb31   : > { %9166 = vmatprep.mubr.bf16.mxu1 %v13885_v29 }
 0xb38   : > { %9167 = vmatmul.mubr.bf16.gmra.mrb[36].mxu1 %v13883_v19 }
 0xb39   : > { %9174 = vmatprep.mubr.bf16.mxu1 %v13889_v39 }
 0xb40   : > { %9175 = vmatmul.mubr.bf16.gmra.mrb[40].mxu1 %v13887_v52 }
 0xb41   : > { %9182 = vmatprep.mubr.bf16.mxu1 %v13893_v59 }
 0xb48   : > { %9183 = vmatmul.mubr.bf16.gmra.mrb[44].mxu1 %v13891_v46 }
 0xb49   : > { %9190 = vmatprep.mubr.bf16.mxu1 %v13897_v34 }
 0xb50   : > { %9191 = vmatmul.mubr.bf16.gmra.mrb[48].mxu1 %v13895_v26 }
 0xb51   : > { %9198 = vmatprep.mubr.bf16.mxu1 %v13901_v54 }
 0xb58   : > { %9199 = vmatmul.mubr.bf16.gmra.mrb[52].mxu1 %v13899_v12 }
 0xb59   : > { %9206 = vmatprep.mubr.bf16.mxu1 %v13905_v25 }
 0xb60   : > { %9207 = vmatmul.mubr.bf16.gmra.mrb[56].mxu1 %v13903_v55 }
 0xb61   : > { %9214 = vmatprep.mubr.bf16.mxu1 %v13909_v1 }
 0xb68   : > { %9215 = vmatmul.mubr.bf16.gmra.mrb[60].mxu1 %v13907_v8 }
 0xba3   : > { %v9064_v62 = vpop.f32.mrb[240].mxu1 }
 0xba4   : > { %v9066_v48 = vpop.f32.mrb[241].mxu1 }
 0xba5   : > { %v9067_v41 = vpop.f32.mrb[242].mxu1 }
 0xba6   : > { %v9069_v63 = vpop.f32.mrb[243].mxu1 }
 0xbab   : > { %v9072_v21 = vpop.f32.mrb[244].mxu1 }
 0xbac   : > { %v9074_v33 = vpop.f32.mrb[245].mxu1 }
 0xbad   : > { %v9075_v40 = vpop.f32.mrb[246].mxu1 }
 0xbae   : > { %v9077_v13 = vpop.f32.mrb[247].mxu1 }
 0xbb3   : > { %v9080_v27 = vpop.f32.mrb[248].mxu1 }
 0xbb4   : > { %v13023_v7 = vpop.f32.mrb[112].mxu0  ;;  %v9082_v42 = vpop.f32.mrb[249].mxu1 }
 0xbb5   : > { %v9266_v22 = vadd.f32 %v13023_v7, %v9072_v21  ;;  %v9257_v56 = vpop.f32.mrb[113].mxu0  ;;  %v9083_v24 = vpop.f32.mrb[250].mxu1 }
 0xbb6   : > { %v9258_v11 = vadd.f32 %v9257_v56, %v9064_v62  ;;  %v13024_v32 = vpop.f32.mrb[114].mxu0  ;;  %v9085_v29 = vpop.f32.mrb[251].mxu1 }
 0xbb7   : > { %v17742_v19 = vadd.f32 %v9266_v22, %v17330_v38  ;;  %v9269_v39 = vadd.f32 %v13024_v32, %v9075_v40  ;;  %v9260_v52 = vpop.f32.mrb[115].mxu0 }
 0xbb8   : > { %v17745_v59 = vadd.f32 %v9258_v11, %v17333_v0  ;;  %v9261_v46 = vadd.f32 %v9260_v52, %v9067_v41 }
 0xbb9   : > { %v17748_v34 = vadd.f32 %v9269_v39, %v17336_v37 }
 0xbba   : > { %v17751_v26 = vadd.f32 %v9261_v46, %v17339_v3 }
 0xbbb   : > { %v9088_v54 = vpop.f32.mrb[252].mxu1 }
 0xbbc   : > { %v13027_v12 = vpop.f32.mrb[116].mxu0  ;;  %v9090_v25 = vpop.f32.mrb[253].mxu1 }
 0xbbd   : > { %v9282_v55 = vadd.f32 %v13027_v12, %v9088_v54  ;;  %v9273_v1 = vpop.f32.mrb[117].mxu0  ;;  %v9091_v8 = vpop.f32.mrb[254].mxu1 }
 0xbbe   : > { %v9274_v38 = vadd.f32 %v9273_v1, %v9080_v27  ;;  %v13028_v14 = vpop.f32.mrb[118].mxu0  ;;  %v9093_v62 = vpop.f32.mrb[255].mxu1 }
 0xbbf   : > { %v17754_v48 = vadd.f32 %v9282_v55, %v17342_v16  ;;  %v9285_v0 = vadd.f32 %v13028_v14, %v9091_v8  ;;  %v9276_v41 = vpop.f32.mrb[119].mxu0 }
 0xbc0   : > { %v17757_v37 = vadd.f32 %v9274_v38, %v17345_v61  ;;  %v9277_v63 = vadd.f32 %v9276_v41, %v9083_v24 }
 0xbc1   : > { %v17760_v3 = vadd.f32 %v9285_v0, %v17348_v44  ;;  %v18515_v0 = vld [vmem:[#allocation42_spill] sm:$0xff] }
 0xbc2   : > { %v17763_v21 = vadd.f32 %v9277_v63, %v17351_v10 }
 0xbc3   : > { %v9096_v33 = vpop.f32.mrb[0].mxu1 }
 0xbc4   : > { %v13031_v40 = vpop.f32.mrb[120].mxu0  ;;  %v9098_v13 = vpop.f32.mrb[1].mxu1 }
 0xbc5   : > { %v9289_v27 = vpop.f32.mrb[121].mxu0  ;;  %v9099_v7 = vpop.f32.mrb[2].mxu1  ;;  %v18516_v13 = vld [vmem:[#allocation43_spill] sm:$0xff] }
 0xbc6   : > { %v9290_v42 = vadd.f32 %v9289_v27, %v9096_v33  ;;  %v13032_v16 = vpop.f32.mrb[122].mxu0  ;;  %v9101_v22 = vpop.f32.mrb[3].mxu1 }
 0xbc7   : > { %v9292_v56 = vpop.f32.mrb[123].mxu0 }
 0xbc8   : > { %v17766_v11 = vadd.f32 %v9290_v42, %v17357_v35  ;;  %v9293_v61 = vadd.f32 %v9292_v56, %v9099_v7 }
 0xbca   : > { %v17769_v24 = vadd.f32 %v9293_v61, %v17360_v17  ;;  %v18517_v61 = vld [vmem:[#allocation44_spill] sm:$0xff] }
 0xbcb   : > { %v9104_v44 = vpop.f32.mrb[4].mxu1 }
 0xbcc   : > { %v9298_v32 = vadd.f32 %v13031_v40, %v9104_v44  ;;  %v9106_v10 = vpop.f32.mrb[5].mxu1  ;;  %v13035_v29 = vpop.f32.mrb[124].mxu0 }
 0xbcd   : > { %v9107_v39 = vpop.f32.mrb[6].mxu1  ;;  %v9305_v52 = vpop.f32.mrb[125].mxu0 }
 0xbce   : > { %v17772_v46 = vadd.f32 %v9298_v32, %v17363_v31  ;;  %v9301_v54 = vadd.f32 %v13032_v16, %v9107_v39  ;;  %v9109_v12 = vpop.f32.mrb[7].mxu1  ;;  %v13036_v25 = vpop.f32.mrb[126].mxu0 }
 0xbcf   : > { %v9308_v55 = vpop.f32.mrb[127].mxu0 }
 0xbd0   : > { %v17775_v35 = vadd.f32 %v9301_v54, %v17366_v28  ;;  %v18518_v54 = vld [vmem:[#allocation56_spill] sm:$0xff] }
 0xbd3   : > { %v9112_v1 = vpop.f32.mrb[8].mxu1 }
 0xbd4   : > { %v9306_v8 = vadd.f32 %v9305_v52, %v9112_v1  ;;  %v9114_v17 = vpop.f32.mrb[9].mxu1  ;;  %v13039_v38 = vpop.f32.mrb[128].mxu0 }
 0xbd5   : > { %v9115_v14 = vpop.f32.mrb[10].mxu1  ;;  %v9321_v62 = vpop.f32.mrb[129].mxu0 }
 0xbd6   : > { %v17778_v41 = vadd.f32 %v9306_v8, %v18515_v0  ;;  %v9309_v63 = vadd.f32 %v9308_v55, %v9115_v14  ;;  %v9117_v33 = vpop.f32.mrb[11].mxu1  ;;  %v13040_v31 = vpop.f32.mrb[130].mxu0  ;;  %v18519_v0 = vld [vmem:[#allocation57_spill] sm:$0xff] }
 0xbd7   : > { %v9324_v40 = vpop.f32.mrb[131].mxu0 }
 0xbd8   : > { %v17781_v27 = vadd.f32 %v9309_v63, %v18516_v13 }
 0xbdb   : > { %v9120_v7 = vpop.f32.mrb[12].mxu1 }
 0xbdc   : > { %v9314_v42 = vadd.f32 %v13035_v29, %v9120_v7  ;;  %v9122_v28 = vpop.f32.mrb[13].mxu1  ;;  %v13043_v16 = vpop.f32.mrb[132].mxu0 }
 0xbdd   : > { %v9123_v22 = vpop.f32.mrb[14].mxu1  ;;  %v9337_v56 = vpop.f32.mrb[133].mxu0 }
 0xbde   : > { %v17784_v44 = vadd.f32 %v9314_v42, %v18517_v61  ;;  %v9317_v32 = vadd.f32 %v13036_v25, %v9123_v22  ;;  %v9125_v10 = vpop.f32.mrb[15].mxu1  ;;  %v13044_v39 = vpop.f32.mrb[134].mxu0  ;;  %v18520_v42 = vld [vmem:[#allocation45_spill] sm:$0xff] }
 0xbdf   : > { %v9340_v52 = vpop.f32.mrb[135].mxu0 }
 0xbe0   : > { %v17787_v12 = vadd.f32 %v9317_v32, %v18518_v54 }
 0xbe3   : > { %v9128_v55 = vpop.f32.mrb[16].mxu1 }
 0xbe4   : > { %v9322_v1 = vadd.f32 %v9321_v62, %v9128_v55  ;;  %v9130_v8 = vpop.f32.mrb[17].mxu1  ;;  %v17789_v17 = vpop.f32.mrb[136].mxu0  ;;  %v18522_v55 = vld [vmem:[#allocation46_spill] sm:$0xff] }
 0xbe5   : > { %v9131_v29 = vpop.f32.mrb[18].mxu1  ;;  %v9353_v14 = vpop.f32.mrb[137].mxu0 }
 0xbe6   : > { %v17792_v63 = vadd.f32 %v9322_v1, %v18519_v0  ;;  %v9325_v33 = vadd.f32 %v9324_v40, %v9131_v29  ;;  %v9133_v13 = vpop.f32.mrb[19].mxu1  ;;  %v17794_v7 = vpop.f32.mrb[138].mxu0 }
 0xbe7   : > { %v9356_v25 = vpop.f32.mrb[139].mxu0  ;;  %v18524_v13 = vld [vmem:[#allocation60_spill] sm:$0xff] }
 0xbe8   : > { %v17797_v28 = vadd.f32 %v9325_v33, %v18520_v42 }
 0xbea   : > { %18521 = vst [vmem:[#allocation63_spill] sm:$0xff] %v17797_v28 }
 0xbeb   : > { %v9136_v22 = vpop.f32.mrb[20].mxu1 }
 0xbec   : > { %v9330_v61 = vadd.f32 %v13039_v38, %v9136_v22  ;;  %v9138_v32 = vpop.f32.mrb[21].mxu1  ;;  %v17799_v62 = vpop.f32.mrb[140].mxu0 }
 0xbed   : > { %v9139_v10 = vpop.f32.mrb[22].mxu1  ;;  %v17801_v54 = vpop.f32.mrb[141].mxu0 }
 0xbee   : > { %v17804_v8 = vadd.f32 %v9330_v61, %v18522_v55  ;;  %v9333_v1 = vadd.f32 %v13040_v31, %v9139_v10  ;;  %v9141_v40 = vpop.f32.mrb[23].mxu1  ;;  %v17806_v29 = vpop.f32.mrb[142].mxu0 }
 0xbef   : > { %v17808_v0 = vpop.f32.mrb[143].mxu0 }
 0xbf0   : > { %18523 = vst [vmem:[#allocation64_spill] sm:$0xff] %v17804_v8  ;;  %v17811_v33 = vadd.f32 %v9333_v1, %v18524_v13  ;;  %v18527_v1 = vld [vmem:[#allocation48_spill] sm:$0xff] }
 0xbf2   : > { %18525 = vst [vmem:[#allocation61_spill] sm:$0xff] %v17811_v33  ;;  %v9499_v33 = vpop.permute.xlu0 %9498 }
 0xbf3   : > { %v9144_v42 = vpop.f32.mrb[24].mxu1 }
 0xbf4   : > { %v9338_v38 = vadd.f32 %v9337_v56, %v9144_v42  ;;  %v9146_v22 = vpop.f32.mrb[25].mxu1  ;;  %v17813_v32 = vpop.f32.mrb[144].mxu0 }
 0xbf5   : > { %v9147_v50 = vpop.f32.mrb[26].mxu1  ;;  %v17815_v47 = vpop.f32.mrb[145].mxu0 }
 0xbf6   : > { %v9436_v61 = vadd.f32 %v9338_v38, %v18526_v20  ;;  %v9341_v55 = vadd.f32 %v9340_v52, %v9147_v50  ;;  %v9149_v31 = vpop.f32.mrb[27].mxu1  ;;  %v17818_v10 = vpop.f32.mrb[146].mxu0 }
 0xbf7   : > { %v17820_v40 = vpop.f32.mrb[147].mxu0  ;;  %v9504_v22 = vpop.permute.xlu1 %9503 }
 0xbf8   : > { %v9456_v8 = vmax.f32 %v17745_v59, %v9436_v61  ;;  %v9437_v13 = vadd.f32 %v9341_v55, %v18527_v1  ;;  %v18528_v61 = vld [vmem:[#allocation59_spill] sm:$0xff] }
 0xbfa   : > { %v17824_v56 = vadd.f32 %v9499_v33, %v9456_v8  ;;  %v9457_v42 = vmax.f32 %v17751_v26, %v9437_v13 }
 0xbfb   : > { %v9152_v28 = vpop.f32.mrb[28].mxu1 }
 0xbfc   : > { %v17827_v18 = vadd.f32 %v9504_v22, %v9457_v42  ;;  %v9346_v20 = vadd.f32 %v13043_v16, %v9152_v28  ;;  %v9154_v50 = vpop.f32.mrb[29].mxu1  ;;  %13071 = vmatprep.mubr.msk.f32.mxu0 %vm4042_vm3, %v17824_v56  ;;  %v17831_v52 = vpop.f32.mrb[148].mxu0  ;;  %v18529_v28 = vld [vmem:[#allocation50_spill] sm:$0xff] }
 0xbfd   : > { %v9155_v38 = vpop.f32.mrb[30].mxu1  ;;  %v17833_v59 = vpop.f32.mrb[149].mxu0 }
 0xbfe   : > { %v9438_v55 = vadd.f32 %v9346_v20, %v18528_v61  ;;  %v9349_v8 = vadd.f32 %v13044_v39, %v9155_v38  ;;  %13072 = vmatmul.mubr.msk.f32.vlgmr.msra.gmra.mrb[152].mxu0 %vm4042_vm3, %v17827_v18  ;;  %v9157_v26 = vpop.f32.mrb[31].mxu1  ;;  %v17838_v33 = vpop.f32.mrb[150].mxu0  ;;  %v18530_v38 = vmov 1.0  }
 0xbff   : > { %v17840_v31 = vpop.f32.mrb[151].mxu0  ;;  %13192 = vmatpush3.bf16.msk.msra.mxu0 %vm18503_vm15, %v18385_v23  ;;  %v9509_v39 = vpop.permute.xlu0 %9508 }
 0xc00   : > { %v9458_v16 = vmax.f32 %v17742_v19, %v9438_v55  ;;  %v9439_v1 = vadd.f32 %v9349_v8, %v18529_v28  ;;  %13194 = vmatprep.subr.msk.bf16.mxu0 %vm18505_vm1, %v18385_v23  ;;  %v9514_v22 = vpop.permute.xlu1 %9513 }
 0xc02   : > { %v17850_v13 = vadd.f32 %v9509_v39, %v9458_v16  ;;  %v9459_v42 = vmax.f32 %v17748_v34, %v9439_v1 }
 0xc03   : > { %v9160_v20 = vpop.f32.mrb[32].mxu1  ;;  %13196 = vmatpush3.bf16.msk.msra.mxu0 %vm18505_vm1, %v18385_v23  ;;  %v9519_v8 = vpop.permute.xlu0 %9518 }
 0xc04   : > { %v17856_v36 = vadd.f32 %v9514_v22, %v9459_v42  ;;  %v9354_v19 = vadd.f32 %v9353_v14, %v9160_v20  ;;  %v9162_v50 = vpop.f32.mrb[33].mxu1  ;;  %13074 = vmatprep.mubr.msk.f32.mxu0 %vm4042_vm3, %v17850_v13  ;;  %13109 = vmatprep.subr.msk.mxu0 %vm18513_vm9, %v18530_v38  ;;  %v9524_v28 = vpop.permute.xlu1 %9523 }
 0xc05   : > { %v9163_v61 = vpop.f32.mrb[34].mxu1 }
 0xc06   : > { %v9440_v34 = vadd.f32 %v9354_v19, %v17433_v2  ;;  %v9357_v55 = vadd.f32 %v9356_v25, %v9163_v61  ;;  %13075 = vmatmul.mubr.msk.f32.gmra.mrb[154].mxu0 %vm4042_vm3, %v17856_v36  ;;  %v9165_v45 = vpop.f32.mrb[35].mxu1 }
 0xc07   : > { %13110 = vmatpush3.msk.msra.mxu0 %vm18513_vm9, %v18530_v38  ;;  %v9529_v20 = vpop.permute.xlu0 %9528 }
 0xc08   : > { %v9460_v23 = vmax.f32 %v17757_v37, %v9440_v34  ;;  %v9441_v14 = vadd.f32 %v9357_v55, %v17436_v53  ;;  %v9534_v50 = vpop.permute.xlu1 %9533 }
 0xc0a   : > { %v17871_v26 = vadd.f32 %v9519_v8, %v9460_v23  ;;  %v9461_v16 = vmax.f32 %v17763_v21, %v9441_v14 }
 0xc0b   : > { %v9168_v2 = vpop.f32.mrb[36].mxu1 }
 0xc0c   : > { %v17874_v25 = vadd.f32 %v9524_v28, %v9461_v16  ;;  %v9362_v1 = vadd.f32 %v17789_v17, %v9168_v2  ;;  %v9170_v39 = vpop.f32.mrb[37].mxu1  ;;  %13077 = vmatprep.mubr.msk.f32.mxu0 %vm4042_vm3, %v17871_v26  ;;  %v9544_v8 = vpop.permute.xlu1 %9543 }
 0xc0d   : > { %v9171_v4 = vpop.f32.mrb[38].mxu1 }
 0xc0e   : > { %v9442_v37 = vadd.f32 %v9362_v1, %v17440_v5  ;;  %v9365_v53 = vadd.f32 %v17794_v7, %v9171_v4  ;;  %13078 = vmatmul.mubr.msk.f32.gmra.mrb[156].mxu0 %vm4042_vm3, %v17874_v25  ;;  %v9173_v42 = vpop.f32.mrb[39].mxu1 }
 0xc10   : > { %v9462_v21 = vmax.f32 %v17754_v48, %v9442_v37  ;;  %v9443_v22 = vadd.f32 %v9365_v53, %v17444_v9  ;;  %v9554_v53 = vpop.permute.xlu1 %9553 }
 0xc12   : > { %v9602_v19 = vadd.f32 %v9529_v20, %v9462_v21  ;;  %v9463_v17 = vmax.f32 %v17760_v3, %v9443_v22 }
 0xc13   : > { %v9176_v38 = vpop.f32.mrb[40].mxu1 }
 0xc14   : > { %v9603_v61 = vadd.f32 %v9534_v50, %v9463_v17  ;;  %v9370_v34 = vadd.f32 %v17801_v54, %v9176_v38  ;;  %v9178_v5 = vpop.f32.mrb[41].mxu1  ;;  %13080 = vmatprep.mubr.msk.f32.mxu0 %vm4042_vm3, %v9602_v19  ;;  %13120 = vmatprep.mubr.msk.f32.mxu1 %vm4042_vm3, %v9602_v19  ;;  %v9539_v54 = vpop.permute.xlu0 %9538 }
 0xc15   : > { %v9179_v7 = vpop.f32.mrb[42].mxu1  ;;  %v9564_v38 = vpop.permute.xlu1 %9563 }
 0xc16   : > { %v9444_v55 = vadd.f32 %v9370_v34, %v17449_v6  ;;  %v9373_v48 = vadd.f32 %v17808_v0, %v9179_v7  ;;  %13081 = vmatmul.mubr.msk.f32.gmra.mrb[158].mxu0 %vm4042_vm3, %v9603_v61  ;;  %13121 = vmatmul.mubr.msk.f32.vlgmr.msra.gmra.mrb[64].mxu1 %vm4042_vm3, %v9603_v61  ;;  %v9181_v9 = vpop.f32.mrb[43].mxu1 }
 0xc18   : > { %v9464_v3 = vmax.f32 %v17766_v11, %v9444_v55  ;;  %v9445_v45 = vadd.f32 %v9373_v48, %v17454_v49 }
 0xc1a   : > { %v9604_v23 = vadd.f32 %v9539_v54, %v9464_v3  ;;  %v9465_v14 = vmax.f32 %v17769_v24, %v9445_v45  ;;  %v9574_v3 = vpop.permute.xlu1 %9573 }
 0xc1b   : > { %v9184_v16 = vpop.f32.mrb[44].mxu1 }
 0xc1c   : > { %v9605_v28 = vadd.f32 %v9544_v8, %v9465_v14  ;;  %v9378_v6 = vadd.f32 %v17799_v62, %v9184_v16  ;;  %v9186_v2 = vpop.f32.mrb[45].mxu1  ;;  %13083 = vmatprep.mubr.msk.f32.mxu0 %vm4042_vm3, %v9604_v23  ;;  %13123 = vmatprep.mubr.msk.f32.mxu1 %vm4042_vm3, %v9604_v23  ;;  %v9549_v62 = vpop.permute.xlu0 %9548  ;;  %v18531_v8 = vld [vmem:[#allocation53_spill] sm:$0xff] }
 0xc1d   : > { %v9187_v0 = vpop.f32.mrb[46].mxu1 }
 0xc1e   : > { %v9446_v1 = vadd.f32 %v9378_v6, %v17459_v15  ;;  %v9381_v11 = vadd.f32 %v17806_v29, %v9187_v0  ;;  %13084 = vmatmul.mubr.msk.f32.gmra.mrb[160].mxu0 %vm4042_vm3, %v9605_v28  ;;  %13124 = vmatmul.mubr.msk.f32.gmra.mrb[66].mxu1 %vm4042_vm3, %v9605_v28  ;;  %v9189_v49 = vpop.f32.mrb[47].mxu1  ;;  %v18532_v6 = vld [vmem:[#allocation63_spill] sm:$0xff]  ;;  %v9584_v0 = vpop.permute.xlu1 %9583 }
 0xc20   : > { %v9466_v24 = vmax.f32 %v17772_v46, %v9446_v1  ;;  %v9447_v39 = vadd.f32 %v9381_v11, %v17464_v43 }
 0xc22   : > { %v9606_v4 = vadd.f32 %v9549_v62, %v9466_v24  ;;  %v9467_v37 = vmax.f32 %v17775_v35, %v9447_v39  ;;  %v18533_v24 = vld [vmem:[#allocation55_spill] sm:$0xff] }
 0xc23   : > { %v9192_v42 = vpop.f32.mrb[48].mxu1 }
 0xc24   : > { %v9607_v21 = vadd.f32 %v9554_v53, %v9467_v37  ;;  %v9386_v15 = vadd.f32 %v17815_v47, %v9192_v42  ;;  %v9194_v22 = vpop.f32.mrb[49].mxu1  ;;  %13086 = vmatprep.mubr.msk.f32.mxu0 %vm4042_vm3, %v9606_v4  ;;  %13126 = vmatprep.mubr.msk.f32.mxu1 %vm4042_vm3, %v9606_v4  ;;  %v9559_v47 = vpop.permute.xlu0 %9558  ;;  %v18534_v4 = vld [vmem:[#allocation64_spill] sm:$0xff]  ;;  %v18535_v53 = vld [vmem:[#allocation58_spill] sm:$0xff] }
 0xc25   : > { %v9195_v29 = vpop.f32.mrb[50].mxu1 }
 0xc26   : > { %v9448_v20 = vadd.f32 %v9386_v15, %v17469_v30  ;;  %v9389_v46 = vadd.f32 %v17820_v40, %v9195_v29  ;;  %13087 = vmatmul.mubr.msk.f32.gmra.mrb[162].mxu0 %vm4042_vm3, %v9607_v21  ;;  %13127 = vmatmul.mubr.msk.f32.gmra.mrb[68].mxu1 %vm4042_vm3, %v9607_v21  ;;  %v9197_v43 = vpop.f32.mrb[51].mxu1  ;;  %v18536_v15 = vld [vmem:[#allocation61_spill] sm:$0xff]  ;;  %v9594_v29 = vpop.permute.xlu1 %9593 }
 0xc28   : > { %v9468_v35 = vmax.f32 %v17778_v41, %v9448_v20  ;;  %v9449_v19 = vadd.f32 %v9389_v46, %v17474_v60 }
 0xc2a   : > { %v9608_v17 = vadd.f32 %v9559_v47, %v9468_v35  ;;  %v9469_v50 = vmax.f32 %v17781_v27, %v9449_v19 }
 0xc2b   : > { %v9200_v61 = vpop.f32.mrb[52].mxu1 }
 0xc2c   : > { %v9609_v34 = vadd.f32 %v9564_v38, %v9469_v50  ;;  %v9394_v30 = vadd.f32 %v17813_v32, %v9200_v61  ;;  %v9202_v5 = vpop.f32.mrb[53].mxu1  ;;  %13089 = vmatprep.mubr.msk.f32.mxu0 %vm4042_vm3, %v9608_v17  ;;  %13129 = vmatprep.mubr.msk.f32.mxu1 %vm4042_vm3, %v9608_v17  ;;  %v9569_v32 = vpop.permute.xlu0 %9568 }
 0xc2d   : > { %v9203_v40 = vpop.f32.mrb[54].mxu1 }
 0xc2e   : > { %v9450_v7 = vadd.f32 %v9394_v30, %v17479_v58  ;;  %v9397_v41 = vadd.f32 %v17818_v10, %v9203_v40  ;;  %13090 = vmatmul.mubr.msk.f32.gmra.mrb[164].mxu0 %vm4042_vm3, %v9609_v34  ;;  %13130 = vmatmul.mubr.msk.f32.gmra.mrb[70].mxu1 %vm4042_vm3, %v9609_v34  ;;  %v9205_v60 = vpop.f32.mrb[55].mxu1 }
 0xc30   : > { %v9470_v27 = vmax.f32 %v17784_v44, %v9450_v7  ;;  %v9451_v55 = vadd.f32 %v9397_v41, %v17484_v57 }
 0xc32   : > { %v9610_v48 = vadd.f32 %v9569_v32, %v9470_v27  ;;  %v9471_v9 = vmax.f32 %v17787_v12, %v9451_v55 }
 0xc33   : > { %v9208_v45 = vpop.f32.mrb[56].mxu1 }
 0xc34   : > { %v9611_v54 = vadd.f32 %v9574_v3, %v9471_v9  ;;  %v9402_v58 = vadd.f32 %v17833_v59, %v9208_v45  ;;  %v9210_v23 = vpop.f32.mrb[57].mxu1  ;;  %13092 = vmatprep.mubr.msk.f32.mxu0 %vm4042_vm3, %v9610_v48  ;;  %13132 = vmatprep.mubr.msk.f32.mxu1 %vm4042_vm3, %v9610_v48  ;;  %v9579_v59 = vpop.permute.xlu0 %9578 }
 0xc35   : > { %v9211_v10 = vpop.f32.mrb[58].mxu1 }
 0xc36   : > { %v9452_v14 = vadd.f32 %v9402_v58, %v17489_v51  ;;  %v9405_v44 = vadd.f32 %v17840_v31, %v9211_v10  ;;  %13093 = vmatmul.mubr.msk.f32.gmra.mrb[166].mxu0 %vm4042_vm3, %v9611_v54  ;;  %13133 = vmatmul.mubr.msk.f32.gmra.mrb[72].mxu1 %vm4042_vm3, %v9611_v54  ;;  %v9213_v57 = vpop.f32.mrb[59].mxu1 }
 0xc38   : > { %v9472_v12 = vmax.f32 %v17792_v63, %v9452_v14  ;;  %v9453_v16 = vadd.f32 %v9405_v44, %v18531_v8 }
 0xc3a   : > { %v9612_v28 = vadd.f32 %v9579_v59, %v9472_v12  ;;  %v9473_v2 = vmax.f32 %v18532_v6, %v9453_v16 }
 0xc3b   : > { %v9216_v1 = vpop.f32.mrb[60].mxu1 }
 0xc3c   : > { %v9613_v11 = vadd.f32 %v9584_v0, %v9473_v2  ;;  %v9410_v51 = vadd.f32 %v17831_v52, %v9216_v1  ;;  %v9218_v49 = vpop.f32.mrb[61].mxu1  ;;  %13095 = vmatprep.mubr.msk.f32.mxu0 %vm4042_vm3, %v9612_v28  ;;  %13135 = vmatprep.mubr.msk.f32.mxu1 %vm4042_vm3, %v9612_v28  ;;  %v9589_v52 = vpop.permute.xlu0 %9588 }
 0xc3d   : > { %v9219_v31 = vpop.f32.mrb[62].mxu1 }
 0xc3e   : > { %v9454_v39 = vadd.f32 %v9410_v51, %v18533_v24  ;;  %v9413_v63 = vadd.f32 %v17838_v33, %v9219_v31  ;;  %13096 = vmatmul.mubr.msk.f32.gmra.mrb[168].mxu0 %vm4042_vm3, %v9613_v11  ;;  %13136 = vmatmul.mubr.msk.f32.gmra.mrb[74].mxu1 %vm4042_vm3, %v9613_v11  ;;  %v9221_v62 = vpop.f32.mrb[63].mxu1 }
 0xc40   : > { %v9474_v37 = vmax.f32 %v18534_v4, %v9454_v39  ;;  %v9455_v42 = vadd.f32 %v9413_v63, %v18535_v53 }
 0xc42   : > { %v9614_v21 = vadd.f32 %v9589_v52, %v9474_v37  ;;  %v9475_v22 = vmax.f32 %v18536_v15, %v9455_v42 }
 0xc44   : > { %v9615_v20 = vadd.f32 %v9594_v29, %v9475_v22  ;;  %13098 = vmatprep.mubr.msk.f32.mxu0 %vm4042_vm3, %v9614_v21  ;;  %13138 = vmatprep.mubr.msk.f32.mxu1 %vm4042_vm3, %v9614_v21 }
 0xc46   : > { %13099 = vmatmul.mubr.msk.f32.gmra.mrb[170].mxu0 %vm4042_vm3, %v9615_v20  ;;  %13139 = vmatmul.mubr.msk.f32.gmra.mrb[76].mxu1 %vm4042_vm3, %v9615_v20 }
 0xc47   : > { %13111 = vmatprep.mubr.msk.f32.mxu0 %vm4042_vm3, %v17824_v56 }
 0xc4a   : > { %13112 = vmatmul.mubr.msk.f32.vlgmr.msra.gmra.mrb[172].mxu0 %vm4042_vm3, %v17827_v18 }
 0xc4b   : > { %13114 = vmatprep.mubr.msk.f32.mxu0 %vm4042_vm3, %v17850_v13 }
 0xc4e   : > { %13115 = vmatmul.mubr.msk.f32.gmra.mrb[174].mxu0 %vm4042_vm3, %v17856_v36 }
 0xc4f   : > { %13117 = vmatprep.mubr.msk.f32.mxu0 %vm4042_vm3, %v17871_v26 }
 0xc52   : > { %13118 = vmatmul.mubr.msk.f32.gmra.mrb[176].mxu0 %vm4042_vm3, %v17874_v25  ;;  %vm10046_vm3 = vcmask 162816  }
 0xcd1   : > { %v17962_v33 = vpop.f32.mrb[152].mxu0 }
 0xcd2   : > { %v17964_v46 = vpop.f32.mrb[153].mxu0 }
 0xcd9   : > { %v17966_v56 = vpop.f32.mrb[154].mxu0 }
 0xcda   : > { %v17968_v43 = vpop.f32.mrb[155].mxu0 }
 0xce1   : > { %v17970_v18 = vpop.f32.mrb[156].mxu0 }
 0xce2   : > { %v17972_v13 = vpop.f32.mrb[157].mxu0 }
 0xce9   : > { %v13082_v36 = vpop.f32.mrb[158].mxu0  ;;  %v13122_v35 = vpop.f32.mrb[64].mxu1 }
 0xcea   : > { %v10013_v19 = vmax.f32 %v13082_v36, %v13122_v35  ;;  %v9772_v26 = vpop.f32.mrb[159].mxu0  ;;  %v9937_v47 = vpop.f32.mrb[65].mxu1 }
 0xceb   : > { %v10012_v25 = vmax.f32 %v9772_v26, %v9937_v47 }
 0xcec   : > { %v10033_v17 = vmax.f32 %v10013_v19, 0.0 }
 0xced   : > { %v10032_v50 = vmax.f32 %v10012_v25, 0.0 }
 0xcee   : > { %10054 = vst.msk [vmem:[%s17978_s21 + $0x38] sm:$0xff] %vm10046_vm3, %v10033_v17 }
 0xcef   : > { %10053 = vst.msk [vmem:[%s17978_s21 + $0x30] sm:$0xff] %vm10046_vm3, %v10032_v50 }
 0xcf1   : > { %v13085_v38 = vpop.f32.mrb[160].mxu0  ;;  %v13125_v61 = vpop.f32.mrb[66].mxu1 }
 0xcf2   : > { %v10015_v34 = vmax.f32 %v13085_v38, %v13125_v61  ;;  %v9782_v30 = vpop.f32.mrb[161].mxu0  ;;  %v9947_v5 = vpop.f32.mrb[67].mxu1 }
 0xcf3   : > { %v10014_v40 = vmax.f32 %v9782_v30, %v9947_v5 }
 0xcf4   : > { %v10035_v7 = vmax.f32 %v10015_v34, 0.0 }
 0xcf5   : > { %v10034_v41 = vmax.f32 %v10014_v40, 0.0 }
 0xcf6   : > { %10056 = vst.msk [vmem:[%s17978_s21 + $0x48] sm:$0xff] %vm10046_vm3, %v10035_v7 }
 0xcf7   : > { %10055 = vst.msk [vmem:[%s17978_s21 + $0x40] sm:$0xff] %vm10046_vm3, %v10034_v41 }
 0xcf9   : > { %v13088_v60 = vpop.f32.mrb[162].mxu0  ;;  %v13128_v27 = vpop.f32.mrb[68].mxu1 }
 0xcfa   : > { %v10017_v55 = vmax.f32 %v13088_v60, %v13128_v27  ;;  %v9792_v32 = vpop.f32.mrb[163].mxu0  ;;  %v9957_v48 = vpop.f32.mrb[69].mxu1 }
 0xcfb   : > { %v10016_v9 = vmax.f32 %v9792_v32, %v9957_v48 }
 0xcfc   : > { %v10037_v3 = vmax.f32 %v10017_v55, 0.0 }
 0xcfd   : > { %v10036_v45 = vmax.f32 %v10016_v9, 0.0 }
 0xcfe   : > { %10058 = vst.msk [vmem:[%s17978_s21 + $0x58] sm:$0xff] %vm10046_vm3, %v10037_v3 }
 0xcff   : > { %10057 = vst.msk [vmem:[%s17978_s21 + $0x50] sm:$0xff] %vm10046_vm3, %v10036_v45 }
 0xd01   : > { %v13091_v54 = vpop.f32.mrb[164].mxu0  ;;  %v13131_v58 = vpop.f32.mrb[70].mxu1 }
 0xd02   : > { %v10019_v23 = vmax.f32 %v13091_v54, %v13131_v58  ;;  %v9802_v10 = vpop.f32.mrb[165].mxu0  ;;  %v9967_v14 = vpop.f32.mrb[71].mxu1 }
 0xd03   : > { %v10018_v44 = vmax.f32 %v9802_v10, %v9967_v14 }
 0xd04   : > { %v10039_v57 = vmax.f32 %v10019_v23, 0.0 }
 0xd05   : > { %v10038_v12 = vmax.f32 %v10018_v44, 0.0 }
 0xd06   : > { %10060 = vst.msk [vmem:[%s17978_s21 + $0x68] sm:$0xff] %vm10046_vm3, %v10039_v57 }
 0xd07   : > { %10059 = vst.msk [vmem:[%s17978_s21 + $0x60] sm:$0xff] %vm10046_vm3, %v10038_v12 }
 0xd09   : > { %v13094_v8 = vpop.f32.mrb[166].mxu0  ;;  %v13134_v16 = vpop.f32.mrb[72].mxu1 }
 0xd0a   : > { %v10021_v59 = vmax.f32 %v13094_v8, %v13134_v16  ;;  %v9812_v28 = vpop.f32.mrb[167].mxu0  ;;  %v9977_v6 = vpop.f32.mrb[73].mxu1 }
 0xd0b   : > { %v10020_v2 = vmax.f32 %v9812_v28, %v9977_v6 }
 0xd0c   : > { %v10041_v0 = vmax.f32 %v10021_v59, 0.0 }
 0xd0d   : > { %v10040_v1 = vmax.f32 %v10020_v2, 0.0 }
 0xd0e   : > { %10062 = vst.msk [vmem:[%s17978_s21 + $0x78] sm:$0xff] %vm10046_vm3, %v10041_v0 }
 0xd0f   : > { %10061 = vst.msk [vmem:[%s17978_s21 + $0x70] sm:$0xff] %vm10046_vm3, %v10040_v1 }
 0xd11   : > { %v13097_v11 = vpop.f32.mrb[168].mxu0  ;;  %v13137_v51 = vpop.f32.mrb[74].mxu1 }
 0xd12   : > { %v10023_v49 = vmax.f32 %v13097_v11, %v13137_v51  ;;  %v9822_v31 = vpop.f32.mrb[169].mxu0  ;;  %v9987_v24 = vpop.f32.mrb[75].mxu1 }
 0xd13   : > { %v10022_v39 = vmax.f32 %v9822_v31, %v9987_v24 }
 0xd14   : > { %v10043_v63 = vmax.f32 %v10023_v49, 0.0 }
 0xd15   : > { %v10042_v62 = vmax.f32 %v10022_v39, 0.0 }
 0xd16   : > { %10064 = vst.msk [vmem:[%s17978_s21 + $0x88] sm:$0xff] %vm10046_vm3, %v10043_v63 }
 0xd17   : > { %10063 = vst.msk [vmem:[%s17978_s21 + $0x80] sm:$0xff] %vm10046_vm3, %v10042_v62 }
 0xd19   : > { %v13100_v4 = vpop.f32.mrb[170].mxu0  ;;  %v13140_v37 = vpop.f32.mrb[76].mxu1 }
 0xd1a   : > { %v10025_v53 = vmax.f32 %v13100_v4, %v13140_v37  ;;  %v9832_v42 = vpop.f32.mrb[171].mxu0  ;;  %v9997_v52 = vpop.f32.mrb[77].mxu1 }
 0xd1b   : > { %v10024_v21 = vmax.f32 %v9832_v42, %v9997_v52 }
 0xd1c   : > { %v10045_v15 = vmax.f32 %v10025_v53, 0.0 }
 0xd1d   : > { %v10044_v22 = vmax.f32 %v10024_v21, 0.0  ;;  %v13113_v29 = vpop.f32.mrb[172].mxu0 }
 0xd1e   : > { %10066 = vst.msk [vmem:[%s17978_s21 + $0x98] sm:$0xff] %vm10046_vm3, %v10045_v15  ;;  %v10007_v20 = vmax.f32 %v17962_v33, %v13113_v29  ;;  %v9907_v36 = vpop.f32.mrb[173].mxu0 }
 0xd1f   : > { %10065 = vst.msk [vmem:[%s17978_s21 + $0x90] sm:$0xff] %vm10046_vm3, %v10044_v22  ;;  %v10006_v35 = vmax.f32 %v17964_v46, %v9907_v36 }
 0xd20   : > { %v10027_v19 = vmax.f32 %v10007_v20, 0.0 }
 0xd21   : > { %v10026_v26 = vmax.f32 %v10006_v35, 0.0  ;;  %v13116_v47 = vpop.f32.mrb[174].mxu0 }
 0xd22   : > { %10048 = vst.msk [vmem:[%s17978_s21 + $0x8] sm:$0xff] %vm10046_vm3, %v10027_v19  ;;  %v10009_v25 = vmax.f32 %v17966_v56, %v13116_v47  ;;  %v9917_v17 = vpop.f32.mrb[175].mxu0 }
 0xd23   : > { %10047 = vst.msk [vmem:[%s17978_s21] sm:$0xff] %vm10046_vm3, %v10026_v26  ;;  %v10008_v33 = vmax.f32 %v17968_v43, %v9917_v17 }
 0xd24   : > { %v10029_v50 = vmax.f32 %v10009_v25, 0.0 }
 0xd25   : > { %v10028_v38 = vmax.f32 %v10008_v33, 0.0  ;;  %v13119_v61 = vpop.f32.mrb[176].mxu0 }
 0xd26   : > { %10050 = vst.msk [vmem:[%s17978_s21 + $0x18] sm:$0xff] %vm10046_vm3, %v10029_v50  ;;  %v10011_v46 = vmax.f32 %v17970_v18, %v13119_v61  ;;  %v9927_v34 = vpop.f32.mrb[177].mxu0 }
 0xd27   : > { %10049 = vst.msk [vmem:[%s17978_s21 + $0x10] sm:$0xff] %vm10046_vm3, %v10028_v38  ;;  %v10010_v30 = vmax.f32 %v17972_v13, %v9927_v34 }
 0xd28   : > { %v10031_v5 = vmax.f32 %v10011_v46, 0.0 }
 0xd29   : > { %v10030_v40 = vmax.f32 %v10010_v30, 0.0 }
 0xd2a   : > { %10052 = vst.msk [vmem:[%s17978_s21 + $0x28] sm:$0xff] %vm10046_vm3, %v10031_v5 }
 0xd2b   : > { %10051 = vst.msk [vmem:[%s17978_s21 + $0x20] sm:$0xff] %vm10046_vm3, %v10030_v40 }
 0xd2c PF: > { %s15_s18 = sadd.s32 1, %s13919_s18  }
 0xd2d   : > { %p12_p4 = scmp.ge.s32.totalorder %s15_s18, 4  }
 0xd2f   :  { %14 = sbr.rel (!%p12_p4) target bundleno = 1 (0x1), region = 76 }

// kernel: _lambda_.5
= control target key start
LH: loop header
LB: loop body
LE: loop exit
PB: predicated region body
PF: predicated region fallthrough
CT: control target
= control target key end

     0   :  { %7 = vsyncpa [#allocation3], 0  ;;  %s3123_s9 = smov 0   ;;  %s4349_s0 = inlined_call_operand.vmem [shape: f32[2,6], index: 0, kind: input, shape index: {}]   ;;  %s4350_s1 = inlined_call_operand.vmem [shape: f32[2,72,80], index: 1, kind: input, shape index: {}]   ;;  %s4351_s2 = inlined_call_operand.vmem [shape: f32[2,3,1600], index: 2, kind: output, shape index: {}]  }
   0x1 LB: > { %s3129_s10 = sadd.s32 4294967295, %s3102_s9   ;;  %p2708_p0 = scmp.ge.s32.totalorder %s3102_s9, 1  ;;  %s3102_s9 = sphi %s3123_s9, %s13_s9  }
   0x2   : > { %p91_p1 = scmp.lt.s32.totalorder %s3102_s9, 3  ;;  %s104_s13 = sshll.u32 %s4349_s0, 4  ;;  %s105_s13 = int_to_ptr.vmem [resolvable:$true] %s104_s13 }
   0x3   : > { %p3054_p3 = scmp.eq.s32.totalorder %s3129_s10, 0  ;;  %s3077_s15 = scalar_lea.vmem %s105_s13, 32 }
   0x4   : > { %p3136_p2 = pnand %p2708_p0, %p91_p1  ;;  %p3078_p6 = scmp.ne.s32.totalorder %s105_s13, %s3077_s15 }
   0x5   : > { %p3085_p10 = scmp.lt.s32.totalorder %s105_s13, %s105_s13  ;;  %p3086_p11 = scmp.lt.s32.totalorder %s3077_s15, %s3077_s15 }
   0x6   : > { %p3050_p4 = pneg %p3136_p2 }
   0x7   : > { %p3087_p12 = por %p3086_p11, %p3085_p10 }
   0x8   : > { %p3051_p5 = pnand %p3054_p3, %p3050_p4 }
   0xa   : > { %p3079_p7 = pneg %p3051_p5 }
   0xc   : > { %p3080_p8 = pnand %p3079_p7, %p3078_p6 }
   0xe   : > { %p3081_p9 = pneg %p3080_p8 }
  0x10   : > { %p3088_p13 = pnand %p3087_p12, %p3081_p9 }
  0x12   : > { %3091 = shalt.err (!%p3088_p13)
}
  0x13   : > { %s3104_s16 = smov [#allocation2]   ;;  %125 = sbr.rel (%p3136_p2) target bundleno = 543 (0x21f), region = 28 }
  0x14   : > { %3053 = dma.vmem_to_smem (!%p3051_p5), %s105_s13, 32, %s3104_s16, [#allocation3]  }
  0x1a   : > { %3097 = dma.done.wait (%p3054_p3), [#allocation3], 32  }
  0x1b   : > { %3099 = vsyncadd (%p3054_p3), [#allocation3], 4294967264 }
  0x1c   : > { %131 = sfence }
  0x1d   : > { %s3152_s17 = sshll.u32 %s3129_s10, 7  ;;  %v170_v0 = vlaneseq  ;;  %v4353_v1 = vmov 0.0   ;;  %p148_p0 = scmp.lt.s32.totalorder %s3129_s10, 1  ;;  %vm1288_vm0 = vcmask 654336   ;;  %vm3107_vm1 = vmmov 0  }
  0x1e   : > { %s164_s18 = sadd.s32 3, %s3152_s17  ;;  %s166_s19 = sadd.s32 4, %s3152_s17  ;;  %1380 = vmatprep.mubr.f32.mxu0 %v4353_v1  ;;  %1410 = vmatprep.mubr.f32.mxu1 %v4353_v1  ;;  %vm2579_vm2 = vcmask 1040384   ;;  %vm2593_vm3 = vcmask 1041408   ;;  %vm2275_vm4 = vcmask 523264   ;;  %vm2637_vm5 = vcmask 518144  }
  0x1f   : > { %s165_s20 = sld [smem:[#allocation2 + %s164_s18]]  ;;  %v3158_v2 = vand.u32 127, %v170_v0  ;;  %v583_v3 = vshrl.u32 %v170_v0, 7  ;;  %s168_s22 = sadd.s32 5, %s3152_s17 }
  0x20   : > { %s167_s21 = sld [smem:[#allocation2 + %s166_s19]]  ;;  %s4385_s10 = smov (!%p148_p0, %s3129_s10), 1 }
  0x21   : > { %s169_s23 = sld [smem:[#allocation2 + %s168_s22]]  ;;  %v172_v4 = vadd.s32 128, %v3158_v2  ;;  %v584_v5 = vadd.s32 8, %v583_v3  ;;  %v585_v6 = vadd.s32 16, %v583_v3  ;;  %v3162_v7 = vcvt.s32.f32 %v583_v3  ;;  %s3044_s24 = smul.u32 72, %s4385_s10 }
  0x22   : > { %v184_v8 = vcvt.s32.f32 %v3158_v2  ;;  %v586_v9 = vadd.s32 24, %v583_v3  ;;  %v587_v10 = vadd.s32 32, %v583_v3  ;;  %v588_v11 = vadd.s32 40, %v583_v3  ;;  %s160_s28 = sadd.s32 1, %s3152_s17  ;;  %s159_s29 = sld [smem:[#allocation2 + %s3152_s17]] }
  0x23   : > { %v185_v12 = vcvt.s32.f32 %v172_v4  ;;  %v3165_v13 = vcvt.s32.f32 %v584_v5  ;;  %v3167_v14 = vcvt.s32.f32 %v585_v6  ;;  %v589_v15 = vadd.s32 48, %v583_v3  ;;  %s3332_s27 = scalar_lea.vmem %s4350_s1, %s3044_s24  ;;  %s161_s30 = sld [smem:[#allocation2 + %s160_s28]] }
  0x24   : > { %v197_v16 = vadd.f32 0.5, %v184_v8  ;;  %v3169_v17 = vcvt.s32.f32 %v586_v9  ;;  %v3171_v18 = vcvt.s32.f32 %v587_v10  ;;  %v3173_v19 = vcvt.s32.f32 %v588_v11  ;;  %s162_s3 = sadd.s32 2, %s3152_s17  ;;  %s3045_s5 = smul.u32 52, %s4385_s10 }
  0x25   : > { %v198_v20 = vadd.f32 0.5, %v185_v12  ;;  %v3175_v21 = vstv %s165_s20  ;;  %v590_v23 = vadd.s32 56, %v583_v3  ;;  %v3179_v25 = vcvt.s32.f32 %v589_v15  ;;  %s163_s4 = sld [smem:[#allocation2 + %s162_s3]] }
  0x26   : > { %v3177_v22 = vstv %s167_s21  ;;  %v210_v24 = vmul.f32 0.05, %v197_v16  ;;  %v591_v26 = vadd.s32 64, %v583_v3  ;;  %v592_v27 = vadd.s32 72, %v583_v3  ;;  %s4016_s8 = scalar_lea.vmem %s4351_s2, %s3045_s5 }
  0x27   : > { %v211_v28 = vmul.f32 0.05, %v198_v20  ;;  %v3181_v29 = vstv %s169_s23  ;;  %v3183_v30 = vcvt.s32.f32 %v590_v23  ;;  %v174_v31 = vadd.s32 384, %v3158_v2 }
  0x28   : > { %v223_v32 = vfloor.f32 %v210_v24  ;;  %v3186_v33 = vcvt.s32.f32 %v591_v26  ;;  %v3188_v34 = vcvt.s32.f32 %v592_v27  ;;  %v176_v35 = vadd.s32 640, %v3158_v2 }
  0x29   : > { %v224_v36 = vfloor.f32 %v211_v28  ;;  %v187_v37 = vcvt.s32.f32 %v174_v31  ;;  %v173_v38 = vadd.s32 256, %v3158_v2  ;;  %v3193_v39 = vadd.s32 512, %v3158_v2 }
  0x2a   : > { %v236_v40 = vmul.f32 20.0, %v223_v32  ;;  %v315_v41 = vmul.f32 2.0, %v223_v32  ;;  %v189_v42 = vcvt.s32.f32 %v176_v35  ;;  %v3196_v43 = vadd.s32 896, %v3158_v2 }
  0x2b   : > { %v237_v44 = vmul.f32 20.0, %v224_v36  ;;  %v316_v45 = vmul.f32 2.0, %v224_v36  ;;  %v200_v46 = vadd.f32 0.5, %v187_v37  ;;  %v186_v47 = vcvt.s32.f32 %v173_v38 }
  0x2c   : > { %v249_v48 = vsub.f32 %v184_v8, %v236_v40  ;;  %v328_v49 = vadd.f32 1.0, %v315_v41  ;;  %v202_v50 = vadd.f32 0.5, %v189_v42  ;;  %v188_v51 = vcvt.s32.f32 %v3193_v39 }
  0x2d   : > { %v250_v52 = vsub.f32 %v185_v12, %v237_v44  ;;  %v329_v53 = vadd.f32 1.0, %v316_v45  ;;  %v213_v54 = vmul.f32 0.05, %v200_v46  ;;  %v199_v55 = vadd.f32 0.5, %v186_v47 }
  0x2e   : > { %v262_v56 = vmul.f32 2.0, %v249_v48  ;;  %v342_v57 = vmul.f32 0.0125, %v328_v49  ;;  %v215_v58 = vmul.f32 0.05, %v202_v50  ;;  %v201_v59 = vadd.f32 0.5, %v188_v51 }
  0x2f   : > { %v263_v60 = vmul.f32 2.0, %v250_v52  ;;  %v343_v61 = vmul.f32 0.0125, %v329_v53  ;;  %v226_v62 = vfloor.f32 %v213_v54  ;;  %v212_v63 = vmul.f32 0.05, %v199_v55 }
  0x30   : > { %v275_v0 = vadd.f32 1.0, %v262_v56  ;;  %v3201_v3 = vadd.f32 -1.0, %v342_v57  ;;  %v228_v4 = vfloor.f32 %v215_v58  ;;  %v214_v5 = vmul.f32 0.05, %v201_v59 }
  0x31   : > { %v276_v6 = vadd.f32 1.0, %v263_v60  ;;  %v3203_v8 = vadd.f32 -1.0, %v343_v61  ;;  %v239_v9 = vmul.f32 20.0, %v226_v62  ;;  %v318_v10 = vmul.f32 2.0, %v226_v62 }
  0x32   : > { %v289_v11 = vmul.f32 0.05, %v275_v0  ;;  %v438_v12 = vmul.f32 %v3201_v3, %v3177_v22  ;;  %v241_v15 = vmul.f32 20.0, %v228_v4  ;;  %v320_v16 = vmul.f32 2.0, %v228_v4 }
  0x33   : > { %v290_v20 = vmul.f32 0.05, %v276_v6  ;;  %v439_v23 = vmul.f32 %v3203_v8, %v3177_v22  ;;  %v252_v24 = vsub.f32 %v187_v37, %v239_v9  ;;  %v331_v26 = vadd.f32 1.0, %v318_v10 }
  0x34   : > { %v3209_v27 = vadd.f32 -1.0, %v289_v11  ;;  %v254_v28 = vsub.f32 %v189_v42, %v241_v15  ;;  %v333_v31 = vadd.f32 1.0, %v320_v16  ;;  %v225_v32 = vfloor.f32 %v212_v63 }
  0x35   : > { %v3211_v35 = vadd.f32 -1.0, %v290_v20  ;;  %v265_v36 = vmul.f32 2.0, %v252_v24  ;;  %v345_v38 = vmul.f32 0.0125, %v331_v26  ;;  %v227_v40 = vfloor.f32 %v214_v5 }
  0x36   : > { %v424_v41 = vmul.f32 %v3209_v27, %v3175_v21  ;;  %v267_v44 = vmul.f32 2.0, %v254_v28  ;;  %v347_v45 = vmul.f32 0.0125, %v333_v31  ;;  %v238_v46 = vmul.f32 20.0, %v225_v32 }
  0x37   : > { %v425_v37 = vmul.f32 %v3211_v35, %v3175_v21  ;;  %v278_v48 = vadd.f32 1.0, %v265_v36  ;;  %v3217_v49 = vadd.f32 -1.0, %v345_v38  ;;  %v317_v42 = vmul.f32 2.0, %v225_v32 }
  0x38   : > { %v451_v50 = vadd.f32 %v438_v12, %v424_v41  ;;  %v280_v52 = vadd.f32 1.0, %v267_v44  ;;  %v3219_v53 = vadd.f32 -1.0, %v347_v45  ;;  %v251_v54 = vsub.f32 %v186_v47, %v238_v46 }
  0x39   : > { %v452_v55 = vadd.f32 %v439_v23, %v425_v37  ;;  %v292_v56 = vmul.f32 0.05, %v278_v48  ;;  %v441_v57 = vmul.f32 %v3217_v49, %v3177_v22  ;;  %v330_v58 = vadd.f32 1.0, %v317_v42 }
  0x3a   : > { %4364 = vst [vmem:[#allocation5_spill] sm:$0xff] %v3219_v53  ;;  %v465_v59 = vadd.f32 %v3181_v29, %v451_v50  ;;  %v294_v60 = vmul.f32 0.05, %v280_v52  ;;  %v443_v61 = vmul.f32 %v3219_v53, %v3177_v22  ;;  %v264_v62 = vmul.f32 2.0, %v251_v54 }
  0x3b   : > { %v466_v63 = vadd.f32 %v3181_v29, %v452_v55  ;;  %v3227_v0 = vadd.f32 -1.0, %v292_v56  ;;  %v344_v4 = vmul.f32 0.0125, %v330_v58  ;;  %v240_v5 = vmul.f32 20.0, %v227_v40 }
  0x3c   : > { %v530_v47 = vadd.f32 1.0, %v465_v59  ;;  %v3229_v6 = vadd.f32 -1.0, %v294_v60  ;;  %v277_v9 = vadd.f32 1.0, %v264_v62  ;;  %v319_v10 = vmul.f32 2.0, %v227_v40 }
  0x3d   : > { %v531_v11 = vadd.f32 1.0, %v466_v63  ;;  %v427_v12 = vmul.f32 %v3227_v0, %v3175_v21  ;;  %v3233_v15 = vadd.f32 -1.0, %v344_v4  ;;  %v253_v16 = vsub.f32 %v188_v51, %v240_v5 }
  0x3e   : > { %4365 = vst [vmem:[#allocation6_spill] sm:$0xff] %v3229_v6  ;;  %v543_v20 = vmul.f32 80.0, %v530_v47  ;;  %v429_v23 = vmul.f32 %v3229_v6, %v3175_v21  ;;  %v291_v24 = vmul.f32 0.05, %v277_v9  ;;  %v332_v26 = vadd.f32 1.0, %v319_v10 }
  0x3f   : > { %v544_v28 = vmul.f32 80.0, %v531_v11  ;;  %v454_v31 = vadd.f32 %v441_v57, %v427_v12  ;;  %v3241_v32 = vmul.f32 %v3233_v15, %v3177_v22  ;;  %v266_v36 = vmul.f32 2.0, %v253_v16 }
  0x40   : > { %v2755_v38 = vadd.f32 -1.0, %v543_v20  ;;  %v456_v40 = vadd.f32 %v443_v61, %v429_v23  ;;  %v3243_v41 = vadd.f32 -1.0, %v291_v24  ;;  %v346_v44 = vmul.f32 0.0125, %v332_v26 }
  0x41   : > { %v2756_v39 = vadd.f32 -1.0, %v544_v28  ;;  %v468_v51 = vadd.f32 %v3181_v29, %v454_v31  ;;  %v279_v45 = vadd.f32 1.0, %v266_v36  ;;  %v4352_v46 = vcvt.s32.f32 %v3196_v43 }
  0x42   : > { %v3247_v37 = vmul.f32 0.5, %v2755_v38  ;;  %v3250_v48 = vadd.f32 %v3181_v29, %v456_v40  ;;  %v3254_v42 = vmul.f32 %v3243_v41, %v3175_v21  ;;  %v3256_v50 = vadd.f32 -1.0, %v346_v44 }
  0x43   : > { %v3258_v52 = vmul.f32 0.5, %v2756_v39  ;;  %v3260_v54 = vadd.f32 1.0, %v468_v51  ;;  %v3262_v55 = vmul.f32 0.05, %v279_v45  ;;  %v3266_v56 = vadd.f32 0.5, %v4352_v46 }
  0x44   : > { %v603_v57 = vsub.f32 %v3162_v7, %v3247_v37  ;;  %v616_v58 = vsub.f32 %v3165_v13, %v3247_v37  ;;  %v629_v59 = vsub.f32 %v3167_v14, %v3247_v37  ;;  %v642_v60 = vsub.f32 %v3169_v17, %v3247_v37 }
  0x45   : > { %v604_v61 = vsub.f32 %v3162_v7, %v3258_v52  ;;  %v617_v62 = vsub.f32 %v3165_v13, %v3258_v52  ;;  %v630_v63 = vsub.f32 %v3167_v14, %v3258_v52  ;;  %v643_v4 = vsub.f32 %v3169_v17, %v3258_v52 }
  0x46   : > { %v733_v5 = vand.u32 2147483647, %v603_v57  ;;  %v746_v47 = vand.u32 2147483647, %v616_v58  ;;  %v759_v9 = vand.u32 2147483647, %v629_v59  ;;  %v656_v10 = vsub.f32 %v3171_v18, %v3258_v52 }
  0x47   : > { %v734_v11 = vand.u32 2147483647, %v604_v61  ;;  %v747_v12 = vand.u32 2147483647, %v617_v62  ;;  %v760_v16 = vand.u32 2147483647, %v630_v63  ;;  %v669_v20 = vsub.f32 %v3173_v19, %v3258_v52 }
  0x48   : > { %v863_v23 = vsub.f32 1.0, %v733_v5  ;;  %v876_v24 = vsub.f32 1.0, %v746_v47  ;;  %v773_v26 = vand.u32 2147483647, %v643_v4  ;;  %v772_v28 = vand.u32 2147483647, %v642_v60 }
  0x49   : > { %v864_v31 = vsub.f32 1.0, %v734_v11  ;;  %v877_v36 = vsub.f32 1.0, %v747_v12  ;;  %v890_v38 = vsub.f32 1.0, %v760_v16  ;;  %v889_v40 = vsub.f32 1.0, %v759_v9 }
  0x4a   : > { %v993_v44 = vmax.f32 %v863_v23, 0.0  ;;  %v1006_v39 = vmax.f32 %v876_v24, 0.0  ;;  %v903_v51 = vsub.f32 1.0, %v773_v26  ;;  %v902_v45 = vsub.f32 1.0, %v772_v28 }
  0x4b   : > { %v994_v57 = vmax.f32 %v864_v31, 0.0  ;;  %v1007_v58 = vmax.f32 %v877_v36, 0.0  ;;  %v1020_v59 = vmax.f32 %v890_v38, 0.0  ;;  %v1019_v61 = vmax.f32 %v889_v40, 0.0 }
  0x4c   : > { %v2901_v62 = vpack.c.bf16 %v1006_v39, %v993_v44  ;;  %v1033_v63 = vmax.f32 %v903_v51, 0.0  ;;  %v1032_v46 = vmax.f32 %v902_v45, 0.0  ;;  %v786_v1 = vand.u32 2147483647, %v656_v10 }
  0x4d   : > { %v2899_v5 = vpack.c.bf16 %v1007_v58, %v994_v57  ;;  %v799_v47 = vand.u32 2147483647, %v669_v20  ;;  %v655_v60 = vsub.f32 %v3171_v18, %v3247_v37  ;;  %v668_v4 = vsub.f32 %v3173_v19, %v3247_v37 }
  0x4e   : > { %v2903_v9 = vpack.c.bf16 %v1033_v63, %v1020_v59  ;;  %v2905_v11 = vpack.c.bf16 %v1032_v46, %v1019_v61  ;;  %v916_v12 = vsub.f32 1.0, %v786_v1  ;;  %v682_v16 = vsub.f32 %v3179_v25, %v3258_v52 }
  0x4f   : > { %2900 = vmatprep.subr.bf16.mxu0 %v2899_v5  ;;  %3034 = vmatprep.subr.bf16.mxu1 %v2899_v5  ;;  %v929_v23 = vsub.f32 1.0, %v799_v47  ;;  %v785_v24 = vand.u32 2147483647, %v655_v60  ;;  %v798_v10 = vand.u32 2147483647, %v668_v4  ;;  %v695_v20 = vsub.f32 %v3183_v30, %v3258_v52 }
  0x50   : > { %2902 = vmatpush1.bf16.msra.mxu0 %v2901_v62  ;;  %3039 = vmatpush1.bf16.msra.mxu1 %v2901_v62  ;;  %v1046_v26 = vmax.f32 %v916_v12, 0.0  ;;  %v812_v28 = vand.u32 2147483647, %v682_v16  ;;  %v681_v46 = vsub.f32 %v3179_v25, %v3247_v37  ;;  %v694_v1 = vsub.f32 %v3183_v30, %v3247_v37 }
  0x51   : > { %2904 = vmatprep.subr.bf16.mxu0 %v2903_v9  ;;  %3035 = vmatprep.subr.bf16.mxu1 %v2903_v9  ;;  %v1059_v31 = vmax.f32 %v929_v23, 0.0  ;;  %v915_v36 = vsub.f32 1.0, %v785_v24  ;;  %v928_v38 = vsub.f32 1.0, %v798_v10  ;;  %v825_v40 = vand.u32 2147483647, %v695_v20 }
  0x52   : > { %v942_v44 = vsub.f32 1.0, %v812_v28  ;;  %v811_v39 = vand.u32 2147483647, %v681_v46  ;;  %v824_v51 = vand.u32 2147483647, %v694_v1  ;;  %v708_v45 = vsub.f32 %v3186_v33, %v3258_v52 }
  0x53   : > { %v2907_v57 = vpack.c.bf16 %v1059_v31, %v1046_v26  ;;  %v1045_v58 = vmax.f32 %v915_v36, 0.0  ;;  %v1058_v59 = vmax.f32 %v928_v38, 0.0  ;;  %v955_v61 = vsub.f32 1.0, %v825_v40 }
  0x54   : > { %2906 = vmatpush1.bf16.msra.mxu0 %v2905_v11  ;;  %3040 = vmatpush1.bf16.msra.mxu1 %v2905_v11  ;;  %v1072_v62 = vmax.f32 %v942_v44, 0.0  ;;  %v941_v63 = vsub.f32 1.0, %v811_v39  ;;  %v954_v5 = vsub.f32 1.0, %v824_v51  ;;  %v721_v47 = vsub.f32 %v3188_v34, %v3258_v52 }
  0x55   : > { %2908 = vmatprep.subr.bf16.mxu0 %v2907_v57  ;;  %3036 = vmatprep.subr.bf16.mxu1 %v2907_v57  ;;  %v2909_v60 = vpack.c.bf16 %v1058_v59, %v1045_v58  ;;  %v1085_v4 = vmax.f32 %v955_v61, 0.0  ;;  %v838_v9 = vand.u32 2147483647, %v708_v45  ;;  %v707_v12 = vsub.f32 %v3186_v33, %v3247_v37 }
  0x56   : > { %v1071_v16 = vmax.f32 %v941_v63, 0.0  ;;  %v1084_v23 = vmax.f32 %v954_v5, 0.0  ;;  %v851_v11 = vand.u32 2147483647, %v721_v47  ;;  %v720_v24 = vsub.f32 %v3188_v34, %v3247_v37 }
  0x57   : > { %v2911_v10 = vpack.c.bf16 %v1085_v4, %v1072_v62  ;;  %v968_v52 = vsub.f32 1.0, %v838_v9  ;;  %v837_v20 = vand.u32 2147483647, %v707_v12  ;;  %v546_v26 = vmul.f32 80.0, %v3260_v54 }
  0x58   : > { %2910 = vmatpush1.bf16.msra.mxu0 %v2909_v60  ;;  %3041 = vmatpush1.bf16.msra.mxu1 %v2909_v60  ;;  %v2913_v28 = vpack.c.bf16 %v1084_v23, %v1071_v16  ;;  %v981_v46 = vsub.f32 1.0, %v851_v11  ;;  %v850_v1 = vand.u32 2147483647, %v720_v24  ;;  %v535_v31 = vadd.f32 1.0, %v3250_v48  ;;  %v3347_v24 = vld [vmem:[%s3332_s27] sm:$0xff] }
  0x59   : > { %2912 = vmatprep.subr.bf16.mxu0 %v2911_v10  ;;  %3037 = vmatprep.subr.bf16.mxu1 %v2911_v10  ;;  %v1098_v36 = vmax.f32 %v968_v52, 0.0  ;;  %v967_v38 = vsub.f32 1.0, %v837_v20  ;;  %v2758_v37 = vadd.f32 -1.0, %v546_v26  ;;  %v453_v40 = vadd.f32 %v3241_v32, %v3254_v42  ;;  %v3350_v10 = vld [vmem:[%s3332_s27 + $0x28] sm:$0xff] }
  0x5a   : > { %v1111_v44 = vmax.f32 %v981_v46, 0.0  ;;  %v980_v39 = vsub.f32 1.0, %v850_v1  ;;  %v548_v54 = vmul.f32 80.0, %v535_v31  ;;  %v3320_v51 = vadd.f32 -1.0, %v3262_v55 }
  0x5b   : > { %v1097_v45 = vmax.f32 %v967_v38, 0.0  ;;  %v3322_v57 = vmul.f32 0.5, %v2758_v37  ;;  %v467_v48 = vadd.f32 %v3181_v29, %v453_v40  ;;  %v442_v58 = vmul.f32 %v3256_v50, %v3177_v22 }
  0x5c   : > { %2914 = vmatpush1.bf16.msra.mxu0 %v2913_v28  ;;  %3042 = vmatpush1.bf16.msra.mxu1 %v2913_v28  ;;  %v2915_v59 = vpack.c.bf16 %v1111_v44, %v1098_v36  ;;  %v1110_v61 = vmax.f32 %v980_v39, 0.0  ;;  %v2760_v62 = vadd.f32 -1.0, %v548_v54  ;;  %v428_v32 = vmul.f32 %v3320_v51, %v3175_v21 }
  0x5d   : > { %v606_v42 = vsub.f32 %v3162_v7, %v3322_v57  ;;  %v619_v55 = vsub.f32 %v3165_v13, %v3322_v57  ;;  %v532_v63 = vadd.f32 1.0, %v467_v48  ;;  %v632_v5 = vsub.f32 %v3167_v14, %v3322_v57 }
  0x5e   : > { %2916 = vmatprep.subr.bf16.mxu0 %v2915_v59  ;;  %3038 = vmatprep.subr.bf16.mxu1 %v2915_v59  ;;  %v2917_v47 = vpack.c.bf16 %v1110_v61, %v1097_v45  ;;  %v3340_v60 = vmul.f32 0.5, %v2760_v62  ;;  %v455_v4 = vadd.f32 %v442_v58, %v428_v32  ;;  %v645_v9 = vsub.f32 %v3169_v17, %v3322_v57  ;;  %v3366_v32 = vld [vmem:[%s3332_s27 + $0x8] sm:$0xff] }
  0x5f   : > { %v736_v12 = vand.u32 2147483647, %v606_v42  ;;  %v749_v16 = vand.u32 2147483647, %v619_v55  ;;  %v545_v23 = vmul.f32 80.0, %v532_v63  ;;  %v658_v11 = vsub.f32 %v3171_v18, %v3322_v57 }
  0x60   : > { %2918 = vmatpush1.bf16.msra.mxu0 %v2917_v47  ;;  %3043 = vmatpush1.bf16.msra.mxu1 %v2917_v47  ;;  %v608_v52 = vsub.f32 %v3162_v7, %v3340_v60  ;;  %v621_v20 = vsub.f32 %v3165_v13, %v3340_v60  ;;  %v469_v26 = vadd.f32 %v3181_v29, %v455_v4  ;;  %v762_v28 = vand.u32 2147483647, %v632_v5  ;;  %v3375_v47 = vld [vmem:[%s3332_s27 + $0x30] sm:$0xff] }
  0x61   : > { %v866_v46 = vsub.f32 1.0, %v736_v12  ;;  %v879_v1 = vsub.f32 1.0, %v749_v16  ;;  %v2757_v31 = vadd.f32 -1.0, %v545_v23  ;;  %v775_v36 = vand.u32 2147483647, %v645_v9 }
  0x62   : > { %v738_v38 = vand.u32 2147483647, %v608_v52  ;;  %v751_v37 = vand.u32 2147483647, %v621_v20  ;;  %v534_v40 = vadd.f32 1.0, %v469_v26  ;;  %v892_v44 = vsub.f32 1.0, %v762_v28 }
  0x63   : > { %2768 = vmatmul.mubr.msk.f32.vlgmr.msra.gmra.mrb[0].mxu0 %vm1288_vm0, %v3347_v24  ;;  %2773 = vmatmul.mubr.msk.f32.vlgmr.msra.gmra.mrb[0].mxu1 %vm1288_vm0, %v3350_v10  ;;  %v996_v39 = vmax.f32 %v866_v46, 0.0  ;;  %v1009_v54 = vmax.f32 %v879_v1, 0.0  ;;  %v3361_v45 = vmul.f32 0.5, %v2757_v31  ;;  %v905_v48 = vsub.f32 1.0, %v775_v36 }
  0x64   : > { %v868_v58 = vsub.f32 1.0, %v738_v38  ;;  %v881_v59 = vsub.f32 1.0, %v751_v37  ;;  %v547_v61 = vmul.f32 80.0, %v534_v40  ;;  %v4366_v62 = vmov 0.0   ;;  %v3392_v38 = vld [vmem:[%s3332_s27 + $0x10] sm:$0xff] }
  0x65   : > { %1386 = vmatprep.mubr.f32.mxu0 %v4366_v62  ;;  %1416 = vmatprep.mubr.f32.mxu1 %v4366_v62  ;;  %v3368_v42 = vmax.f32 %v892_v44, 0.0  ;;  %v2919_v55 = vpack.c.bf16 %v1009_v54, %v996_v39  ;;  %v605_v63 = vsub.f32 %v3162_v7, %v3361_v45  ;;  %v618_v5 = vsub.f32 %v3165_v13, %v3361_v45  ;;  %v3398_v54 = vld [vmem:[%s3332_s27 + $0x38] sm:$0xff] }
  0x66   : > { %v1035_v4 = vmax.f32 %v905_v48, 0.0  ;;  %v998_v9 = vmax.f32 %v868_v58, 0.0  ;;  %v1011_v12 = vmax.f32 %v881_v59, 0.0  ;;  %v2759_v16 = vadd.f32 -1.0, %v547_v61 }
  0x67   : > { %v634_v23 = vsub.f32 %v3167_v14, %v3340_v60  ;;  %2920 = vmatprep.subr.bf16.mxu1 %v2919_v55  ;;  %v735_v52 = vand.u32 2147483647, %v605_v63  ;;  %v748_v20 = vand.u32 2147483647, %v618_v5  ;;  %2769 = vmatmul.mubr.msk.f32.gmra.mrb[2].mxu0 %vm1288_vm0, %v3366_v32  ;;  %v647_v28 = vsub.f32 %v3169_v17, %v3340_v60 }
  0x68   : > { %v2923_v26 = vpack.c.bf16 %v1035_v4, %v3368_v42  ;;  %v2939_v46 = vpack.c.bf16 %v1011_v12, %v998_v9  ;;  %v3384_v1 = vmul.f32 0.5, %v2759_v16  ;;  %2774 = vmatmul.mubr.msk.f32.gmra.mrb[2].mxu1 %vm1288_vm0, %v3375_v47  ;;  %v631_v36 = vsub.f32 %v3167_v14, %v3361_v45  ;;  %1392 = vmatprep.mubr.f32.mxu0 %v4366_v62  ;;  %v3407_v4 = vld [vmem:[%s3332_s27 + $0x18] sm:$0xff] }
  0x69   : > { %v764_v31 = vand.u32 2147483647, %v634_v23  ;;  %v865_v37 = vsub.f32 1.0, %v735_v52  ;;  %v878_v40 = vsub.f32 1.0, %v748_v20  ;;  %v777_v44 = vand.u32 2147483647, %v647_v28  ;;  %1422 = vmatprep.mubr.f32.mxu1 %v4366_v62 }
  0x6a   : > { %v644_v39 = vsub.f32 %v3169_v17, %v3361_v45  ;;  %2940 = vmatprep.subr.bf16.mxu0 %v2939_v46  ;;  %v607_v48 = vsub.f32 %v3162_v7, %v3384_v1  ;;  %v620_v58 = vsub.f32 %v3165_v13, %v3384_v1  ;;  %v761_v61 = vand.u32 2147483647, %v631_v36 }
  0x6b   : > { %v894_v59 = vsub.f32 1.0, %v764_v31  ;;  %v995_v42 = vmax.f32 %v865_v37, 0.0  ;;  %v1008_v55 = vmax.f32 %v878_v40, 0.0  ;;  %v907_v63 = vsub.f32 1.0, %v777_v44  ;;  %2770 = vmatmul.mubr.msk.f32.gmra.mrb[4].mxu0 %vm1288_vm0, %v3392_v38  ;;  %v3416_v31 = vld [vmem:[%s3332_s27 + $0x40] sm:$0xff] }
  0x6c   : > { %v774_v5 = vand.u32 2147483647, %v644_v39  ;;  %v737_v9 = vand.u32 2147483647, %v607_v48  ;;  %v750_v12 = vand.u32 2147483647, %v620_v58  ;;  %2775 = vmatmul.mubr.msk.f32.gmra.mrb[4].mxu1 %vm1288_vm0, %v3398_v54  ;;  %1398 = vmatprep.mubr.f32.mxu0 %v4366_v62  ;;  %v633_v46 = vsub.f32 %v3167_v14, %v3384_v1 }
  0x6d   : > { %v1024_v16 = vmax.f32 %v894_v59, 0.0  ;;  %v891_v23 = vsub.f32 1.0, %v761_v61  ;;  %v2921_v52 = vpack.c.bf16 %v1008_v55, %v995_v42  ;;  %v1037_v20 = vmax.f32 %v907_v63, 0.0  ;;  %1428 = vmatprep.mubr.f32.mxu1 %v4366_v62  ;;  %v3425_v61 = vld [vmem:[%s3332_s27 + $0x20] sm:$0xff] }
  0x6e   : > { %v904_v28 = vsub.f32 1.0, %v774_v5  ;;  %v867_v36 = vsub.f32 1.0, %v737_v9  ;;  %v880_v37 = vsub.f32 1.0, %v750_v12  ;;  %v646_v44 = vsub.f32 %v3169_v17, %v3384_v1 }
  0x6f   : > { %v1021_v40 = vmax.f32 %v891_v23, 0.0  ;;  %2922 = vmatpush1.bf16.msra.mxu1 %v2921_v52  ;;  %v2943_v39 = vpack.c.bf16 %v1037_v20, %v1024_v16  ;;  %v763_v58 = vand.u32 2147483647, %v633_v46  ;;  %v671_v59 = vsub.f32 %v3173_v19, %v3322_v57  ;;  %2771 = vmatmul.mubr.msk.f32.gmra.mrb[6].mxu0 %vm1288_vm0, %v3407_v4 }
  0x70   : > { %v1034_v48 = vmax.f32 %v904_v28, 0.0  ;;  %v997_v42 = vmax.f32 %v867_v36, 0.0  ;;  %v1010_v55 = vmax.f32 %v880_v37, 0.0  ;;  %2924 = vmatprep.subr.bf16.mxu1 %v2923_v26  ;;  %v776_v63 = vand.u32 2147483647, %v646_v44  ;;  %2776 = vmatmul.mubr.msk.f32.gmra.mrb[6].mxu1 %vm1288_vm0, %v3416_v31 }
  0x71   : > { %v788_v5 = vand.u32 2147483647, %v658_v11  ;;  %v893_v12 = vsub.f32 1.0, %v763_v58  ;;  %v801_v16 = vand.u32 2147483647, %v671_v59  ;;  %v660_v23 = vsub.f32 %v3171_v18, %v3340_v60  ;;  %1404 = vmatprep.mubr.f32.mxu0 %v4366_v62  ;;  %1499 = vmatprep.mubr.f32.mxu1 %v4366_v62 }
  0x72   : > { %v2925_v9 = vpack.c.bf16 %v1034_v48, %v1021_v40  ;;  %v2941_v52 = vpack.c.bf16 %v1010_v55, %v997_v42  ;;  %v906_v26 = vsub.f32 1.0, %v776_v63  ;;  %v673_v28 = vsub.f32 %v3173_v19, %v3340_v60 }
  0x73   : > { %v918_v20 = vsub.f32 1.0, %v788_v5  ;;  %v1023_v11 = vmax.f32 %v893_v12, 0.0  ;;  %v931_v46 = vsub.f32 1.0, %v801_v16  ;;  %v790_v36 = vand.u32 2147483647, %v660_v23  ;;  %2772 = vmatmul.mubr.msk.f32.gmra.mrb[8].mxu0 %vm1288_vm0, %v3425_v61 }
  0x74   : > { %2926 = vmatpush1.bf16.msra.mxu1 %v2925_v9  ;;  %v657_v37 = vsub.f32 %v3171_v18, %v3361_v45  ;;  %2942 = vmatpush1.bf16.msra.mxu0 %v2941_v52  ;;  %v1036_v40 = vmax.f32 %v906_v26, 0.0  ;;  %v803_v48 = vand.u32 2147483647, %v673_v28  ;;  %v670_v58 = vsub.f32 %v3173_v19, %v3361_v45 }
  0x75   : > { %v1048_v44 = vmax.f32 %v918_v20, 0.0  ;;  %1618 = vmatprep.mubr.f32.mxu0 %v4366_v62  ;;  %2944 = vmatprep.subr.bf16.mxu0 %v2943_v39  ;;  %v1061_v59 = vmax.f32 %v931_v46, 0.0  ;;  %v920_v42 = vsub.f32 1.0, %v790_v36  ;;  %v659_v63 = vsub.f32 %v3171_v18, %v3384_v1 }
  0x76   : > { %v787_v55 = vand.u32 2147483647, %v657_v37  ;;  %v2945_v5 = vpack.c.bf16 %v1036_v40, %v1023_v11  ;;  %v933_v9 = vsub.f32 1.0, %v803_v48  ;;  %v800_v12 = vand.u32 2147483647, %v670_v58 }
  0x77   : > { %v672_v16 = vsub.f32 %v3173_v19, %v3384_v1  ;;  %v2927_v23 = vpack.c.bf16 %v1061_v59, %v1048_v44  ;;  %v1050_v52 = vmax.f32 %v920_v42, 0.0  ;;  %v789_v20 = vand.u32 2147483647, %v659_v63 }
  0x78   : > { %v917_v26 = vsub.f32 1.0, %v787_v55  ;;  %2946 = vmatpush1.bf16.msra.mxu0 %v2945_v5  ;;  %v1063_v28 = vmax.f32 %v933_v9, 0.0  ;;  %v930_v53 = vsub.f32 1.0, %v800_v12  ;;  %v684_v46 = vsub.f32 %v3179_v25, %v3322_v57 }
  0x79   : > { %v802_v39 = vand.u32 2147483647, %v672_v16  ;;  %2928 = vmatprep.subr.bf16.mxu1 %v2927_v23  ;;  %v919_v37 = vsub.f32 1.0, %v789_v20  ;;  %v697_v11 = vsub.f32 %v3183_v30, %v3322_v57  ;;  %v686_v40 = vsub.f32 %v3179_v25, %v3340_v60 }
  0x7a   : > { %v1047_v36 = vmax.f32 %v917_v26, 0.0  ;;  %v2947_v44 = vpack.c.bf16 %v1063_v28, %v1050_v52  ;;  %v1060_v48 = vmax.f32 %v930_v53, 0.0  ;;  %v814_v59 = vand.u32 2147483647, %v684_v46 }
  0x7b   : > { %v932_v58 = vsub.f32 1.0, %v802_v39  ;;  %v1049_v42 = vmax.f32 %v919_v37, 0.0  ;;  %v827_v55 = vand.u32 2147483647, %v697_v11  ;;  %v699_v63 = vsub.f32 %v3183_v30, %v3340_v60 }
  0x7c   : > { %v816_v5 = vand.u32 2147483647, %v686_v40  ;;  %2948 = vmatprep.subr.bf16.mxu0 %v2947_v44  ;;  %v2929_v9 = vpack.c.bf16 %v1060_v48, %v1047_v36  ;;  %v944_v16 = vsub.f32 1.0, %v814_v59  ;;  %v683_v23 = vsub.f32 %v3179_v25, %v3361_v45 }
  0x7d   : > { %v1062_v12 = vmax.f32 %v932_v58, 0.0  ;;  %v957_v26 = vsub.f32 1.0, %v827_v55  ;;  %v829_v20 = vand.u32 2147483647, %v699_v63  ;;  %v696_v53 = vsub.f32 %v3183_v30, %v3361_v45 }
  0x7e   : > { %v946_v6 = vsub.f32 1.0, %v816_v5  ;;  %2930 = vmatpush1.bf16.msra.mxu1 %v2929_v9  ;;  %v1074_v28 = vmax.f32 %v944_v16, 0.0  ;;  %v813_v39 = vand.u32 2147483647, %v683_v23  ;;  %v685_v46 = vsub.f32 %v3179_v25, %v3384_v1 }
  0x7f   : > { %v2949_v52 = vpack.c.bf16 %v1062_v12, %v1049_v42  ;;  %v1087_v37 = vmax.f32 %v957_v26, 0.0  ;;  %v959_v36 = vsub.f32 1.0, %v829_v20  ;;  %v826_v40 = vand.u32 2147483647, %v696_v53 }
  0x80   : > { %v1076_v11 = vmax.f32 %v946_v6, 0.0  ;;  %v943_v44 = vsub.f32 1.0, %v813_v39  ;;  %v698_v48 = vsub.f32 %v3183_v30, %v3384_v1  ;;  %v815_v58 = vand.u32 2147483647, %v685_v46 }
  0x81   : > { %2950 = vmatpush1.bf16.msra.mxu0 %v2949_v52  ;;  %v710_v59 = vsub.f32 %v3186_v33, %v3322_v57  ;;  %v2931_v55 = vpack.c.bf16 %v1087_v37, %v1074_v28  ;;  %v1089_v42 = vmax.f32 %v959_v36, 0.0  ;;  %v956_v63 = vsub.f32 1.0, %v826_v40 }
  0x82   : > { %v723_v5 = vsub.f32 %v3188_v34, %v3322_v57  ;;  %v1073_v9 = vmax.f32 %v943_v44, 0.0  ;;  %v828_v12 = vand.u32 2147483647, %v698_v48  ;;  %v945_v16 = vsub.f32 1.0, %v815_v58 }
  0x83   : > { %v840_v6 = vand.u32 2147483647, %v710_v59  ;;  %2932 = vmatprep.subr.bf16.mxu1 %v2931_v55  ;;  %v2951_v23 = vpack.c.bf16 %v1089_v42, %v1076_v11  ;;  %v1086_v26 = vmax.f32 %v956_v63, 0.0  ;;  %v712_v53 = vsub.f32 %v3186_v33, %v3340_v60 }
  0x84   : > { %v853_v20 = vand.u32 2147483647, %v723_v5  ;;  %v958_v52 = vsub.f32 1.0, %v828_v12  ;;  %v1075_v39 = vmax.f32 %v945_v16, 0.0  ;;  %v725_v28 = vsub.f32 %v3188_v34, %v3340_v60 }
  0x85   : > { %v970_v46 = vsub.f32 1.0, %v840_v6  ;;  %2952 = vmatprep.subr.bf16.mxu0 %v2951_v23  ;;  %v2933_v37 = vpack.c.bf16 %v1086_v26, %v1073_v9  ;;  %v842_v36 = vand.u32 2147483647, %v712_v53  ;;  %v709_v40 = vsub.f32 %v3186_v33, %v3361_v45 }
  0x86   : > { %v983_v57 = vsub.f32 1.0, %v853_v20  ;;  %v1088_v44 = vmax.f32 %v958_v52, 0.0  ;;  %v855_v48 = vand.u32 2147483647, %v725_v28  ;;  %v722_v58 = vsub.f32 %v3188_v34, %v3361_v45 }
  0x87   : > { %v1100_v11 = vmax.f32 %v970_v46, 0.0  ;;  %2934 = vmatpush1.bf16.msra.mxu1 %v2933_v37  ;;  %v972_v55 = vsub.f32 1.0, %v842_v36  ;;  %v839_v42 = vand.u32 2147483647, %v709_v40  ;;  %v711_v60 = vsub.f32 %v3186_v33, %v3384_v1 }
  0x88   : > { %v1113_v59 = vmax.f32 %v983_v57, 0.0  ;;  %v2953_v63 = vpack.c.bf16 %v1088_v44, %v1075_v39  ;;  %v985_v5 = vsub.f32 1.0, %v855_v48  ;;  %v852_v9 = vand.u32 2147483647, %v722_v58 }
  0x89   : > { %v724_v12 = vsub.f32 %v3188_v34, %v3384_v1  ;;  %v1102_v6 = vmax.f32 %v972_v55, 0.0  ;;  %v969_v23 = vsub.f32 1.0, %v839_v42  ;;  %v841_v26 = vand.u32 2147483647, %v711_v60 }
  0x8a   : > { %v2935_v16 = vpack.c.bf16 %v1113_v59, %v1100_v11  ;;  %2954 = vmatpush1.bf16.msra.mxu0 %v2953_v63  ;;  %v1115_v20 = vmax.f32 %v985_v5, 0.0  ;;  %v982_v45 = vsub.f32 1.0, %v852_v9  ;;  %v217_v52 = vmul.f32 0.05, %v3266_v56 }
  0x8b   : > { %v854_v53 = vand.u32 2147483647, %v724_v12  ;;  %v1099_v46 = vmax.f32 %v969_v23, 0.0  ;;  %v971_v28 = vsub.f32 1.0, %v841_v26  ;;  %v177_v39 = vadd.s32 768, %v3158_v2 }
  0x8c   : > { %2936 = vmatprep.subr.bf16.mxu1 %v2935_v16  ;;  %v180_v37 = vadd.s32 1152, %v3158_v2  ;;  %v2955_v57 = vpack.c.bf16 %v1115_v20, %v1102_v6  ;;  %v1112_v36 = vmax.f32 %v982_v45, 0.0  ;;  %v230_v40 = vfloor.f32 %v217_v52 }
  0x8d   : > { %v984_v1 = vsub.f32 1.0, %v854_v53  ;;  %v1101_v44 = vmax.f32 %v971_v28, 0.0  ;;  %v190_v11 = vcvt.s32.f32 %v177_v39  ;;  %v179_v58 = vadd.s32 1024, %v3158_v2 }
  0x8e   : > { %v193_v48 = vcvt.s32.f32 %v180_v37  ;;  %2956 = vmatprep.subr.bf16.mxu0 %v2955_v57  ;;  %v2937_v59 = vpack.c.bf16 %v1112_v36, %v1099_v46  ;;  %v243_v56 = vmul.f32 20.0, %v230_v40  ;;  %v322_v42 = vmul.f32 2.0, %v230_v40 }
  0x8f   : > { %v1114_v55 = vmax.f32 %v984_v1, 0.0  ;;  %v203_v60 = vadd.f32 0.5, %v190_v11  ;;  %v192_v5 = vcvt.s32.f32 %v179_v58  ;;  %v3486_v9 = vadd.s32 1408, %v3158_v2 }
  0x90   : > { %v206_v63 = vadd.f32 0.5, %v193_v48  ;;  %2938 = vmatpush1.bf16.msra.mxu1 %v2937_v59  ;;  %v4367_v16 = vcvt.s32.f32 %v3196_v43  ;;  %v335_v23 = vadd.f32 1.0, %v322_v42  ;;  %v3491_v26 = vadd.s32 1280, %v3158_v2 }
  0x91   : > { %v2957_v12 = vpack.c.bf16 %v1114_v55, %v1101_v44  ;;  %v216_v20 = vmul.f32 0.05, %v203_v60  ;;  %v205_v53 = vadd.f32 0.5, %v192_v5  ;;  %v195_v52 = vcvt.s32.f32 %v3486_v9 }
  0x92   : > { %v256_v6 = vsub.f32 %v4367_v16, %v243_v56  ;;  %v219_v45 = vmul.f32 0.05, %v206_v63  ;;  %v349_v28 = vmul.f32 0.0125, %v335_v23  ;;  %v194_v39 = vcvt.s32.f32 %v3491_v26 }
  0x93   : > { %2958 = vmatpush1.bf16.msra.mxu0 %v2957_v12  ;;  %2777 = vmatmul.mubr.msk.f32.vlgmr.msra.gmra.mrb[8].mxu1 %vm1288_vm0, %v3347_v24  ;;  %v229_v37 = vfloor.f32 %v216_v20  ;;  %v218_v57 = vmul.f32 0.05, %v205_v53  ;;  %v208_v36 = vadd.f32 0.5, %v195_v52  ;;  %v3503_v58 = vadd.s32 1536, %v3158_v2 }
  0x94   : > { %v269_v46 = vmul.f32 2.0, %v256_v6  ;;  %v232_v43 = vfloor.f32 %v219_v45  ;;  %v3497_v40 = vadd.f32 -1.0, %v349_v28  ;;  %1505 = vmatprep.mubr.f32.mxu1 %v4366_v62  ;;  %v207_v44 = vadd.f32 0.5, %v194_v39 }
  0x95   : > { %v242_v59 = vmul.f32 20.0, %v229_v37  ;;  %v321_v55 = vmul.f32 2.0, %v229_v37  ;;  %v231_v9 = vfloor.f32 %v218_v57  ;;  %v221_v12 = vmul.f32 0.05, %v208_v36 }
  0x96   : > { %v282_v1 = vadd.f32 1.0, %v269_v46  ;;  %2786 = vmatmul.mubr.msk.f32.vlgmr.msra.gmra.mrb[10].mxu0 %vm1288_vm0, %v3347_v24  ;;  %v245_v56 = vmul.f32 20.0, %v232_v43  ;;  %v324_v42 = vmul.f32 2.0, %v232_v43  ;;  %v445_v63 = vmul.f32 %v3497_v40, %v3177_v22 }
  0x97   : > { %1624 = vmatprep.mubr.f32.mxu0 %v4366_v62  ;;  %v255_v16 = vsub.f32 %v190_v11, %v242_v59  ;;  %v334_v6 = vadd.f32 1.0, %v321_v55  ;;  %2778 = vmatmul.mubr.msk.f32.gmra.mrb[10].mxu1 %vm1288_vm0, %v3366_v32  ;;  %v244_v20 = vmul.f32 20.0, %v231_v9  ;;  %v323_v45 = vmul.f32 2.0, %v231_v9 }
  0x98   : > { %v296_v60 = vmul.f32 0.05, %v282_v1  ;;  %v258_v23 = vsub.f32 %v193_v48, %v245_v56  ;;  %v337_v2 = vadd.f32 1.0, %v324_v42  ;;  %1511 = vmatprep.mubr.f32.mxu1 %v4366_v62  ;;  %v234_v53 = vfloor.f32 %v221_v12 }
  0x99   : > { %v268_v46 = vmul.f32 2.0, %v255_v16  ;;  %v348_v28 = vmul.f32 0.0125, %v334_v6  ;;  %v257_v48 = vsub.f32 %v192_v5, %v244_v20  ;;  %v336_v57 = vadd.f32 1.0, %v323_v45 }
  0x9a   : > { %v3512_v24 = vadd.f32 -1.0, %v296_v60  ;;  %v271_v37 = vmul.f32 2.0, %v258_v23  ;;  %v351_v43 = vmul.f32 0.0125, %v337_v2  ;;  %2787 = vmatmul.mubr.msk.f32.gmra.mrb[12].mxu0 %vm1288_vm0, %v3366_v32  ;;  %v247_v36 = vmul.f32 20.0, %v234_v53 }
  0x9b   : > { %1630 = vmatprep.mubr.f32.mxu0 %v4366_v62  ;;  %v281_v1 = vadd.f32 1.0, %v268_v46  ;;  %v3520_v59 = vadd.f32 -1.0, %v348_v28  ;;  %2779 = vmatmul.mubr.msk.f32.gmra.mrb[12].mxu1 %vm1288_vm0, %v3392_v38  ;;  %v270_v60 = vmul.f32 2.0, %v257_v48  ;;  %v350_v32 = vmul.f32 0.0125, %v336_v57 }
  0x9c   : > { %v431_v11 = vmul.f32 %v3512_v24, %v3175_v21  ;;  %v284_v55 = vadd.f32 1.0, %v271_v37  ;;  %v3522_v56 = vadd.f32 -1.0, %v351_v43  ;;  %1517 = vmatprep.mubr.f32.mxu1 %v4366_v62  ;;  %v260_v9 = vsub.f32 %v195_v52, %v247_v36 }
  0x9d   : > { %v295_v5 = vmul.f32 0.05, %v281_v1  ;;  %v444_v12 = vmul.f32 %v3520_v59, %v3177_v22  ;;  %v283_v2 = vadd.f32 1.0, %v270_v60  ;;  %v326_v46 = vmul.f32 2.0, %v234_v53 }
  0x9e   : > { %4368 = vst [vmem:[#allocation7_spill] sm:$0xff] %v3522_v56  ;;  %v458_v42 = vadd.f32 %v445_v63, %v431_v11  ;;  %v298_v16 = vmul.f32 0.05, %v284_v55  ;;  %v447_v6 = vmul.f32 %v3522_v56, %v3177_v22  ;;  %2788 = vmatmul.mubr.msk.f32.gmra.mrb[14].mxu0 %vm1288_vm0, %v3392_v38  ;;  %v3534_v63 = vadd.f32 -1.0, %v350_v32 }
  0x9f   : > { %1636 = vmatprep.mubr.f32.mxu0 %v4366_v62  ;;  %v273_v20 = vmul.f32 2.0, %v260_v9  ;;  %v3537_v52 = vadd.f32 -1.0, %v295_v5  ;;  %2780 = vmatmul.mubr.msk.f32.gmra.mrb[14].mxu1 %vm1288_vm0, %v3407_v4  ;;  %v220_v28 = vmul.f32 0.05, %v207_v44  ;;  %v297_v43 = vmul.f32 0.05, %v283_v2 }
  0xa0   : > { %v472_v23 = vadd.f32 %v3181_v29, %v458_v42  ;;  %4369 = vst [vmem:[#allocation8_spill] sm:$0xff] %v3534_v63  ;;  %v3539_v45 = vadd.f32 -1.0, %v298_v16  ;;  %v446_v38 = vmul.f32 %v3534_v63, %v3177_v22  ;;  %1523 = vmatprep.mubr.f32.mxu1 %v4366_v62  ;;  %v339_v36 = vadd.f32 1.0, %v326_v46 }
  0xa1   : > { %v286_v11 = vadd.f32 1.0, %v273_v20  ;;  %v430_v48 = vmul.f32 %v3537_v52, %v3175_v21  ;;  %v233_v53 = vfloor.f32 %v220_v28  ;;  %v3552_v1 = vadd.f32 -1.0, %v297_v43 }
  0xa2   : > { %4370 = vst [vmem:[#allocation9_spill] sm:$0xff] %v3539_v45  ;;  %v537_v37 = vadd.f32 1.0, %v472_v23  ;;  %v433_v57 = vmul.f32 %v3539_v45, %v3175_v21  ;;  %2789 = vmatmul.mubr.msk.f32.gmra.mrb[16].mxu0 %vm1288_vm0, %v3407_v4  ;;  %v353_v9 = vmul.f32 0.0125, %v339_v36 }
  0xa3   : > { %4371 = vst [vmem:[#allocation10_spill] sm:$0xff] %v3552_v1  ;;  %1642 = vmatprep.mubr.f32.mxu0 %v4366_v62  ;;  %v300_v55 = vmul.f32 0.05, %v286_v11  ;;  %v457_v60 = vadd.f32 %v444_v12, %v430_v48  ;;  %2781 = vmatmul.mubr.msk.f32.gmra.mrb[16].mxu1 %vm1288_vm0, %v3425_v61  ;;  %v246_v5 = vmul.f32 20.0, %v233_v53  ;;  %v432_v4 = vmul.f32 %v3552_v1, %v3175_v21 }
  0xa4   : > { %v550_v44 = vmul.f32 80.0, %v537_v37  ;;  %v460_v32 = vadd.f32 %v447_v6, %v433_v57  ;;  %1529 = vmatprep.mubr.f32.mxu1 %v4366_v62  ;;  %v325_v2 = vmul.f32 2.0, %v233_v53  ;;  %v3567_v12 = vadd.f32 -1.0, %v353_v9 }
  0xa5   : > { %v3561_v23 = vadd.f32 -1.0, %v300_v55  ;;  %v471_v20 = vadd.f32 %v3181_v29, %v457_v60  ;;  %v259_v6 = vsub.f32 %v194_v39, %v246_v5  ;;  %v459_v37 = vadd.f32 %v446_v38, %v432_v4 }
  0xa6   : > { %v2762_v16 = vadd.f32 -1.0, %v550_v44  ;;  %v474_v46 = vadd.f32 %v3181_v29, %v460_v32  ;;  %2790 = vmatmul.mubr.msk.f32.gmra.mrb[18].mxu0 %vm1288_vm0, %v3425_v61  ;;  %4373 = vst [vmem:[#allocation12_spill] sm:$0xff] %v3567_v12  ;;  %v3578_v11 = vadd.f32 1.0, %v325_v2  ;;  %v3584_v61 = vmul.f32 %v3567_v12, %v3177_v22 }
  0xa7   : > { %4372 = vst [vmem:[#allocation11_spill] sm:$0xff] %v3561_v23  ;;  %1648 = vmatprep.mubr.f32.mxu0 %v4366_v62  ;;  %v3576_v43 = vmul.f32 %v3561_v23, %v3175_v21  ;;  %v536_v48 = vadd.f32 1.0, %v471_v20  ;;  %2782 = vmatmul.mubr.msk.f32.gmra.mrb[18].mxu1 %vm1288_vm0, %v3350_v10  ;;  %v3586_v26 = vmul.f32 2.0, %v259_v6  ;;  %v473_v36 = vadd.f32 %v3181_v29, %v459_v37 }
  0xa8   : > { %v3571_v28 = vmul.f32 0.5, %v2762_v16  ;;  %v539_v57 = vadd.f32 1.0, %v474_v46  ;;  %1535 = vmatprep.mubr.f32.mxu1 %v4366_v62 }
  0xa9   : > { %v549_v44 = vmul.f32 80.0, %v536_v48  ;;  %v538_v16 = vadd.f32 1.0, %v473_v36 }
  0xaa   : > { %v610_v39 = vsub.f32 %v3162_v7, %v3571_v28  ;;  %v623_v38 = vsub.f32 %v3165_v13, %v3571_v28  ;;  %v636_v53 = vsub.f32 %v3167_v14, %v3571_v28  ;;  %v552_v55 = vmul.f32 80.0, %v539_v57  ;;  %2791 = vmatmul.mubr.msk.f32.gmra.mrb[20].mxu0 %vm1288_vm0, %v3350_v10 }
  0xab   : > { %v649_v60 = vsub.f32 %v3169_v17, %v3571_v28  ;;  %v662_v32 = vsub.f32 %v3171_v18, %v3571_v28  ;;  %v675_v4 = vsub.f32 %v3173_v19, %v3571_v28  ;;  %1654 = vmatprep.mubr.f32.mxu0 %v4366_v62  ;;  %v2761_v2 = vadd.f32 -1.0, %v549_v44  ;;  %2783 = vmatmul.mubr.msk.f32.gmra.mrb[20].mxu1 %vm1288_vm0, %v3375_v47 }
  0xac   : > { %v740_v9 = vand.u32 2147483647, %v610_v39  ;;  %v753_v5 = vand.u32 2147483647, %v623_v38  ;;  %v2764_v20 = vadd.f32 -1.0, %v552_v55  ;;  %v551_v57 = vmul.f32 80.0, %v538_v16  ;;  %1541 = vmatprep.mubr.f32.mxu1 %v4366_v62 }
  0xad   : > { %v766_v46 = vand.u32 2147483647, %v636_v53  ;;  %v779_v6 = vand.u32 2147483647, %v649_v60  ;;  %v3607_v42 = vand.u32 2147483647, %v662_v32 }
  0xae   : > { %v870_v37 = vsub.f32 1.0, %v740_v9  ;;  %v883_v48 = vsub.f32 1.0, %v753_v5  ;;  %v3610_v10 = vmul.f32 0.5, %v2761_v2  ;;  %v3612_v39 = vmul.f32 0.5, %v2764_v20  ;;  %2792 = vmatmul.mubr.msk.f32.gmra.mrb[22].mxu0 %vm1288_vm0, %v3375_v47 }
  0xaf   : > { %v896_v38 = vsub.f32 1.0, %v766_v46  ;;  %v909_v36 = vsub.f32 1.0, %v779_v6  ;;  %v2763_v55 = vadd.f32 -1.0, %v551_v57  ;;  %v3616_v60 = vand.u32 2147483647, %v675_v4  ;;  %1660 = vmatprep.mubr.f32.mxu0 %v4366_v62  ;;  %2784 = vmatmul.mubr.msk.f32.gmra.mrb[22].mxu1 %vm1288_vm0, %v3398_v54 }
  0xb0   : > { %v1000_v53 = vmax.f32 %v870_v37, 0.0  ;;  %v1013_v44 = vmax.f32 %v883_v48, 0.0  ;;  %v609_v32 = vsub.f32 %v3162_v7, %v3610_v10  ;;  %v622_v9 = vsub.f32 %v3165_v13, %v3610_v10  ;;  %1547 = vmatprep.mubr.f32.mxu1 %v4366_v62 }
  0xb1   : > { %v612_v5 = vsub.f32 %v3162_v7, %v3612_v39  ;;  %v625_v16 = vsub.f32 %v3165_v13, %v3612_v39  ;;  %v3629_v4 = vmul.f32 0.5, %v2763_v55  ;;  %v1026_v2 = vmax.f32 %v896_v38, 0.0 }
  0xb2   : > { %v2959_v47 = vpack.c.bf16 %v1013_v44, %v1000_v53  ;;  %v1039_v20 = vmax.f32 %v909_v36, 0.0  ;;  %v739_v46 = vand.u32 2147483647, %v609_v32  ;;  %v752_v6 = vand.u32 2147483647, %v622_v9  ;;  %2793 = vmatmul.mubr.msk.f32.gmra.mrb[24].mxu0 %vm1288_vm0, %v3398_v54 }
  0xb3   : > { %v742_v37 = vand.u32 2147483647, %v612_v5  ;;  %v635_v48 = vsub.f32 %v3167_v14, %v3610_v10  ;;  %v755_v57 = vand.u32 2147483647, %v625_v16  ;;  %v611_v53 = vsub.f32 %v3162_v7, %v3629_v4  ;;  %1666 = vmatprep.mubr.f32.mxu0 %v4366_v62  ;;  %2785 = vmatmul.mubr.msk.f32.gmra.mrb[24].mxu1 %vm1288_vm0, %v3416_v31 }
  0xb4   : > { %2960 = vmatprep.subr.bf16.mxu1 %v2959_v47  ;;  %v624_v38 = vsub.f32 %v3165_v13, %v3629_v4  ;;  %v2963_v36 = vpack.c.bf16 %v1039_v20, %v1026_v2  ;;  %v869_v44 = vsub.f32 1.0, %v739_v46  ;;  %v882_v55 = vsub.f32 1.0, %v752_v6  ;;  %1737 = vmatprep.mubr.f32.mxu1 %v4366_v62 }
  0xb5   : > { %v872_v32 = vsub.f32 1.0, %v742_v37  ;;  %v648_v9 = vsub.f32 %v3169_v17, %v3610_v10  ;;  %v885_v54 = vsub.f32 1.0, %v755_v57  ;;  %v741_v5 = vand.u32 2147483647, %v611_v53 }
  0xb6   : > { %v754_v16 = vand.u32 2147483647, %v624_v38  ;;  %v638_v47 = vsub.f32 %v3167_v14, %v3612_v39  ;;  %v999_v2 = vmax.f32 %v869_v44, 0.0  ;;  %v1012_v20 = vmax.f32 %v882_v55, 0.0  ;;  %2794 = vmatmul.mubr.msk.f32.gmra.mrb[26].mxu0 %vm1288_vm0, %v3416_v31 }
  0xb7   : > { %v1002_v12 = vmax.f32 %v872_v32, 0.0  ;;  %v765_v46 = vand.u32 2147483647, %v635_v48  ;;  %v1015_v6 = vmax.f32 %v885_v54, 0.0  ;;  %v871_v37 = vsub.f32 1.0, %v741_v5  ;;  %1856 = vmatprep.mubr.f32.mxu0 %v4366_v62 }
  0xb8   : > { %v884_v23 = vsub.f32 1.0, %v754_v16  ;;  %v778_v56 = vand.u32 2147483647, %v648_v9  ;;  %v2961_v57 = vpack.c.bf16 %v1012_v20, %v999_v2  ;;  %v651_v38 = vsub.f32 %v3169_v17, %v3612_v39 }
  0xb9   : > { %v895_v53 = vsub.f32 1.0, %v765_v46  ;;  %v768_v45 = vand.u32 2147483647, %v638_v47  ;;  %v2979_v63 = vpack.c.bf16 %v1015_v6, %v1002_v12  ;;  %v1001_v44 = vmax.f32 %v871_v37, 0.0 }
  0xba   : > { %v1014_v55 = vmax.f32 %v884_v23, 0.0  ;;  %v908_v32 = vsub.f32 1.0, %v778_v56  ;;  %2962 = vmatpush1.bf16.msra.mxu1 %v2961_v57  ;;  %v781_v1 = vand.u32 2147483647, %v651_v38  ;;  %v637_v54 = vsub.f32 %v3167_v14, %v3629_v4 }
  0xbb   : > { %v1025_v48 = vmax.f32 %v895_v53, 0.0  ;;  %v898_v31 = vsub.f32 1.0, %v768_v45  ;;  %2980 = vmatprep.subr.bf16.mxu0 %v2979_v63  ;;  %2964 = vmatprep.subr.bf16.mxu1 %v2963_v36  ;;  %v650_v16 = vsub.f32 %v3169_v17, %v3629_v4  ;;  %v922_v47 = vsub.f32 1.0, %v3607_v42 }
  0xbc   : > { %v2981_v9 = vpack.c.bf16 %v1014_v55, %v1001_v44  ;;  %v1038_v5 = vmax.f32 %v908_v32, 0.0  ;;  %v911_v12 = vsub.f32 1.0, %v781_v1  ;;  %v767_v23 = vand.u32 2147483647, %v637_v54 }
  0xbd   : > { %v1028_v2 = vmax.f32 %v898_v31, 0.0  ;;  %v935_v56 = vsub.f32 1.0, %v3616_v60  ;;  %v780_v45 = vand.u32 2147483647, %v650_v16  ;;  %v1052_v46 = vmax.f32 %v922_v47, 0.0 }
  0xbe   : > { %2982 = vmatpush1.bf16.msra.mxu0 %v2981_v9  ;;  %v2965_v20 = vpack.c.bf16 %v1038_v5, %v1025_v48  ;;  %v661_v63 = vsub.f32 %v3171_v18, %v3610_v10  ;;  %v1041_v6 = vmax.f32 %v911_v12, 0.0  ;;  %v897_v36 = vsub.f32 1.0, %v767_v23 }
  0xbf   : > { %v1065_v37 = vmax.f32 %v935_v56, 0.0  ;;  %v674_v57 = vsub.f32 %v3173_v19, %v3610_v10  ;;  %v910_v42 = vsub.f32 1.0, %v780_v45  ;;  %v664_v53 = vsub.f32 %v3171_v18, %v3612_v39 }
  0xc0   : > { %2966 = vmatpush1.bf16.msra.mxu1 %v2965_v20  ;;  %v791_v1 = vand.u32 2147483647, %v661_v63  ;;  %v677_v60 = vsub.f32 %v3173_v19, %v3612_v39  ;;  %v2983_v38 = vpack.c.bf16 %v1041_v6, %v1028_v2  ;;  %v1027_v44 = vmax.f32 %v897_v36, 0.0 }
  0xc1   : > { %v2967_v55 = vpack.c.bf16 %v1065_v37, %v1052_v46  ;;  %v804_v32 = vand.u32 2147483647, %v674_v57  ;;  %v1040_v48 = vmax.f32 %v910_v42, 0.0  ;;  %v794_v54 = vand.u32 2147483647, %v664_v53 }
  0xc2   : > { %v921_v31 = vsub.f32 1.0, %v791_v1  ;;  %v807_v9 = vand.u32 2147483647, %v677_v60  ;;  %2984 = vmatprep.subr.bf16.mxu0 %v2983_v38  ;;  %v663_v16 = vsub.f32 %v3171_v18, %v3629_v4  ;;  %v676_v47 = vsub.f32 %v3173_v19, %v3629_v4 }
  0xc3   : > { %2968 = vmatprep.subr.bf16.mxu1 %v2967_v55  ;;  %v934_v5 = vsub.f32 1.0, %v804_v32  ;;  %v688_v12 = vsub.f32 %v3179_v25, %v3571_v28  ;;  %v2985_v2 = vpack.c.bf16 %v1040_v48, %v1027_v44  ;;  %v924_v56 = vsub.f32 1.0, %v794_v54 }
  0xc4   : > { %v1051_v23 = vmax.f32 %v921_v31, 0.0  ;;  %v937_v20 = vsub.f32 1.0, %v807_v9  ;;  %v793_v46 = vand.u32 2147483647, %v663_v16  ;;  %v806_v63 = vand.u32 2147483647, %v676_v47 }
  0xc5   : > { %v1064_v45 = vmax.f32 %v934_v5, 0.0  ;;  %v701_v6 = vsub.f32 %v3183_v30, %v3571_v28  ;;  %2986 = vmatpush1.bf16.msra.mxu0 %v2985_v2  ;;  %v1054_v36 = vmax.f32 %v924_v56, 0.0  ;;  %v818_v57 = vand.u32 2147483647, %v688_v12 }
  0xc6   : > { %v1067_v37 = vmax.f32 %v937_v20, 0.0  ;;  %v687_v42 = vsub.f32 %v3179_v25, %v3610_v10  ;;  %v923_v53 = vsub.f32 1.0, %v793_v46  ;;  %v936_v60 = vsub.f32 1.0, %v806_v63 }
  0xc7   : > { %v2969_v1 = vpack.c.bf16 %v1064_v45, %v1051_v23  ;;  %v831_v38 = vand.u32 2147483647, %v701_v6  ;;  %v948_v55 = vsub.f32 1.0, %v818_v57  ;;  %v700_v32 = vsub.f32 %v3183_v30, %v3610_v10 }
  0xc8   : > { %v2987_v44 = vpack.c.bf16 %v1067_v37, %v1054_v36  ;;  %v817_v48 = vand.u32 2147483647, %v687_v42  ;;  %v1053_v31 = vmax.f32 %v923_v53, 0.0  ;;  %v1066_v54 = vmax.f32 %v936_v60, 0.0 }
  0xc9   : > { %2970 = vmatpush1.bf16.msra.mxu1 %v2969_v1  ;;  %v961_v9 = vsub.f32 1.0, %v831_v38  ;;  %v690_v5 = vsub.f32 %v3179_v25, %v3612_v39  ;;  %v1078_v16 = vmax.f32 %v948_v55, 0.0  ;;  %v830_v47 = vand.u32 2147483647, %v700_v32 }
  0xca   : > { %2988 = vmatprep.subr.bf16.mxu0 %v2987_v44  ;;  %v947_v12 = vsub.f32 1.0, %v817_v48  ;;  %v703_v2 = vsub.f32 %v3183_v30, %v3612_v39  ;;  %v2989_v23 = vpack.c.bf16 %v1066_v54, %v1053_v31  ;;  %v689_v45 = vsub.f32 %v3179_v25, %v3629_v4 }
  0xcb   : > { %v1091_v56 = vmax.f32 %v961_v9, 0.0  ;;  %v820_v20 = vand.u32 2147483647, %v690_v5  ;;  %v960_v46 = vsub.f32 1.0, %v830_v47  ;;  %v702_v36 = vsub.f32 %v3183_v30, %v3629_v4 }
  0xcc   : > { %v1077_v63 = vmax.f32 %v947_v12, 0.0  ;;  %v833_v6 = vand.u32 2147483647, %v703_v2  ;;  %2990 = vmatpush1.bf16.msra.mxu0 %v2989_v23  ;;  %v819_v42 = vand.u32 2147483647, %v689_v45  ;;  %v714_v1 = vsub.f32 %v3186_v33, %v3571_v28 }
  0xcd   : > { %v2971_v37 = vpack.c.bf16 %v1091_v56, %v1078_v16  ;;  %v950_v57 = vsub.f32 1.0, %v820_v20  ;;  %v1090_v53 = vmax.f32 %v960_v46, 0.0  ;;  %v832_v38 = vand.u32 2147483647, %v702_v36 }
  0xce   : > { %v963_v60 = vsub.f32 1.0, %v833_v6  ;;  %v727_v44 = vsub.f32 %v3188_v34, %v3571_v28  ;;  %v949_v32 = vsub.f32 1.0, %v819_v42  ;;  %v844_v48 = vand.u32 2147483647, %v714_v1 }
  0xcf   : > { %2972 = vmatprep.subr.bf16.mxu1 %v2971_v37  ;;  %v1080_v55 = vmax.f32 %v950_v57, 0.0  ;;  %v713_v31 = vsub.f32 %v3186_v33, %v3610_v10  ;;  %v2973_v54 = vpack.c.bf16 %v1090_v53, %v1077_v63  ;;  %v962_v5 = vsub.f32 1.0, %v832_v38 }
  0xd0   : > { %v1093_v9 = vmax.f32 %v963_v60, 0.0  ;;  %v857_v16 = vand.u32 2147483647, %v727_v44  ;;  %v1079_v47 = vmax.f32 %v949_v32, 0.0  ;;  %v974_v12 = vsub.f32 1.0, %v844_v48 }
  0xd1   : > { %v726_v2 = vsub.f32 %v3188_v34, %v3610_v10  ;;  %v843_v23 = vand.u32 2147483647, %v713_v31  ;;  %2974 = vmatpush1.bf16.msra.mxu1 %v2973_v54  ;;  %v1092_v28 = vmax.f32 %v962_v5, 0.0  ;;  %v716_v45 = vsub.f32 %v3186_v33, %v3612_v39 }
  0xd2   : > { %v2991_v56 = vpack.c.bf16 %v1093_v9, %v1080_v55  ;;  %v987_v20 = vsub.f32 1.0, %v857_v16  ;;  %v1104_v46 = vmax.f32 %v974_v12, 0.0  ;;  %v729_v63 = vsub.f32 %v3188_v34, %v3612_v39 }
  0xd3   : > { %v856_v6 = vand.u32 2147483647, %v726_v2  ;;  %v973_v36 = vsub.f32 1.0, %v843_v23  ;;  %v2993_v37 = vpack.c.bf16 %v1092_v28, %v1079_v47  ;;  %v846_v42 = vand.u32 2147483647, %v716_v45 }
  0xd4   : > { %2992 = vmatprep.subr.bf16.mxu0 %v2991_v56  ;;  %v1117_v57 = vmax.f32 %v987_v20, 0.0  ;;  %v715_v10 = vsub.f32 %v3186_v33, %v3629_v4  ;;  %v859_v60 = vand.u32 2147483647, %v729_v63  ;;  %v728_v38 = vsub.f32 %v3188_v34, %v3629_v4 }
  0xd5   : > { %v986_v1 = vsub.f32 1.0, %v856_v6  ;;  %v1103_v53 = vmax.f32 %v973_v36, 0.0  ;;  %2994 = vmatpush1.bf16.msra.mxu0 %v2993_v37  ;;  %v976_v55 = vsub.f32 1.0, %v846_v42  ;;  %v462_v39 = vadd.f32 %v3584_v61, %v3576_v43  ;;  %v3719_v42 = vld [vmem:[%s3332_s27] sm:$0xff] }
  0xd6   : > { %v2975_v44 = vpack.c.bf16 %v1117_v57, %v1104_v46  ;;  %v845_v32 = vand.u32 2147483647, %v715_v10  ;;  %v989_v31 = vsub.f32 1.0, %v859_v60  ;;  %v858_v54 = vand.u32 2147483647, %v728_v38 }
  0xd7   : > { %v1116_v48 = vmax.f32 %v986_v1, 0.0  ;;  %v285_v9 = vadd.f32 1.0, %v3586_v26  ;;  %v1106_v5 = vmax.f32 %v976_v55, 0.0  ;;  %v476_v47 = vadd.f32 %v3181_v29, %v462_v39 }
  0xd8   : > { %2976 = vmatprep.subr.bf16.mxu1 %v2975_v44  ;;  %v975_v16 = vsub.f32 1.0, %v845_v32  ;;  %v352_v12 = vmul.f32 0.0125, %v3578_v11  ;;  %v1119_v2 = vmax.f32 %v989_v31, 0.0  ;;  %v988_v23 = vsub.f32 1.0, %v858_v54 }
  0xd9   : > { %v2977_v4 = vpack.c.bf16 %v1116_v48, %v1103_v53  ;;  %v299_v56 = vmul.f32 0.05, %v285_v9  ;;  %v541_v20 = vadd.f32 1.0, %v476_v47  ;;  %v4374_v61 = vcvt.s32.f32 %v3503_v58 }
  0xda   : > { %v1105_v28 = vmax.f32 %v975_v16, 0.0  ;;  %v3708_v43 = vadd.f32 -1.0, %v352_v12  ;;  %v2995_v26 = vpack.c.bf16 %v1119_v2, %v1106_v5  ;;  %v1118_v46 = vmax.f32 %v988_v23, 0.0  ;;  %v3737_v5 = vld [vmem:[%s3332_s27 + $0x8] sm:$0xff] }
  0xdb   : > { %v209_v45 = vadd.f32 0.5, %v4374_v61  ;;  %2978 = vmatpush1.bf16.msra.mxu1 %v2977_v4  ;;  %v3712_v6 = vadd.f32 -1.0, %v299_v56  ;;  %v554_v36 = vmul.f32 80.0, %v541_v20  ;;  %v3106_v38 = vmov 0.0|0.0  }
  0xdc   : > { %v448_v11 = vmul.f32 %v3708_v43, %v3177_v22  ;;  %2996 = vmatprep.subr.bf16.mxu0 %v2995_v26  ;;  %v2997_v37 = vpack.c.bf16 %v1118_v46, %v1105_v28  ;;  %v4375_v31 = vmov %v4374_v61 }
  0xdd   : > { %v222_v63 = vmul.f32 0.05, %v209_v45  ;;  %v434_v57 = vmul.f32 %v3712_v6, %v3175_v21  ;;  %v2766_v10 = vadd.f32 -1.0, %v554_v36 }
  0xde   : > { %2795 = vmatmul.mubr.msk.f32.vlgmr.msra.gmra.mrb[26].mxu1 %vm1288_vm0, %v3719_v42  ;;  %2998 = vmatpush1.bf16.msra.mxu0 %v2997_v37 }
  0xdf   : > { %v235_v1 = vfloor.f32 %v222_v63  ;;  %v461_v53 = vadd.f32 %v448_v11, %v434_v57  ;;  %1743 = vmatprep.mubr.f32.mxu1 %v4366_v62  ;;  %v3724_v60 = vmul.f32 0.5, %v2766_v10  ;;  %3019 = vmatprep.subr.bf16.mxu0 %v3106_v38  ;;  %v3756_v11 = vld [vmem:[%s3332_s27 + $0x10] sm:$0xff] }
  0xe1   : > { %v248_v44 = vmul.f32 20.0, %v235_v1  ;;  %v327_v55 = vmul.f32 2.0, %v235_v1  ;;  %v475_v32 = vadd.f32 %v3181_v29, %v461_v53  ;;  %2804 = vmatmul.mubr.msk.f32.vlgmr.msra.gmra.mrb[28].mxu0 %vm1288_vm0, %v3719_v42  ;;  %v614_v39 = vsub.f32 %v3162_v7, %v3724_v60 }
  0xe2   : > { %v627_v48 = vsub.f32 %v3165_v13, %v3724_v60  ;;  %2796 = vmatmul.mubr.msk.f32.gmra.mrb[28].mxu1 %vm1288_vm0, %v3737_v5  ;;  %1862 = vmatprep.mubr.f32.mxu0 %v4366_v62  ;;  %v640_v47 = vsub.f32 %v3167_v14, %v3724_v60  ;;  %v653_v12 = vsub.f32 %v3169_v17, %v3724_v60 }
  0xe3   : > { %v261_v54 = vsub.f32 %v4375_v31, %v248_v44  ;;  %v340_v9 = vadd.f32 1.0, %v327_v55  ;;  %v540_v16 = vadd.f32 1.0, %v475_v32  ;;  %1749 = vmatprep.mubr.f32.mxu1 %v4366_v62  ;;  %v666_v58 = vsub.f32 %v3171_v18, %v3724_v60 }
  0xe4   : > { %v744_v4 = vand.u32 2147483647, %v614_v39  ;;  %v757_v2 = vand.u32 2147483647, %v627_v48  ;;  %v679_v56 = vsub.f32 %v3173_v19, %v3724_v60  ;;  %v770_v61 = vand.u32 2147483647, %v640_v47 }
  0xe5   : > { %v274_v23 = vmul.f32 2.0, %v261_v54  ;;  %v553_v28 = vmul.f32 80.0, %v540_v16  ;;  %v354_v20 = vmul.f32 0.0125, %v340_v9  ;;  %v692_v45 = vsub.f32 %v3179_v25, %v3724_v60  ;;  %2805 = vmatmul.mubr.msk.f32.gmra.mrb[30].mxu0 %vm1288_vm0, %v3737_v5 }
  0xe6   : > { %v874_v26 = vsub.f32 1.0, %v744_v4  ;;  %v887_v46 = vsub.f32 1.0, %v757_v2  ;;  %2797 = vmatmul.mubr.msk.f32.gmra.mrb[30].mxu1 %vm1288_vm0, %v3756_v11  ;;  %v783_v63 = vand.u32 2147483647, %v653_v12  ;;  %1868 = vmatprep.mubr.f32.mxu0 %v4366_v62  ;;  %v900_v10 = vsub.f32 1.0, %v770_v61  ;;  %v3777_v12 = vld [vmem:[%s3332_s27 + $0x18] sm:$0xff] }
  0xe7   : > { %v287_v36 = vadd.f32 1.0, %v274_v23  ;;  %v2765_v37 = vadd.f32 -1.0, %v553_v28  ;;  %v3760_v57 = vadd.f32 -1.0, %v354_v20  ;;  %1755 = vmatprep.mubr.f32.mxu1 %v4366_v62  ;;  %v796_v1 = vand.u32 2147483647, %v666_v58 }
  0xe8   : > { %v1004_v53 = vmax.f32 %v874_v26, 0.0  ;;  %v1017_v44 = vmax.f32 %v887_v46, 0.0  ;;  %v913_v32 = vsub.f32 1.0, %v783_v63  ;;  %v3768_v31 = vmax.f32 %v900_v10, 0.0 }
  0xe9   : > { %v301_v55 = vmul.f32 0.05, %v287_v36  ;;  %v3764_v39 = vmul.f32 0.5, %v2765_v37  ;;  %v450_v48 = vmul.f32 %v3760_v57, %v3177_v22  ;;  %v809_v54 = vand.u32 2147483647, %v679_v56  ;;  %2806 = vmatmul.mubr.msk.f32.gmra.mrb[32].mxu0 %vm1288_vm0, %v3756_v11 }
  0xea   : > { %v2999_v9 = vpack.c.bf16 %v1017_v44, %v1004_v53  ;;  %v3774_v47 = vmax.f32 %v913_v32, 0.0  ;;  %2798 = vmatmul.mubr.msk.f32.gmra.mrb[32].mxu1 %vm1288_vm0, %v3777_v12  ;;  %v926_v58 = vsub.f32 1.0, %v796_v1  ;;  %1874 = vmatprep.mubr.f32.mxu0 %v4366_v62  ;;  %v3804_v1 = vld [vmem:[%s3332_s27 + $0x20] sm:$0xff] }
  0xeb   : > { %v3770_v16 = vadd.f32 -1.0, %v301_v55  ;;  %v613_v22 = vsub.f32 %v3162_v7, %v3764_v39  ;;  %v626_v4 = vsub.f32 %v3165_v13, %v3764_v39  ;;  %v639_v2 = vsub.f32 %v3167_v14, %v3764_v39  ;;  %1761 = vmatprep.mubr.f32.mxu1 %v4366_v62 }
  0xec   : > { %v652_v23 = vsub.f32 %v3169_v17, %v3764_v39  ;;  %3000 = vmatprep.subr.bf16.mxu1 %v2999_v9  ;;  %v3003_v28 = vpack.c.bf16 %v3774_v47, %v3768_v31  ;;  %v939_v20 = vsub.f32 1.0, %v809_v54  ;;  %v3795_v61 = vmax.f32 %v926_v58, 0.0 }
  0xed   : > { %v436_v56 = vmul.f32 %v3770_v16, %v3175_v21  ;;  %v743_v26 = vand.u32 2147483647, %v613_v22  ;;  %v756_v46 = vand.u32 2147483647, %v626_v4  ;;  %v769_v36 = vand.u32 2147483647, %v639_v2  ;;  %2807 = vmatmul.mubr.msk.f32.gmra.mrb[34].mxu0 %vm1288_vm0, %v3777_v12 }
  0xee   : > { %v665_v63 = vsub.f32 %v3171_v18, %v3764_v39  ;;  %v782_v10 = vand.u32 2147483647, %v652_v23  ;;  %v3801_v21 = vmax.f32 %v939_v20, 0.0  ;;  %2799 = vmatmul.mubr.msk.f32.gmra.mrb[34].mxu1 %vm1288_vm0, %v3804_v1  ;;  %v678_v53 = vsub.f32 %v3173_v19, %v3764_v39  ;;  %1880 = vmatprep.mubr.f32.mxu0 %v4366_v62 }
  0xef   : > { %v463_v37 = vadd.f32 %v450_v48, %v436_v56  ;;  %v873_v44 = vsub.f32 1.0, %v743_v26  ;;  %v886_v55 = vsub.f32 1.0, %v756_v46  ;;  %v899_v32 = vsub.f32 1.0, %v769_v36  ;;  %1767 = vmatprep.mubr.f32.mxu1 %v4366_v62  ;;  %v3818_v26 = vld [vmem:[%s3332_s27 + $0x28] sm:$0xff] }
  0xf0   : > { %v795_v48 = vand.u32 2147483647, %v665_v63  ;;  %v912_v54 = vsub.f32 1.0, %v782_v10  ;;  %v3007_v9 = vpack.c.bf16 %v3801_v21, %v3795_v61  ;;  %v808_v47 = vand.u32 2147483647, %v678_v53 }
  0xf1   : > { %v477_v31 = vadd.f32 %v3181_v29, %v463_v37  ;;  %v1003_v58 = vmax.f32 %v873_v44, 0.0  ;;  %v1016_v22 = vmax.f32 %v886_v55, 0.0  ;;  %v1029_v4 = vmax.f32 %v899_v32, 0.0  ;;  %2808 = vmatmul.mubr.msk.f32.gmra.mrb[36].mxu0 %vm1288_vm0, %v3804_v1 }
  0xf2   : > { %v925_v2 = vsub.f32 1.0, %v795_v48  ;;  %v1042_v56 = vmax.f32 %v912_v54, 0.0  ;;  %v938_v20 = vsub.f32 1.0, %v808_v47  ;;  %2800 = vmatmul.mubr.msk.f32.gmra.mrb[36].mxu1 %vm1288_vm0, %v3818_v26  ;;  %v705_v29 = vsub.f32 %v3183_v30, %v3724_v60  ;;  %1886 = vmatprep.mubr.f32.mxu0 %v4366_v62 }
  0xf3   : > { %v542_v23 = vadd.f32 1.0, %v477_v31  ;;  %v3001_v61 = vpack.c.bf16 %v1016_v22, %v1003_v58  ;;  %v822_v36 = vand.u32 2147483647, %v692_v45  ;;  %1773 = vmatprep.mubr.f32.mxu1 %v4366_v62  ;;  %v691_v63 = vsub.f32 %v3179_v25, %v3764_v39 }
  0xf4   : > { %v1055_v46 = vmax.f32 %v925_v2, 0.0  ;;  %v3005_v10 = vpack.c.bf16 %v1042_v56, %v1029_v4  ;;  %v1068_v21 = vmax.f32 %v938_v20, 0.0  ;;  %v835_v53 = vand.u32 2147483647, %v705_v29  ;;  %v3841_v2 = vld [vmem:[%s3332_s27 + $0x30] sm:$0xff] }
  0xf5   : > { %v555_v37 = vmul.f32 80.0, %v542_v23  ;;  %3002 = vmatpush1.bf16.msra.mxu1 %v3001_v61  ;;  %v952_v44 = vsub.f32 1.0, %v822_v36  ;;  %v704_v55 = vsub.f32 %v3183_v30, %v3764_v39  ;;  %v821_v32 = vand.u32 2147483647, %v691_v63  ;;  %2809 = vmatmul.mubr.msk.f32.gmra.mrb[38].mxu0 %vm1288_vm0, %v3818_v26 }
  0xf6   : > { %v718_v48 = vsub.f32 %v3186_v33, %v3724_v60  ;;  %3004 = vmatprep.subr.bf16.mxu1 %v3003_v28  ;;  %v3009_v31 = vpack.c.bf16 %v1068_v21, %v1055_v46  ;;  %v965_v54 = vsub.f32 1.0, %v835_v53  ;;  %v731_v47 = vsub.f32 %v3188_v34, %v3724_v60  ;;  %1892 = vmatprep.mubr.f32.mxu0 %v4366_v62 }
  0xf7   : > { %v2767_v45 = vadd.f32 -1.0, %v555_v37  ;;  %v1082_v58 = vmax.f32 %v952_v44, 0.0  ;;  %v834_v22 = vand.u32 2147483647, %v704_v55  ;;  %v951_v4 = vsub.f32 1.0, %v821_v32  ;;  %2801 = vmatmul.mubr.msk.f32.gmra.mrb[38].mxu1 %vm1288_vm0, %v3841_v2  ;;  %v3867_v32 = vld [vmem:[%s3332_s27 + $0x38] sm:$0xff] }
  0xf8   : > { %v848_v23 = vand.u32 2147483647, %v718_v48  ;;  %v1095_v56 = vmax.f32 %v965_v54, 0.0  ;;  %1779 = vmatprep.mubr.f32.mxu1 %v4366_v62  ;;  %v861_v20 = vand.u32 2147483647, %v731_v47  ;;  %v717_v60 = vsub.f32 %v3186_v33, %v3764_v39 }
  0xf9   : > { %v3845_v28 = vmul.f32 0.5, %v2767_v45  ;;  %3006 = vmatpush1.bf16.msra.mxu1 %v3005_v10  ;;  %v964_v29 = vsub.f32 1.0, %v834_v22  ;;  %v1081_v61 = vmax.f32 %v951_v4, 0.0  ;;  %v730_v36 = vsub.f32 %v3188_v34, %v3764_v39  ;;  %2810 = vmatmul.mubr.msk.f32.gmra.mrb[40].mxu0 %vm1288_vm0, %v3841_v2 }
  0xfa   : > { %v978_v46 = vsub.f32 1.0, %v848_v23  ;;  %3008 = vmatprep.subr.bf16.mxu1 %v3007_v9  ;;  %v3011_v39 = vpack.c.bf16 %v1095_v56, %v1082_v58  ;;  %1898 = vmatprep.mubr.f32.mxu0 %v4366_v62 }
  0xfb   : > { %v615_v63 = vsub.f32 %v3162_v7, %v3845_v28  ;;  %v628_v37 = vsub.f32 %v3165_v13, %v3845_v28  ;;  %v641_v21 = vsub.f32 %v3167_v14, %v3845_v28  ;;  %v654_v53 = vsub.f32 %v3169_v17, %v3845_v28  ;;  %2802 = vmatmul.mubr.msk.f32.gmra.mrb[40].mxu1 %vm1288_vm0, %v3867_v32 }
  0xfc   : > { %v667_v10 = vsub.f32 %v3171_v18, %v3845_v28  ;;  %v680_v44 = vsub.f32 %v3173_v19, %v3845_v28  ;;  %v1094_v55 = vmax.f32 %v964_v29, 0.0  ;;  %v693_v9 = vsub.f32 %v3179_v25, %v3845_v28  ;;  %1785 = vmatprep.mubr.f32.mxu1 %v4366_v62 }
  0xfd   : > { %v745_v48 = vand.u32 2147483647, %v615_v63  ;;  %v758_v45 = vand.u32 2147483647, %v628_v37  ;;  %v771_v17 = vand.u32 2147483647, %v641_v21  ;;  %3010 = vmatpush1.bf16.msra.mxu1 %v3009_v31  ;;  %v706_v23 = vsub.f32 %v3183_v30, %v3845_v28  ;;  %2811 = vmatmul.mubr.msk.f32.gmra.mrb[42].mxu0 %vm1288_vm0, %v3867_v32 }
  0xfe   : > { %v784_v18 = vand.u32 2147483647, %v654_v53  ;;  %v797_v19 = vand.u32 2147483647, %v667_v10  ;;  %v810_v54 = vand.u32 2147483647, %v680_v44  ;;  %v3013_v47 = vpack.c.bf16 %v1094_v55, %v1081_v61  ;;  %3012 = vmatprep.subr.bf16.mxu1 %v3011_v39  ;;  %1904 = vmatprep.mubr.f32.mxu0 %v4366_v62 }
  0xff   : > { %v875_v58 = vsub.f32 1.0, %v745_v48  ;;  %v888_v22 = vsub.f32 1.0, %v758_v45  ;;  %v901_v4 = vsub.f32 1.0, %v771_v17  ;;  %v823_v63 = vand.u32 2147483647, %v693_v9  ;;  %v3880_v37 = vld [vmem:[%s3332_s27 + $0x40] sm:$0xff] }
 0x100   : > { %v914_v56 = vsub.f32 1.0, %v784_v18  ;;  %v927_v29 = vsub.f32 1.0, %v797_v19  ;;  %v940_v25 = vsub.f32 1.0, %v810_v54  ;;  %2803 = vmatmul.mubr.msk.f32.gmra.mrb[42].mxu1 %vm1288_vm0, %v3880_v37  ;;  %v836_v53 = vand.u32 2147483647, %v706_v23 }
 0x101   : > { %v1005_v31 = vmax.f32 %v875_v58, 0.0  ;;  %v1018_v61 = vmax.f32 %v888_v22, 0.0  ;;  %v1031_v21 = vmax.f32 %v901_v4, 0.0  ;;  %1975 = vmatprep.mubr.f32.mxu1 %v4366_v62  ;;  %3014 = vmatpush1.bf16.msra.mxu1 %v3013_v47  ;;  %v991_v39 = vsub.f32 1.0, %v861_v20 }
 0x102   : > { %v1044_v30 = vmax.f32 %v914_v56, 0.0  ;;  %v1057_v44 = vmax.f32 %v927_v29, 0.0  ;;  %v1108_v55 = vmax.f32 %v978_v46, 0.0  ;;  %v1070_v48 = vmax.f32 %v940_v25, 0.0  ;;  %2812 = vmatmul.mubr.msk.f32.gmra.mrb[44].mxu0 %vm1288_vm0, %v3880_v37 }
 0x103   : > { %v3020_v10 = vpack.c.bf16 %v1018_v61, %v1005_v31  ;;  %v953_v45 = vsub.f32 1.0, %v823_v63  ;;  %v966_v17 = vsub.f32 1.0, %v836_v53  ;;  %v847_v9 = vand.u32 2147483647, %v717_v60  ;;  %2872 = vmatprep.mubr.msk.f32.mxu0 %vm3107_vm1, %v4366_v62 }
 0x104   : > { %v3023_v18 = vpack.c.bf16 %v1044_v30, %v1031_v21  ;;  %v1121_v19 = vmax.f32 %v991_v39, 0.0  ;;  %v860_v54 = vand.u32 2147483647, %v730_v36  ;;  %v719_v47 = vsub.f32 %v3186_v33, %v3845_v28 }
 0x105   : > { %3021 = vmatpush3.bf16.msra.mxu0 %v3020_v10  ;;  %v977_v20 = vsub.f32 1.0, %v847_v9  ;;  %v732_v60 = vsub.f32 %v3188_v34, %v3845_v28  ;;  %v3026_v36 = vpack.c.bf16 %v1070_v48, %v1057_v44  ;;  %v1083_v33 = vmax.f32 %v953_v45, 0.0 }
 0x106   : > { %3022 = vmatprep.subr.bf16.mxu0 %v3106_v38  ;;  %v3015_v46 = vpack.c.bf16 %v1121_v19, %v1108_v55  ;;  %v990_v58 = vsub.f32 1.0, %v860_v54  ;;  %v849_v22 = vand.u32 2147483647, %v719_v47  ;;  %v1096_v56 = vmax.f32 %v966_v17, 0.0 }
 0x107   : > { %v1107_v4 = vmax.f32 %v977_v20, 0.0  ;;  %v862_v23 = vand.u32 2147483647, %v732_v60  ;;  %v3900_v21 = vstv %s159_s29  ;;  %v3902_v53 = vstv %s161_s30 }
 0x108   : > { %3016 = vmatprep.subr.bf16.mxu1 %v3015_v46  ;;  %v1120_v29 = vmax.f32 %v990_v58, 0.0  ;;  %v979_v25 = vsub.f32 1.0, %v849_v22  ;;  %v3029_v34 = vpack.c.bf16 %v1096_v56, %v1083_v33  ;;  %v369_v10 = vmul.f32 %v3209_v27, %v3900_v21 }
 0x109   : > { %3024 = vmatpush3.bf16.msra.mxu0 %v3023_v18  ;;  %v992_v63 = vsub.f32 1.0, %v862_v23  ;;  %v383_v44 = vmul.f32 %v3201_v3, %v3902_v53  ;;  %v370_v39 = vmul.f32 %v3211_v35, %v3900_v21  ;;  %v384_v55 = vmul.f32 %v3203_v8, %v3902_v53 }
 0x10a   : > { %3025 = vmatprep.subr.bf16.mxu0 %v3106_v38  ;;  %v3017_v31 = vpack.c.bf16 %v1120_v29, %v1107_v4  ;;  %v1109_v28 = vmax.f32 %v979_v25, 0.0 }
 0x10b   : > { %v1122_v61 = vmax.f32 %v992_v63, 0.0  ;;  %v396_v48 = vadd.f32 %v383_v44, %v369_v10  ;;  %v397_v45 = vadd.f32 %v384_v55, %v370_v39 }
 0x10c   : > { %3018 = vmatpush1.bf16.msra.mxu1 %v3017_v31 }
 0x10d   : > { %3027 = vmatpush3.bf16.msra.mxu0 %v3026_v36  ;;  %v3032_v30 = vpack.c.bf16 %v1122_v61, %v1109_v28 }
 0x10e   : > { %3028 = vmatprep.subr.bf16.mxu0 %v3106_v38 }
 0x10f   : > { %2813 = vmatmul.mubr.msk.f32.vlgmr.msra.gmra.mrb[44].mxu1 %vm1288_vm0, %v3719_v42 }
 0x110   : > { %1981 = vmatprep.mubr.f32.mxu1 %v4366_v62 }
 0x111   : > { %3030 = vmatpush3.bf16.msra.mxu0 %v3029_v34 }
 0x112   : > { %3031 = vmatprep.subr.bf16.mxu0 %v3106_v38  ;;  %v3919_v38 = vstv %s163_s4 }
 0x113   : > { %2814 = vmatmul.mubr.msk.f32.gmra.mrb[46].mxu1 %vm1288_vm0, %v3737_v5  ;;  %v410_v3 = vadd.f32 %v3919_v38, %v396_v48  ;;  %v411_v8 = vadd.f32 %v3919_v38, %v397_v45 }
 0x114   : > { %1987 = vmatprep.mubr.f32.mxu1 %v4366_v62 }
 0x115   : > { %3033 = vmatpush3.bf16.msra.mxu0 %v3032_v30  ;;  %v478_v27 = vadd.f32 1.0, %v410_v3  ;;  %v479_v35 = vadd.f32 1.0, %v411_v8  ;;  %v371_v3 = vmul.f32 %v3243_v41, %v3900_v21  ;;  %v385_v8 = vmul.f32 %v3233_v15, %v3902_v53 }
 0x117   : > { %2815 = vmatmul.mubr.msk.f32.gmra.mrb[48].mxu1 %vm1288_vm0, %v3756_v11  ;;  %v398_v15 = vadd.f32 %v385_v8, %v371_v3 }
 0x118   : > { %2873 = vmatmul.mubr.msk.f32.vlgmr.msra.gmra.mrb[46].mxu0 %vm1288_vm0, %v3719_v42  ;;  %1993 = vmatprep.mubr.f32.mxu1 %v4366_v62  ;;  %v491_v42 = vmul.f32 20.0, %v478_v27 }
 0x119   : > { %2875 = vmatprep.mubr.msk.f32.mxu0 %vm3107_vm1, %v4366_v62 }
 0x11b   : > { %2816 = vmatmul.mubr.msk.f32.gmra.mrb[50].mxu1 %vm1288_vm0, %v3777_v12 }
 0x11c   : > { %2876 = vmatmul.mubr.msk.f32.gmra.mrb[48].mxu0 %vm1288_vm0, %v3737_v5  ;;  %1999 = vmatprep.mubr.f32.mxu1 %v4366_v62  ;;  %v492_v5 = vmul.f32 20.0, %v479_v35 }
 0x11d   : > { %2878 = vmatprep.mubr.msk.f32.mxu0 %vm3107_vm1, %v4366_v62 }
 0x11e   : > { %v2743_v17 = vadd.f32 -1.0, %v492_v5  ;;  %v386_v5 = vmul.f32 %v3217_v49, %v3902_v53  ;;  %v387_v49 = vmul.f32 %v3256_v50, %v3902_v53 }
 0x11f   : > { %2817 = vmatmul.mubr.msk.f32.gmra.mrb[52].mxu1 %vm1288_vm0, %v3804_v1 }
 0x120   : > { %2879 = vmatmul.mubr.msk.f32.gmra.mrb[50].mxu0 %vm1288_vm0, %v3756_v11  ;;  %2005 = vmatprep.mubr.f32.mxu1 %v4366_v62  ;;  %v2742_v11 = vadd.f32 -1.0, %v491_v42  ;;  %v518_v9 = vmul.f32 0.5, %v2743_v17  ;;  %v372_v42 = vmul.f32 %v3227_v0, %v3900_v21 }
 0x121   : > { %2881 = vmatprep.mubr.msk.f32.mxu0 %vm3107_vm1, %v4366_v62 }
 0x122   : > { %v1124_v19 = vsub.f32 %v3162_v7, %v518_v9  ;;  %v1137_v54 = vsub.f32 %v3165_v13, %v518_v9 }
 0x123   : > { %2818 = vmatmul.mubr.msk.f32.gmra.mrb[54].mxu1 %vm1288_vm0, %v3818_v26 }
 0x124   : > { %2882 = vmatmul.mubr.msk.f32.gmra.mrb[52].mxu0 %vm1288_vm0, %v3777_v12  ;;  %2011 = vmatprep.mubr.f32.mxu1 %v4366_v62  ;;  %v517_v12 = vmul.f32 0.5, %v2742_v11  ;;  %v1163_v20 = vand.u32 2147483647, %v1124_v19  ;;  %v1176_v60 = vand.u32 2147483647, %v1137_v54 }
 0x125   : > { %2884 = vmatprep.mubr.msk.f32.mxu0 %vm3107_vm1, %v4366_v62 }
 0x126   : > { %v1136_v18 = vsub.f32 %v3165_v13, %v517_v12  ;;  %v1149_v46 = vsub.f32 %v3167_v14, %v517_v12  ;;  %v1202_v36 = vsub.f32 1.0, %v1163_v20  ;;  %v1215_v4 = vsub.f32 1.0, %v1176_v60 }
 0x127   : > { %2819 = vmatmul.mubr.msk.f32.gmra.mrb[56].mxu1 %vm1288_vm0, %v3841_v2  ;;  %v373_v20 = vmul.f32 %v3320_v51, %v3900_v21 }
 0x128   : > { %2885 = vmatmul.mubr.msk.f32.gmra.mrb[54].mxu0 %vm1288_vm0, %v3804_v1  ;;  %2017 = vmatprep.mubr.f32.mxu1 %v4366_v62  ;;  %v1123_v1 = vsub.f32 %v3162_v7, %v517_v12  ;;  %v1175_v47 = vand.u32 2147483647, %v1136_v18  ;;  %v1188_v23 = vand.u32 2147483647, %v1149_v46  ;;  %v1254_v34 = vmax.f32 %v1215_v4, 0.0 }
 0x129   : > { %2887 = vmatprep.mubr.msk.f32.mxu0 %vm3107_vm1, %v4366_v62  ;;  %v399_v46 = vadd.f32 %v386_v5, %v372_v42 }
 0x12a   : > { %v1214_v22 = vsub.f32 1.0, %v1175_v47  ;;  %v1227_v28 = vsub.f32 1.0, %v1188_v23  ;;  %v4377_v23 = vld [vmem:[#allocation5_spill] sm:$0xff] }
 0x12b   : > { %2820 = vmatmul.mubr.msk.f32.gmra.mrb[58].mxu1 %vm1288_vm0, %v3867_v32 }
 0x12c   : > { %2888 = vmatmul.mubr.msk.f32.gmra.mrb[56].mxu0 %vm1288_vm0, %v3818_v26  ;;  %2023 = vmatprep.mubr.f32.mxu1 %v4366_v62  ;;  %v1162_v26 = vand.u32 2147483647, %v1123_v1  ;;  %v1253_v31 = vmax.f32 %v1214_v22, 0.0  ;;  %v1266_v27 = vmax.f32 %v1227_v28, 0.0 }
 0x12d   : > { %2890 = vmatprep.mubr.msk.f32.mxu0 %vm3107_vm1, %v4366_v62 }
 0x12e   : > { %v1201_v58 = vsub.f32 1.0, %v1162_v26 }
 0x12f   : > { %2821 = vmatmul.mubr.msk.f32.gmra.mrb[60].mxu1 %vm1288_vm0, %v3880_v37 }
 0x130   : > { %2891 = vmatmul.mubr.msk.f32.gmra.mrb[58].mxu0 %vm1288_vm0, %v3841_v2  ;;  %v1150_v2 = vsub.f32 %v3167_v14, %v518_v9  ;;  %v1240_v25 = vmax.f32 %v1201_v58, 0.0 }
 0x131   : > { %2893 = vmatprep.mubr.msk.f32.mxu0 %vm3107_vm1, %v4366_v62 }
 0x132   : > { %v1189_v56 = vand.u32 2147483647, %v1150_v2 }
 0x134   : > { %2894 = vmatmul.mubr.msk.f32.gmra.mrb[60].mxu0 %vm1288_vm0, %v3867_v32  ;;  %v1228_v61 = vsub.f32 1.0, %v1189_v56  ;;  %v388_v56 = vmul.f32 %v4377_v23, %v3902_v53 }
 0x135   : > { %2896 = vmatprep.mubr.msk.f32.mxu0 %vm3107_vm1, %v4366_v62  ;;  %v1241_v62 = vmax.f32 %v1202_v36, 0.0  ;;  %v4376_v36 = vld [vmem:[#allocation6_spill] sm:$0xff] }
 0x136   : > { %v3983_v33 = vpop.f32.mrb[0].mxu1  ;;  %v1382_v29 = vpop.f32.mrb[0].mxu0  ;;  %v1267_v11 = vmax.f32 %v1228_v61, 0.0  ;;  %v374_v4 = vmul.f32 %v4376_v36, %v3900_v21 }
 0x137   : > { %v3985_v32 = vpop.f32.mrb[1].mxu1  ;;  %v1384_v63 = vpop.f32.mrb[1].mxu0  ;;  %v2140_v10 = vmul.f32 %v1382_v29, %v1240_v25 }
 0x138   : > { %2897 = vmatmul.mubr.msk.f32.gmra.mrb[62].mxu0 %vm1288_vm0, %v3880_v37  ;;  %v2141_v37 = vmul.f32 %v1384_v63, %v1241_v62 }
 0x13a   : > { %v1388_v30 = vpop.f32.mrb[2].mxu0 }
 0x13b   : > { %v2153_v44 = vmul.f32 %v1388_v30, %v1253_v31  ;;  %v1390_v39 = vpop.f32.mrb[3].mxu0  ;;  %v1418_v55 = vpop.f32.mrb[2].mxu1 }
 0x13c   : > { %v2154_v48 = vmul.f32 %v1390_v39, %v1254_v34  ;;  %v1420_v45 = vpop.f32.mrb[3].mxu1  ;;  %v2433_v12 = vmul.f32 %v1418_v55, %v1240_v25  ;;  %v400_v39 = vadd.f32 %v387_v49, %v373_v20 }
 0x13d   : > { %v2179_v35 = vadd.f32 %v2153_v44, %v2140_v10  ;;  %v2434_v1 = vmul.f32 %v1420_v45, %v1241_v62  ;;  %v401_v45 = vadd.f32 %v388_v56, %v374_v4 }
 0x13e   : > { %v2187_v17 = vadd.f32 %v2154_v48, %v2141_v37  ;;  %v1394_v9 = vpop.f32.mrb[4].mxu0  ;;  %v412_v37 = vadd.f32 %v3919_v38, %v398_v15  ;;  %v413_v48 = vadd.f32 %v3919_v38, %v399_v46 }
 0x13f   : > { %v2166_v18 = vmul.f32 %v1394_v9, %v1266_v27  ;;  %v1424_v19 = vpop.f32.mrb[4].mxu1  ;;  %v1396_v54 = vpop.f32.mrb[5].mxu0  ;;  %v415_v20 = vadd.f32 %v3919_v38, %v401_v45 }
 0x140   : > { %v2446_v41 = vmul.f32 %v1424_v19, %v1253_v31  ;;  %v2167_v26 = vmul.f32 %v1396_v54, %v1267_v11  ;;  %v1426_v47 = vpop.f32.mrb[5].mxu1 }
 0x141   : > { %v2180_v60 = vadd.f32 %v2179_v35, %v2166_v18  ;;  %v2447_v0 = vmul.f32 %v1426_v47, %v1254_v34  ;;  %v2313_v18 = vmul.f32 %v3983_v33, %v1266_v27 }
 0x142   : > { %v2472_v2 = vadd.f32 %v2446_v41, %v2433_v12  ;;  %v2188_v58 = vadd.f32 %v2187_v17, %v2167_v26  ;;  %v1400_v22 = vpop.f32.mrb[6].mxu0  ;;  %v414_v41 = vadd.f32 %v3919_v38, %v400_v39  ;;  %v2314_v26 = vmul.f32 %v3985_v32, %v1267_v11 }
 0x143   : > { %v2181_v29 = vrot.slane %v2180_v60, 4  ;;  %v2480_v63 = vadd.f32 %v2447_v0, %v2434_v1  ;;  %v1430_v28 = vpop.f32.mrb[6].mxu1  ;;  %v1402_v61 = vpop.f32.mrb[7].mxu0  ;;  %v2287_v35 = vmul.f32 %v1400_v22, %v1240_v25  ;;  %v480_v0 = vadd.f32 1.0, %v412_v37 }
 0x144   : > { %v2189_v51 = vrot.slane %v2188_v58, 4  ;;  %v2459_v30 = vmul.f32 %v1430_v28, %v1266_v27  ;;  %v1432_v10 = vpop.f32.mrb[7].mxu1  ;;  %v2288_v9 = vmul.f32 %v1402_v61, %v1241_v62  ;;  %v482_v27 = vadd.f32 1.0, %v414_v41 }
 0x145   : > { %v2460_v44 = vmul.f32 %v1432_v10, %v1267_v11  ;;  %v2182_v3 = vadd.f32 %v2181_v29, %v2180_v60  ;;  %v483_v22 = vadd.f32 1.0, %v415_v20  ;;  %v493_v32 = vmul.f32 20.0, %v480_v0 }
 0x146   : > { %v2473_v55 = vadd.f32 %v2472_v2, %v2459_v30  ;;  %v1406_v50 = vpop.f32.mrb[8].mxu0  ;;  %v2190_v17 = vadd.f32 %v2189_v51, %v2188_v58  ;;  %v495_v61 = vmul.f32 20.0, %v482_v27 }
 0x147   : > { %v2481_v8 = vadd.f32 %v2480_v63, %v2460_v44  ;;  %v2300_v42 = vmul.f32 %v1406_v50, %v1253_v31  ;;  %v1408_v5 = vpop.f32.mrb[9].mxu0  ;;  %v2183_v60 = vrot.slane %v2182_v3, 2  ;;  %v496_v30 = vmul.f32 20.0, %v483_v22 }
 0x148   : > { %v2474_v12 = vrot.slane %v2473_v55, 4  ;;  %v2301_v1 = vmul.f32 %v1408_v5, %v1254_v34  ;;  %v2191_v46 = vrot.slane %v2190_v17, 2  ;;  %v481_v34 = vadd.f32 1.0, %v413_v48 }
 0x149   : > { %v2482_v19 = vrot.slane %v2481_v8, 4  ;;  %v2326_v54 = vadd.f32 %v2300_v42, %v2287_v35  ;;  %v2184_v36 = vadd.f32 %v2183_v60, %v2182_v3  ;;  %v2744_v39 = vadd.f32 -1.0, %v493_v32 }
 0x14a   : > { %v2475_v47 = vadd.f32 %v2474_v12, %v2473_v55  ;;  %v2334_v15 = vadd.f32 %v2301_v1, %v2288_v9  ;;  %v2192_v11 = vadd.f32 %v2191_v46, %v2190_v17  ;;  %v494_v29 = vmul.f32 20.0, %v481_v34 }
 0x14b   : > { %v2483_v25 = vadd.f32 %v2482_v19, %v2481_v8  ;;  %v2327_v31 = vadd.f32 %v2326_v54, %v2313_v18  ;;  %v2185_v10 = vrot.slane %v2184_v36, 1  ;;  %v2746_v8 = vadd.f32 -1.0, %v495_v61 }
 0x14c   : > { %v2476_v49 = vrot.slane %v2475_v47, 2  ;;  %v2335_v62 = vadd.f32 %v2334_v15, %v2314_v26  ;;  %v2193_v55 = vrot.slane %v2192_v11, 1  ;;  %v2745_v48 = vadd.f32 -1.0, %v494_v29 }
 0x14d   : > { %v2484_v2 = vrot.slane %v2483_v25, 2  ;;  %v2328_v33 = vrot.slane %v2327_v31, 4  ;;  %v2747_v42 = vadd.f32 -1.0, %v496_v30  ;;  %v2186_v5 = vadd.f32 %v2185_v10, %v2184_v36 }
 0x14e   : > { %v2336_v58 = vrot.slane %v2335_v62, 4  ;;  %v2477_v23 = vadd.f32 %v2476_v49, %v2475_v47  ;;  %v519_v12 = vmul.f32 0.5, %v2744_v39  ;;  %v2194_v9 = vadd.f32 %v2193_v55, %v2192_v11 }
 0x14f   : > { %v2329_v4 = vadd.f32 %v2328_v33, %v2327_v31  ;;  %v2485_v63 = vadd.f32 %v2484_v2, %v2483_v25  ;;  %v520_v19 = vmul.f32 0.5, %v2745_v48  ;;  %v521_v26 = vmul.f32 0.5, %v2746_v8 }
 0x150   : > { %v2337_v56 = vadd.f32 %v2336_v58, %v2335_v62  ;;  %v2478_v50 = vrot.slane %v2477_v23, 1  ;;  %v522_v20 = vmul.f32 0.5, %v2747_v42  ;;  %v1125_v25 = vsub.f32 %v3162_v7, %v519_v12 }
 0x151   : > { %v2330_v28 = vrot.slane %v2329_v4, 2  ;;  %v2486_v45 = vrot.slane %v2485_v63, 1  ;;  %v1138_v31 = vsub.f32 %v3165_v13, %v519_v12  ;;  %v1126_v46 = vsub.f32 %v3162_v7, %v520_v19 }
 0x152   : > { %v2338_v51 = vrot.slane %v2337_v56, 2  ;;  %v2479_v1 = vadd.f32 %v2478_v50, %v2477_v23  ;;  %v1139_v49 = vsub.f32 %v3165_v13, %v520_v19  ;;  %v1127_v62 = vsub.f32 %v3162_v7, %v521_v26 }
 0x153   : > { %v2331_v44 = vadd.f32 %v2330_v28, %v2329_v4  ;;  %v2487_v54 = vadd.f32 %v2486_v45, %v2485_v63  ;;  %v1140_v34 = vsub.f32 %v3165_v13, %v521_v26  ;;  %v1128_v2 = vsub.f32 %v3162_v7, %v522_v20 }
 0x154   : > { %v2339_v37 = vadd.f32 %v2338_v51, %v2337_v56  ;;  %v1141_v33 = vsub.f32 %v3165_v13, %v522_v20  ;;  %v1164_v27 = vand.u32 2147483647, %v1125_v25  ;;  %v1177_v58 = vand.u32 2147483647, %v1138_v31 }
 0x155   : > { %v2332_v3 = vrot.slane %v2331_v44, 1  ;;  %v1151_v22 = vsub.f32 %v3167_v14, %v519_v12  ;;  %v1165_v36 = vand.u32 2147483647, %v1126_v46  ;;  %v1178_v4 = vand.u32 2147483647, %v1139_v49 }
 0x156   : > { %v2340_v35 = vrot.slane %v2339_v37, 1  ;;  %v1152_v32 = vsub.f32 %v3167_v14, %v520_v19  ;;  %v1166_v11 = vand.u32 2147483647, %v1127_v62  ;;  %v1179_v23 = vand.u32 2147483647, %v1140_v34 }
 0x157   : > { %v2333_v17 = vadd.f32 %v2332_v3, %v2331_v44  ;;  %v1153_v56 = vsub.f32 %v3167_v14, %v521_v26  ;;  %v1167_v29 = vand.u32 2147483647, %v1128_v2  ;;  %v1180_v63 = vand.u32 2147483647, %v1141_v33 }
 0x158   : > { %v2341_v18 = vadd.f32 %v2340_v35, %v2339_v37  ;;  %v1154_v28 = vsub.f32 %v3167_v14, %v522_v20  ;;  %v1203_v61 = vsub.f32 1.0, %v1164_v27  ;;  %v1216_v51 = vsub.f32 1.0, %v1177_v58 }
 0x159   : > { %v2580_v41 = vsel %vm2579_vm2, %v2186_v5, %v2333_v17  ;;  %v1190_v30 = vand.u32 2147483647, %v1151_v22  ;;  %v1204_v10 = vsub.f32 1.0, %v1165_v36  ;;  %v1217_v44 = vsub.f32 1.0, %v1178_v4 }
 0x15a   : > { %v2594_v47 = vsel %vm2593_vm3, %v2580_v41, %v2479_v1  ;;  %v2581_v15 = vsel %vm2579_vm2, %v2194_v9, %v2341_v18  ;;  %v1191_v39 = vand.u32 2147483647, %v1152_v32  ;;  %v1205_v55 = vsub.f32 1.0, %v1166_v11 }
 0x15b   : > { %v2595_v60 = vsel %vm2593_vm3, %v2581_v15, %v2487_v54  ;;  %v1218_v50 = vsub.f32 1.0, %v1179_v23  ;;  %v1192_v37 = vand.u32 2147483647, %v1153_v56  ;;  %v1206_v45 = vsub.f32 1.0, %v1167_v29 }
 0x15c   : > { %v2619_v0 = vcombine.low %v2594_v47, %v2595_v60  ;;  %v1219_v3 = vsub.f32 1.0, %v1180_v63  ;;  %v1193_v8 = vand.u32 2147483647, %v1154_v28  ;;  %v4032_v35 = vmax.f32 %v1203_v61, 0.0 }
 0x15d   : > { %v4034_v5 = vmax.f32 %v1216_v51, 0.0  ;;  %v1229_v17 = vsub.f32 1.0, %v1190_v30  ;;  %v4036_v12 = vmax.f32 %v1204_v10, 0.0  ;;  %v4038_v1 = vmax.f32 %v1217_v44, 0.0 }
 0x15e   : > { %2631 = vst [vmem:[%s4016_s8] sm:$0x77] %v2619_v0  ;;  %v1230_v18 = vsub.f32 1.0, %v1191_v39  ;;  %v4040_v19 = vmax.f32 %v1205_v55, 0.0  ;;  %v4042_v41 = vmax.f32 %v1218_v50, 0.0  ;;  %v1231_v26 = vsub.f32 1.0, %v1192_v37 }
 0x15f   : > { %v4044_v47 = vmax.f32 %v1206_v45, 0.0  ;;  %v4046_v20 = vmax.f32 %v1219_v3, 0.0  ;;  %v1232_v60 = vsub.f32 1.0, %v1193_v8  ;;  %v4050_v46 = vmax.f32 %v1229_v17, 0.0 }
 0x160   : > { %v4054_v2 = vmax.f32 %v1230_v18, 0.0  ;;  %v4058_v36 = vmax.f32 %v1231_v26, 0.0  ;;  %v375_v10 = vmul.f32 %v3537_v52, %v3900_v21  ;;  %v389_v44 = vmul.f32 %v3520_v59, %v3902_v53 }
 0x161   : > { %v4062_v56 = vmax.f32 %v1232_v60, 0.0  ;;  %v376_v52 = vmul.f32 %v3512_v24, %v3900_v21  ;;  %v390_v60 = vmul.f32 %v3497_v40, %v3902_v53 }
 0x166   : > { %v1501_v48 = vpop.f32.mrb[8].mxu1 }
 0x167   : > { %v1503_v42 = vpop.f32.mrb[9].mxu1  ;;  %v2142_v25 = vmul.f32 %v1501_v48, %v4032_v35 }
 0x168   : > { %v2143_v49 = vmul.f32 %v1503_v42, %v4036_v12 }
 0x169   : > { %v1620_v9 = vpop.f32.mrb[10].mxu0 }
 0x16a   : > { %v1622_v54 = vpop.f32.mrb[11].mxu0  ;;  %v1507_v15 = vpop.f32.mrb[10].mxu1  ;;  %v2144_v33 = vmul.f32 %v1620_v9, %v4040_v19 }
 0x16b   : > { %v2155_v31 = vmul.f32 %v1507_v15, %v4034_v5  ;;  %v1509_v0 = vpop.f32.mrb[11].mxu1  ;;  %v2145_v4 = vmul.f32 %v1622_v54, %v4044_v47  ;;  %v4072_v54 = vadd.f32 %v389_v44, %v375_v10 }
 0x16c   : > { %v2156_v34 = vmul.f32 %v1509_v0, %v4038_v1 }
 0x16d   : > { %v1626_v62 = vpop.f32.mrb[12].mxu0  ;;  %v2195_v27 = vadd.f32 %v2155_v31, %v2142_v25  ;;  %v4378_v25 = vld [vmem:[#allocation10_spill] sm:$0xff] }
 0x16e   : > { %v2157_v58 = vmul.f32 %v1626_v62, %v4042_v41  ;;  %v1628_v22 = vpop.f32.mrb[13].mxu0  ;;  %v2203_v32 = vadd.f32 %v2156_v34, %v2143_v49  ;;  %v1513_v23 = vpop.f32.mrb[12].mxu1  ;;  %v4080_v31 = vmul.f32 %v4378_v25, %v3900_v21 }
 0x16f   : > { %v2158_v11 = vmul.f32 %v1628_v22, %v4046_v20  ;;  %v2168_v63 = vmul.f32 %v1513_v23, %v4050_v46  ;;  %v1515_v28 = vpop.f32.mrb[13].mxu1 }
 0x170   : > { %v2211_v29 = vadd.f32 %v2157_v58, %v2144_v33  ;;  %v2169_v30 = vmul.f32 %v1515_v28, %v4054_v2 }
 0x171   : > { %v2219_v61 = vadd.f32 %v2158_v11, %v2145_v4  ;;  %v1632_v51 = vpop.f32.mrb[14].mxu0  ;;  %v2196_v39 = vadd.f32 %v2195_v27, %v2168_v63 }
 0x172   : > { %v2170_v55 = vmul.f32 %v1632_v51, %v4058_v36  ;;  %v1634_v50 = vpop.f32.mrb[15].mxu0  ;;  %v2204_v37 = vadd.f32 %v2203_v32, %v2169_v30  ;;  %v1519_v45 = vpop.f32.mrb[14].mxu1 }
 0x173   : > { %v2171_v48 = vmul.f32 %v1634_v50, %v4062_v56  ;;  %v2197_v3 = vrot.slane %v2196_v39, 4  ;;  %v1521_v42 = vpop.f32.mrb[15].mxu1  ;;  %v2289_v62 = vmul.f32 %v1519_v45, %v4032_v35 }
 0x174   : > { %v2212_v8 = vadd.f32 %v2211_v29, %v2170_v55  ;;  %v2205_v17 = vrot.slane %v2204_v37, 4  ;;  %v2290_v34 = vmul.f32 %v1521_v42, %v4036_v12 }
 0x175   : > { %v2220_v9 = vadd.f32 %v2219_v61, %v2171_v48  ;;  %v1638_v18 = vpop.f32.mrb[16].mxu0  ;;  %v2198_v59 = vadd.f32 %v2197_v3, %v2196_v39 }
 0x176   : > { %v2213_v26 = vrot.slane %v2212_v8, 4  ;;  %v1640_v15 = vpop.f32.mrb[17].mxu0  ;;  %v2206_v0 = vadd.f32 %v2205_v17, %v2204_v37  ;;  %v1525_v33 = vpop.f32.mrb[16].mxu1  ;;  %v2291_v24 = vmul.f32 %v1638_v18, %v4040_v19 }
 0x177   : > { %v2221_v49 = vrot.slane %v2220_v9, 4  ;;  %v2199_v27 = vrot.slane %v2198_v59, 2  ;;  %v2302_v22 = vmul.f32 %v1525_v33, %v4034_v5  ;;  %v1527_v4 = vpop.f32.mrb[17].mxu1  ;;  %v2292_v11 = vmul.f32 %v1640_v15, %v4044_v47 }
 0x178   : > { %v2214_v58 = vadd.f32 %v2213_v26, %v2212_v8  ;;  %v2207_v32 = vrot.slane %v2206_v0, 2  ;;  %v2303_v29 = vmul.f32 %v1527_v4, %v4038_v1 }
 0x179   : > { %v2222_v40 = vadd.f32 %v2221_v49, %v2220_v9  ;;  %v1644_v23 = vpop.f32.mrb[18].mxu0  ;;  %v2200_v63 = vadd.f32 %v2199_v27, %v2198_v59  ;;  %v2342_v61 = vadd.f32 %v2302_v22, %v2289_v62  ;;  %v4379_v49 = vld [vmem:[#allocation8_spill] sm:$0xff] }
 0x17a   : > { %v2215_v28 = vrot.slane %v2214_v58, 2  ;;  %v2304_v51 = vmul.f32 %v1644_v23, %v4042_v41  ;;  %v1646_v30 = vpop.f32.mrb[19].mxu0  ;;  %v2208_v10 = vadd.f32 %v2207_v32, %v2206_v0  ;;  %v2350_v39 = vadd.f32 %v2303_v29, %v2290_v34  ;;  %v1531_v50 = vpop.f32.mrb[18].mxu1  ;;  %v4381_v23 = vld [vmem:[#allocation7_spill] sm:$0xff] }
 0x17b   : > { %v2223_v44 = vrot.slane %v2222_v40, 2  ;;  %v2305_v55 = vmul.f32 %v1646_v30, %v4046_v20  ;;  %v2201_v37 = vrot.slane %v2200_v63, 1  ;;  %v2315_v3 = vmul.f32 %v1531_v50, %v4050_v46  ;;  %v1533_v8 = vpop.f32.mrb[19].mxu1 }
 0x17c   : > { %v2216_v48 = vadd.f32 %v2215_v28, %v2214_v58  ;;  %v2358_v45 = vadd.f32 %v2304_v51, %v2291_v24  ;;  %v2209_v42 = vrot.slane %v2208_v10, 1  ;;  %v2316_v59 = vmul.f32 %v1533_v8, %v4054_v2  ;;  %v4380_v24 = vld [vmem:[#allocation9_spill] sm:$0xff] }
 0x17d   : > { %v2224_v17 = vadd.f32 %v2223_v44, %v2222_v40  ;;  %v2366_v9 = vadd.f32 %v2305_v55, %v2292_v11  ;;  %v1650_v18 = vpop.f32.mrb[20].mxu0  ;;  %v2343_v15 = vadd.f32 %v2342_v61, %v2315_v3  ;;  %v4095_v62 = vmul.f32 %v4379_v49, %v3902_v53 }
 0x17e   : > { %v2217_v26 = vrot.slane %v2216_v48, 1  ;;  %v2317_v25 = vmul.f32 %v1650_v18, %v4058_v36  ;;  %v1652_v0 = vpop.f32.mrb[21].mxu0  ;;  %v2351_v33 = vadd.f32 %v2350_v39, %v2316_v59  ;;  %v1537_v58 = vpop.f32.mrb[20].mxu1  ;;  %v4100_v22 = vmul.f32 %v4380_v24, %v3900_v21 }
 0x17f   : > { %v2225_v34 = vrot.slane %v2224_v17, 1  ;;  %v2318_v27 = vmul.f32 %v1652_v0, %v4062_v56  ;;  %v2344_v4 = vrot.slane %v2343_v15, 4  ;;  %v1539_v40 = vpop.f32.mrb[21].mxu1  ;;  %v4102_v11 = vadd.f32 %v390_v60, %v376_v52 }
 0x180   : > { %v2359_v32 = vadd.f32 %v2358_v45, %v2317_v25  ;;  %v4106_v29 = vmul.f32 %v4381_v23, %v3902_v53  ;;  %v2202_v28 = vadd.f32 %v2201_v37, %v2200_v63  ;;  %v2210_v61 = vadd.f32 %v2209_v42, %v2208_v10 }
 0x181   : > { %v2352_v51 = vrot.slane %v2351_v33, 4  ;;  %v2367_v30 = vadd.f32 %v2366_v9, %v2318_v27  ;;  %v1656_v44 = vpop.f32.mrb[22].mxu0  ;;  %v2218_v39 = vadd.f32 %v2217_v26, %v2216_v48  ;;  %v2345_v55 = vadd.f32 %v2344_v4, %v2343_v15 }
 0x182   : > { %v2360_v50 = vrot.slane %v2359_v32, 4  ;;  %v2435_v3 = vmul.f32 %v1537_v58, %v4032_v35  ;;  %v1658_v8 = vpop.f32.mrb[23].mxu0  ;;  %v2226_v18 = vadd.f32 %v2225_v34, %v2224_v17  ;;  %v2436_v52 = vmul.f32 %v1539_v40, %v4036_v12  ;;  %v1543_v60 = vpop.f32.mrb[22].mxu1 }
 0x183   : > { %v2353_v45 = vadd.f32 %v2352_v51, %v2351_v33  ;;  %v2368_v59 = vrot.slane %v2367_v30, 4  ;;  %v2346_v25 = vrot.slane %v2345_v55, 2  ;;  %v2437_v63 = vmul.f32 %v1656_v44, %v4040_v19  ;;  %v1545_v37 = vpop.f32.mrb[23].mxu1 }
 0x184   : > { %v2361_v0 = vadd.f32 %v2360_v50, %v2359_v32  ;;  %v2448_v10 = vmul.f32 %v1543_v60, %v4034_v5  ;;  %v2438_v9 = vmul.f32 %v1658_v8, %v4044_v47  ;;  %v2449_v35 = vmul.f32 %v1545_v37, %v4038_v1 }
 0x185   : > { %v2354_v42 = vrot.slane %v2353_v45, 2  ;;  %v2369_v48 = vadd.f32 %v2368_v59, %v2367_v30  ;;  %v1662_v26 = vpop.f32.mrb[24].mxu0  ;;  %v2347_v17 = vadd.f32 %v2346_v25, %v2345_v55 }
 0x186   : > { %v2362_v15 = vrot.slane %v2361_v0, 2  ;;  %v2488_v49 = vadd.f32 %v2448_v10, %v2435_v3  ;;  %v2450_v12 = vmul.f32 %v1662_v26, %v4042_v41  ;;  %v1664_v34 = vpop.f32.mrb[25].mxu0  ;;  %v2496_v58 = vadd.f32 %v2449_v35, %v2436_v52  ;;  %v1549_v5 = vpop.f32.mrb[24].mxu1 }
 0x187   : > { %v2355_v33 = vadd.f32 %v2354_v42, %v2353_v45  ;;  %v2370_v27 = vrot.slane %v2369_v48, 2  ;;  %v2451_v19 = vmul.f32 %v1664_v34, %v4046_v20  ;;  %v2348_v24 = vrot.slane %v2347_v17, 1  ;;  %v1551_v40 = vpop.f32.mrb[25].mxu1 }
 0x188   : > { %v2363_v4 = vadd.f32 %v2362_v15, %v2361_v0  ;;  %v2504_v32 = vadd.f32 %v2450_v12, %v2437_v63  ;;  %v2461_v47 = vmul.f32 %v1549_v5, %v4050_v46  ;;  %v2462_v44 = vmul.f32 %v1551_v40, %v4054_v2 }
 0x189   : > { %v2356_v23 = vrot.slane %v2355_v33, 1  ;;  %v2371_v1 = vadd.f32 %v2370_v27, %v2369_v48  ;;  %v2512_v51 = vadd.f32 %v2451_v19, %v2438_v9  ;;  %v1668_v30 = vpop.f32.mrb[26].mxu0  ;;  %v2349_v41 = vadd.f32 %v2348_v24, %v2347_v17 }
 0x18a   : > { %v2364_v55 = vrot.slane %v2363_v4, 1  ;;  %v2489_v50 = vadd.f32 %v2488_v49, %v2461_v47  ;;  %v2463_v3 = vmul.f32 %v1668_v30, %v4058_v36  ;;  %v1670_v8 = vpop.f32.mrb[27].mxu0  ;;  %v2497_v59 = vadd.f32 %v2496_v58, %v2462_v44 }
 0x18b   : > { %v2357_v20 = vadd.f32 %v2356_v23, %v2355_v33  ;;  %v2372_v45 = vrot.slane %v2371_v1, 1  ;;  %v2464_v52 = vmul.f32 %v1670_v8, %v4062_v56  ;;  %v2582_v46 = vsel %vm2579_vm2, %v2202_v28, %v2349_v41 }
 0x18c   : > { %v2365_v60 = vadd.f32 %v2364_v55, %v2363_v4  ;;  %v2490_v25 = vrot.slane %v2489_v50, 4  ;;  %v2505_v0 = vadd.f32 %v2504_v32, %v2463_v3  ;;  %v2498_v2 = vrot.slane %v2497_v59, 4 }
 0x18d   : > { %v2583_v63 = vsel %vm2579_vm2, %v2210_v61, %v2357_v20  ;;  %v2373_v10 = vadd.f32 %v2372_v45, %v2371_v1  ;;  %v2513_v37 = vadd.f32 %v2512_v51, %v2464_v52  ;;  %v404_v9 = vadd.f32 %v4095_v62, %v4080_v31 }
 0x18e   : > { %v2584_v42 = vsel %vm2579_vm2, %v2218_v39, %v2365_v60  ;;  %v2491_v48 = vadd.f32 %v2490_v25, %v2489_v50  ;;  %v2506_v36 = vrot.slane %v2505_v0, 4  ;;  %v2499_v56 = vadd.f32 %v2498_v2, %v2497_v59 }
 0x18f   : > { %v2585_v26 = vsel %vm2579_vm2, %v2226_v18, %v2373_v10  ;;  %v2514_v35 = vrot.slane %v2513_v37, 4  ;;  %v405_v15 = vadd.f32 %v4106_v29, %v4100_v22  ;;  %v416_v12 = vadd.f32 %v3919_v38, %v4072_v54 }
 0x190   : > { %v2492_v28 = vrot.slane %v2491_v48, 2  ;;  %v2507_v17 = vadd.f32 %v2506_v36, %v2505_v0  ;;  %v2500_v61 = vrot.slane %v2499_v56, 2  ;;  %v417_v33 = vadd.f32 %v3919_v38, %v4102_v11 }
 0x191   : > { %v2515_v49 = vadd.f32 %v2514_v35, %v2513_v37  ;;  %v418_v31 = vadd.f32 %v3919_v38, %v404_v9  ;;  %v419_v19 = vadd.f32 %v3919_v38, %v405_v15  ;;  %v484_v29 = vadd.f32 1.0, %v416_v12 }
 0x192   : > { %v2493_v39 = vadd.f32 %v2492_v28, %v2491_v48  ;;  %v2508_v34 = vrot.slane %v2507_v17, 2  ;;  %v2501_v62 = vadd.f32 %v2500_v61, %v2499_v56  ;;  %v485_v54 = vadd.f32 1.0, %v417_v33 }
 0x193   : > { %v2516_v18 = vrot.slane %v2515_v49, 2  ;;  %v486_v32 = vadd.f32 1.0, %v418_v31  ;;  %v487_v1 = vadd.f32 1.0, %v419_v19  ;;  %v497_v44 = vmul.f32 20.0, %v484_v29  ;;  %v4383_v31 = vld [vmem:[#allocation12_spill] sm:$0xff] }
 0x194   : > { %v2494_v27 = vrot.slane %v2493_v39, 1  ;;  %v2509_v58 = vadd.f32 %v2508_v34, %v2507_v17  ;;  %v2502_v5 = vrot.slane %v2501_v62, 1  ;;  %v498_v50 = vmul.f32 20.0, %v485_v54  ;;  %v4382_v34 = vld [vmem:[#allocation11_spill] sm:$0xff] }
 0x195   : > { %v2517_v22 = vadd.f32 %v2516_v18, %v2515_v49  ;;  %v499_v3 = vmul.f32 20.0, %v486_v32  ;;  %v500_v45 = vmul.f32 20.0, %v487_v1  ;;  %v2748_v59 = vadd.f32 -1.0, %v497_v44 }
 0x196   : > { %v2495_v24 = vadd.f32 %v2494_v27, %v2493_v39  ;;  %v2510_v4 = vrot.slane %v2509_v58, 1  ;;  %v2503_v47 = vadd.f32 %v2502_v5, %v2501_v62  ;;  %v2749_v52 = vadd.f32 -1.0, %v498_v50 }
 0x197   : > { %v2518_v40 = vrot.slane %v2517_v22, 1  ;;  %v2751_v60 = vadd.f32 -1.0, %v500_v45  ;;  %v523_v25 = vmul.f32 0.5, %v2748_v59  ;;  %v379_v2 = vmul.f32 %v3712_v6, %v3900_v21 }
 0x198   : > { %v2596_v11 = vsel %vm2593_vm3, %v2582_v46, %v2495_v24  ;;  %v2511_v23 = vadd.f32 %v2510_v4, %v2509_v58  ;;  %v2597_v51 = vsel %vm2593_vm3, %v2583_v63, %v2503_v47  ;;  %v2750_v46 = vadd.f32 -1.0, %v499_v3 }
 0x199   : > { %v2519_v30 = vadd.f32 %v2518_v40, %v2517_v22  ;;  %v2620_v55 = vcombine.low %v2596_v11, %v2597_v51  ;;  %v524_v0 = vmul.f32 0.5, %v2749_v52  ;;  %v526_v10 = vmul.f32 0.5, %v2751_v60 }
 0x19a   : > { %v2598_v41 = vsel %vm2593_vm3, %v2584_v42, %v2511_v23  ;;  %v525_v63 = vmul.f32 0.5, %v2750_v46  ;;  %v393_v37 = vmul.f32 %v3708_v43, %v3902_v53  ;;  %v1129_v42 = vsub.f32 %v3162_v7, %v523_v25 }
 0x19b   : > { %v2599_v8 = vsel %vm2593_vm3, %v2585_v26, %v2519_v30  ;;  %2632 = vst [vmem:[%s4016_s8 + $0x8] sm:$0x77] %v2620_v55  ;;  %v1142_v48 = vsub.f32 %v3165_v13, %v523_v25  ;;  %v1130_v36 = vsub.f32 %v3162_v7, %v524_v0  ;;  %v1143_v26 = vsub.f32 %v3165_v13, %v524_v0 }
 0x19c   : > { %v2621_v20 = vcombine.low %v2598_v41, %v2599_v8  ;;  %v1131_v9 = vsub.f32 %v3162_v7, %v525_v63  ;;  %v1132_v56 = vsub.f32 %v3162_v7, %v526_v10  ;;  %v1144_v35 = vsub.f32 %v3165_v13, %v525_v63 }
 0x19d   : > { %v1155_v28 = vsub.f32 %v3167_v14, %v523_v25  ;;  %v406_v6 = vadd.f32 %v393_v37, %v379_v2  ;;  %v1168_v17 = vand.u32 2147483647, %v1129_v42  ;;  %v1181_v15 = vand.u32 2147483647, %v1142_v48 }
 0x19e   : > { %2633 = vst [vmem:[%s4016_s8 + $0x10] sm:$0x77] %v2621_v20  ;;  %v1145_v43 = vsub.f32 %v3165_v13, %v526_v10  ;;  %v1169_v61 = vand.u32 2147483647, %v1130_v36  ;;  %v1170_v49 = vand.u32 2147483647, %v1131_v9  ;;  %v1156_v39 = vsub.f32 %v3167_v14, %v524_v0 }
 0x19f   : > { %v1182_v12 = vand.u32 2147483647, %v1143_v26  ;;  %v380_v33 = vmul.f32 %v4382_v34, %v3900_v21  ;;  %v394_v62 = vmul.f32 %v4383_v31, %v3902_v53  ;;  %v381_v18 = vmul.f32 %v3770_v16, %v3900_v21 }
 0x1a0   : > { %v395_v27 = vmul.f32 %v3760_v57, %v3902_v53  ;;  %v1171_v58 = vand.u32 2147483647, %v1132_v56  ;;  %v1183_v19 = vand.u32 2147483647, %v1144_v35  ;;  %v1194_v5 = vand.u32 2147483647, %v1155_v28 }
 0x1a1   : > { %v420_v22 = vadd.f32 %v3919_v38, %v406_v6  ;;  %v1207_v29 = vsub.f32 1.0, %v1168_v17  ;;  %v1220_v24 = vsub.f32 1.0, %v1181_v15  ;;  %v1184_v4 = vand.u32 2147483647, %v1145_v43 }
 0x1a2   : > { %v1157_v54 = vsub.f32 %v3167_v14, %v525_v63  ;;  %v1208_v32 = vsub.f32 1.0, %v1169_v61  ;;  %v1221_v47 = vsub.f32 1.0, %v1182_v12  ;;  %v1195_v40 = vand.u32 2147483647, %v1156_v39 }
 0x1a3   : > { %v1158_v11 = vsub.f32 %v3167_v14, %v526_v10  ;;  %v1209_v23 = vsub.f32 1.0, %v1170_v49  ;;  %v407_v16 = vadd.f32 %v394_v62, %v380_v33  ;;  %v408_v21 = vadd.f32 %v395_v27, %v381_v18 }
 0x1a4   : > { %v1210_v57 = vsub.f32 1.0, %v1171_v58  ;;  %v1222_v53 = vsub.f32 1.0, %v1183_v19  ;;  %v1233_v51 = vsub.f32 1.0, %v1194_v5  ;;  %v488_v30 = vadd.f32 1.0, %v420_v22 }
 0x1a5   : > { %v4165_v44 = vmax.f32 %v1207_v29, 0.0  ;;  %v4167_v55 = vmax.f32 %v1220_v24, 0.0  ;;  %v1223_v50 = vsub.f32 1.0, %v1184_v4  ;;  %v1196_v3 = vand.u32 2147483647, %v1157_v54 }
 0x1a6   : > { %v4169_v8 = vmax.f32 %v1208_v32, 0.0  ;;  %v4171_v20 = vmax.f32 %v1221_v47, 0.0  ;;  %v1234_v45 = vsub.f32 1.0, %v1195_v40  ;;  %v1197_v59 = vand.u32 2147483647, %v1158_v11 }
 0x1a7   : > { %v4173_v52 = vmax.f32 %v1209_v23, 0.0  ;;  %v421_v46 = vadd.f32 %v3919_v38, %v407_v16  ;;  %v422_v60 = vadd.f32 %v3919_v38, %v408_v21  ;;  %v4177_v0 = vmax.f32 %v1210_v57, 0.0 }
 0x1a8   : > { %v4179_v10 = vmax.f32 %v1222_v53, 0.0  ;;  %v4181_v2 = vmax.f32 %v1233_v51, 0.0  ;;  %v501_v37 = vmul.f32 20.0, %v488_v30  ;;  %v4185_v26 = vmax.f32 %v1223_v50, 0.0 }
 0x1a9   : > { %v1235_v56 = vsub.f32 1.0, %v1196_v3  ;;  %v4189_v28 = vmax.f32 %v1234_v45, 0.0  ;;  %v1236_v6 = vsub.f32 1.0, %v1197_v59  ;;  %v489_v15 = vadd.f32 1.0, %v421_v46 }
 0x1aa   : > { %v490_v43 = vadd.f32 1.0, %v422_v60  ;;  %v2752_v39 = vadd.f32 -1.0, %v501_v37 }
 0x1ab   : > { %v4194_v18 = vmax.f32 %v1235_v56, 0.0  ;;  %v4199_v22 = vmax.f32 %v1236_v6, 0.0  ;;  %v502_v4 = vmul.f32 20.0, %v489_v15 }
 0x1ac   : > { %v503_v54 = vmul.f32 20.0, %v490_v43  ;;  %v4201_v23 = vmul.f32 0.5, %v2752_v39 }
 0x1ad   : > { %v2753_v50 = vadd.f32 -1.0, %v502_v4 }
 0x1ae   : > { %v2754_v3 = vadd.f32 -1.0, %v503_v54 }
 0x1af   : > { %v4211_v43 = vmul.f32 0.5, %v2753_v50 }
 0x1b1   : > { %v1739_v1 = vpop.f32.mrb[26].mxu1 }
 0x1b2   : > { %v1741_v41 = vpop.f32.mrb[27].mxu1  ;;  %v2146_v42 = vmul.f32 %v1739_v1, %v4165_v44 }
 0x1b3   : > { %v2147_v38 = vmul.f32 %v1741_v41, %v4169_v8 }
 0x1b4   : > { %v1858_v25 = vpop.f32.mrb[28].mxu0 }
 0x1b5   : > { %v1745_v63 = vpop.f32.mrb[28].mxu1  ;;  %v1860_v48 = vpop.f32.mrb[29].mxu0  ;;  %v2148_v34 = vmul.f32 %v1858_v25, %v4173_v52  ;;  %v1133_v25 = vsub.f32 %v3162_v7, %v4201_v23 }
 0x1b6   : > { %v2159_v36 = vmul.f32 %v1745_v63, %v4167_v55  ;;  %v1747_v9 = vpop.f32.mrb[29].mxu1  ;;  %v2149_v58 = vmul.f32 %v1860_v48, %v4177_v0 }
 0x1b7   : > { %v2160_v35 = vmul.f32 %v1747_v9, %v4171_v20 }
 0x1b8   : > { %v2227_v17 = vadd.f32 %v2159_v36, %v2146_v42  ;;  %v1864_v61 = vpop.f32.mrb[30].mxu0 }
 0x1b9   : > { %v2235_v49 = vadd.f32 %v2160_v35, %v2147_v38  ;;  %v1751_v12 = vpop.f32.mrb[30].mxu1  ;;  %v2161_v33 = vmul.f32 %v1864_v61, %v4179_v10  ;;  %v1866_v31 = vpop.f32.mrb[31].mxu0  ;;  %v4213_v61 = vmul.f32 0.5, %v2754_v3 }
 0x1ba   : > { %v2172_v62 = vmul.f32 %v1751_v12, %v4181_v2  ;;  %v1753_v27 = vpop.f32.mrb[31].mxu1  ;;  %v2162_v19 = vmul.f32 %v1866_v31, %v4185_v26 }
 0x1bb   : > { %v2173_v5 = vmul.f32 %v1753_v27, %v4189_v28  ;;  %v2243_v29 = vadd.f32 %v2161_v33, %v2148_v34 }
 0x1bc   : > { %v2228_v24 = vadd.f32 %v2227_v17, %v2172_v62  ;;  %v2251_v32 = vadd.f32 %v2162_v19, %v2149_v58  ;;  %v1870_v47 = vpop.f32.mrb[32].mxu0 }
 0x1bd   : > { %v2236_v40 = vadd.f32 %v2235_v49, %v2173_v5  ;;  %v1757_v11 = vpop.f32.mrb[32].mxu1  ;;  %v2174_v21 = vmul.f32 %v1870_v47, %v4194_v18  ;;  %v1872_v1 = vpop.f32.mrb[33].mxu0 }
 0x1be   : > { %v2229_v16 = vrot.slane %v2228_v24, 4  ;;  %v1759_v57 = vpop.f32.mrb[33].mxu1  ;;  %v2175_v51 = vmul.f32 %v1872_v1, %v4199_v22  ;;  %v2293_v42 = vmul.f32 %v1757_v11, %v4165_v44  ;;  %v4221_v11 = vand.u32 2147483647, %v1133_v25 }
 0x1bf   : > { %v2237_v53 = vrot.slane %v2236_v40, 4  ;;  %v2244_v41 = vadd.f32 %v2243_v29, %v2174_v21  ;;  %v2294_v35 = vmul.f32 %v1759_v57, %v4169_v8 }
 0x1c0   : > { %v2230_v30 = vadd.f32 %v2229_v16, %v2228_v24  ;;  %v2252_v59 = vadd.f32 %v2251_v32, %v2175_v51  ;;  %v1876_v46 = vpop.f32.mrb[34].mxu0  ;;  %v1134_v16 = vsub.f32 %v3162_v7, %v4211_v43 }
 0x1c1   : > { %v2238_v45 = vadd.f32 %v2237_v53, %v2236_v40  ;;  %v1763_v60 = vpop.f32.mrb[34].mxu1  ;;  %v2245_v37 = vrot.slane %v2244_v41, 4  ;;  %v1878_v48 = vpop.f32.mrb[35].mxu0  ;;  %v2295_v27 = vmul.f32 %v1876_v46, %v4173_v52 }
 0x1c2   : > { %v2231_v63 = vrot.slane %v2230_v30, 2  ;;  %v2306_v36 = vmul.f32 %v1763_v60, %v4167_v55  ;;  %v1765_v9 = vpop.f32.mrb[35].mxu1  ;;  %v2253_v38 = vrot.slane %v2252_v59, 4  ;;  %v2296_v4 = vmul.f32 %v1878_v48, %v4177_v0 }
 0x1c3   : > { %v2239_v56 = vrot.slane %v2238_v45, 2  ;;  %v2307_v6 = vmul.f32 %v1765_v9, %v4171_v20  ;;  %v2246_v17 = vadd.f32 %v2245_v37, %v2244_v41  ;;  %v1146_v37 = vsub.f32 %v3165_v13, %v4201_v23 }
 0x1c4   : > { %v2374_v15 = vadd.f32 %v2306_v36, %v2293_v42  ;;  %v2232_v49 = vadd.f32 %v2231_v63, %v2230_v30  ;;  %v2254_v39 = vadd.f32 %v2253_v38, %v2252_v59  ;;  %v1882_v34 = vpop.f32.mrb[36].mxu0  ;;  %v1135_v63 = vsub.f32 %v3162_v7, %v4213_v61 }
 0x1c5   : > { %v2240_v12 = vadd.f32 %v2239_v56, %v2238_v45  ;;  %v2382_v33 = vadd.f32 %v2307_v6, %v2294_v35  ;;  %v1769_v31 = vpop.f32.mrb[36].mxu1  ;;  %v2247_v62 = vrot.slane %v2246_v17, 2  ;;  %v2308_v58 = vmul.f32 %v1882_v34, %v4179_v10  ;;  %v1884_v19 = vpop.f32.mrb[37].mxu0 }
 0x1c6   : > { %v2319_v5 = vmul.f32 %v1769_v31, %v4181_v2  ;;  %v1771_v29 = vpop.f32.mrb[37].mxu1  ;;  %v2255_v24 = vrot.slane %v2254_v39, 2  ;;  %v2309_v54 = vmul.f32 %v1884_v19, %v4185_v26  ;;  %v2233_v21 = vrot.slane %v2232_v49, 1 }
 0x1c7   : > { %v2320_v32 = vmul.f32 %v1771_v29, %v4189_v28  ;;  %v2390_v47 = vadd.f32 %v2308_v58, %v2295_v27  ;;  %v2241_v1 = vrot.slane %v2240_v12, 1  ;;  %v4225_v30 = vadd.f32 %v2247_v62, %v2246_v17 }
 0x1c8   : > { %v2375_v40 = vadd.f32 %v2374_v15, %v2319_v5  ;;  %v2398_v57 = vadd.f32 %v2309_v54, %v2296_v4  ;;  %v1888_v53 = vpop.f32.mrb[38].mxu0  ;;  %v4227_v41 = vadd.f32 %v2255_v24, %v2254_v39  ;;  %v4235_v36 = vand.u32 2147483647, %v1134_v16 }
 0x1c9   : > { %v2383_v51 = vadd.f32 %v2382_v33, %v2320_v32  ;;  %v2321_v3 = vmul.f32 %v1888_v53, %v4194_v18  ;;  %v1890_v45 = vpop.f32.mrb[39].mxu0  ;;  %v1147_v9 = vsub.f32 %v3165_v13, %v4211_v43  ;;  %v2234_v56 = vadd.f32 %v2233_v21, %v2232_v49 }
 0x1ca   : > { %v2376_v50 = vrot.slane %v2375_v40, 4  ;;  %v1775_v59 = vpop.f32.mrb[38].mxu1  ;;  %v2322_v60 = vmul.f32 %v1890_v45, %v4199_v22  ;;  %v2242_v38 = vadd.f32 %v2241_v1, %v2240_v12  ;;  %v2249_v17 = vrot.slane %v4225_v30, 1 }
 0x1cb   : > { %v2384_v46 = vrot.slane %v2383_v51, 4  ;;  %v1777_v25 = vpop.f32.mrb[39].mxu1  ;;  %v2391_v48 = vadd.f32 %v2390_v47, %v2321_v3  ;;  %v2257_v15 = vrot.slane %v4227_v41, 1  ;;  %v2439_v58 = vmul.f32 %v1775_v59, %v4165_v44 }
 0x1cc   : > { %v2377_v42 = vadd.f32 %v2376_v50, %v2375_v40  ;;  %v2399_v6 = vadd.f32 %v2398_v57, %v2322_v60  ;;  %v1894_v33 = vpop.f32.mrb[40].mxu0  ;;  %v2440_v24 = vmul.f32 %v1777_v25, %v4169_v8  ;;  %v1161_v7 = vsub.f32 %v3167_v14, %v4213_v61 }
 0x1cd   : > { %v2385_v35 = vadd.f32 %v2384_v46, %v2383_v51  ;;  %v2392_v34 = vrot.slane %v2391_v48, 4  ;;  %v1896_v19 = vpop.f32.mrb[41].mxu0  ;;  %v2441_v47 = vmul.f32 %v1894_v33, %v4173_v52 }
 0x1ce   : > { %v2378_v39 = vrot.slane %v2377_v42, 2  ;;  %v1781_v31 = vpop.f32.mrb[40].mxu1  ;;  %v2400_v27 = vrot.slane %v2399_v6, 4  ;;  %v2442_v1 = vmul.f32 %v1896_v19, %v4177_v0  ;;  %v2258_v19 = vadd.f32 %v2257_v15, %v4227_v41 }
 0x1cf   : > { %v2386_v62 = vrot.slane %v2385_v35, 2  ;;  %v2452_v5 = vmul.f32 %v1781_v31, %v4167_v55  ;;  %v1783_v29 = vpop.f32.mrb[41].mxu1  ;;  %v2393_v12 = vadd.f32 %v2392_v34, %v2391_v48  ;;  %v1186_v15 = vand.u32 2147483647, %v1147_v9 }
 0x1d0   : > { %v2379_v49 = vadd.f32 %v2378_v39, %v2377_v42  ;;  %v2453_v4 = vmul.f32 %v1783_v29, %v4171_v20  ;;  %v2401_v32 = vadd.f32 %v2400_v27, %v2399_v6  ;;  %v1900_v44 = vpop.f32.mrb[42].mxu0 }
 0x1d1   : > { %v2387_v54 = vadd.f32 %v2386_v62, %v2385_v35  ;;  %v2520_v40 = vadd.f32 %v2452_v5, %v2439_v58  ;;  %v2394_v21 = vrot.slane %v2393_v12, 2  ;;  %v2454_v50 = vmul.f32 %v1900_v44, %v4179_v10  ;;  %v1902_v3 = vpop.f32.mrb[43].mxu0 }
 0x1d2   : > { %v2380_v16 = vrot.slane %v2379_v49, 1  ;;  %v2528_v57 = vadd.f32 %v2453_v4, %v2440_v24  ;;  %v2402_v51 = vrot.slane %v2401_v32, 2  ;;  %v2455_v52 = vmul.f32 %v1902_v3, %v4185_v26 }
 0x1d3   : > { %v1787_v53 = vpop.f32.mrb[42].mxu1  ;;  %v2388_v55 = vrot.slane %v2387_v54, 1  ;;  %v2395_v59 = vadd.f32 %v2394_v21, %v2393_v12  ;;  %v2536_v0 = vadd.f32 %v2454_v50, %v2441_v47  ;;  %v2250_v26 = vadd.f32 %v2249_v17, %v4225_v30 }
 0x1d4   : > { %v2465_v8 = vmul.f32 %v1787_v53, %v4181_v2  ;;  %v1789_v20 = vpop.f32.mrb[43].mxu1  ;;  %v2381_v45 = vadd.f32 %v2380_v16, %v2379_v49  ;;  %v2403_v25 = vadd.f32 %v2402_v51, %v2401_v32  ;;  %v2544_v6 = vadd.f32 %v2455_v52, %v2442_v1 }
 0x1d5   : > { %v2466_v46 = vmul.f32 %v1789_v20, %v4189_v28  ;;  %v2389_v60 = vadd.f32 %v2388_v55, %v2387_v54  ;;  %v2396_v35 = vrot.slane %v2395_v59, 1  ;;  %v1906_v39 = vpop.f32.mrb[44].mxu0  ;;  %v1160_v54 = vsub.f32 %v3167_v14, %v4211_v43 }
 0x1d6   : > { %v2521_v42 = vadd.f32 %v2520_v40, %v2465_v8  ;;  %v2586_v48 = vsel %vm2579_vm2, %v2234_v56, %v2381_v45  ;;  %v2404_v2 = vrot.slane %v2403_v25, 1  ;;  %v2467_v31 = vmul.f32 %v1906_v39, %v4194_v18  ;;  %v1908_v62 = vpop.f32.mrb[45].mxu0 }
 0x1d7   : > { %v2529_v10 = vadd.f32 %v2528_v57, %v2466_v46  ;;  %v2587_v34 = vsel %vm2579_vm2, %v2242_v38, %v2389_v60  ;;  %v2397_v28 = vadd.f32 %v2396_v35, %v2395_v59  ;;  %v2468_v58 = vmul.f32 %v1908_v62, %v4199_v22 }
 0x1d8   : > { %v2522_v33 = vrot.slane %v2521_v42, 4  ;;  %v2405_v56 = vadd.f32 %v2404_v2, %v2403_v25  ;;  %v2537_v29 = vadd.f32 %v2536_v0, %v2467_v31  ;;  %v1185_v18 = vand.u32 2147483647, %v1146_v37 }
 0x1d9   : > { %v2530_v27 = vrot.slane %v2529_v10, 4  ;;  %v2588_v49 = vsel %vm2579_vm2, %v2250_v26, %v2397_v28  ;;  %v2545_v38 = vadd.f32 %v2544_v6, %v2468_v58  ;;  %v1159_v22 = vsub.f32 %v3167_v14, %v4201_v23 }
 0x1da   : > { %v2523_v5 = vadd.f32 %v2522_v33, %v2521_v42  ;;  %v2589_v24 = vsel %vm2579_vm2, %v2258_v19, %v2405_v56  ;;  %v2538_v17 = vrot.slane %v2537_v29, 4  ;;  %v1211_v37 = vsub.f32 1.0, %v4221_v11 }
 0x1db   : > { %v2531_v12 = vadd.f32 %v2530_v27, %v2529_v10  ;;  %v2546_v41 = vrot.slane %v2545_v38, 4  ;;  %v1148_v40 = vsub.f32 %v3165_v13, %v4213_v61  ;;  %v1212_v23 = vsub.f32 1.0, %v4235_v36 }
 0x1dc   : > { %v2524_v30 = vrot.slane %v2523_v5, 2  ;;  %v2539_v47 = vadd.f32 %v2538_v17, %v2537_v29  ;;  %v1174_v1 = vand.u32 2147483647, %v1135_v63  ;;  %v1224_v57 = vsub.f32 1.0, %v1185_v18 }
 0x1dd   : > { %v2532_v4 = vrot.slane %v2531_v12, 2  ;;  %v2547_v21 = vadd.f32 %v2546_v41, %v2545_v38  ;;  %v1198_v53 = vand.u32 2147483647, %v1159_v22  ;;  %v1225_v51 = vsub.f32 1.0, %v1186_v15 }
 0x1de   : > { %v2525_v32 = vadd.f32 %v2524_v30, %v2523_v5  ;;  %v2540_v9 = vrot.slane %v2539_v47, 2  ;;  %v1199_v50 = vand.u32 2147483647, %v1160_v54  ;;  %v4276_v8 = vmax.f32 %v1211_v37, 0.0 }
 0x1df   : > { %v2533_v16 = vadd.f32 %v2532_v4, %v2531_v12  ;;  %v2548_v55 = vrot.slane %v2547_v21, 2  ;;  %v1187_v13 = vand.u32 2147483647, %v1148_v40  ;;  %v4278_v59 = vmax.f32 %v1212_v23, 0.0 }
 0x1e0   : > { %v2526_v44 = vrot.slane %v2525_v32, 1  ;;  %v2541_v3 = vadd.f32 %v2540_v9, %v2539_v47  ;;  %v4283_v60 = vmax.f32 %v1224_v57, 0.0  ;;  %v1237_v25 = vsub.f32 1.0, %v1198_v53 }
 0x1e1   : > { %v2534_v43 = vrot.slane %v2533_v16, 1  ;;  %v2549_v45 = vadd.f32 %v2548_v55, %v2547_v21  ;;  %v4286_v35 = vmax.f32 %v1225_v51, 0.0  ;;  %v1238_v6 = vsub.f32 1.0, %v1199_v50 }
 0x1e2   : > { %v2527_v11 = vadd.f32 %v2526_v44, %v2525_v32  ;;  %v1977_v36 = vpop.f32.mrb[44].mxu1  ;;  %v2542_v52 = vrot.slane %v2541_v3, 1  ;;  %v1213_v2 = vsub.f32 1.0, %v1174_v1  ;;  %v1226_v14 = vsub.f32 1.0, %v1187_v13 }
 0x1e3   : > { %v2535_v20 = vadd.f32 %v2534_v43, %v2533_v16  ;;  %v1979_v46 = vpop.f32.mrb[45].mxu1  ;;  %v2550_v42 = vrot.slane %v2549_v45, 1  ;;  %v1200_v61 = vand.u32 2147483647, %v1161_v7  ;;  %v2150_v62 = vmul.f32 %v1977_v36, %v4276_v8 }
 0x1e4   : > { %v2600_v63 = vsel %vm2593_vm3, %v2586_v48, %v2527_v11  ;;  %v2543_v39 = vadd.f32 %v2542_v52, %v2541_v3  ;;  %v4292_v28 = vmax.f32 %v1237_v25, 0.0  ;;  %v2151_v58 = vmul.f32 %v1979_v46, %v4278_v59 }
 0x1e5   : > { %v2601_v0 = vsel %vm2593_vm3, %v2587_v34, %v2535_v20  ;;  %v2551_v33 = vadd.f32 %v2550_v42, %v2549_v45  ;;  %v4297_v56 = vmax.f32 %v1238_v6, 0.0  ;;  %v4299_v29 = vmax.f32 %v1213_v2, 0.0 }
 0x1e6   : > { %v2622_v10 = vcombine.low %v2600_v63, %v2601_v0  ;;  %v1983_v31 = vpop.f32.mrb[46].mxu1  ;;  %v2602_v48 = vsel %vm2593_vm3, %v2588_v49, %v2543_v39  ;;  %v4302_v17 = vmax.f32 %v1226_v14, 0.0 }
 0x1e7   : > { %v2163_v26 = vmul.f32 %v1983_v31, %v4283_v60  ;;  %v1985_v34 = vpop.f32.mrb[47].mxu1  ;;  %v2603_v27 = vsel %vm2593_vm3, %v2589_v24, %v2551_v33  ;;  %v1239_v24 = vsub.f32 1.0, %v1200_v61 }
 0x1e8   : > { %2634 = vst [vmem:[%s4016_s8 + $0x18] sm:$0x77] %v2622_v10  ;;  %v2164_v19 = vmul.f32 %v1985_v34, %v4286_v35  ;;  %v2623_v5 = vcombine.low %v2602_v48, %v2603_v27 }
 0x1e9   : > { %v2259_v49 = vadd.f32 %v2163_v26, %v2150_v62  ;;  %v4308_v21 = vmax.f32 %v1239_v24, 0.0 }
 0x1ea   : > { %v2267_v38 = vadd.f32 %v2164_v19, %v2151_v58  ;;  %v1989_v18 = vpop.f32.mrb[48].mxu1  ;;  %2635 = vst [vmem:[%s4016_s8 + $0x20] sm:$0x77] %v2623_v5 }
 0x1eb   : > { %v2096_v12 = vpop.f32.mrb[46].mxu0  ;;  %v2176_v22 = vmul.f32 %v1989_v18, %v4292_v28  ;;  %v1991_v4 = vpop.f32.mrb[49].mxu1 }
 0x1ec   : > { %v2874_v30 = vpop.f32.mrb[47].mxu0  ;;  %v2177_v41 = vmul.f32 %v1991_v4, %v4297_v56  ;;  %v2152_v15 = vmul.f32 %v2096_v12, %v4299_v29 }
 0x1ed   : > { %v2260_v54 = vadd.f32 %v2259_v49, %v2176_v22 }
 0x1ee   : > { %v2268_v47 = vadd.f32 %v2267_v38, %v2177_v41  ;;  %v1995_v37 = vpop.f32.mrb[50].mxu1  ;;  %v2276_v44 = vsel %vm2275_vm4, %v2152_v15, 0.0 }
 0x1ef   : > { %v2101_v32 = vpop.f32.mrb[48].mxu0  ;;  %v1997_v23 = vpop.f32.mrb[51].mxu1  ;;  %v2261_v1 = vrot.slane %v2260_v54, 4  ;;  %v2297_v11 = vmul.f32 %v1995_v37, %v4276_v8 }
 0x1f0   : > { %v2165_v40 = vmul.f32 %v2101_v32, %v4302_v17  ;;  %v2877_v16 = vpop.f32.mrb[49].mxu0  ;;  %v2269_v57 = vrot.slane %v2268_v47, 4  ;;  %v2298_v45 = vmul.f32 %v1997_v23, %v4278_v59 }
 0x1f1   : > { %v2262_v20 = vadd.f32 %v2261_v1, %v2260_v54 }
 0x1f2   : > { %v2277_v9 = vsel %vm2275_vm4, %v2165_v40, 0.0  ;;  %v2001_v55 = vpop.f32.mrb[52].mxu1  ;;  %v2270_v63 = vadd.f32 %v2269_v57, %v2268_v47 }
 0x1f3   : > { %v2278_v53 = vadd.f32 %v2277_v9, %v2276_v44  ;;  %v2106_v43 = vpop.f32.mrb[50].mxu0  ;;  %v2310_v3 = vmul.f32 %v2001_v55, %v4283_v60  ;;  %v2003_v13 = vpop.f32.mrb[53].mxu1  ;;  %v2263_v2 = vrot.slane %v2262_v20, 2 }
 0x1f4   : > { %v2178_v51 = vmul.f32 %v2106_v43, %v4308_v21  ;;  %v2880_v50 = vpop.f32.mrb[51].mxu0  ;;  %v2311_v36 = vmul.f32 %v2003_v13, %v4286_v35  ;;  %v2271_v31 = vrot.slane %v2270_v63, 2 }
 0x1f5   : > { %v2406_v52 = vadd.f32 %v2310_v3, %v2297_v11  ;;  %v2264_v49 = vadd.f32 %v2263_v2, %v2262_v20 }
 0x1f6   : > { %v2279_v7 = vsel %vm2275_vm4, %v2178_v51, 0.0  ;;  %v2414_v0 = vadd.f32 %v2311_v36, %v2298_v45  ;;  %v2007_v42 = vpop.f32.mrb[54].mxu1  ;;  %v2272_v38 = vadd.f32 %v2271_v31, %v2270_v63 }
 0x1f7   : > { %v2280_v46 = vadd.f32 %v2279_v7, %v2278_v53  ;;  %v2111_v25 = vpop.f32.mrb[52].mxu0  ;;  %v2323_v39 = vmul.f32 %v2007_v42, %v4292_v28  ;;  %v2009_v10 = vpop.f32.mrb[55].mxu1  ;;  %v2265_v1 = vrot.slane %v2264_v49, 1 }
 0x1f8   : > { %v2883_v6 = vpop.f32.mrb[53].mxu0  ;;  %v2324_v33 = vmul.f32 %v2009_v10, %v4297_v56  ;;  %v2299_v14 = vmul.f32 %v2111_v25, %v4299_v29  ;;  %v2273_v53 = vrot.slane %v2272_v38, 1 }
 0x1f9   : > { %v2407_v61 = vadd.f32 %v2406_v52, %v2323_v39  ;;  %v2281_v48 = vrot.slane %v2280_v46, 4  ;;  %v2266_v63 = vadd.f32 %v2265_v1, %v2264_v49 }
 0x1fa   : > { %v2415_v26 = vadd.f32 %v2414_v0, %v2324_v33  ;;  %v2013_v34 = vpop.f32.mrb[56].mxu1  ;;  %v2422_v18 = vsel %vm2275_vm4, %v2299_v14, 0.0 }
 0x1fb   : > { %v2116_v62 = vpop.f32.mrb[54].mxu0  ;;  %v2408_v19 = vrot.slane %v2407_v61, 4  ;;  %v2015_v5 = vpop.f32.mrb[57].mxu1  ;;  %v2282_v24 = vadd.f32 %v2281_v48, %v2280_v46  ;;  %v2443_v40 = vmul.f32 %v2013_v34, %v4276_v8  ;;  %v2274_v46 = vadd.f32 %v2273_v53, %v2272_v38 }
 0x1fc   : > { %v2312_v27 = vmul.f32 %v2116_v62, %v4302_v17  ;;  %v2886_v58 = vpop.f32.mrb[55].mxu0  ;;  %v2416_v12 = vrot.slane %v2415_v26, 4  ;;  %v2444_v9 = vmul.f32 %v2015_v5, %v4278_v59 }
 0x1fd   : > { %v2409_v22 = vadd.f32 %v2408_v19, %v2407_v61  ;;  %v2283_v50 = vrot.slane %v2282_v24, 2 }
 0x1fe   : > { %v2423_v30 = vsel %vm2275_vm4, %v2312_v27, 0.0  ;;  %v2417_v15 = vadd.f32 %v2416_v12, %v2415_v26  ;;  %v2019_v54 = vpop.f32.mrb[58].mxu1 }
 0x1ff   : > { %v2424_v4 = vadd.f32 %v2423_v30, %v2422_v18  ;;  %v2121_v41 = vpop.f32.mrb[56].mxu0  ;;  %v2410_v32 = vrot.slane %v2409_v22, 2  ;;  %v2456_v16 = vmul.f32 %v2019_v54, %v4283_v60  ;;  %v2021_v23 = vpop.f32.mrb[59].mxu1  ;;  %v2284_v6 = vadd.f32 %v2283_v50, %v2282_v24 }
 0x200   : > { %v2325_v47 = vmul.f32 %v2121_v41, %v4308_v21  ;;  %v2889_v37 = vpop.f32.mrb[57].mxu0  ;;  %v2418_v44 = vrot.slane %v2417_v15, 2  ;;  %v2457_v57 = vmul.f32 %v2021_v23, %v4286_v35 }
 0x201   : > { %v2411_v43 = vadd.f32 %v2410_v32, %v2409_v22  ;;  %v2552_v51 = vadd.f32 %v2456_v16, %v2443_v40  ;;  %v2285_v27 = vrot.slane %v2284_v6, 1 }
 0x202   : > { %v2425_v55 = vsel %vm2275_vm4, %v2325_v47, 0.0  ;;  %v2419_v3 = vadd.f32 %v2418_v44, %v2417_v15  ;;  %v2560_v20 = vadd.f32 %v2457_v57, %v2444_v9  ;;  %v2025_v8 = vpop.f32.mrb[60].mxu1 }
 0x203   : > { %v2426_v11 = vadd.f32 %v2425_v55, %v2424_v4  ;;  %v2126_v13 = vpop.f32.mrb[58].mxu0  ;;  %v2412_v45 = vrot.slane %v2411_v43, 1  ;;  %v2469_v36 = vmul.f32 %v2025_v8, %v4292_v28  ;;  %v2027_v7 = vpop.f32.mrb[61].mxu1  ;;  %v2286_v4 = vadd.f32 %v2285_v27, %v2284_v6 }
 0x204   : > { %v2892_v60 = vpop.f32.mrb[59].mxu0  ;;  %v2420_v52 = vrot.slane %v2419_v3, 1  ;;  %v2470_v35 = vmul.f32 %v2027_v7, %v4297_v56  ;;  %v2445_v0 = vmul.f32 %v2126_v13, %v4299_v29 }
 0x205   : > { %v2427_v59 = vrot.slane %v2426_v11, 4  ;;  %v2413_v25 = vadd.f32 %v2412_v45, %v2411_v43  ;;  %v2553_v42 = vadd.f32 %v2552_v51, %v2469_v36 }
 0x206   : > { %v2421_v10 = vadd.f32 %v2420_v52, %v2419_v3  ;;  %v2561_v33 = vadd.f32 %v2560_v20, %v2470_v35  ;;  %v2568_v26 = vsel %vm2275_vm4, %v2445_v0, 0.0 }
 0x207   : > { %v2428_v39 = vadd.f32 %v2427_v59, %v2426_v11  ;;  %v2131_v2 = vpop.f32.mrb[60].mxu0  ;;  %v2590_v31 = vsel %vm2579_vm2, %v2266_v63, %v2413_v25  ;;  %v2554_v61 = vrot.slane %v2553_v42, 4 }
 0x208   : > { %v2458_v28 = vmul.f32 %v2131_v2, %v4302_v17  ;;  %v2895_v14 = vpop.f32.mrb[61].mxu0  ;;  %v2591_v62 = vsel %vm2579_vm2, %v2274_v46, %v2421_v10  ;;  %v2562_v56 = vrot.slane %v2561_v33, 4 }
 0x209   : > { %v2429_v48 = vrot.slane %v2428_v39, 2  ;;  %v2555_v34 = vadd.f32 %v2554_v61, %v2553_v42 }
 0x20a   : > { %v2569_v29 = vsel %vm2275_vm4, %v2458_v28, 0.0  ;;  %v2563_v49 = vadd.f32 %v2562_v56, %v2561_v33 }
 0x20b   : > { %v2430_v58 = vadd.f32 %v2429_v48, %v2428_v39  ;;  %v2570_v19 = vadd.f32 %v2569_v29, %v2568_v26  ;;  %v2136_v5 = vpop.f32.mrb[62].mxu0  ;;  %v2556_v12 = vrot.slane %v2555_v34, 2 }
 0x20c   : > { %v2471_v38 = vmul.f32 %v2136_v5, %v4308_v21  ;;  %v2898_v17 = vpop.f32.mrb[63].mxu0  ;;  %v2564_v30 = vrot.slane %v2563_v49, 2 }
 0x20d   : > { %v2431_v18 = vrot.slane %v2430_v58, 1  ;;  %v2557_v22 = vadd.f32 %v2556_v12, %v2555_v34 }
 0x20e   : > { %v2571_v24 = vsel %vm2275_vm4, %v2471_v38, 0.0  ;;  %v2565_v54 = vadd.f32 %v2564_v30, %v2563_v49 }
 0x20f   : > { %v2432_v41 = vadd.f32 %v2431_v18, %v2430_v58  ;;  %v2572_v15 = vadd.f32 %v2571_v24, %v2570_v19  ;;  %v2558_v32 = vrot.slane %v2557_v22, 1 }
 0x210   : > { %v2566_v40 = vrot.slane %v2565_v54, 1 }
 0x211   : > { %v2592_v47 = vsel %vm2579_vm2, %v2286_v4, %v2432_v41  ;;  %v2573_v37 = vrot.slane %v2572_v15, 4  ;;  %v2559_v16 = vadd.f32 %v2558_v32, %v2557_v22 }
 0x212   : > { %v2567_v21 = vadd.f32 %v2566_v40, %v2565_v54 }
 0x213   : > { %v2574_v23 = vadd.f32 %v2573_v37, %v2572_v15  ;;  %v2604_v1 = vsel %vm2593_vm3, %v2590_v31, %v2559_v16 }
 0x214   : > { %v2605_v9 = vsel %vm2593_vm3, %v2591_v62, %v2567_v21 }
 0x215   : > { %v2575_v44 = vrot.slane %v2574_v23, 2  ;;  %v2624_v57 = vcombine.low %v2604_v1, %v2605_v9 }
 0x217   : > { %v2576_v53 = vadd.f32 %v2575_v44, %v2574_v23  ;;  %2636 = vst [vmem:[%s4016_s8 + $0x28] sm:$0x77] %v2624_v57 }
 0x219   : > { %v2577_v43 = vrot.slane %v2576_v53, 1 }
 0x21b   : > { %v2578_v55 = vadd.f32 %v2577_v43, %v2576_v53 }
 0x21d   : > { %v2606_v51 = vsel %vm2593_vm3, %v2592_v47, %v2578_v55 }
 0x21e   : > { %2638 = vst.msk [vmem:[%s4016_s8 + $0x30] sm:$0x7] %vm2637_vm5, %v2606_v51 }
 0x21f PF: > { %s13_s9 = sadd.s32 1, %s3102_s9  }
 0x220   : > { %p10_p1 = scmp.ge.s32.totalorder %s13_s9, 4  }
 0x222   :  { %12 = sbr.rel (!%p10_p1) target bundleno = 1 (0x1), region = 63 }
 0x229   :  { %2660 = vsyncpa [#allocation3], 1 }
 0x22a   :  { %2662 = vsyncpa [#allocation3 + $0x1], 1 }

</bundles_post_ra>
